<compile_context>
chip_gen: v7x
topology: tpu7x:2x2x1
jax: 0.10.0
libtpu: 0.0.40
codegen_flags: <defaults>
</compile_context>

<pallas_src>
import functools

import jax
import jax.numpy as jnp
from jax.experimental import pallas as pl
from jax.experimental.pallas import tpu as pltpu

_VMEM_LIMIT = 48 * 1024 * 1024


def _pick_tile(size, max_tile):
    """Largest multiple of 128 that divides `size` and is <= max_tile, else `size`."""
    if size <= max_tile:
        return size
    t = (max_tile // 128) * 128
    while t >= 128:
        if size % t == 0:
            return t
        t -= 128
    return size


def _block_diag2(a, b):
    """2-block block-diagonal matrix."""
    za = jnp.zeros((a.shape[0], b.shape[1]), a.dtype)
    zb = jnp.zeros((b.shape[0], a.shape[1]), b.dtype)
    return jnp.concatenate(
        [jnp.concatenate([a, za], axis=1), jnp.concatenate([zb, b], axis=1)], axis=0)


def _slab_layout(channels, inner):
    """Row offsets of the packed weight slab (shared by wrapper and kernel)."""
    c2, i2 = 2 * channels, 2 * inner
    lw = max(c2, i2)
    off = {}
    r = 0
    off["wqT"] = r; r += c2      # (2C, 2I)   q projection, transposed
    off["wvT"] = r; r += c2      # (2C, 2I)   v projection, transposed
    off["wk"] = r; r += i2       # (2I, 2C)   k projection
    off["woT"] = r; r += i2      # (2I, 2C)   to_out, transposed
    off["f1"] = r; r += c2       # (2C, 2C)   fuse conv 1
    off["f2"] = r; r += c2       # (2C, 2C)   fuse conv 2
    off["wpT"] = r; r += c2      # (2C, 2C)   post conv, transposed
    off["fb"] = r; r += c2       # col 0: fuse bias 1, col 1: fuse bias 2
    off["bp"] = r; r += 8        # row 0, cols 0:2C : folded (to_out + post) bias
    return off, r, lw, c2, i2


def _pack_weights(p, channels, inner):
    """Pack block-diagonal (amp|pha stacked) weights into one f32 slab."""
    off, rows, lw, c2, i2 = _slab_layout(channels, inner)
    cat = lambda a, b: jnp.concatenate([a, b], axis=0)

    f1 = _block_diag2(p["amp_fuse_w1"], p["pha_fuse_w1"])
    f2 = _block_diag2(p["amp_fuse_w2"], p["pha_fuse_w2"])
    fb1 = cat(p["amp_fuse_b1"], p["pha_fuse_b1"])
    fb2 = cat(p["amp_fuse_b2"], p["pha_fuse_b2"])
    wq = _block_diag2(p["amp_wq"], p["pha_wq"])          # (2I, 2C)
    wk = _block_diag2(p["amp_wk"], p["pha_wk"])          # (2I, 2C)
    wv = _block_diag2(p["amp_wv"], p["pha_wv"])          # (2I, 2C)
    wo = _block_diag2(p["amp_wo"], p["pha_wo"])          # (2C, 2I)
    bo = cat(p["amp_bo"], p["pha_bo"])
    wp = _block_diag2(p["amp_post_w"], p["pha_post_w"])  # (2C, 2C)
    bp = cat(p["amp_post_b"], p["pha_post_b"])
    # Fold the attention-out bias into the post bias (row layout):
    #   wp @ (attn + bo + f) + bp == (attn + f) @ wp.T + (bo @ wp.T + bp)
    bp_eff = jnp.dot(bo, wp.T, precision=jax.lax.Precision.HIGHEST) + bp

    slab = jnp.zeros((rows, lw), jnp.float32)
    slab = slab.at[off["wqT"]:off["wqT"] + c2, 0:i2].set(wq.T)
    slab = slab.at[off["wvT"]:off["wvT"] + c2, 0:i2].set(wv.T)
    slab = slab.at[off["wk"]:off["wk"] + i2, 0:c2].set(wk)
    slab = slab.at[off["woT"]:off["woT"] + i2, 0:c2].set(wo.T)
    slab = slab.at[off["f1"]:off["f1"] + c2, 0:c2].set(f1)
    slab = slab.at[off["f2"]:off["f2"] + c2, 0:c2].set(f2)
    slab = slab.at[off["wpT"]:off["wpT"] + c2, 0:c2].set(wp.T)
    slab = slab.at[off["fb"]:off["fb"] + c2, 0].set(fb1)
    slab = slab.at[off["fb"]:off["fb"] + c2, 1].set(fb2)
    slab = slab.at[off["bp"], 0:c2].set(bp_eff)
    return slab


# ---------------------------------------------------------------------------
# Fused spectral kernel (both branches stacked on the channel axis):
#   fuse (conv1x1 -> LeakyReLU(0.1) -> conv1x1) -> FrequencyAttention
#   -> post conv1x1(attn + fused) -> re = M*cos(P), im = M*sin(P)
# Grid: (batch, query-tile).
# ---------------------------------------------------------------------------
def _spectral_kernel(x_ref, w_ref, re_ref, im_ref, f_sc, k_sc, v_sc,
                     *, channels, num_heads, dim_head, tq):
    qi = pl.program_id(1)
    inner = num_heads * dim_head
    off, _, _, c2, i2 = _slab_layout(channels, inner)
    scale = float(dim_head) ** -0.5
    f32 = jnp.float32

    # Per batch element (first query tile): fused activations + K / V^T caches,
    # kept in VMEM scratch across the "arbitrary" query-tile axis.
    @pl.when(qi == 0)
    def _():
        x = x_ref[0]                                                  # (2C, HW) mag|pha
        w1 = w_ref[off["f1"]:off["f1"] + c2, 0:c2]
        b1 = w_ref[off["fb"]:off["fb"] + c2, 0:1]
        w2 = w_ref[off["f2"]:off["f2"] + c2, 0:c2]
        b2 = w_ref[off["fb"]:off["fb"] + c2, 1:2]
        h = jnp.dot(w1, x, preferred_element_type=f32) + b1
        h = jnp.where(h >= 0.0, h, 0.1 * h)                           # LeakyReLU(0.1)
        f = jnp.dot(w2, h, preferred_element_type=f32) + b2           # (2C, HW)
        ft = f.T                                                      # (HW, 2C), once/batch
        f_sc[...] = ft
        k_sc[...] = jnp.dot(w_ref[off["wk"]:off["wk"] + i2, 0:c2], f,
                            preferred_element_type=f32)               # (2I, HW)
        v_sc[...] = jnp.dot(ft, w_ref[off["wvT"]:off["wvT"] + c2, 0:i2],
                            preferred_element_type=f32)               # (HW, 2I) pre-transposed

    q_start = pl.multiple_of(qi * tq, tq)
    ft_q = f_sc[pl.ds(q_start, tq), :]                                # (TQ, 2C)
    q_all = jnp.dot(ft_q, w_ref[off["wqT"]:off["wqT"] + c2, 0:i2],
                    preferred_element_type=f32) * scale               # (TQ, 2I)

    attn = jnp.zeros((tq, c2), f32)
    for h in range(2 * num_heads):                                    # amp heads, then pha
        lo = h * dim_head
        q_h = q_all[:, lo:lo + dim_head]                              # (TQ, dh)
        k_h = k_sc[lo:lo + dim_head, :]                               # (dh, HW)
        vt_h = v_sc[:, lo:lo + dim_head]                              # (HW, dh)
        s = jnp.dot(q_h, k_h, preferred_element_type=f32)             # (TQ, HW)
        e = jnp.exp(s - jnp.max(s, axis=-1, keepdims=True))
        denom = jnp.sum(e, axis=-1, keepdims=True)
        out_h = jnp.dot(e, vt_h, preferred_element_type=f32) / denom  # (TQ, dh)
        wot_h = w_ref[off["woT"] + lo:off["woT"] + lo + dim_head, 0:c2]
        attn = attn + jnp.dot(out_h, wot_h, preferred_element_type=f32)

    # post conv on (attn + fused); attention-out bias folded into bp_eff.
    y = (jnp.dot(attn + ft_q, w_ref[off["wpT"]:off["wpT"] + c2, 0:c2],
                 preferred_element_type=f32)
         + w_ref[off["bp"]:off["bp"] + 1, 0:c2])                      # (TQ, 2C)
    y_t = y.T                                                         # (2C, TQ): tiny transpose
    m = y_t[0:channels, :]
    p = y_t[channels:c2, :]
    re_ref[0] = (m * jnp.cos(p)).astype(re_ref.dtype)
    im_ref[0] = (m * jnp.sin(p)).astype(im_ref.dtype)


def spectral_stage(x_stacked, params, channels, num_heads, dim_head):
    N, c2, HW = x_stacked.shape
    inner = num_heads * dim_head
    _, _, _, c2_chk, i2 = _slab_layout(channels, inner)
    assert c2 == c2_chk
    slab = _pack_weights(params, channels, inner)

    tq = _pick_tile(HW, 512)
    n_q = HW // tq

    kernel = functools.partial(_spectral_kernel, channels=channels,
                               num_heads=num_heads, dim_head=dim_head, tq=tq)

    x_spec = pl.BlockSpec((1, c2, HW), lambda b, q: (b, 0, 0))        # resident per batch
    w_spec = pl.BlockSpec(slab.shape, lambda b, q: (0, 0))            # resident weights
    o_spec = pl.BlockSpec((1, channels, tq), lambda b, q: (b, 0, q))

    re, im = pl.pallas_call(
        kernel,
        out_shape=(jax.ShapeDtypeStruct((N, channels, HW), jnp.float32),
                   jax.ShapeDtypeStruct((N, channels, HW), jnp.float32)),
        grid=(N, n_q),
        in_specs=[x_spec, w_spec],
        out_specs=(o_spec, o_spec),
        scratch_shapes=[pltpu.VMEM((HW, c2), jnp.float32),            # fused acts (transposed)
                        pltpu.VMEM((i2, HW), jnp.float32),            # K  (heads stacked)
                        pltpu.VMEM((HW, i2), jnp.float32)],           # V^T (heads stacked)
        compiler_params=pltpu.CompilerParams(
            dimension_semantics=("parallel", "arbitrary"),
            vmem_limit_bytes=_VMEM_LIMIT),
    )(x_stacked, slab)
    return re, im


# ---------------------------------------------------------------------------
# Final pointwise conv1x1 (post), channel-first, large spatial tiles.
# ---------------------------------------------------------------------------
def _post_conv_kernel(x_ref, w_ref, b_ref, o_ref):
    o_ref[0] = (jnp.dot(w_ref[...], x_ref[0], preferred_element_type=jnp.float32)
                + b_ref[...]).astype(o_ref.dtype)


def post_conv(x, w, b):
    N, C, S = x.shape
    ts = _pick_tile(S, 8192)
    n_t = S // ts
    return pl.pallas_call(
        _post_conv_kernel,
        out_shape=jax.ShapeDtypeStruct((N, C, S), jnp.float32),
        grid=(N, n_t),
        in_specs=[pl.BlockSpec((1, C, ts), lambda b_, t: (b_, 0, t)),
                  pl.BlockSpec(w.shape, lambda b_, t: (0, 0)),
                  pl.BlockSpec((C, 1), lambda b_, t: (0, 0))],
        out_specs=pl.BlockSpec((1, C, ts), lambda b_, t: (b_, 0, t)),
        compiler_params=pltpu.CompilerParams(
            dimension_semantics=("parallel", "parallel"),
            vmem_limit_bytes=_VMEM_LIMIT),
    )(x, w, b.reshape(C, 1))


# ---------------------------------------------------------------------------
# Parameters (synthetic, deterministic).  Matmul weights are stored exactly like
# the squeezed PyTorch conv weights: (C_out, C_in).
# ---------------------------------------------------------------------------
def init_params(key, channels, num_heads=2, dim_head=8):
    inner = num_heads * dim_head
    ks = jax.random.split(key, 24)
    f = lambda k, shp: jax.random.normal(k, shp, jnp.float32) * 0.1
    return {
        "amp_fuse_w1": f(ks[0], (channels, channels)), "amp_fuse_b1": f(ks[1], (channels,)),
        "amp_fuse_w2": f(ks[2], (channels, channels)), "amp_fuse_b2": f(ks[3], (channels,)),
        "pha_fuse_w1": f(ks[4], (channels, channels)), "pha_fuse_b1": f(ks[5], (channels,)),
        "pha_fuse_w2": f(ks[6], (channels, channels)), "pha_fuse_b2": f(ks[7], (channels,)),
        "amp_wq": f(ks[8], (inner, channels)), "amp_wk": f(ks[9], (inner, channels)),
        "amp_wv": f(ks[10], (inner, channels)), "amp_wo": f(ks[11], (channels, inner)),
        "amp_bo": f(ks[12], (channels,)),
        "pha_wq": f(ks[13], (inner, channels)), "pha_wk": f(ks[14], (inner, channels)),
        "pha_wv": f(ks[15], (inner, channels)), "pha_wo": f(ks[16], (channels, inner)),
        "pha_bo": f(ks[17], (channels,)),
        "amp_post_w": f(ks[18], (channels, channels)), "amp_post_b": f(ks[19], (channels,)),
        "pha_post_w": f(ks[20], (channels, channels)), "pha_post_b": f(ks[21], (channels,)),
        "post_w": f(ks[22], (channels, channels)), "post_b": f(ks[23], (channels,)),
    }


# ---------------------------------------------------------------------------
# Full forward pass of freup_pad_attention
# ---------------------------------------------------------------------------
def freup_pad_attention_forward(params, x, num_heads=2, dim_head=8):
    N, C, H, W = x.shape
    HW = H * W

    # TODO(synk): FFT / IFFT and complex abs/angle have no Pallas TPU equivalent.
    fft_x = jnp.fft.fft2(x)
    mag = jnp.abs(fft_x).astype(jnp.float32).reshape(N, C, HW)   # reshape only, no transpose
    pha = jnp.angle(fft_x).astype(jnp.float32).reshape(N, C, HW)
    x_stacked = jnp.concatenate([mag, pha], axis=1)              # (N, 2C, HW) amp|pha

    re, im = spectral_stage(x_stacked, params, C, num_heads, dim_head)

    # 2x2 spectrum tiling commutes with the elementwise cos/sin product, so it is
    # applied after the Pallas polar step (same result as tile-then-multiply).
    re4 = re.reshape(N, C, H, W)
    im4 = im.reshape(N, C, H, W)
    real = jnp.tile(re4, (1, 1, 2, 2))           # (N, C, 2H, 2W)
    imag = jnp.tile(im4, (1, 1, 2, 2))
    out = jnp.abs(jnp.fft.ifft2(real + 1j * imag)).astype(jnp.float32)

    y = post_conv(out.reshape(N, C, 4 * HW), params["post_w"], params["post_b"])
    return y.reshape(N, C, 2 * H, 2 * W)


# ---------------------------------------------------------------------------
# Pure-JAX reference (direct translation of the PyTorch module) for validation.
# ---------------------------------------------------------------------------
def _reference_forward(params, x, num_heads, dim_head):
    HI = jax.lax.Precision.HIGHEST

    def conv1x1(t, w, b=None):                    # t: (N,Cin,H,W); w: (Cout,Cin)
        y = jnp.einsum('oc,nchw->nohw', w, t, precision=HI)
        if b is not None:
            y = y + b.reshape(1, -1, 1, 1)
        return y

    def lrelu(t, s):
        return jnp.where(t >= 0, t, s * t)

    def attention(t, wq, wk, wv, wo, bo):
        b_, c_, h_, w_ = t.shape
        hw = h_ * w_
        scale = float(dim_head) ** -0.5
        q = conv1x1(t, wq).reshape(b_, num_heads, dim_head, hw).transpose(0, 1, 3, 2)
        k = conv1x1(t, wk).reshape(b_, num_heads, dim_head, hw)
        v = conv1x1(t, wv).reshape(b_, num_heads, dim_head, hw).transpose(0, 1, 3, 2)
        attn = jax.nn.softmax(
            jnp.einsum('bhqd,bhdk->bhqk', q, k, precision=HI) * scale, axis=-1)
        out = jnp.einsum('bhqk,bhkd->bhqd', attn, v, precision=HI)
        out = out.transpose(0, 1, 3, 2).reshape(b_, num_heads * dim_head, h_, w_)
        return conv1x1(out, wo, bo)

    fft_x = jnp.fft.fft2(x)
    mag = jnp.abs(fft_x)
    pha = jnp.angle(fft_x)
    Mag = conv1x1(lrelu(conv1x1(mag, params["amp_fuse_w1"], params["amp_fuse_b1"]), 0.1),
                  params["amp_fuse_w2"], params["amp_fuse_b2"])
    Pha = conv1x1(lrelu(conv1x1(pha, params["pha_fuse_w1"], params["pha_fuse_b1"]), 0.1),
                  params["pha_fuse_w2"], params["pha_fuse_b2"])
    Mag_attn = attention(Mag, params["amp_wq"], params["amp_wk"], params["amp_wv"],
                         params["amp_wo"], params["amp_bo"])
    Pha_attn = attention(Pha, params["pha_wq"], params["pha_wk"], params["pha_wv"],
                         params["pha_wo"], params["pha_bo"])
    Mag = conv1x1(Mag_attn + Mag, params["amp_post_w"], params["amp_post_b"])
    Pha = conv1x1(Pha_attn + Pha, params["pha_post_w"], params["pha_post_b"])
    amp_f = jnp.tile(Mag, (1, 1, 2, 2))
    pha_f = jnp.tile(Pha, (1, 1, 2, 2))
    real = amp_f * jnp.cos(pha_f)
    imag = amp_f * jnp.sin(pha_f)
    out = jnp.abs(jnp.fft.ifft2(real + 1j * imag))
    return conv1x1(out, params["post_w"], params["post_b"])


if __name__ == "__main__":
    key = jax.random.PRNGKey(0)
    k_param, k_x = jax.random.split(key)

    N, C, H, W = 2, 4, 16, 16
    num_heads, dim_head = 2, 8

    params = init_params(k_param, C, num_heads, dim_head)
    x = jax.random.normal(k_x, (N, C, H, W), jnp.float32)

    fwd = jax.jit(functools.partial(freup_pad_attention_forward,
                                    num_heads=num_heads, dim_head=dim_head))
    y = fwd(params, x)
    jax.block_until_ready(y)

    assert y.shape == (N, C, 2 * H, 2 * W), y.shape
    assert bool(jnp.all(jnp.isfinite(y)))

    # Validate against the pure-JAX reference (exact softmax in the kernel;
    # remaining differences are matmul rounding).
    y_ref = _reference_forward(params, x, num_heads, dim_head)
    rel_err = float(jnp.max(jnp.abs(y - y_ref)) / (jnp.max(jnp.abs(y_ref)) + 1e-6))
    assert rel_err < 1e-2, f"kernel deviates from reference: rel_err={rel_err}"

    print("KERNEL_OK")
</pallas_src>

<mosaic_0001>
module attributes {stable_mosaic.version = 11 : i64} {
  func.func @_spectral_kernel(%arg0: i32, %arg1: i32, %arg2: memref<1x8x256xf32, #tpu.memory_space<vmem>>, %arg3: memref<120x32xf32, #tpu.memory_space<vmem>>, %arg4: memref<1x4x256xf32, #tpu.memory_space<vmem>>, %arg5: memref<1x4x256xf32, #tpu.memory_space<vmem>>, %arg6: memref<256x8xf32, #tpu.memory_space<vmem>>, %arg7: memref<32x256xf32, #tpu.memory_space<vmem>>, %arg8: memref<256x32xf32, #tpu.memory_space<vmem>>) attributes {dimension_semantics = [#tpu.dimension_semantics<parallel>, #tpu.dimension_semantics<arbitrary>], iteration_bounds = array<i64: 2, 1>, scalar_prefetch = 0 : i64, scratch_operands = 3 : i64, tpu.core_type = #tpu.core_type<tc>, window_params = [{transform_indices = @transform_0, window_bounds = array<i64: 1, 8, 256>}, {pipeline_mode = #tpu.pipeline_mode<synchronous>, transform_indices = @transform_1, window_bounds = array<i64: 120, 32>}, {transform_indices = @transform_2, window_bounds = array<i64: 1, 4, 256>}, {transform_indices = @transform_3, window_bounds = array<i64: 1, 4, 256>}]} {
    %c0_i32 = arith.constant 0 : i32
    %0 = arith.cmpi eq, %arg1, %c0_i32 : i32
    %1 = arith.extui %0 : i1 to i32
    %c0_i32_0 = arith.constant 0 : i32
    %2 = arith.cmpi ne, %1, %c0_i32_0 : i32
    scf.if %2 {
      %c0_51 = arith.constant 0 : index
      %c0_52 = arith.constant 0 : index
      %c0_53 = arith.constant 0 : index
      %99 = vector.load %arg2[%c0_51, %c0_52, %c0_53] : memref<1x8x256xf32, #tpu.memory_space<vmem>>, vector<1x8x256xf32>
      %100 = vector.shape_cast %99 : vector<1x8x256xf32> to vector<8x256xf32>
      %c80 = arith.constant 80 : index
      %c0_54 = arith.constant 0 : index
      %101 = vector.load %arg3[%c80, %c0_54] : memref<120x32xf32, #tpu.memory_space<vmem>>, vector<8x8xf32>
      %c104 = arith.constant 104 : index
      %c0_55 = arith.constant 0 : index
      %102 = vector.load %arg3[%c104, %c0_55] : memref<120x32xf32, #tpu.memory_space<vmem>>, vector<8x1xf32>
      %c88 = arith.constant 88 : index
      %c0_56 = arith.constant 0 : index
      %103 = vector.load %arg3[%c88, %c0_56] : memref<120x32xf32, #tpu.memory_space<vmem>>, vector<8x8xf32>
      %c104_57 = arith.constant 104 : index
      %c1 = arith.constant 1 : index
      %104 = vector.load %arg3[%c104_57, %c1] : memref<120x32xf32, #tpu.memory_space<vmem>>, vector<8x1xf32>
      %cst_58 = arith.constant dense<0.000000e+00> : vector<8x256xf32>
      %105 = tpu.matmul %101, %100, %cst_58 {dimension_numbers = #tpu.dot_dimension_numbers<[1], [0], [0], [1], [0, 0, 1, 1], [], []>} : vector<8x8xf32>, vector<8x256xf32>, vector<8x256xf32> -> vector<8x256xf32>
      %106 = vector.broadcast %102 : vector<8x1xf32> to vector<8x256xf32>
      %107 = arith.addf %105, %106 : vector<8x256xf32>
      %cst_59 = arith.constant 0.000000e+00 : f32
      %108 = vector.broadcast %cst_59 : f32 to vector<8x256xf32>
      %109 = arith.cmpf oge, %107, %108 : vector<8x256xf32>
      %cst_60 = arith.constant 1.000000e-01 : f32
      %110 = vector.broadcast %cst_60 : f32 to vector<8x256xf32>
      %111 = arith.mulf %110, %107 : vector<8x256xf32>
      %112 = arith.select %109, %107, %111 : vector<8x256xi1>, vector<8x256xf32>
      %cst_61 = arith.constant dense<0.000000e+00> : vector<8x256xf32>
      %113 = tpu.matmul %103, %112, %cst_61 {dimension_numbers = #tpu.dot_dimension_numbers<[1], [0], [0], [1], [0, 0, 1, 1], [], []>} : vector<8x8xf32>, vector<8x256xf32>, vector<8x256xf32> -> vector<8x256xf32>
      %114 = vector.broadcast %104 : vector<8x1xf32> to vector<8x256xf32>
      %115 = arith.addf %113, %114 : vector<8x256xf32>
      %116 = tpu.transpose %115, [1, 0] : vector<8x256xf32> -> vector<256x8xf32>
      %c0_62 = arith.constant 0 : index
      %c0_63 = arith.constant 0 : index
      %117 = vector.load %arg6[%c0_62, %c0_63] : memref<256x8xf32, #tpu.memory_space<vmem>>, vector<256x8xf32>
      tpu.vector_store %arg6[%c0_62, %c0_63], %116 {strides = array<i32>} : memref<256x8xf32, #tpu.memory_space<vmem>>, vector<256x8xf32>,
      %c16_64 = arith.constant 16 : index
      %c0_65 = arith.constant 0 : index
      %118 = vector.load %arg3[%c16_64, %c0_65] : memref<120x32xf32, #tpu.memory_space<vmem>>, vector<32x8xf32>
      %cst_66 = arith.constant dense<0.000000e+00> : vector<32x256xf32>
      %119 = tpu.matmul %118, %115, %cst_66 {dimension_numbers = #tpu.dot_dimension_numbers<[1], [0], [0], [1], [0, 0, 1, 1], [], []>} : vector<32x8xf32>, vector<8x256xf32>, vector<32x256xf32> -> vector<32x256xf32>
      %c0_67 = arith.constant 0 : index
      %c0_68 = arith.constant 0 : index
      %120 = vector.load %arg7[%c0_67, %c0_68] : memref<32x256xf32, #tpu.memory_space<vmem>>, vector<32x256xf32>
      tpu.vector_store %arg7[%c0_67, %c0_68], %119 {strides = array<i32>} : memref<32x256xf32, #tpu.memory_space<vmem>>, vector<32x256xf32>,
      %c8_69 = arith.constant 8 : index
      %c0_70 = arith.constant 0 : index
      %121 = vector.load %arg3[%c8_69, %c0_70] : memref<120x32xf32, #tpu.memory_space<vmem>>, vector<8x32xf32>
      %cst_71 = arith.constant dense<0.000000e+00> : vector<256x32xf32>
      %122 = tpu.matmul %116, %121, %cst_71 {dimension_numbers = #tpu.dot_dimension_numbers<[1], [0], [0], [1], [0, 0, 1, 1], [], []>} : vector<256x8xf32>, vector<8x32xf32>, vector<256x32xf32> -> vector<256x32xf32>
      %c0_72 = arith.constant 0 : index
      %c0_73 = arith.constant 0 : index
      %123 = vector.load %arg8[%c0_72, %c0_73] : memref<256x32xf32, #tpu.memory_space<vmem>>, vector<256x32xf32>
      tpu.vector_store %arg8[%c0_72, %c0_73], %122 {strides = array<i32>} : memref<256x32xf32, #tpu.memory_space<vmem>>, vector<256x32xf32>,
    } else {
    }
    %c256_i32 = arith.constant 256 : i32
    %3 = arith.muli %arg1, %c256_i32 : i32
    %4 = tpu.assume_multiple %3, 256 : i32
    %5 = arith.index_cast %4 : i32 to index
    %c0 = arith.constant 0 : index
    %6 = vector.load %arg6[%5, %c0] : memref<256x8xf32, #tpu.memory_space<vmem>>, vector<256x8xf32>
    %c0_1 = arith.constant 0 : index
    %c0_2 = arith.constant 0 : index
    %7 = vector.load %arg3[%c0_1, %c0_2] : memref<120x32xf32, #tpu.memory_space<vmem>>, vector<8x32xf32>
    %cst = arith.constant dense<0.000000e+00> : vector<256x32xf32>
    %8 = tpu.matmul %6, %7, %cst {dimension_numbers = #tpu.dot_dimension_numbers<[1], [0], [0], [1], [0, 0, 1, 1], [], []>} : vector<256x8xf32>, vector<8x32xf32>, vector<256x32xf32> -> vector<256x32xf32>
    %cst_3 = arith.constant 0.353553385 : f32
    %9 = vector.broadcast %cst_3 : f32 to vector<256x32xf32>
    %10 = arith.mulf %8, %9 : vector<256x32xf32>
    %cst_4 = arith.constant 0.000000e+00 : f32
    %11 = vector.broadcast %cst_4 : f32 to vector<256x8xf32>
    %12 = vector.extract_strided_slice %10 {offsets = [0, 0], sizes = [256, 8], strides = [1, 1]} : vector<256x32xf32> to vector<256x8xf32>
    %c0_5 = arith.constant 0 : index
    %c0_6 = arith.constant 0 : index
    %13 = vector.load %arg7[%c0_5, %c0_6] : memref<32x256xf32, #tpu.memory_space<vmem>>, vector<8x256xf32>
    %c0_7 = arith.constant 0 : index
    %c0_8 = arith.constant 0 : index
    %14 = vector.load %arg8[%c0_7, %c0_8] : memref<256x32xf32, #tpu.memory_space<vmem>>, vector<256x8xf32>
    %cst_9 = arith.constant dense<0.000000e+00> : vector<256x256xf32>
    %15 = tpu.matmul %12, %13, %cst_9 {dimension_numbers = #tpu.dot_dimension_numbers<[1], [0], [0], [1], [0, 0, 1, 1], [], []>} : vector<256x8xf32>, vector<8x256xf32>, vector<256x256xf32> -> vector<256x256xf32>
    %cst_10 = arith.constant dense<0xFF800000> : vector<256xf32>
    %16 = vector.multi_reduction <maximumf>, %15, %cst_10 [1] : vector<256x256xf32> to vector<256xf32>
    %17 = vector.shape_cast %16 : vector<256xf32> to vector<256x1xf32>
    %18 = vector.broadcast %17 : vector<256x1xf32> to vector<256x256xf32>
    %19 = arith.subf %15, %18 : vector<256x256xf32>
    %20 = math.exp %19 : vector<256x256xf32>
    %cst_11 = arith.constant dense<0.000000e+00> : vector<256xf32>
    %21 = vector.multi_reduction <add>, %20, %cst_11 [1] : vector<256x256xf32> to vector<256xf32>
    %22 = vector.shape_cast %21 : vector<256xf32> to vector<256x1xf32>
    %cst_12 = arith.constant dense<0.000000e+00> : vector<256x8xf32>
    %23 = tpu.matmul %20, %14, %cst_12 {dimension_numbers = #tpu.dot_dimension_numbers<[1], [0], [0], [1], [0, 0, 1, 1], [], []>} : vector<256x256xf32>, vector<256x8xf32>, vector<256x8xf32> -> vector<256x8xf32>
    %24 = vector.broadcast %22 : vector<256x1xf32> to vector<256x8xf32>
    %25 = arith.divf %23, %24 : vector<256x8xf32>
    %c48 = arith.constant 48 : index
    %c0_13 = arith.constant 0 : index
    %26 = vector.load %arg3[%c48, %c0_13] : memref<120x32xf32, #tpu.memory_space<vmem>>, vector<8x8xf32>
    %cst_14 = arith.constant dense<0.000000e+00> : vector<256x8xf32>
    %27 = tpu.matmul %25, %26, %cst_14 {dimension_numbers = #tpu.dot_dimension_numbers<[1], [0], [0], [1], [0, 0, 1, 1], [], []>} : vector<256x8xf32>, vector<8x8xf32>, vector<256x8xf32> -> vector<256x8xf32>
    %28 = arith.addf %11, %27 : vector<256x8xf32>
    %29 = vector.extract_strided_slice %10 {offsets = [0, 8], sizes = [256, 8], strides = [1, 1]} : vector<256x32xf32> to vector<256x8xf32>
    %c8 = arith.constant 8 : index
    %c0_15 = arith.constant 0 : index
    %30 = vector.load %arg7[%c8, %c0_15] : memref<32x256xf32, #tpu.memory_space<vmem>>, vector<8x256xf32>
    %c0_16 = arith.constant 0 : index
    %c8_17 = arith.constant 8 : index
    %31 = vector.load %arg8[%c0_16, %c8_17] : memref<256x32xf32, #tpu.memory_space<vmem>>, vector<256x8xf32>
    %cst_18 = arith.constant dense<0.000000e+00> : vector<256x256xf32>
    %32 = tpu.matmul %29, %30, %cst_18 {dimension_numbers = #tpu.dot_dimension_numbers<[1], [0], [0], [1], [0, 0, 1, 1], [], []>} : vector<256x8xf32>, vector<8x256xf32>, vector<256x256xf32> -> vector<256x256xf32>
    %cst_19 = arith.constant dense<0xFF800000> : vector<256xf32>
    %33 = vector.multi_reduction <maximumf>, %32, %cst_19 [1] : vector<256x256xf32> to vector<256xf32>
    %34 = vector.shape_cast %33 : vector<256xf32> to vector<256x1xf32>
    %35 = vector.broadcast %34 : vector<256x1xf32> to vector<256x256xf32>
    %36 = arith.subf %32, %35 : vector<256x256xf32>
    %37 = math.exp %36 : vector<256x256xf32>
    %cst_20 = arith.constant dense<0.000000e+00> : vector<256xf32>
    %38 = vector.multi_reduction <add>, %37, %cst_20 [1] : vector<256x256xf32> to vector<256xf32>
    %39 = vector.shape_cast %38 : vector<256xf32> to vector<256x1xf32>
    %cst_21 = arith.constant dense<0.000000e+00> : vector<256x8xf32>
    %40 = tpu.matmul %37, %31, %cst_21 {dimension_numbers = #tpu.dot_dimension_numbers<[1], [0], [0], [1], [0, 0, 1, 1], [], []>} : vector<256x256xf32>, vector<256x8xf32>, vector<256x8xf32> -> vector<256x8xf32>
    %41 = vector.broadcast %39 : vector<256x1xf32> to vector<256x8xf32>
    %42 = arith.divf %40, %41 : vector<256x8xf32>
    %c56 = arith.constant 56 : index
    %c0_22 = arith.constant 0 : index
    %43 = vector.load %arg3[%c56, %c0_22] : memref<120x32xf32, #tpu.memory_space<vmem>>, vector<8x8xf32>
    %cst_23 = arith.constant dense<0.000000e+00> : vector<256x8xf32>
    %44 = tpu.matmul %42, %43, %cst_23 {dimension_numbers = #tpu.dot_dimension_numbers<[1], [0], [0], [1], [0, 0, 1, 1], [], []>} : vector<256x8xf32>, vector<8x8xf32>, vector<256x8xf32> -> vector<256x8xf32>
    %45 = arith.addf %28, %44 : vector<256x8xf32>
    %46 = vector.extract_strided_slice %10 {offsets = [0, 16], sizes = [256, 8], strides = [1, 1]} : vector<256x32xf32> to vector<256x8xf32>
    %c16 = arith.constant 16 : index
    %c0_24 = arith.constant 0 : index
    %47 = vector.load %arg7[%c16, %c0_24] : memref<32x256xf32, #tpu.memory_space<vmem>>, vector<8x256xf32>
    %c0_25 = arith.constant 0 : index
    %c16_26 = arith.constant 16 : index
    %48 = vector.load %arg8[%c0_25, %c16_26] : memref<256x32xf32, #tpu.memory_space<vmem>>, vector<256x8xf32>
    %cst_27 = arith.constant dense<0.000000e+00> : vector<256x256xf32>
    %49 = tpu.matmul %46, %47, %cst_27 {dimension_numbers = #tpu.dot_dimension_numbers<[1], [0], [0], [1], [0, 0, 1, 1], [], []>} : vector<256x8xf32>, vector<8x256xf32>, vector<256x256xf32> -> vector<256x256xf32>
    %cst_28 = arith.constant dense<0xFF800000> : vector<256xf32>
    %50 = vector.multi_reduction <maximumf>, %49, %cst_28 [1] : vector<256x256xf32> to vector<256xf32>
    %51 = vector.shape_cast %50 : vector<256xf32> to vector<256x1xf32>
    %52 = vector.broadcast %51 : vector<256x1xf32> to vector<256x256xf32>
    %53 = arith.subf %49, %52 : vector<256x256xf32>
    %54 = math.exp %53 : vector<256x256xf32>
    %cst_29 = arith.constant dense<0.000000e+00> : vector<256xf32>
    %55 = vector.multi_reduction <add>, %54, %cst_29 [1] : vector<256x256xf32> to vector<256xf32>
    %56 = vector.shape_cast %55 : vector<256xf32> to vector<256x1xf32>
    %cst_30 = arith.constant dense<0.000000e+00> : vector<256x8xf32>
    %57 = tpu.matmul %54, %48, %cst_30 {dimension_numbers = #tpu.dot_dimension_numbers<[1], [0], [0], [1], [0, 0, 1, 1], [], []>} : vector<256x256xf32>, vector<256x8xf32>, vector<256x8xf32> -> vector<256x8xf32>
    %58 = vector.broadcast %56 : vector<256x1xf32> to vector<256x8xf32>
    %59 = arith.divf %57, %58 : vector<256x8xf32>
    %c64 = arith.constant 64 : index
    %c0_31 = arith.constant 0 : index
    %60 = vector.load %arg3[%c64, %c0_31] : memref<120x32xf32, #tpu.memory_space<vmem>>, vector<8x8xf32>
    %cst_32 = arith.constant dense<0.000000e+00> : vector<256x8xf32>
    %61 = tpu.matmul %59, %60, %cst_32 {dimension_numbers = #tpu.dot_dimension_numbers<[1], [0], [0], [1], [0, 0, 1, 1], [], []>} : vector<256x8xf32>, vector<8x8xf32>, vector<256x8xf32> -> vector<256x8xf32>
    %62 = arith.addf %45, %61 : vector<256x8xf32>
    %63 = vector.extract_strided_slice %10 {offsets = [0, 24], sizes = [256, 8], strides = [1, 1]} : vector<256x32xf32> to vector<256x8xf32>
    %c24 = arith.constant 24 : index
    %c0_33 = arith.constant 0 : index
    %64 = vector.load %arg7[%c24, %c0_33] : memref<32x256xf32, #tpu.memory_space<vmem>>, vector<8x256xf32>
    %c0_34 = arith.constant 0 : index
    %c24_35 = arith.constant 24 : index
    %65 = vector.load %arg8[%c0_34, %c24_35] : memref<256x32xf32, #tpu.memory_space<vmem>>, vector<256x8xf32>
    %cst_36 = arith.constant dense<0.000000e+00> : vector<256x256xf32>
    %66 = tpu.matmul %63, %64, %cst_36 {dimension_numbers = #tpu.dot_dimension_numbers<[1], [0], [0], [1], [0, 0, 1, 1], [], []>} : vector<256x8xf32>, vector<8x256xf32>, vector<256x256xf32> -> vector<256x256xf32>
    %cst_37 = arith.constant dense<0xFF800000> : vector<256xf32>
    %67 = vector.multi_reduction <maximumf>, %66, %cst_37 [1] : vector<256x256xf32> to vector<256xf32>
    %68 = vector.shape_cast %67 : vector<256xf32> to vector<256x1xf32>
    %69 = vector.broadcast %68 : vector<256x1xf32> to vector<256x256xf32>
    %70 = arith.subf %66, %69 : vector<256x256xf32>
    %71 = math.exp %70 : vector<256x256xf32>
    %cst_38 = arith.constant dense<0.000000e+00> : vector<256xf32>
    %72 = vector.multi_reduction <add>, %71, %cst_38 [1] : vector<256x256xf32> to vector<256xf32>
    %73 = vector.shape_cast %72 : vector<256xf32> to vector<256x1xf32>
    %cst_39 = arith.constant dense<0.000000e+00> : vector<256x8xf32>
    %74 = tpu.matmul %71, %65, %cst_39 {dimension_numbers = #tpu.dot_dimension_numbers<[1], [0], [0], [1], [0, 0, 1, 1], [], []>} : vector<256x256xf32>, vector<256x8xf32>, vector<256x8xf32> -> vector<256x8xf32>
    %75 = vector.broadcast %73 : vector<256x1xf32> to vector<256x8xf32>
    %76 = arith.divf %74, %75 : vector<256x8xf32>
    %c72 = arith.constant 72 : index
    %c0_40 = arith.constant 0 : index
    %77 = vector.load %arg3[%c72, %c0_40] : memref<120x32xf32, #tpu.memory_space<vmem>>, vector<8x8xf32>
    %cst_41 = arith.constant dense<0.000000e+00> : vector<256x8xf32>
    %78 = tpu.matmul %76, %77, %cst_41 {dimension_numbers = #tpu.dot_dimension_numbers<[1], [0], [0], [1], [0, 0, 1, 1], [], []>} : vector<256x8xf32>, vector<8x8xf32>, vector<256x8xf32> -> vector<256x8xf32>
    %79 = arith.addf %62, %78 : vector<256x8xf32>
    %80 = arith.addf %79, %6 : vector<256x8xf32>
    %c96 = arith.constant 96 : index
    %c0_42 = arith.constant 0 : index
    %81 = vector.load %arg3[%c96, %c0_42] : memref<120x32xf32, #tpu.memory_space<vmem>>, vector<8x8xf32>
    %cst_43 = arith.constant dense<0.000000e+00> : vector<256x8xf32>
    %82 = tpu.matmul %80, %81, %cst_43 {dimension_numbers = #tpu.dot_dimension_numbers<[1], [0], [0], [1], [0, 0, 1, 1], [], []>} : vector<256x8xf32>, vector<8x8xf32>, vector<256x8xf32> -> vector<256x8xf32>
    %c112 = arith.constant 112 : index
    %c0_44 = arith.constant 0 : index
    %83 = vector.load %arg3[%c112, %c0_44] : memref<120x32xf32, #tpu.memory_space<vmem>>, vector<1x8xf32>
    %84 = vector.broadcast %83 : vector<1x8xf32> to vector<256x8xf32>
    %85 = arith.addf %82, %84 : vector<256x8xf32>
    %86 = tpu.transpose %85, [1, 0] : vector<256x8xf32> -> vector<8x256xf32>
    %87 = vector.extract_strided_slice %86 {offsets = [0, 0], sizes = [4, 256], strides = [1, 1]} : vector<8x256xf32> to vector<4x256xf32>
    %88 = vector.extract_strided_slice %86 {offsets = [4, 0], sizes = [4, 256], strides = [1, 1]} : vector<8x256xf32> to vector<4x256xf32>
    %89 = math.cos %88 : vector<4x256xf32>
    %90 = arith.mulf %87, %89 : vector<4x256xf32>
    %c0_45 = arith.constant 0 : index
    %c0_46 = arith.constant 0 : index
    %c0_47 = arith.constant 0 : index
    %91 = vector.load %arg4[%c0_45, %c0_46, %c0_47] : memref<1x4x256xf32, #tpu.memory_space<vmem>>, vector<1x4x256xf32>
    %92 = vector.shape_cast %91 : vector<1x4x256xf32> to vector<4x256xf32>
    %93 = vector.shape_cast %90 : vector<4x256xf32> to vector<1x4x256xf32>
    tpu.vector_store %arg4[%c0_45, %c0_46, %c0_47], %93 {strides = array<i32>} : memref<1x4x256xf32, #tpu.memory_space<vmem>>, vector<1x4x256xf32>,
    %94 = math.sin %88 : vector<4x256xf32>
    %95 = arith.mulf %87, %94 : vector<4x256xf32>
    %c0_48 = arith.constant 0 : index
    %c0_49 = arith.constant 0 : index
    %c0_50 = arith.constant 0 : index
    %96 = vector.load %arg5[%c0_48, %c0_49, %c0_50] : memref<1x4x256xf32, #tpu.memory_space<vmem>>, vector<1x4x256xf32>
    %97 = vector.shape_cast %96 : vector<1x4x256xf32> to vector<4x256xf32>
    %98 = vector.shape_cast %95 : vector<4x256xf32> to vector<1x4x256xf32>
    tpu.vector_store %arg5[%c0_48, %c0_49, %c0_50], %98 {strides = array<i32>} : memref<1x4x256xf32, #tpu.memory_space<vmem>>, vector<1x4x256xf32>,
    return
  }
  func.func @transform_0(%arg0: i32, %arg1: i32) -> (i32, i32, i32) {
    %c0_i32 = arith.constant 0 : i32
    %c0_i32_0 = arith.constant 0 : i32
    %c0_i32_1 = arith.constant 0 : i32
    return %arg0, %c0_i32, %c0_i32_0 : i32, i32, i32
  }
  func.func @transform_1(%arg0: i32, %arg1: i32) -> (i32, i32) {
    %c0_i32 = arith.constant 0 : i32
    %c0_i32_0 = arith.constant 0 : i32
    %c0_i32_1 = arith.constant 0 : i32
    return %c0_i32, %c0_i32_0 : i32, i32
  }
  func.func @transform_2(%arg0: i32, %arg1: i32) -> (i32, i32, i32) {
    %c0_i32 = arith.constant 0 : i32
    %c0_i32_0 = arith.constant 0 : i32
    return %arg0, %c0_i32, %arg1 : i32, i32, i32
  }
  func.func @transform_3(%arg0: i32, %arg1: i32) -> (i32, i32, i32) {
    %c0_i32 = arith.constant 0 : i32
    %c0_i32_0 = arith.constant 0 : i32
    return %arg0, %c0_i32, %arg1 : i32, i32, i32
  }
}

module attributes {stable_mosaic.version = 11 : i64} {
  func.func @_post_conv_kernel(%arg0: i32, %arg1: i32, %arg2: memref<1x4x1024xf32, #tpu.memory_space<vmem>>, %arg3: memref<4x4xf32, #tpu.memory_space<vmem>>, %arg4: memref<4x1xf32, #tpu.memory_space<vmem>>, %arg5: memref<1x4x1024xf32, #tpu.memory_space<vmem>>) attributes {dimension_semantics = [#tpu.dimension_semantics<parallel>, #tpu.dimension_semantics<parallel>], iteration_bounds = array<i64: 2, 1>, scalar_prefetch = 0 : i64, scratch_operands = 0 : i64, tpu.core_type = #tpu.core_type<tc>, window_params = [{transform_indices = @transform_0, window_bounds = array<i64: 1, 4, 1024>}, {pipeline_mode = #tpu.pipeline_mode<synchronous>, transform_indices = @transform_1, window_bounds = array<i64: 4, 4>}, {pipeline_mode = #tpu.pipeline_mode<synchronous>, transform_indices = @transform_2, window_bounds = array<i64: 4, 1>}, {transform_indices = @transform_3, window_bounds = array<i64: 1, 4, 1024>}]} {
    %c0 = arith.constant 0 : index
    %c0_0 = arith.constant 0 : index
    %0 = vector.load %arg3[%c0, %c0_0] : memref<4x4xf32, #tpu.memory_space<vmem>>, vector<4x4xf32>
    %c0_1 = arith.constant 0 : index
    %c0_2 = arith.constant 0 : index
    %c0_3 = arith.constant 0 : index
    %1 = vector.load %arg2[%c0_1, %c0_2, %c0_3] : memref<1x4x1024xf32, #tpu.memory_space<vmem>>, vector<1x4x1024xf32>
    %2 = vector.shape_cast %1 : vector<1x4x1024xf32> to vector<4x1024xf32>
    %cst = arith.constant dense<0.000000e+00> : vector<4x1024xf32>
    %3 = tpu.matmul %0, %2, %cst {dimension_numbers = #tpu.dot_dimension_numbers<[1], [0], [0], [1], [0, 0, 1, 1], [], []>} : vector<4x4xf32>, vector<4x1024xf32>, vector<4x1024xf32> -> vector<4x1024xf32>
    %c0_4 = arith.constant 0 : index
    %c0_5 = arith.constant 0 : index
    %4 = vector.load %arg4[%c0_4, %c0_5] : memref<4x1xf32, #tpu.memory_space<vmem>>, vector<4x1xf32>
    %5 = vector.broadcast %4 : vector<4x1xf32> to vector<4x1024xf32>
    %6 = arith.addf %3, %5 : vector<4x1024xf32>
    %c0_6 = arith.constant 0 : index
    %c0_7 = arith.constant 0 : index
    %c0_8 = arith.constant 0 : index
    %7 = vector.load %arg5[%c0_6, %c0_7, %c0_8] : memref<1x4x1024xf32, #tpu.memory_space<vmem>>, vector<1x4x1024xf32>
    %8 = vector.shape_cast %7 : vector<1x4x1024xf32> to vector<4x1024xf32>
    %9 = vector.shape_cast %6 : vector<4x1024xf32> to vector<1x4x1024xf32>
    tpu.vector_store %arg5[%c0_6, %c0_7, %c0_8], %9 {strides = array<i32>} : memref<1x4x1024xf32, #tpu.memory_space<vmem>>, vector<1x4x1024xf32>,
    return
  }
  func.func @transform_0(%arg0: i32, %arg1: i32) -> (i32, i32, i32) {
    %c0_i32 = arith.constant 0 : i32
    %c0_i32_0 = arith.constant 0 : i32
    return %arg0, %c0_i32, %arg1 : i32, i32, i32
  }
  func.func @transform_1(%arg0: i32, %arg1: i32) -> (i32, i32) {
    %c0_i32 = arith.constant 0 : i32
    %c0_i32_0 = arith.constant 0 : i32
    %c0_i32_1 = arith.constant 0 : i32
    return %c0_i32, %c0_i32_0 : i32, i32
  }
  func.func @transform_2(%arg0: i32, %arg1: i32) -> (i32, i32) {
    %c0_i32 = arith.constant 0 : i32
    %c0_i32_0 = arith.constant 0 : i32
    %c0_i32_1 = arith.constant 0 : i32
    return %c0_i32, %c0_i32_0 : i32, i32
  }
  func.func @transform_3(%arg0: i32, %arg1: i32) -> (i32, i32, i32) {
    %c0_i32 = arith.constant 0 : i32
    %c0_i32_0 = arith.constant 0 : i32
    return %arg0, %c0_i32, %arg1 : i32, i32, i32
  }
}

</mosaic_0001>

<bundles_post_ra>
// kernel: tile.15
= control target key start
LH: loop header
LB: loop body
LE: loop exit
PB: predicated region body
PF: predicated region fallthrough
CT: control target
= control target key end

     0   :  { %vm1282_vm0 = vcmask 1047556   ;;  %s2488_s10 = smov 16   ;;  %vm1284_vm1 = vcmask 130048   ;;  %vm1573_vm2 = vcmask 261248   ;;  %s3619_s0 = inlined_call_operand.vmem [shape: f32[2,4,2,16,2,16], index: 0, kind: input, shape index: {}]   ;;  %s3620_s1 = inlined_call_operand.vmem [shape: f32[2,4,32,32], index: 1, kind: output, shape index: {}]  }
   0x1   :  { %v2418_v0 = vld [vmem:[%s3619_s0 + $0xe] sm:$0x3]  ;;  %v2419_v1 = vld [vmem:[%s3619_s0 + $0xc] sm:$0x3]  ;;  %v2420_v2 = vld [vmem:[%s3619_s0 + $0xa] sm:$0x3] }
   0x2   :  { %1248 = vst [vmem:[#allocation0 + $0x38] sm:$0x3] %v2418_v0  ;;  %1253 = vst [vmem:[#allocation0 + $0x30] sm:$0x3] %v2419_v1  ;;  %v2421_v3 = vld [vmem:[%s3619_s0 + $0x8] sm:$0x3] }
   0x3   :  { %1258 = vst [vmem:[#allocation0 + $0x28] sm:$0x3] %v2420_v2  ;;  %v2422_v4 = vld [vmem:[%s3619_s0 + $0x6] sm:$0x3]  ;;  %v2423_v5 = vld [vmem:[%s3619_s0 + $0x4] sm:$0x3] }
   0x4   :  { %1263 = vst [vmem:[#allocation0 + $0x20] sm:$0x3] %v2421_v3  ;;  %1268 = vst [vmem:[#allocation0 + $0x18] sm:$0x3] %v2422_v4  ;;  %v2424_v6 = vld [vmem:[%s3619_s0 + $0x2] sm:$0x3] }
   0x5   :  { %1273 = vst [vmem:[#allocation0 + $0x10] sm:$0x3] %v2423_v5  ;;  %v1278_v7 = vld [vmem:[%s3619_s0] sm:$0x3]  ;;  %1277 = vst [vmem:[#allocation0 + $0x8] sm:$0x3] %v2424_v6 }
   0x6   :  { %1279 = vst [vmem:[#allocation0] sm:$0x3] %v1278_v7  ;;  %v2354_v8 = vld [vmem:[%s3619_s0 + $0x8e] sm:$0x3]  ;;  %v2355_v9 = vld [vmem:[%s3619_s0 + $0x8c] sm:$0x3] }
   0x7   :  { %v2356_v10 = vld [vmem:[%s3619_s0 + $0x8a] sm:$0x3]  ;;  %928 = vst [vmem:[#allocation0 + $0x238] sm:$0x3] %v2354_v8  ;;  %933 = vst [vmem:[#allocation0 + $0x230] sm:$0x3] %v2355_v9 }
   0x8   :  { %938 = vst [vmem:[#allocation0 + $0x228] sm:$0x3] %v2356_v10  ;;  %v2357_v11 = vld [vmem:[%s3619_s0 + $0x88] sm:$0x3]  ;;  %v2358_v12 = vld [vmem:[%s3619_s0 + $0x86] sm:$0x3] }
   0x9   :  { %v2359_v13 = vld [vmem:[%s3619_s0 + $0x84] sm:$0x3]  ;;  %943 = vst [vmem:[#allocation0 + $0x220] sm:$0x3] %v2357_v11  ;;  %948 = vst [vmem:[#allocation0 + $0x218] sm:$0x3] %v2358_v12 }
   0xa   :  { %953 = vst [vmem:[#allocation0 + $0x210] sm:$0x3] %v2359_v13  ;;  %v2360_v14 = vld [vmem:[%s3619_s0 + $0x82] sm:$0x3]  ;;  %v2361_v15 = vld [vmem:[%s3619_s0 + $0x80] sm:$0x3] }
   0xb   :  { %v2386_v16 = vld [vmem:[%s3619_s0 + $0x4e] sm:$0x3]  ;;  %958 = vst [vmem:[#allocation0 + $0x208] sm:$0x3] %v2360_v14  ;;  %963 = vst [vmem:[#allocation0 + $0x200] sm:$0x3] %v2361_v15 }
   0xc   :  { %1088 = vst [vmem:[#allocation0 + $0x138] sm:$0x3] %v2386_v16  ;;  %v2387_v17 = vld [vmem:[%s3619_s0 + $0x4c] sm:$0x3]  ;;  %v2388_v18 = vld [vmem:[%s3619_s0 + $0x4a] sm:$0x3] }
   0xd   :  { %v2389_v19 = vld [vmem:[%s3619_s0 + $0x48] sm:$0x3]  ;;  %1093 = vst [vmem:[#allocation0 + $0x130] sm:$0x3] %v2387_v17  ;;  %1098 = vst [vmem:[#allocation0 + $0x128] sm:$0x3] %v2388_v18 }
   0xe   :  { %1103 = vst [vmem:[#allocation0 + $0x120] sm:$0x3] %v2389_v19  ;;  %v2390_v20 = vld [vmem:[%s3619_s0 + $0x46] sm:$0x3]  ;;  %v2391_v21 = vld [vmem:[%s3619_s0 + $0x44] sm:$0x3] }
   0xf   :  { %v2392_v22 = vld [vmem:[%s3619_s0 + $0x42] sm:$0x3]  ;;  %1108 = vst [vmem:[#allocation0 + $0x118] sm:$0x3] %v2390_v20  ;;  %1113 = vst [vmem:[#allocation0 + $0x110] sm:$0x3] %v2391_v21 }
  0x10   :  { %1118 = vst [vmem:[#allocation0 + $0x108] sm:$0x3] %v2392_v22  ;;  %v2393_v23 = vld [vmem:[%s3619_s0 + $0x40] sm:$0x3]  ;;  %v2322_v24 = vld [vmem:[%s3619_s0 + $0xce] sm:$0x3] }
  0x11   :  { %v2323_v25 = vld [vmem:[%s3619_s0 + $0xcc] sm:$0x3]  ;;  %v1568_v26 = vld [vmem:[#allocation0 + $0x1] ss:$8 sm:$0xf0]  }
  0x12   :  { %1123 = vst [vmem:[#allocation0 + $0x100] sm:$0x3] %v2393_v23  ;;  %768 = vst [vmem:[#allocation0 + $0x338] sm:$0x3] %v2322_v24  ;;  %v2324_v27 = vld [vmem:[%s3619_s0 + $0xca] sm:$0x3] }
  0x13   :  { %773 = vst [vmem:[#allocation0 + $0x330] sm:$0x3] %v2323_v25  ;;  %v1566_v28 = vld [vmem:[#allocation0 + $0x1] ss:$8 sm:$0xf]  }
  0x14   :  { %778 = vst [vmem:[#allocation0 + $0x328] sm:$0x3] %v2324_v27  ;;  %v2325_v29 = vld [vmem:[%s3619_s0 + $0xc8] sm:$0x3]  ;;  %v1570_v30 = vsel %vm1282_vm0, %v1568_v26, %v1566_v28  ;;  %v2326_v31 = vld [vmem:[%s3619_s0 + $0xc6] sm:$0x3] }
  0x15   :  { %783 = vst [vmem:[#allocation0 + $0x320] sm:$0x3] %v2325_v29  ;;  %v2327_v32 = vld [vmem:[%s3619_s0 + $0xc4] sm:$0x3]  ;;  %v2328_v33 = vld [vmem:[%s3619_s0 + $0xc2] sm:$0x3]  ;;  %1571 = vrot.lane.b32.xlu0 %v1570_v30, %s2488_s10 }
  0x16   :  { %v1589_v34 = vld [vmem:[#allocation0 + $0x201] ss:$8 sm:$0xf0]   ;;  %788 = vst [vmem:[#allocation0 + $0x318] sm:$0x3] %v2326_v31 }
  0x17   :  { %793 = vst [vmem:[#allocation0 + $0x310] sm:$0x3] %v2327_v32  ;;  %798 = vst [vmem:[#allocation0 + $0x308] sm:$0x3] %v2328_v33  ;;  %v2329_v35 = vld [vmem:[%s3619_s0 + $0xc0] sm:$0x3] }
  0x18   :  { %v1587_v36 = vld [vmem:[#allocation0 + $0x201] ss:$8 sm:$0xf]   ;;  %803 = vst [vmem:[#allocation0 + $0x300] sm:$0x3] %v2329_v35 }
  0x19   :  { %v2290_v37 = vld [vmem:[%s3619_s0 + $0x10e] sm:$0x3]  ;;  %v1591_v38 = vsel %vm1282_vm0, %v1589_v34, %v1587_v36  ;;  %v1578_v39 = vld [vmem:[#allocation0 + $0x101] ss:$8 sm:$0xf0]  }
  0x1a   :  { %608 = vst [vmem:[#allocation0 + $0x438] sm:$0x3] %v2290_v37  ;;  %v2291_v40 = vld [vmem:[%s3619_s0 + $0x10c] sm:$0x3]  ;;  %1592 = vrot.lane.b32.xlu1 %v1591_v38, %s2488_s10  ;;  %v2292_v41 = vld [vmem:[%s3619_s0 + $0x10a] sm:$0x3] }
  0x1b   :  { %613 = vst [vmem:[#allocation0 + $0x430] sm:$0x3] %v2291_v40  ;;  %v2293_v42 = vld [vmem:[%s3619_s0 + $0x108] sm:$0x3]  ;;  %v2294_v43 = vld [vmem:[%s3619_s0 + $0x106] sm:$0x3] }
  0x1c   :  { %v1576_v44 = vld [vmem:[#allocation0 + $0x101] ss:$8 sm:$0xf]   ;;  %618 = vst [vmem:[#allocation0 + $0x428] sm:$0x3] %v2292_v41 }
  0x1d   :  { %623 = vst [vmem:[#allocation0 + $0x420] sm:$0x3] %v2293_v42  ;;  %628 = vst [vmem:[#allocation0 + $0x418] sm:$0x3] %v2294_v43  ;;  %v2295_v45 = vld [vmem:[%s3619_s0 + $0x104] sm:$0x3]  ;;  %v1580_v46 = vsel %vm1282_vm0, %v1578_v39, %v1576_v44 }
  0x1e   :  { %633 = vst [vmem:[#allocation0 + $0x410] sm:$0x3] %v2295_v45  ;;  %v2296_v47 = vld [vmem:[%s3619_s0 + $0x102] sm:$0x3]  ;;  %v2297_v48 = vld [vmem:[%s3619_s0 + $0x100] sm:$0x3]  ;;  %1581 = vrot.lane.b32.xlu0 %v1580_v46, %s2488_s10 }
  0x1f   :  { %v2258_v49 = vld [vmem:[%s3619_s0 + $0x14e] sm:$0x3]  ;;  %v1600_v50 = vld [vmem:[#allocation0 + $0x301] ss:$8 sm:$0xf0]  }
  0x20   :  { %638 = vst [vmem:[#allocation0 + $0x408] sm:$0x3] %v2296_v47  ;;  %643 = vst [vmem:[#allocation0 + $0x400] sm:$0x3] %v2297_v48  ;;  %v2259_v51 = vld [vmem:[%s3619_s0 + $0x14c] sm:$0x3] }
  0x21   :  { %448 = vst [vmem:[#allocation0 + $0x538] sm:$0x3] %v2258_v49  ;;  %453 = vst [vmem:[#allocation0 + $0x530] sm:$0x3] %v2259_v51  ;;  %v2260_v52 = vld [vmem:[%s3619_s0 + $0x14a] sm:$0x3] }
  0x22   :  { %v2261_v53 = vld [vmem:[%s3619_s0 + $0x148] sm:$0x3]  ;;  %v2262_v54 = vld [vmem:[%s3619_s0 + $0x146] sm:$0x3]  ;;  %458 = vst [vmem:[#allocation0 + $0x528] sm:$0x3] %v2260_v52 }
  0x23   :  { %v1598_v55 = vld [vmem:[#allocation0 + $0x301] ss:$8 sm:$0xf]   ;;  %463 = vst [vmem:[#allocation0 + $0x520] sm:$0x3] %v2261_v53 }
  0x24   :  { %468 = vst [vmem:[#allocation0 + $0x518] sm:$0x3] %v2262_v54  ;;  %v2263_v56 = vld [vmem:[%s3619_s0 + $0x144] sm:$0x3]  ;;  %v1602_v57 = vsel %vm1282_vm0, %v1600_v50, %v1598_v55  ;;  %v2264_v58 = vld [vmem:[%s3619_s0 + $0x142] sm:$0x3] }
  0x25   :  { %473 = vst [vmem:[#allocation0 + $0x510] sm:$0x3] %v2263_v56  ;;  %v2265_v59 = vld [vmem:[%s3619_s0 + $0x140] sm:$0x3]  ;;  %v2226_v60 = vld [vmem:[%s3619_s0 + $0x18e] sm:$0x3]  ;;  %1603 = vrot.lane.b32.xlu1 %v1602_v57, %s2488_s10 }
  0x26   :  { %478 = vst [vmem:[#allocation0 + $0x508] sm:$0x3] %v2264_v58  ;;  %483 = vst [vmem:[#allocation0 + $0x500] sm:$0x3] %v2265_v59  ;;  %v2227_v61 = vld [vmem:[%s3619_s0 + $0x18c] sm:$0x3] }
  0x27   :  { %288 = vst [vmem:[#allocation0 + $0x638] sm:$0x3] %v2226_v60  ;;  %v2228_v62 = vld [vmem:[%s3619_s0 + $0x18a] sm:$0x3]  ;;  %v2229_v63 = vld [vmem:[%s3619_s0 + $0x188] sm:$0x3] }
  0x28   :  { %v1611_v0 = vld [vmem:[#allocation0 + $0x401] ss:$8 sm:$0xf0]   ;;  %293 = vst [vmem:[#allocation0 + $0x630] sm:$0x3] %v2227_v61 }
  0x29   :  { %298 = vst [vmem:[#allocation0 + $0x628] sm:$0x3] %v2228_v62  ;;  %303 = vst [vmem:[#allocation0 + $0x620] sm:$0x3] %v2229_v63  ;;  %v2230_v1 = vld [vmem:[%s3619_s0 + $0x186] sm:$0x3] }
  0x2a   :  { %308 = vst [vmem:[#allocation0 + $0x618] sm:$0x3] %v2230_v1  ;;  %v2231_v2 = vld [vmem:[%s3619_s0 + $0x184] sm:$0x3]  ;;  %v2232_v3 = vld [vmem:[%s3619_s0 + $0x182] sm:$0x3] }
  0x2b   :  { %v2233_v4 = vld [vmem:[%s3619_s0 + $0x180] sm:$0x3]  ;;  %313 = vst [vmem:[#allocation0 + $0x610] sm:$0x3] %v2231_v2  ;;  %318 = vst [vmem:[#allocation0 + $0x608] sm:$0x3] %v2232_v3 }
  0x2c   :  { %v1609_v5 = vld [vmem:[#allocation0 + $0x401] ss:$8 sm:$0xf]   ;;  %323 = vst [vmem:[#allocation0 + $0x600] sm:$0x3] %v2233_v4 }
  0x2d   :  { %v2194_v6 = vld [vmem:[%s3619_s0 + $0x1ce] sm:$0x3]  ;;  %v1613_v7 = vsel %vm1282_vm0, %v1611_v0, %v1609_v5  ;;  %v2195_v8 = vld [vmem:[%s3619_s0 + $0x1cc] sm:$0x3]  ;;  %v2196_v9 = vld [vmem:[%s3619_s0 + $0x1ca] sm:$0x3] }
  0x2e   :  { %128 = vst [vmem:[#allocation0 + $0x738] sm:$0x3] %v2194_v6  ;;  %v2197_v10 = vld [vmem:[%s3619_s0 + $0x1c8] sm:$0x3]  ;;  %1614 = vrot.lane.b32.xlu0 %v1613_v7, %s2488_s10  ;;  %133 = vst [vmem:[#allocation0 + $0x730] sm:$0x3] %v2195_v8 }
  0x2f   :  { %v1622_v11 = vld [vmem:[#allocation0 + $0x501] ss:$8 sm:$0xf0]   ;;  %138 = vst [vmem:[#allocation0 + $0x728] sm:$0x3] %v2196_v9 }
  0x30   :  { %143 = vst [vmem:[#allocation0 + $0x720] sm:$0x3] %v2197_v10  ;;  %v2198_v12 = vld [vmem:[%s3619_s0 + $0x1c6] sm:$0x3]  ;;  %v2199_v13 = vld [vmem:[%s3619_s0 + $0x1c4] sm:$0x3] }
  0x31   :  { %148 = vst [vmem:[#allocation0 + $0x718] sm:$0x3] %v2198_v12  ;;  %v2200_v14 = vld [vmem:[%s3619_s0 + $0x1c2] sm:$0x3]  ;;  %v2201_v15 = vld [vmem:[%s3619_s0 + $0x1c0] sm:$0x3] }
  0x32   :  { %v1620_v16 = vld [vmem:[#allocation0 + $0x501] ss:$8 sm:$0xf]   ;;  %153 = vst [vmem:[#allocation0 + $0x710] sm:$0x3] %v2199_v13 }
  0x33   :  { %158 = vst [vmem:[#allocation0 + $0x708] sm:$0x3] %v2200_v14  ;;  %163 = vst [vmem:[#allocation0 + $0x700] sm:$0x3] %v2201_v15  ;;  %v2410_v17 = vld [vmem:[%s3619_s0 + $0x1e] sm:$0x3]  ;;  %v1624_v18 = vsel %vm1282_vm0, %v1622_v11, %v1620_v16 }
  0x34   :  { %v1633_v19 = vld [vmem:[#allocation0 + $0x601] ss:$8 sm:$0xf0]   ;;  %1208 = vst [vmem:[#allocation0 + $0x78] sm:$0x3] %v2410_v17  ;;  %1625 = vrot.lane.b32.xlu1 %v1624_v18, %s2488_s10 }
  0x35   :  { %v2411_v20 = vld [vmem:[%s3619_s0 + $0x1c] sm:$0x3]  ;;  %v2412_v21 = vld [vmem:[%s3619_s0 + $0x1a] sm:$0x3]  ;;  %v2413_v22 = vld [vmem:[%s3619_s0 + $0x18] sm:$0x3] }
  0x36   :  { %1213 = vst [vmem:[#allocation0 + $0x70] sm:$0x3] %v2411_v20  ;;  %v2414_v23 = vld [vmem:[%s3619_s0 + $0x16] sm:$0x3]  ;;  %1218 = vst [vmem:[#allocation0 + $0x68] sm:$0x3] %v2412_v21 }
  0x37   :  { %v1631_v24 = vld [vmem:[#allocation0 + $0x601] ss:$8 sm:$0xf]   ;;  %1223 = vst [vmem:[#allocation0 + $0x60] sm:$0x3] %v2413_v22 }
  0x38   :  { %1228 = vst [vmem:[#allocation0 + $0x58] sm:$0x3] %v2414_v23  ;;  %v2415_v25 = vld [vmem:[%s3619_s0 + $0x14] sm:$0x3]  ;;  %v1635_v26 = vsel %vm1282_vm0, %v1633_v19, %v1631_v24  ;;  %v2416_v27 = vld [vmem:[%s3619_s0 + $0x12] sm:$0x3] }
  0x39   :  { %1233 = vst [vmem:[#allocation0 + $0x50] sm:$0x3] %v2415_v25  ;;  %v2417_v28 = vld [vmem:[%s3619_s0 + $0x10] sm:$0x3]  ;;  %v2378_v29 = vld [vmem:[%s3619_s0 + $0x5e] sm:$0x3]  ;;  %1636 = vrot.lane.b32.xlu0 %v1635_v26, %s2488_s10 }
  0x3a   :  { %v1644_v30 = vld [vmem:[#allocation0 + $0x701] ss:$8 sm:$0xf0]   ;;  %1238 = vst [vmem:[#allocation0 + $0x48] sm:$0x3] %v2416_v27 }
  0x3b   :  { %1243 = vst [vmem:[#allocation0 + $0x40] sm:$0x3] %v2417_v28  ;;  %1048 = vst [vmem:[#allocation0 + $0x178] sm:$0x3] %v2378_v29  ;;  %v2379_v31 = vld [vmem:[%s3619_s0 + $0x5c] sm:$0x3] }
  0x3c   :  { %1053 = vst [vmem:[#allocation0 + $0x170] sm:$0x3] %v2379_v31  ;;  %v2380_v32 = vld [vmem:[%s3619_s0 + $0x5a] sm:$0x3]  ;;  %v2381_v33 = vld [vmem:[%s3619_s0 + $0x58] sm:$0x3] }
  0x3d   :  { %v2382_v34 = vld [vmem:[%s3619_s0 + $0x56] sm:$0x3]  ;;  %v1642_v35 = vld [vmem:[#allocation0 + $0x701] ss:$8 sm:$0xf]  }
  0x3e   :  { %1058 = vst [vmem:[#allocation0 + $0x168] sm:$0x3] %v2380_v32  ;;  %1063 = vst [vmem:[#allocation0 + $0x160] sm:$0x3] %v2381_v33  ;;  %v2383_v36 = vld [vmem:[%s3619_s0 + $0x54] sm:$0x3]  ;;  %v1646_v37 = vsel %vm1282_vm0, %v1644_v30, %v1642_v35 }
  0x3f   :  { %1068 = vst [vmem:[#allocation0 + $0x158] sm:$0x3] %v2382_v34  ;;  %1073 = vst [vmem:[#allocation0 + $0x150] sm:$0x3] %v2383_v36  ;;  %v2384_v38 = vld [vmem:[%s3619_s0 + $0x52] sm:$0x3]  ;;  %1647 = vrot.lane.b32.xlu1 %v1646_v37, %s2488_s10 }
  0x40   :  { %v2385_v39 = vld [vmem:[%s3619_s0 + $0x50] sm:$0x3]  ;;  %v2346_v40 = vld [vmem:[%s3619_s0 + $0x9e] sm:$0x3]  ;;  %1078 = vst [vmem:[#allocation0 + $0x148] sm:$0x3] %v2384_v38 }
  0x41   :  { %1083 = vst [vmem:[#allocation0 + $0x140] sm:$0x3] %v2385_v39  ;;  %888 = vst [vmem:[#allocation0 + $0x278] sm:$0x3] %v2346_v40  ;;  %v2347_v41 = vld [vmem:[%s3619_s0 + $0x9c] sm:$0x3] }
  0x42   :  { %v2348_v42 = vld [vmem:[%s3619_s0 + $0x9a] sm:$0x3]  ;;  %v2349_v43 = vld [vmem:[%s3619_s0 + $0x98] sm:$0x3]  ;;  %893 = vst [vmem:[#allocation0 + $0x270] sm:$0x3] %v2347_v41 }
  0x43   :  { %v1655_v44 = vld [vmem:[#allocation0 + $0x41] ss:$8 sm:$0xf0]   ;;  %898 = vst [vmem:[#allocation0 + $0x268] sm:$0x3] %v2348_v42 }
  0x44   :  { %903 = vst [vmem:[#allocation0 + $0x260] sm:$0x3] %v2349_v43  ;;  %v2350_v45 = vld [vmem:[%s3619_s0 + $0x96] sm:$0x3]  ;;  %v2351_v46 = vld [vmem:[%s3619_s0 + $0x94] sm:$0x3] }
  0x45   :  { %908 = vst [vmem:[#allocation0 + $0x258] sm:$0x3] %v2350_v45  ;;  %v2352_v47 = vld [vmem:[%s3619_s0 + $0x92] sm:$0x3]  ;;  %v2353_v48 = vld [vmem:[%s3619_s0 + $0x90] sm:$0x3] }
  0x46   :  { %v1653_v49 = vld [vmem:[#allocation0 + $0x41] ss:$8 sm:$0xf]   ;;  %913 = vst [vmem:[#allocation0 + $0x250] sm:$0x3] %v2351_v46 }
  0x47   :  { %918 = vst [vmem:[#allocation0 + $0x248] sm:$0x3] %v2352_v47  ;;  %923 = vst [vmem:[#allocation0 + $0x240] sm:$0x3] %v2353_v48  ;;  %v2314_v50 = vld [vmem:[%s3619_s0 + $0xde] sm:$0x3]  ;;  %v1657_v51 = vsel %vm1282_vm0, %v1655_v44, %v1653_v49 }
  0x48   :  { %728 = vst [vmem:[#allocation0 + $0x378] sm:$0x3] %v2314_v50  ;;  %v2315_v52 = vld [vmem:[%s3619_s0 + $0xdc] sm:$0x3]  ;;  %v2316_v53 = vld [vmem:[%s3619_s0 + $0xda] sm:$0x3]  ;;  %1658 = vrot.lane.b32.xlu0 %v1657_v51, %s2488_s10 }
  0x49   :  { %v2317_v54 = vld [vmem:[%s3619_s0 + $0xd8] sm:$0x3]  ;;  %733 = vst [vmem:[#allocation0 + $0x370] sm:$0x3] %v2315_v52  ;;  %738 = vst [vmem:[#allocation0 + $0x368] sm:$0x3] %v2316_v53 }
  0x4a   :  { %v1666_v55 = vld [vmem:[#allocation0 + $0x141] ss:$8 sm:$0xf0]   ;;  %743 = vst [vmem:[#allocation0 + $0x360] sm:$0x3] %v2317_v54 }
  0x4b   :  { %v2318_v56 = vld [vmem:[%s3619_s0 + $0xd6] sm:$0x3]  ;;  %v2319_v57 = vld [vmem:[%s3619_s0 + $0xd4] sm:$0x3]  ;;  %v2320_v58 = vld [vmem:[%s3619_s0 + $0xd2] sm:$0x3] }
  0x4c   :  { %748 = vst [vmem:[#allocation0 + $0x358] sm:$0x3] %v2318_v56  ;;  %v2321_v59 = vld [vmem:[%s3619_s0 + $0xd0] sm:$0x3]  ;;  %753 = vst [vmem:[#allocation0 + $0x350] sm:$0x3] %v2319_v57 }
  0x4d   :  { %v1664_v60 = vld [vmem:[#allocation0 + $0x141] ss:$8 sm:$0xf]   ;;  %758 = vst [vmem:[#allocation0 + $0x348] sm:$0x3] %v2320_v58 }
  0x4e   :  { %763 = vst [vmem:[#allocation0 + $0x340] sm:$0x3] %v2321_v59  ;;  %v2282_v61 = vld [vmem:[%s3619_s0 + $0x11e] sm:$0x3]  ;;  %v1668_v62 = vsel %vm1282_vm0, %v1666_v55, %v1664_v60  ;;  %v2283_v0 = vld [vmem:[%s3619_s0 + $0x11c] sm:$0x3] }
  0x4f   :  { %v1677_v63 = vld [vmem:[#allocation0 + $0x241] ss:$8 sm:$0xf0]   ;;  %568 = vst [vmem:[#allocation0 + $0x478] sm:$0x3] %v2282_v61  ;;  %1669 = vrot.lane.b32.xlu1 %v1668_v62, %s2488_s10 }
  0x50   :  { %573 = vst [vmem:[#allocation0 + $0x470] sm:$0x3] %v2283_v0  ;;  %v2284_v1 = vld [vmem:[%s3619_s0 + $0x11a] sm:$0x3]  ;;  %v2285_v2 = vld [vmem:[%s3619_s0 + $0x118] sm:$0x3] }
  0x51   :  { %v2286_v3 = vld [vmem:[%s3619_s0 + $0x116] sm:$0x3]  ;;  %v1675_v4 = vld [vmem:[#allocation0 + $0x241] ss:$8 sm:$0xf]  }
  0x52   :  { %578 = vst [vmem:[#allocation0 + $0x468] sm:$0x3] %v2284_v1  ;;  %583 = vst [vmem:[#allocation0 + $0x460] sm:$0x3] %v2285_v2  ;;  %v2287_v5 = vld [vmem:[%s3619_s0 + $0x114] sm:$0x3]  ;;  %v1679_v6 = vsel %vm1282_vm0, %v1677_v63, %v1675_v4 }
  0x53   :  { %588 = vst [vmem:[#allocation0 + $0x458] sm:$0x3] %v2286_v3  ;;  %593 = vst [vmem:[#allocation0 + $0x450] sm:$0x3] %v2287_v5  ;;  %v2288_v7 = vld [vmem:[%s3619_s0 + $0x112] sm:$0x3]  ;;  %1680 = vrot.lane.b32.xlu0 %v1679_v6, %s2488_s10 }
  0x54   :  { %v2289_v8 = vld [vmem:[%s3619_s0 + $0x110] sm:$0x3]  ;;  %v2250_v9 = vld [vmem:[%s3619_s0 + $0x15e] sm:$0x3]  ;;  %598 = vst [vmem:[#allocation0 + $0x448] sm:$0x3] %v2288_v7 }
  0x55   :  { %v1688_v10 = vld [vmem:[#allocation0 + $0x341] ss:$8 sm:$0xf0]   ;;  %603 = vst [vmem:[#allocation0 + $0x440] sm:$0x3] %v2289_v8 }
  0x56   :  { %408 = vst [vmem:[#allocation0 + $0x578] sm:$0x3] %v2250_v9  ;;  %v2251_v11 = vld [vmem:[%s3619_s0 + $0x15c] sm:$0x3]  ;;  %v2252_v12 = vld [vmem:[%s3619_s0 + $0x15a] sm:$0x3] }
  0x57   :  { %413 = vst [vmem:[#allocation0 + $0x570] sm:$0x3] %v2251_v11  ;;  %v2253_v13 = vld [vmem:[%s3619_s0 + $0x158] sm:$0x3]  ;;  %v2254_v14 = vld [vmem:[%s3619_s0 + $0x156] sm:$0x3] }
  0x58   :  { %v1686_v15 = vld [vmem:[#allocation0 + $0x341] ss:$8 sm:$0xf]   ;;  %418 = vst [vmem:[#allocation0 + $0x568] sm:$0x3] %v2252_v12 }
  0x59   :  { %423 = vst [vmem:[#allocation0 + $0x560] sm:$0x3] %v2253_v13  ;;  %428 = vst [vmem:[#allocation0 + $0x558] sm:$0x3] %v2254_v14  ;;  %v2255_v16 = vld [vmem:[%s3619_s0 + $0x154] sm:$0x3]  ;;  %v1690_v17 = vsel %vm1282_vm0, %v1688_v10, %v1686_v15 }
  0x5a   :  { %433 = vst [vmem:[#allocation0 + $0x550] sm:$0x3] %v2255_v16  ;;  %v2256_v18 = vld [vmem:[%s3619_s0 + $0x152] sm:$0x3]  ;;  %v2257_v19 = vld [vmem:[%s3619_s0 + $0x150] sm:$0x3]  ;;  %1691 = vrot.lane.b32.xlu1 %v1690_v17, %s2488_s10 }
  0x5b   :  { %v2218_v20 = vld [vmem:[%s3619_s0 + $0x19e] sm:$0x3]  ;;  %438 = vst [vmem:[#allocation0 + $0x548] sm:$0x3] %v2256_v18  ;;  %443 = vst [vmem:[#allocation0 + $0x540] sm:$0x3] %v2257_v19 }
  0x5c   :  { %248 = vst [vmem:[#allocation0 + $0x678] sm:$0x3] %v2218_v20  ;;  %v2219_v21 = vld [vmem:[%s3619_s0 + $0x19c] sm:$0x3]  ;;  %v2220_v22 = vld [vmem:[%s3619_s0 + $0x19a] sm:$0x3] }
  0x5d   :  { %v2221_v23 = vld [vmem:[%s3619_s0 + $0x198] sm:$0x3]  ;;  %253 = vst [vmem:[#allocation0 + $0x670] sm:$0x3] %v2219_v21  ;;  %258 = vst [vmem:[#allocation0 + $0x668] sm:$0x3] %v2220_v22 }
  0x5e   :  { %v1699_v24 = vld [vmem:[#allocation0 + $0x441] ss:$8 sm:$0xf0]   ;;  %263 = vst [vmem:[#allocation0 + $0x660] sm:$0x3] %v2221_v23 }
  0x5f   :  { %v2222_v25 = vld [vmem:[%s3619_s0 + $0x196] sm:$0x3]  ;;  %v2223_v26 = vld [vmem:[%s3619_s0 + $0x194] sm:$0x3]  ;;  %v2224_v27 = vld [vmem:[%s3619_s0 + $0x192] sm:$0x3] }
  0x60   :  { %268 = vst [vmem:[#allocation0 + $0x658] sm:$0x3] %v2222_v25  ;;  %v2225_v28 = vld [vmem:[%s3619_s0 + $0x190] sm:$0x3]  ;;  %273 = vst [vmem:[#allocation0 + $0x650] sm:$0x3] %v2223_v26 }
  0x61   :  { %v1697_v29 = vld [vmem:[#allocation0 + $0x441] ss:$8 sm:$0xf]   ;;  %278 = vst [vmem:[#allocation0 + $0x648] sm:$0x3] %v2224_v27 }
  0x62   :  { %283 = vst [vmem:[#allocation0 + $0x640] sm:$0x3] %v2225_v28  ;;  %v2186_v30 = vld [vmem:[%s3619_s0 + $0x1de] sm:$0x3]  ;;  %v1701_v31 = vsel %vm1282_vm0, %v1699_v24, %v1697_v29  ;;  %v2187_v32 = vld [vmem:[%s3619_s0 + $0x1dc] sm:$0x3] }
  0x63   :  { %88 = vst [vmem:[#allocation0 + $0x778] sm:$0x3] %v2186_v30  ;;  %v2188_v33 = vld [vmem:[%s3619_s0 + $0x1da] sm:$0x3]  ;;  %v2189_v34 = vld [vmem:[%s3619_s0 + $0x1d8] sm:$0x3]  ;;  %1702 = vrot.lane.b32.xlu0 %v1701_v31, %s2488_s10 }
  0x64   :  { %v1710_v35 = vld [vmem:[#allocation0 + $0x541] ss:$8 sm:$0xf0]   ;;  %93 = vst [vmem:[#allocation0 + $0x770] sm:$0x3] %v2187_v32 }
  0x65   :  { %98 = vst [vmem:[#allocation0 + $0x768] sm:$0x3] %v2188_v33  ;;  %103 = vst [vmem:[#allocation0 + $0x760] sm:$0x3] %v2189_v34  ;;  %v2190_v36 = vld [vmem:[%s3619_s0 + $0x1d6] sm:$0x3] }
  0x66   :  { %108 = vst [vmem:[#allocation0 + $0x758] sm:$0x3] %v2190_v36  ;;  %v2191_v37 = vld [vmem:[%s3619_s0 + $0x1d4] sm:$0x3]  ;;  %v2192_v38 = vld [vmem:[%s3619_s0 + $0x1d2] sm:$0x3] }
  0x67   :  { %v2193_v39 = vld [vmem:[%s3619_s0 + $0x1d0] sm:$0x3]  ;;  %113 = vst [vmem:[#allocation0 + $0x750] sm:$0x3] %v2191_v37  ;;  %118 = vst [vmem:[#allocation0 + $0x748] sm:$0x3] %v2192_v38 }
  0x68   :  { %v1708_v40 = vld [vmem:[#allocation0 + $0x541] ss:$8 sm:$0xf]   ;;  %123 = vst [vmem:[#allocation0 + $0x740] sm:$0x3] %v2193_v39 }
  0x69   :  { %v2402_v41 = vld [vmem:[%s3619_s0 + $0x2e] sm:$0x3]  ;;  %v1712_v42 = vsel %vm1282_vm0, %v1710_v35, %v1708_v40  ;;  %v1721_v43 = vld [vmem:[#allocation0 + $0x641] ss:$8 sm:$0xf0]  }
  0x6a   :  { %1168 = vst [vmem:[#allocation0 + $0xb8] sm:$0x3] %v2402_v41  ;;  %v2403_v44 = vld [vmem:[%s3619_s0 + $0x2c] sm:$0x3]  ;;  %1713 = vrot.lane.b32.xlu1 %v1712_v42, %s2488_s10  ;;  %v2404_v45 = vld [vmem:[%s3619_s0 + $0x2a] sm:$0x3] }
  0x6b   :  { %1173 = vst [vmem:[#allocation0 + $0xb0] sm:$0x3] %v2403_v44  ;;  %v2405_v46 = vld [vmem:[%s3619_s0 + $0x28] sm:$0x3]  ;;  %v2406_v47 = vld [vmem:[%s3619_s0 + $0x26] sm:$0x3] }
  0x6c   :  { %v1719_v48 = vld [vmem:[#allocation0 + $0x641] ss:$8 sm:$0xf]   ;;  %1178 = vst [vmem:[#allocation0 + $0xa8] sm:$0x3] %v2404_v45 }
  0x6d   :  { %1183 = vst [vmem:[#allocation0 + $0xa0] sm:$0x3] %v2405_v46  ;;  %1188 = vst [vmem:[#allocation0 + $0x98] sm:$0x3] %v2406_v47  ;;  %v2407_v49 = vld [vmem:[%s3619_s0 + $0x24] sm:$0x3]  ;;  %v1723_v50 = vsel %vm1282_vm0, %v1721_v43, %v1719_v48 }
  0x6e   :  { %1193 = vst [vmem:[#allocation0 + $0x90] sm:$0x3] %v2407_v49  ;;  %v2408_v51 = vld [vmem:[%s3619_s0 + $0x22] sm:$0x3]  ;;  %v2409_v52 = vld [vmem:[%s3619_s0 + $0x20] sm:$0x3]  ;;  %1724 = vrot.lane.b32.xlu0 %v1723_v50, %s2488_s10 }
  0x6f   :  { %v2370_v53 = vld [vmem:[%s3619_s0 + $0x6e] sm:$0x3]  ;;  %v1732_v54 = vld [vmem:[#allocation0 + $0x741] ss:$8 sm:$0xf0]  }
  0x70   :  { %1198 = vst [vmem:[#allocation0 + $0x88] sm:$0x3] %v2408_v51  ;;  %1203 = vst [vmem:[#allocation0 + $0x80] sm:$0x3] %v2409_v52  ;;  %v2371_v55 = vld [vmem:[%s3619_s0 + $0x6c] sm:$0x3] }
  0x71   :  { %1008 = vst [vmem:[#allocation0 + $0x1b8] sm:$0x3] %v2370_v53  ;;  %1013 = vst [vmem:[#allocation0 + $0x1b0] sm:$0x3] %v2371_v55  ;;  %v2372_v56 = vld [vmem:[%s3619_s0 + $0x6a] sm:$0x3] }
  0x72   :  { %v2373_v57 = vld [vmem:[%s3619_s0 + $0x68] sm:$0x3]  ;;  %v2374_v58 = vld [vmem:[%s3619_s0 + $0x66] sm:$0x3]  ;;  %1018 = vst [vmem:[#allocation0 + $0x1a8] sm:$0x3] %v2372_v56 }
  0x73   :  { %v1730_v59 = vld [vmem:[#allocation0 + $0x741] ss:$8 sm:$0xf]   ;;  %1023 = vst [vmem:[#allocation0 + $0x1a0] sm:$0x3] %v2373_v57 }
  0x74   :  { %1028 = vst [vmem:[#allocation0 + $0x198] sm:$0x3] %v2374_v58  ;;  %v2375_v60 = vld [vmem:[%s3619_s0 + $0x64] sm:$0x3]  ;;  %v1734_v61 = vsel %vm1282_vm0, %v1732_v54, %v1730_v59  ;;  %v2376_v62 = vld [vmem:[%s3619_s0 + $0x62] sm:$0x3] }
  0x75   :  { %1033 = vst [vmem:[#allocation0 + $0x190] sm:$0x3] %v2375_v60  ;;  %v2377_v63 = vld [vmem:[%s3619_s0 + $0x60] sm:$0x3]  ;;  %v2338_v0 = vld [vmem:[%s3619_s0 + $0xae] sm:$0x3]  ;;  %1735 = vrot.lane.b32.xlu1 %v1734_v61, %s2488_s10 }
  0x76   :  { %1038 = vst [vmem:[#allocation0 + $0x188] sm:$0x3] %v2376_v62  ;;  %1043 = vst [vmem:[#allocation0 + $0x180] sm:$0x3] %v2377_v63  ;;  %v2339_v1 = vld [vmem:[%s3619_s0 + $0xac] sm:$0x3] }
  0x77   :  { %848 = vst [vmem:[#allocation0 + $0x2b8] sm:$0x3] %v2338_v0  ;;  %v2340_v2 = vld [vmem:[%s3619_s0 + $0xaa] sm:$0x3]  ;;  %v2341_v3 = vld [vmem:[%s3619_s0 + $0xa8] sm:$0x3] }
  0x78   :  { %v1743_v4 = vld [vmem:[#allocation0 + $0x81] ss:$8 sm:$0xf0]   ;;  %853 = vst [vmem:[#allocation0 + $0x2b0] sm:$0x3] %v2339_v1 }
  0x79   :  { %858 = vst [vmem:[#allocation0 + $0x2a8] sm:$0x3] %v2340_v2  ;;  %863 = vst [vmem:[#allocation0 + $0x2a0] sm:$0x3] %v2341_v3  ;;  %v2342_v5 = vld [vmem:[%s3619_s0 + $0xa6] sm:$0x3] }
  0x7a   :  { %868 = vst [vmem:[#allocation0 + $0x298] sm:$0x3] %v2342_v5  ;;  %v2343_v6 = vld [vmem:[%s3619_s0 + $0xa4] sm:$0x3]  ;;  %v2344_v7 = vld [vmem:[%s3619_s0 + $0xa2] sm:$0x3] }
  0x7b   :  { %v2345_v8 = vld [vmem:[%s3619_s0 + $0xa0] sm:$0x3]  ;;  %873 = vst [vmem:[#allocation0 + $0x290] sm:$0x3] %v2343_v6  ;;  %878 = vst [vmem:[#allocation0 + $0x288] sm:$0x3] %v2344_v7 }
  0x7c   :  { %v1741_v9 = vld [vmem:[#allocation0 + $0x81] ss:$8 sm:$0xf]   ;;  %883 = vst [vmem:[#allocation0 + $0x280] sm:$0x3] %v2345_v8 }
  0x7d   :  { %v2306_v10 = vld [vmem:[%s3619_s0 + $0xee] sm:$0x3]  ;;  %v1745_v11 = vsel %vm1282_vm0, %v1743_v4, %v1741_v9  ;;  %v2307_v12 = vld [vmem:[%s3619_s0 + $0xec] sm:$0x3]  ;;  %v2308_v13 = vld [vmem:[%s3619_s0 + $0xea] sm:$0x3] }
  0x7e   :  { %688 = vst [vmem:[#allocation0 + $0x3b8] sm:$0x3] %v2306_v10  ;;  %v2309_v14 = vld [vmem:[%s3619_s0 + $0xe8] sm:$0x3]  ;;  %1746 = vrot.lane.b32.xlu0 %v1745_v11, %s2488_s10  ;;  %693 = vst [vmem:[#allocation0 + $0x3b0] sm:$0x3] %v2307_v12 }
  0x7f   :  { %v1754_v15 = vld [vmem:[#allocation0 + $0x181] ss:$8 sm:$0xf0]   ;;  %698 = vst [vmem:[#allocation0 + $0x3a8] sm:$0x3] %v2308_v13 }
  0x80   :  { %703 = vst [vmem:[#allocation0 + $0x3a0] sm:$0x3] %v2309_v14  ;;  %v2310_v16 = vld [vmem:[%s3619_s0 + $0xe6] sm:$0x3]  ;;  %v2311_v17 = vld [vmem:[%s3619_s0 + $0xe4] sm:$0x3] }
  0x81   :  { %708 = vst [vmem:[#allocation0 + $0x398] sm:$0x3] %v2310_v16  ;;  %v2312_v18 = vld [vmem:[%s3619_s0 + $0xe2] sm:$0x3]  ;;  %v2313_v19 = vld [vmem:[%s3619_s0 + $0xe0] sm:$0x3] }
  0x82   :  { %v1752_v20 = vld [vmem:[#allocation0 + $0x181] ss:$8 sm:$0xf]   ;;  %713 = vst [vmem:[#allocation0 + $0x390] sm:$0x3] %v2311_v17 }
  0x83   :  { %718 = vst [vmem:[#allocation0 + $0x388] sm:$0x3] %v2312_v18  ;;  %723 = vst [vmem:[#allocation0 + $0x380] sm:$0x3] %v2313_v19  ;;  %v2274_v21 = vld [vmem:[%s3619_s0 + $0x12e] sm:$0x3]  ;;  %v1756_v22 = vsel %vm1282_vm0, %v1754_v15, %v1752_v20 }
  0x84   :  { %v1765_v23 = vld [vmem:[#allocation0 + $0x281] ss:$8 sm:$0xf0]   ;;  %528 = vst [vmem:[#allocation0 + $0x4b8] sm:$0x3] %v2274_v21  ;;  %1757 = vrot.lane.b32.xlu1 %v1756_v22, %s2488_s10 }
  0x85   :  { %v2275_v24 = vld [vmem:[%s3619_s0 + $0x12c] sm:$0x3]  ;;  %v2276_v25 = vld [vmem:[%s3619_s0 + $0x12a] sm:$0x3]  ;;  %v2277_v26 = vld [vmem:[%s3619_s0 + $0x128] sm:$0x3] }
  0x86   :  { %533 = vst [vmem:[#allocation0 + $0x4b0] sm:$0x3] %v2275_v24  ;;  %v2278_v27 = vld [vmem:[%s3619_s0 + $0x126] sm:$0x3]  ;;  %538 = vst [vmem:[#allocation0 + $0x4a8] sm:$0x3] %v2276_v25 }
  0x87   :  { %v1763_v28 = vld [vmem:[#allocation0 + $0x281] ss:$8 sm:$0xf]   ;;  %543 = vst [vmem:[#allocation0 + $0x4a0] sm:$0x3] %v2277_v26 }
  0x88   :  { %548 = vst [vmem:[#allocation0 + $0x498] sm:$0x3] %v2278_v27  ;;  %v2279_v29 = vld [vmem:[%s3619_s0 + $0x124] sm:$0x3]  ;;  %v1767_v30 = vsel %vm1282_vm0, %v1765_v23, %v1763_v28  ;;  %v2280_v31 = vld [vmem:[%s3619_s0 + $0x122] sm:$0x3] }
  0x89   :  { %553 = vst [vmem:[#allocation0 + $0x490] sm:$0x3] %v2279_v29  ;;  %v2281_v32 = vld [vmem:[%s3619_s0 + $0x120] sm:$0x3]  ;;  %v2242_v33 = vld [vmem:[%s3619_s0 + $0x16e] sm:$0x3]  ;;  %1768 = vrot.lane.b32.xlu0 %v1767_v30, %s2488_s10 }
  0x8a   :  { %v1776_v34 = vld [vmem:[#allocation0 + $0x381] ss:$8 sm:$0xf0]   ;;  %558 = vst [vmem:[#allocation0 + $0x488] sm:$0x3] %v2280_v31 }
  0x8b   :  { %563 = vst [vmem:[#allocation0 + $0x480] sm:$0x3] %v2281_v32  ;;  %368 = vst [vmem:[#allocation0 + $0x5b8] sm:$0x3] %v2242_v33  ;;  %v2243_v35 = vld [vmem:[%s3619_s0 + $0x16c] sm:$0x3] }
  0x8c   :  { %373 = vst [vmem:[#allocation0 + $0x5b0] sm:$0x3] %v2243_v35  ;;  %v2244_v36 = vld [vmem:[%s3619_s0 + $0x16a] sm:$0x3]  ;;  %v2245_v37 = vld [vmem:[%s3619_s0 + $0x168] sm:$0x3] }
  0x8d   :  { %v2246_v38 = vld [vmem:[%s3619_s0 + $0x166] sm:$0x3]  ;;  %v1774_v39 = vld [vmem:[#allocation0 + $0x381] ss:$8 sm:$0xf]  }
  0x8e   :  { %378 = vst [vmem:[#allocation0 + $0x5a8] sm:$0x3] %v2244_v36  ;;  %383 = vst [vmem:[#allocation0 + $0x5a0] sm:$0x3] %v2245_v37  ;;  %v2247_v40 = vld [vmem:[%s3619_s0 + $0x164] sm:$0x3]  ;;  %v1778_v41 = vsel %vm1282_vm0, %v1776_v34, %v1774_v39 }
  0x8f   :  { %388 = vst [vmem:[#allocation0 + $0x598] sm:$0x3] %v2246_v38  ;;  %393 = vst [vmem:[#allocation0 + $0x590] sm:$0x3] %v2247_v40  ;;  %v2248_v42 = vld [vmem:[%s3619_s0 + $0x162] sm:$0x3]  ;;  %1779 = vrot.lane.b32.xlu1 %v1778_v41, %s2488_s10 }
  0x90   :  { %v2249_v43 = vld [vmem:[%s3619_s0 + $0x160] sm:$0x3]  ;;  %v2210_v44 = vld [vmem:[%s3619_s0 + $0x1ae] sm:$0x3]  ;;  %398 = vst [vmem:[#allocation0 + $0x588] sm:$0x3] %v2248_v42 }
  0x91   :  { %403 = vst [vmem:[#allocation0 + $0x580] sm:$0x3] %v2249_v43  ;;  %208 = vst [vmem:[#allocation0 + $0x6b8] sm:$0x3] %v2210_v44  ;;  %v2211_v45 = vld [vmem:[%s3619_s0 + $0x1ac] sm:$0x3] }
  0x92   :  { %v2212_v46 = vld [vmem:[%s3619_s0 + $0x1aa] sm:$0x3]  ;;  %v2213_v47 = vld [vmem:[%s3619_s0 + $0x1a8] sm:$0x3]  ;;  %213 = vst [vmem:[#allocation0 + $0x6b0] sm:$0x3] %v2211_v45 }
  0x93   :  { %v1787_v48 = vld [vmem:[#allocation0 + $0x481] ss:$8 sm:$0xf0]   ;;  %218 = vst [vmem:[#allocation0 + $0x6a8] sm:$0x3] %v2212_v46 }
  0x94   :  { %223 = vst [vmem:[#allocation0 + $0x6a0] sm:$0x3] %v2213_v47  ;;  %v2214_v49 = vld [vmem:[%s3619_s0 + $0x1a6] sm:$0x3]  ;;  %v2215_v50 = vld [vmem:[%s3619_s0 + $0x1a4] sm:$0x3] }
  0x95   :  { %228 = vst [vmem:[#allocation0 + $0x698] sm:$0x3] %v2214_v49  ;;  %v2216_v51 = vld [vmem:[%s3619_s0 + $0x1a2] sm:$0x3]  ;;  %v2217_v52 = vld [vmem:[%s3619_s0 + $0x1a0] sm:$0x3] }
  0x96   :  { %v1785_v53 = vld [vmem:[#allocation0 + $0x481] ss:$8 sm:$0xf]   ;;  %233 = vst [vmem:[#allocation0 + $0x690] sm:$0x3] %v2215_v50 }
  0x97   :  { %238 = vst [vmem:[#allocation0 + $0x688] sm:$0x3] %v2216_v51  ;;  %243 = vst [vmem:[#allocation0 + $0x680] sm:$0x3] %v2217_v52  ;;  %v2178_v54 = vld [vmem:[%s3619_s0 + $0x1ee] sm:$0x3]  ;;  %v1789_v55 = vsel %vm1282_vm0, %v1787_v48, %v1785_v53 }
  0x98   :  { %48 = vst [vmem:[#allocation0 + $0x7b8] sm:$0x3] %v2178_v54  ;;  %v2179_v56 = vld [vmem:[%s3619_s0 + $0x1ec] sm:$0x3]  ;;  %v2180_v57 = vld [vmem:[%s3619_s0 + $0x1ea] sm:$0x3]  ;;  %1790 = vrot.lane.b32.xlu0 %v1789_v55, %s2488_s10 }
  0x99   :  { %v2181_v58 = vld [vmem:[%s3619_s0 + $0x1e8] sm:$0x3]  ;;  %53 = vst [vmem:[#allocation0 + $0x7b0] sm:$0x3] %v2179_v56  ;;  %58 = vst [vmem:[#allocation0 + $0x7a8] sm:$0x3] %v2180_v57 }
  0x9a   :  { %v1798_v59 = vld [vmem:[#allocation0 + $0x581] ss:$8 sm:$0xf0]   ;;  %63 = vst [vmem:[#allocation0 + $0x7a0] sm:$0x3] %v2181_v58 }
  0x9b   :  { %v2182_v60 = vld [vmem:[%s3619_s0 + $0x1e6] sm:$0x3]  ;;  %v2183_v61 = vld [vmem:[%s3619_s0 + $0x1e4] sm:$0x3]  ;;  %v2184_v62 = vld [vmem:[%s3619_s0 + $0x1e2] sm:$0x3] }
  0x9c   :  { %68 = vst [vmem:[#allocation0 + $0x798] sm:$0x3] %v2182_v60  ;;  %v2185_v63 = vld [vmem:[%s3619_s0 + $0x1e0] sm:$0x3]  ;;  %73 = vst [vmem:[#allocation0 + $0x790] sm:$0x3] %v2183_v61 }
  0x9d   :  { %v1796_v0 = vld [vmem:[#allocation0 + $0x581] ss:$8 sm:$0xf]   ;;  %78 = vst [vmem:[#allocation0 + $0x788] sm:$0x3] %v2184_v62 }
  0x9e   :  { %83 = vst [vmem:[#allocation0 + $0x780] sm:$0x3] %v2185_v63  ;;  %v2394_v1 = vld [vmem:[%s3619_s0 + $0x3e] sm:$0x3]  ;;  %v1800_v2 = vsel %vm1282_vm0, %v1798_v59, %v1796_v0  ;;  %v2395_v4 = vld [vmem:[%s3619_s0 + $0x3c] sm:$0x3] }
  0x9f   :  { %v1809_v3 = vld [vmem:[#allocation0 + $0x681] ss:$8 sm:$0xf0]   ;;  %1128 = vst [vmem:[#allocation0 + $0xf8] sm:$0x3] %v2394_v1  ;;  %1801 = vrot.lane.b32.xlu1 %v1800_v2, %s2488_s10 }
  0xa0   :  { %1133 = vst [vmem:[#allocation0 + $0xf0] sm:$0x3] %v2395_v4  ;;  %v2396_v5 = vld [vmem:[%s3619_s0 + $0x3a] sm:$0x3]  ;;  %v2397_v6 = vld [vmem:[%s3619_s0 + $0x38] sm:$0x3] }
  0xa1   :  { %v2398_v7 = vld [vmem:[%s3619_s0 + $0x36] sm:$0x3]  ;;  %v1807_v8 = vld [vmem:[#allocation0 + $0x681] ss:$8 sm:$0xf]  }
  0xa2   :  { %1138 = vst [vmem:[#allocation0 + $0xe8] sm:$0x3] %v2396_v5  ;;  %1143 = vst [vmem:[#allocation0 + $0xe0] sm:$0x3] %v2397_v6  ;;  %v2399_v9 = vld [vmem:[%s3619_s0 + $0x34] sm:$0x3]  ;;  %v1811_v10 = vsel %vm1282_vm0, %v1809_v3, %v1807_v8 }
  0xa3   :  { %1148 = vst [vmem:[#allocation0 + $0xd8] sm:$0x3] %v2398_v7  ;;  %1153 = vst [vmem:[#allocation0 + $0xd0] sm:$0x3] %v2399_v9  ;;  %v2400_v11 = vld [vmem:[%s3619_s0 + $0x32] sm:$0x3]  ;;  %1812 = vrot.lane.b32.xlu0 %v1811_v10, %s2488_s10 }
  0xa4   :  { %v2401_v12 = vld [vmem:[%s3619_s0 + $0x30] sm:$0x3]  ;;  %v2362_v13 = vld [vmem:[%s3619_s0 + $0x7e] sm:$0x3]  ;;  %1158 = vst [vmem:[#allocation0 + $0xc8] sm:$0x3] %v2400_v11 }
  0xa5   :  { %v1820_v14 = vld [vmem:[#allocation0 + $0x781] ss:$8 sm:$0xf0]   ;;  %1163 = vst [vmem:[#allocation0 + $0xc0] sm:$0x3] %v2401_v12 }
  0xa6   :  { %968 = vst [vmem:[#allocation0 + $0x1f8] sm:$0x3] %v2362_v13  ;;  %v2363_v15 = vld [vmem:[%s3619_s0 + $0x7c] sm:$0x3]  ;;  %v2364_v16 = vld [vmem:[%s3619_s0 + $0x7a] sm:$0x3] }
  0xa7   :  { %973 = vst [vmem:[#allocation0 + $0x1f0] sm:$0x3] %v2363_v15  ;;  %v2365_v17 = vld [vmem:[%s3619_s0 + $0x78] sm:$0x3]  ;;  %v2366_v18 = vld [vmem:[%s3619_s0 + $0x76] sm:$0x3] }
  0xa8   :  { %v1818_v19 = vld [vmem:[#allocation0 + $0x781] ss:$8 sm:$0xf]   ;;  %978 = vst [vmem:[#allocation0 + $0x1e8] sm:$0x3] %v2364_v16 }
  0xa9   :  { %983 = vst [vmem:[#allocation0 + $0x1e0] sm:$0x3] %v2365_v17  ;;  %988 = vst [vmem:[#allocation0 + $0x1d8] sm:$0x3] %v2366_v18  ;;  %v2367_v20 = vld [vmem:[%s3619_s0 + $0x74] sm:$0x3]  ;;  %v1822_v21 = vsel %vm1282_vm0, %v1820_v14, %v1818_v19 }
  0xaa   :  { %993 = vst [vmem:[#allocation0 + $0x1d0] sm:$0x3] %v2367_v20  ;;  %v2368_v22 = vld [vmem:[%s3619_s0 + $0x72] sm:$0x3]  ;;  %v2369_v23 = vld [vmem:[%s3619_s0 + $0x70] sm:$0x3]  ;;  %1823 = vrot.lane.b32.xlu1 %v1822_v21, %s2488_s10 }
  0xab   :  { %v2330_v24 = vld [vmem:[%s3619_s0 + $0xbe] sm:$0x3]  ;;  %998 = vst [vmem:[#allocation0 + $0x1c8] sm:$0x3] %v2368_v22  ;;  %1003 = vst [vmem:[#allocation0 + $0x1c0] sm:$0x3] %v2369_v23 }
  0xac   :  { %808 = vst [vmem:[#allocation0 + $0x2f8] sm:$0x3] %v2330_v24  ;;  %v2331_v25 = vld [vmem:[%s3619_s0 + $0xbc] sm:$0x3]  ;;  %v2332_v26 = vld [vmem:[%s3619_s0 + $0xba] sm:$0x3] }
  0xad   :  { %v2333_v27 = vld [vmem:[%s3619_s0 + $0xb8] sm:$0x3]  ;;  %813 = vst [vmem:[#allocation0 + $0x2f0] sm:$0x3] %v2331_v25  ;;  %818 = vst [vmem:[#allocation0 + $0x2e8] sm:$0x3] %v2332_v26 }
  0xae   :  { %v1831_v28 = vld [vmem:[#allocation0 + $0xc1] ss:$8 sm:$0xf0]   ;;  %823 = vst [vmem:[#allocation0 + $0x2e0] sm:$0x3] %v2333_v27 }
  0xaf   :  { %v2334_v29 = vld [vmem:[%s3619_s0 + $0xb6] sm:$0x3]  ;;  %v2335_v30 = vld [vmem:[%s3619_s0 + $0xb4] sm:$0x3]  ;;  %v2336_v31 = vld [vmem:[%s3619_s0 + $0xb2] sm:$0x3] }
  0xb0   :  { %828 = vst [vmem:[#allocation0 + $0x2d8] sm:$0x3] %v2334_v29  ;;  %v2337_v32 = vld [vmem:[%s3619_s0 + $0xb0] sm:$0x3]  ;;  %833 = vst [vmem:[#allocation0 + $0x2d0] sm:$0x3] %v2335_v30 }
  0xb1   :  { %v1829_v33 = vld [vmem:[#allocation0 + $0xc1] ss:$8 sm:$0xf]   ;;  %838 = vst [vmem:[#allocation0 + $0x2c8] sm:$0x3] %v2336_v31 }
  0xb2   :  { %843 = vst [vmem:[#allocation0 + $0x2c0] sm:$0x3] %v2337_v32  ;;  %v2298_v34 = vld [vmem:[%s3619_s0 + $0xfe] sm:$0x3]  ;;  %v1833_v35 = vsel %vm1282_vm0, %v1831_v28, %v1829_v33  ;;  %v2299_v36 = vld [vmem:[%s3619_s0 + $0xfc] sm:$0x3]  ;;  %v1572_v28 = vpop.permute.xlu0 %1571  }
  0xb3   :  { %648 = vst [vmem:[#allocation0 + $0x3f8] sm:$0x3] %v2298_v34  ;;  %v2300_v37 = vld [vmem:[%s3619_s0 + $0xfa] sm:$0x3]  ;;  %v2301_v38 = vld [vmem:[%s3619_s0 + $0xf8] sm:$0x3]  ;;  %1834 = vrot.lane.b32.xlu0 %v1833_v35, %s2488_s10 }
  0xb4   :  { %v1842_v39 = vld [vmem:[#allocation0 + $0x1c1] ss:$8 sm:$0xf0]   ;;  %653 = vst [vmem:[#allocation0 + $0x3f0] sm:$0x3] %v2299_v36 }
  0xb5   :  { %658 = vst [vmem:[#allocation0 + $0x3e8] sm:$0x3] %v2300_v37  ;;  %663 = vst [vmem:[#allocation0 + $0x3e0] sm:$0x3] %v2301_v38  ;;  %v2302_v40 = vld [vmem:[%s3619_s0 + $0xf6] sm:$0x3]  ;;  %v1593_v37 = vpop.permute.xlu1 %1592  }
  0xb6   :  { %668 = vst [vmem:[#allocation0 + $0x3d8] sm:$0x3] %v2302_v40  ;;  %v2303_v41 = vld [vmem:[%s3619_s0 + $0xf4] sm:$0x3]  ;;  %v2304_v42 = vld [vmem:[%s3619_s0 + $0xf2] sm:$0x3] }
  0xb7   :  { %v2305_v43 = vld [vmem:[%s3619_s0 + $0xf0] sm:$0x3]  ;;  %673 = vst [vmem:[#allocation0 + $0x3d0] sm:$0x3] %v2303_v41  ;;  %678 = vst [vmem:[#allocation0 + $0x3c8] sm:$0x3] %v2304_v42 }
  0xb8   :  { %v1840_v44 = vld [vmem:[#allocation0 + $0x1c1] ss:$8 sm:$0xf]   ;;  %683 = vst [vmem:[#allocation0 + $0x3c0] sm:$0x3] %v2305_v43 }
  0xb9   :  { %v2266_v45 = vld [vmem:[%s3619_s0 + $0x13e] sm:$0x3]  ;;  %v1844_v46 = vsel %vm1282_vm0, %v1842_v39, %v1840_v44  ;;  %v1853_v47 = vld [vmem:[#allocation0 + $0x2c1] ss:$8 sm:$0xf0]  }
  0xba   :  { %488 = vst [vmem:[#allocation0 + $0x4f8] sm:$0x3] %v2266_v45  ;;  %v2267_v48 = vld [vmem:[%s3619_s0 + $0x13c] sm:$0x3]  ;;  %1845 = vrot.lane.b32.xlu1 %v1844_v46, %s2488_s10  ;;  %v2268_v49 = vld [vmem:[%s3619_s0 + $0x13a] sm:$0x3] }
  0xbb   :  { %493 = vst [vmem:[#allocation0 + $0x4f0] sm:$0x3] %v2267_v48  ;;  %v2269_v50 = vld [vmem:[%s3619_s0 + $0x138] sm:$0x3]  ;;  %v2270_v51 = vld [vmem:[%s3619_s0 + $0x136] sm:$0x3] }
  0xbc   :  { %v1851_v52 = vld [vmem:[#allocation0 + $0x2c1] ss:$8 sm:$0xf]   ;;  %498 = vst [vmem:[#allocation0 + $0x4e8] sm:$0x3] %v2268_v49 }
  0xbd   :  { %503 = vst [vmem:[#allocation0 + $0x4e0] sm:$0x3] %v2269_v50  ;;  %508 = vst [vmem:[#allocation0 + $0x4d8] sm:$0x3] %v2270_v51  ;;  %v2271_v53 = vld [vmem:[%s3619_s0 + $0x134] sm:$0x3]  ;;  %v1855_v54 = vsel %vm1282_vm0, %v1853_v47, %v1851_v52  ;;  %v1582_v47 = vpop.permute.xlu0 %1581  }
  0xbe   :  { %513 = vst [vmem:[#allocation0 + $0x4d0] sm:$0x3] %v2271_v53  ;;  %v2272_v55 = vld [vmem:[%s3619_s0 + $0x132] sm:$0x3]  ;;  %v2273_v56 = vld [vmem:[%s3619_s0 + $0x130] sm:$0x3]  ;;  %1856 = vrot.lane.b32.xlu0 %v1855_v54, %s2488_s10 }
  0xbf   :  { %v2234_v57 = vld [vmem:[%s3619_s0 + $0x17e] sm:$0x3]  ;;  %v1864_v58 = vld [vmem:[#allocation0 + $0x3c1] ss:$8 sm:$0xf0]  }
  0xc0   :  { %518 = vst [vmem:[#allocation0 + $0x4c8] sm:$0x3] %v2272_v55  ;;  %523 = vst [vmem:[#allocation0 + $0x4c0] sm:$0x3] %v2273_v56  ;;  %v2235_v59 = vld [vmem:[%s3619_s0 + $0x17c] sm:$0x3] }
  0xc1   :  { %328 = vst [vmem:[#allocation0 + $0x5f8] sm:$0x3] %v2234_v57  ;;  %333 = vst [vmem:[#allocation0 + $0x5f0] sm:$0x3] %v2235_v59  ;;  %v2236_v60 = vld [vmem:[%s3619_s0 + $0x17a] sm:$0x3]  ;;  %v1604_v59 = vpop.permute.xlu1 %1603  }
  0xc2   :  { %v2237_v61 = vld [vmem:[%s3619_s0 + $0x178] sm:$0x3]  ;;  %v2238_v62 = vld [vmem:[%s3619_s0 + $0x176] sm:$0x3]  ;;  %338 = vst [vmem:[#allocation0 + $0x5e8] sm:$0x3] %v2236_v60 }
  0xc3   :  { %v1862_v63 = vld [vmem:[#allocation0 + $0x3c1] ss:$8 sm:$0xf]   ;;  %343 = vst [vmem:[#allocation0 + $0x5e0] sm:$0x3] %v2237_v61 }
  0xc4   :  { %348 = vst [vmem:[#allocation0 + $0x5d8] sm:$0x3] %v2238_v62  ;;  %v2239_v0 = vld [vmem:[%s3619_s0 + $0x174] sm:$0x3]  ;;  %v1866_v1 = vsel %vm1282_vm0, %v1864_v58, %v1862_v63  ;;  %v2240_v2 = vld [vmem:[%s3619_s0 + $0x172] sm:$0x3] }
  0xc5   :  { %353 = vst [vmem:[#allocation0 + $0x5d0] sm:$0x3] %v2239_v0  ;;  %v2241_v3 = vld [vmem:[%s3619_s0 + $0x170] sm:$0x3]  ;;  %v2202_v4 = vld [vmem:[%s3619_s0 + $0x1be] sm:$0x3]  ;;  %1867 = vrot.lane.b32.xlu1 %v1866_v1, %s2488_s10 }
  0xc6   :  { %358 = vst [vmem:[#allocation0 + $0x5c8] sm:$0x3] %v2240_v2  ;;  %363 = vst [vmem:[#allocation0 + $0x5c0] sm:$0x3] %v2241_v3  ;;  %v2203_v5 = vld [vmem:[%s3619_s0 + $0x1bc] sm:$0x3] }
  0xc7   :  { %168 = vst [vmem:[#allocation0 + $0x6f8] sm:$0x3] %v2202_v4  ;;  %v2204_v6 = vld [vmem:[%s3619_s0 + $0x1ba] sm:$0x3]  ;;  %v2205_v7 = vld [vmem:[%s3619_s0 + $0x1b8] sm:$0x3] }
  0xc8   :  { %v1875_v8 = vld [vmem:[#allocation0 + $0x4c1] ss:$8 sm:$0xf0]   ;;  %173 = vst [vmem:[#allocation0 + $0x6f0] sm:$0x3] %v2203_v5 }
  0xc9   :  { %178 = vst [vmem:[#allocation0 + $0x6e8] sm:$0x3] %v2204_v6  ;;  %183 = vst [vmem:[#allocation0 + $0x6e0] sm:$0x3] %v2205_v7  ;;  %v2206_v9 = vld [vmem:[%s3619_s0 + $0x1b6] sm:$0x3] }
  0xca   :  { %188 = vst [vmem:[#allocation0 + $0x6d8] sm:$0x3] %v2206_v9  ;;  %v2207_v10 = vld [vmem:[%s3619_s0 + $0x1b4] sm:$0x3]  ;;  %v2208_v11 = vld [vmem:[%s3619_s0 + $0x1b2] sm:$0x3] }
  0xcb   :  { %v2209_v12 = vld [vmem:[%s3619_s0 + $0x1b0] sm:$0x3]  ;;  %193 = vst [vmem:[#allocation0 + $0x6d0] sm:$0x3] %v2207_v10  ;;  %198 = vst [vmem:[#allocation0 + $0x6c8] sm:$0x3] %v2208_v11  ;;  %v1615_v11 = vpop.permute.xlu0 %1614  }
  0xcc   :  { %v1873_v13 = vld [vmem:[#allocation0 + $0x4c1] ss:$8 sm:$0xf]   ;;  %203 = vst [vmem:[#allocation0 + $0x6c0] sm:$0x3] %v2209_v12 }
  0xcd   :  { %v2170_v14 = vld [vmem:[%s3619_s0 + $0x1fe] sm:$0x3]  ;;  %v1877_v15 = vsel %vm1282_vm0, %v1875_v8, %v1873_v13  ;;  %v2171_v16 = vld [vmem:[%s3619_s0 + $0x1fc] sm:$0x3]  ;;  %v2172_v17 = vld [vmem:[%s3619_s0 + $0x1fa] sm:$0x3] }
  0xce   :  { %8 = vst [vmem:[#allocation0 + $0x7f8] sm:$0x3] %v2170_v14  ;;  %v2173_v18 = vld [vmem:[%s3619_s0 + $0x1f8] sm:$0x3]  ;;  %1878 = vrot.lane.b32.xlu0 %v1877_v15, %s2488_s10  ;;  %13 = vst [vmem:[#allocation0 + $0x7f0] sm:$0x3] %v2171_v16 }
  0xcf   :  { %v1886_v19 = vld [vmem:[#allocation0 + $0x5c1] ss:$8 sm:$0xf0]   ;;  %18 = vst [vmem:[#allocation0 + $0x7e8] sm:$0x3] %v2172_v17 }
  0xd0   :  { %23 = vst [vmem:[#allocation0 + $0x7e0] sm:$0x3] %v2173_v18  ;;  %v2174_v20 = vld [vmem:[%s3619_s0 + $0x1f6] sm:$0x3]  ;;  %v2175_v21 = vld [vmem:[%s3619_s0 + $0x1f4] sm:$0x3] }
  0xd1   :  { %28 = vst [vmem:[#allocation0 + $0x7d8] sm:$0x3] %v2174_v20  ;;  %v2176_v22 = vld [vmem:[%s3619_s0 + $0x1f2] sm:$0x3]  ;;  %v2177_v23 = vld [vmem:[%s3619_s0 + $0x1f0] sm:$0x3] }
  0xd2   :  { %v1884_v24 = vld [vmem:[#allocation0 + $0x5c1] ss:$8 sm:$0xf]   ;;  %33 = vst [vmem:[#allocation0 + $0x7d0] sm:$0x3] %v2175_v21 }
  0xd3   :  { %38 = vst [vmem:[#allocation0 + $0x7c8] sm:$0x3] %v2176_v22  ;;  %43 = vst [vmem:[#allocation0 + $0x7c0] sm:$0x3] %v2177_v23  ;;  %v1888_v26 = vsel %vm1282_vm0, %v1886_v19, %v1884_v24  ;;  %v1626_v24 = vpop.permute.xlu1 %1625  }
  0xd4   :  { %v1280_v25 = vld [vmem:[#allocation0] ss:$8 sm:$0xf]   ;;  %v1897_v27 = vld [vmem:[#allocation0 + $0x6c1] ss:$8 sm:$0xf0]   ;;  %1889 = vrot.lane.b32.xlu1 %v1888_v26, %s2488_s10 }
  0xd5   :  { %v1281_v29 = vld [vmem:[#allocation0] ss:$8 sm:$0xf0]   ;;  %v1895_v33 = vld [vmem:[#allocation0 + $0x6c1] ss:$8 sm:$0xf]  }
  0xd6   :  { %v1283_v30 = vsel %vm1282_vm0, %v1281_v29, %v1280_v25  ;;  %v1350_v31 = vld [vmem:[#allocation0 + $0x200] ss:$8 sm:$0xf]   ;;  %v1899_v36 = vsel %vm1282_vm0, %v1897_v27, %v1895_v33 }
  0xd7   :  { %v1352_v32 = vld [vmem:[#allocation0 + $0x200] ss:$8 sm:$0xf0]   ;;  %1285 = vst.msk [vmem:[%s3620_s1] sm:$0xff] %vm1284_vm1, %v1283_v30   ;;  %1900 = vrot.lane.b32.xlu0 %v1899_v36, %s2488_s10 }
  0xd8   :  { %v1354_v34 = vsel %vm1282_vm0, %v1352_v32, %v1350_v31  ;;  %v1314_v35 = vld [vmem:[#allocation0 + $0x100] ss:$8 sm:$0xf]   ;;  %1574 = vst.msk [vmem:[%s3620_s1] sm:$0xff] %vm1573_vm2, %v1572_v28  }
  0xd9   :  { %2432 = vst.msk [vmem:[%s3620_s1 + $0x40] sm:$0xff] %vm1284_vm1, %v1354_v34   ;;  %v1316_v38 = vld [vmem:[#allocation0 + $0x100] ss:$8 sm:$0xf0]   ;;  %v1637_v34 = vpop.permute.xlu0 %1636  }
  0xda   :  { %v1386_v39 = vld [vmem:[#allocation0 + $0x300] ss:$8 sm:$0xf]   ;;  %v1908_v40 = vld [vmem:[#allocation0 + $0x7c1] ss:$8 sm:$0xf0]   ;;  %v1318_v41 = vsel %vm1282_vm0, %v1316_v38, %v1314_v35 }
  0xdb   :  { %2457 = vst.msk [vmem:[%s3620_s1 + $0x40] sm:$0xff] %vm1573_vm2, %v1593_v37   ;;  %v1388_v42 = vld [vmem:[#allocation0 + $0x300] ss:$8 sm:$0xf0]  }
  0xdc   :  { %2428 = vst.msk [vmem:[%s3620_s1 + $0x20] sm:$0xff] %vm1284_vm1, %v1318_v41   ;;  %v1390_v43 = vsel %vm1282_vm0, %v1388_v42, %v1386_v39  ;;  %v1422_v44 = vld [vmem:[#allocation0 + $0x400] ss:$8 sm:$0xf]  }
  0xdd   :  { %v1424_v45 = vld [vmem:[#allocation0 + $0x400] ss:$8 sm:$0xf0]   ;;  %v1906_v46 = vld [vmem:[#allocation0 + $0x7c1] ss:$8 sm:$0xf]  }
  0xde   :  { %2436 = vst.msk [vmem:[%s3620_s1 + $0x60] sm:$0xff] %vm1284_vm1, %v1390_v43   ;;  %v1426_v48 = vsel %vm1282_vm0, %v1424_v45, %v1422_v44  ;;  %v1458_v49 = vld [vmem:[#allocation0 + $0x500] ss:$8 sm:$0xf]   ;;  %v1910_v50 = vsel %vm1282_vm0, %v1908_v40, %v1906_v46 }
  0xdf   :  { %2456 = vst.msk [vmem:[%s3620_s1 + $0x20] sm:$0xff] %vm1573_vm2, %v1582_v47   ;;  %v1460_v51 = vld [vmem:[#allocation0 + $0x500] ss:$8 sm:$0xf0]   ;;  %1911 = vrot.lane.b32.xlu1 %v1910_v50, %s2488_s10  ;;  %2458 = vst.msk [vmem:[%s3620_s1 + $0x60] sm:$0xff] %vm1573_vm2, %v1604_v59   ;;  %v1648_v47 = vpop.permute.xlu1 %1647  }
  0xe0   :  { %2440 = vst.msk [vmem:[%s3620_s1 + $0x80] sm:$0xff] %vm1284_vm1, %v1426_v48   ;;  %v1494_v52 = vld [vmem:[#allocation0 + $0x600] ss:$8 sm:$0xf]   ;;  %v1462_v53 = vsel %vm1282_vm0, %v1460_v51, %v1458_v49 }
  0xe1   :  { %v1496_v54 = vld [vmem:[#allocation0 + $0x600] ss:$8 sm:$0xf0]   ;;  %2444 = vst.msk [vmem:[%s3620_s1 + $0xa0] sm:$0xff] %vm1284_vm1, %v1462_v53  }
  0xe2   :  { %v1530_v55 = vld [vmem:[#allocation0 + $0x700] ss:$8 sm:$0xf]   ;;  %v1498_v56 = vsel %vm1282_vm0, %v1496_v54, %v1494_v52  ;;  %2459 = vst.msk [vmem:[%s3620_s1 + $0x80] sm:$0xff] %vm1573_vm2, %v1615_v11   ;;  %2460 = vst.msk [vmem:[%s3620_s1 + $0xa0] sm:$0xff] %vm1573_vm2, %v1626_v24  }
  0xe3   :  { %v1532_v57 = vld [vmem:[#allocation0 + $0x700] ss:$8 sm:$0xf0]   ;;  %2448 = vst.msk [vmem:[%s3620_s1 + $0xc0] sm:$0xff] %vm1284_vm1, %v1498_v56  }
  0xe4   :  { %v1287_v58 = vld [vmem:[#allocation0 + $0x40] ss:$8 sm:$0xf]   ;;  %v1534_v60 = vsel %vm1282_vm0, %v1532_v57, %v1530_v55  ;;  %2461 = vst.msk [vmem:[%s3620_s1 + $0xc0] sm:$0xff] %vm1573_vm2, %v1637_v34  }
  0xe5   :  { %v1289_v61 = vld [vmem:[#allocation0 + $0x40] ss:$8 sm:$0xf0]   ;;  %2452 = vst.msk [vmem:[%s3620_s1 + $0xe0] sm:$0xff] %vm1284_vm1, %v1534_v60  }
  0xe6   :  { %v1323_v62 = vld [vmem:[#allocation0 + $0x140] ss:$8 sm:$0xf]   ;;  %v1291_v63 = vsel %vm1282_vm0, %v1289_v61, %v1287_v58  ;;  %2462 = vst.msk [vmem:[%s3620_s1 + $0xe0] sm:$0xff] %vm1573_vm2, %v1648_v47  }
  0xe7   :  { %v1325_v0 = vld [vmem:[#allocation0 + $0x140] ss:$8 sm:$0xf0]   ;;  %2425 = vst.msk [vmem:[%s3620_s1 + $0x8] sm:$0xff] %vm1284_vm1, %v1291_v63   ;;  %v1659_v63 = vpop.permute.xlu0 %1658  }
  0xe8   :  { %v1359_v1 = vld [vmem:[#allocation0 + $0x240] ss:$8 sm:$0xf]   ;;  %v1327_v2 = vsel %vm1282_vm0, %v1325_v0, %v1323_v62  ;;  %2463 = vst.msk [vmem:[%s3620_s1 + $0x8] sm:$0xff] %vm1573_vm2, %v1659_v63  }
  0xe9   :  { %v1361_v3 = vld [vmem:[#allocation0 + $0x240] ss:$8 sm:$0xf0]   ;;  %2429 = vst.msk [vmem:[%s3620_s1 + $0x28] sm:$0xff] %vm1284_vm1, %v1327_v2  }
  0xea   :  { %v1395_v4 = vld [vmem:[#allocation0 + $0x340] ss:$8 sm:$0xf]   ;;  %v1363_v5 = vsel %vm1282_vm0, %v1361_v3, %v1359_v1 }
  0xeb   :  { %v1397_v6 = vld [vmem:[#allocation0 + $0x340] ss:$8 sm:$0xf0]   ;;  %2433 = vst.msk [vmem:[%s3620_s1 + $0x48] sm:$0xff] %vm1284_vm1, %v1363_v5  }
  0xec   :  { %v1431_v7 = vld [vmem:[#allocation0 + $0x440] ss:$8 sm:$0xf]   ;;  %v1399_v8 = vsel %vm1282_vm0, %v1397_v6, %v1395_v4 }
  0xed   :  { %v1433_v9 = vld [vmem:[#allocation0 + $0x440] ss:$8 sm:$0xf0]   ;;  %2437 = vst.msk [vmem:[%s3620_s1 + $0x68] sm:$0xff] %vm1284_vm1, %v1399_v8  }
  0xee   :  { %v1467_v10 = vld [vmem:[#allocation0 + $0x540] ss:$8 sm:$0xf]   ;;  %v1435_v12 = vsel %vm1282_vm0, %v1433_v9, %v1431_v7  ;;  %v1670_v9 = vpop.permute.xlu1 %1669  }
  0xef   :  { %v1469_v13 = vld [vmem:[#allocation0 + $0x540] ss:$8 sm:$0xf0]   ;;  %2441 = vst.msk [vmem:[%s3620_s1 + $0x88] sm:$0xff] %vm1284_vm1, %v1435_v12  }
  0xf0   :  { %v1503_v14 = vld [vmem:[#allocation0 + $0x640] ss:$8 sm:$0xf]   ;;  %v1471_v15 = vsel %vm1282_vm0, %v1469_v13, %v1467_v10  ;;  %2464 = vst.msk [vmem:[%s3620_s1 + $0x28] sm:$0xff] %vm1573_vm2, %v1670_v9   ;;  %v1681_v10 = vpop.permute.xlu0 %1680  }
  0xf1   :  { %v1505_v16 = vld [vmem:[#allocation0 + $0x640] ss:$8 sm:$0xf0]   ;;  %2445 = vst.msk [vmem:[%s3620_s1 + $0xa8] sm:$0xff] %vm1284_vm1, %v1471_v15  }
  0xf2   :  { %v1539_v17 = vld [vmem:[#allocation0 + $0x740] ss:$8 sm:$0xf]   ;;  %v1507_v18 = vsel %vm1282_vm0, %v1505_v16, %v1503_v14  ;;  %2465 = vst.msk [vmem:[%s3620_s1 + $0x48] sm:$0xff] %vm1573_vm2, %v1681_v10   ;;  %v1692_v11 = vpop.permute.xlu1 %1691  }
  0xf3   :  { %v1541_v19 = vld [vmem:[#allocation0 + $0x740] ss:$8 sm:$0xf0]   ;;  %2449 = vst.msk [vmem:[%s3620_s1 + $0xc8] sm:$0xff] %vm1284_vm1, %v1507_v18  }
  0xf4   :  { %v1296_v20 = vld [vmem:[#allocation0 + $0x80] ss:$8 sm:$0xf]   ;;  %v1543_v21 = vsel %vm1282_vm0, %v1541_v19, %v1539_v17  ;;  %2466 = vst.msk [vmem:[%s3620_s1 + $0x68] sm:$0xff] %vm1573_vm2, %v1692_v11   ;;  %v1703_v12 = vpop.permute.xlu0 %1702  }
  0xf5   :  { %v1298_v22 = vld [vmem:[#allocation0 + $0x80] ss:$8 sm:$0xf0]   ;;  %2453 = vst.msk [vmem:[%s3620_s1 + $0xe8] sm:$0xff] %vm1284_vm1, %v1543_v21  }
  0xf6   :  { %v1332_v23 = vld [vmem:[#allocation0 + $0x180] ss:$8 sm:$0xf]   ;;  %v1300_v25 = vsel %vm1282_vm0, %v1298_v22, %v1296_v20  ;;  %2467 = vst.msk [vmem:[%s3620_s1 + $0x88] sm:$0xff] %vm1573_vm2, %v1703_v12   ;;  %v1714_v13 = vpop.permute.xlu1 %1713  }
  0xf7   :  { %v1334_v26 = vld [vmem:[#allocation0 + $0x180] ss:$8 sm:$0xf0]   ;;  %2426 = vst.msk [vmem:[%s3620_s1 + $0x10] sm:$0xff] %vm1284_vm1, %v1300_v25  }
  0xf8   :  { %v1368_v27 = vld [vmem:[#allocation0 + $0x280] ss:$8 sm:$0xf]   ;;  %v1336_v28 = vsel %vm1282_vm0, %v1334_v26, %v1332_v23  ;;  %2468 = vst.msk [vmem:[%s3620_s1 + $0xa8] sm:$0xff] %vm1573_vm2, %v1714_v13   ;;  %v1725_v14 = vpop.permute.xlu0 %1724  }
  0xf9   :  { %v1370_v29 = vld [vmem:[#allocation0 + $0x280] ss:$8 sm:$0xf0]   ;;  %2430 = vst.msk [vmem:[%s3620_s1 + $0x30] sm:$0xff] %vm1284_vm1, %v1336_v28  }
  0xfa   :  { %v1404_v30 = vld [vmem:[#allocation0 + $0x380] ss:$8 sm:$0xf]   ;;  %v1372_v31 = vsel %vm1282_vm0, %v1370_v29, %v1368_v27  ;;  %2469 = vst.msk [vmem:[%s3620_s1 + $0xc8] sm:$0xff] %vm1573_vm2, %v1725_v14   ;;  %v1736_v15 = vpop.permute.xlu1 %1735  }
  0xfb   :  { %v1406_v32 = vld [vmem:[#allocation0 + $0x380] ss:$8 sm:$0xf0]   ;;  %2434 = vst.msk [vmem:[%s3620_s1 + $0x50] sm:$0xff] %vm1284_vm1, %v1372_v31  }
  0xfc   :  { %v1440_v33 = vld [vmem:[#allocation0 + $0x480] ss:$8 sm:$0xf]   ;;  %v1408_v35 = vsel %vm1282_vm0, %v1406_v32, %v1404_v30  ;;  %2470 = vst.msk [vmem:[%s3620_s1 + $0xe8] sm:$0xff] %vm1573_vm2, %v1736_v15   ;;  %v1747_v16 = vpop.permute.xlu0 %1746  }
  0xfd   :  { %v1442_v36 = vld [vmem:[#allocation0 + $0x480] ss:$8 sm:$0xf0]   ;;  %2438 = vst.msk [vmem:[%s3620_s1 + $0x70] sm:$0xff] %vm1284_vm1, %v1408_v35  }
  0xfe   :  { %v1476_v37 = vld [vmem:[#allocation0 + $0x580] ss:$8 sm:$0xf]   ;;  %v1444_v38 = vsel %vm1282_vm0, %v1442_v36, %v1440_v33  ;;  %2471 = vst.msk [vmem:[%s3620_s1 + $0x10] sm:$0xff] %vm1573_vm2, %v1747_v16   ;;  %v1758_v17 = vpop.permute.xlu1 %1757  }
  0xff   :  { %v1478_v39 = vld [vmem:[#allocation0 + $0x580] ss:$8 sm:$0xf0]   ;;  %2442 = vst.msk [vmem:[%s3620_s1 + $0x90] sm:$0xff] %vm1284_vm1, %v1444_v38  }
 0x100   :  { %v1512_v40 = vld [vmem:[#allocation0 + $0x680] ss:$8 sm:$0xf]   ;;  %v1480_v41 = vsel %vm1282_vm0, %v1478_v39, %v1476_v37  ;;  %2472 = vst.msk [vmem:[%s3620_s1 + $0x30] sm:$0xff] %vm1573_vm2, %v1758_v17   ;;  %v1769_v18 = vpop.permute.xlu0 %1768  }
 0x101   :  { %v1514_v42 = vld [vmem:[#allocation0 + $0x680] ss:$8 sm:$0xf0]   ;;  %2446 = vst.msk [vmem:[%s3620_s1 + $0xb0] sm:$0xff] %vm1284_vm1, %v1480_v41  }
 0x102   :  { %v1548_v43 = vld [vmem:[#allocation0 + $0x780] ss:$8 sm:$0xf]   ;;  %v1516_v44 = vsel %vm1282_vm0, %v1514_v42, %v1512_v40  ;;  %2473 = vst.msk [vmem:[%s3620_s1 + $0x50] sm:$0xff] %vm1573_vm2, %v1769_v18   ;;  %v1780_v19 = vpop.permute.xlu1 %1779  }
 0x103   :  { %v1550_v45 = vld [vmem:[#allocation0 + $0x780] ss:$8 sm:$0xf0]   ;;  %2450 = vst.msk [vmem:[%s3620_s1 + $0xd0] sm:$0xff] %vm1284_vm1, %v1516_v44  }
 0x104   :  { %v1305_v46 = vld [vmem:[#allocation0 + $0xc0] ss:$8 sm:$0xf]   ;;  %v1552_v48 = vsel %vm1282_vm0, %v1550_v45, %v1548_v43  ;;  %2474 = vst.msk [vmem:[%s3620_s1 + $0x70] sm:$0xff] %vm1573_vm2, %v1780_v19  }
 0x105   :  { %v1307_v49 = vld [vmem:[#allocation0 + $0xc0] ss:$8 sm:$0xf0]   ;;  %2454 = vst.msk [vmem:[%s3620_s1 + $0xf0] sm:$0xff] %vm1284_vm1, %v1552_v48  }
 0x106   :  { %v1341_v50 = vld [vmem:[#allocation0 + $0x1c0] ss:$8 sm:$0xf]   ;;  %v1309_v51 = vsel %vm1282_vm0, %v1307_v49, %v1305_v46 }
 0x107   :  { %v1343_v52 = vld [vmem:[#allocation0 + $0x1c0] ss:$8 sm:$0xf0]   ;;  %2427 = vst.msk [vmem:[%s3620_s1 + $0x18] sm:$0xff] %vm1284_vm1, %v1309_v51  }
 0x108   :  { %v1377_v53 = vld [vmem:[#allocation0 + $0x2c0] ss:$8 sm:$0xf]   ;;  %v1345_v54 = vsel %vm1282_vm0, %v1343_v52, %v1341_v50 }
 0x109   :  { %v1379_v55 = vld [vmem:[#allocation0 + $0x2c0] ss:$8 sm:$0xf0]   ;;  %2431 = vst.msk [vmem:[%s3620_s1 + $0x38] sm:$0xff] %vm1284_vm1, %v1345_v54  }
 0x10a   :  { %v1413_v56 = vld [vmem:[#allocation0 + $0x3c0] ss:$8 sm:$0xf]   ;;  %v1381_v57 = vsel %vm1282_vm0, %v1379_v55, %v1377_v53  ;;  %v1791_v20 = vpop.permute.xlu0 %1790  }
 0x10b   :  { %v1415_v58 = vld [vmem:[#allocation0 + $0x3c0] ss:$8 sm:$0xf0]   ;;  %2435 = vst.msk [vmem:[%s3620_s1 + $0x58] sm:$0xff] %vm1284_vm1, %v1381_v57  }
 0x10c   :  { %v1449_v59 = vld [vmem:[#allocation0 + $0x4c0] ss:$8 sm:$0xf]   ;;  %v1417_v60 = vsel %vm1282_vm0, %v1415_v58, %v1413_v56  ;;  %2475 = vst.msk [vmem:[%s3620_s1 + $0x90] sm:$0xff] %vm1573_vm2, %v1791_v20  }
 0x10d   :  { %v1451_v61 = vld [vmem:[#allocation0 + $0x4c0] ss:$8 sm:$0xf0]   ;;  %2439 = vst.msk [vmem:[%s3620_s1 + $0x78] sm:$0xff] %vm1284_vm1, %v1417_v60  }
 0x10e   :  { %v1485_v62 = vld [vmem:[#allocation0 + $0x5c0] ss:$8 sm:$0xf]   ;;  %v1453_v0 = vsel %vm1282_vm0, %v1451_v61, %v1449_v59 }
 0x10f   :  { %v1487_v1 = vld [vmem:[#allocation0 + $0x5c0] ss:$8 sm:$0xf0]   ;;  %2443 = vst.msk [vmem:[%s3620_s1 + $0x98] sm:$0xff] %vm1284_vm1, %v1453_v0  }
 0x110   :  { %v1521_v2 = vld [vmem:[#allocation0 + $0x6c0] ss:$8 sm:$0xf]   ;;  %v1489_v3 = vsel %vm1282_vm0, %v1487_v1, %v1485_v62 }
 0x111   :  { %v1523_v4 = vld [vmem:[#allocation0 + $0x6c0] ss:$8 sm:$0xf0]   ;;  %2447 = vst.msk [vmem:[%s3620_s1 + $0xb8] sm:$0xff] %vm1284_vm1, %v1489_v3   ;;  %v1802_v21 = vpop.permute.xlu1 %1801  }
 0x112   :  { %v1557_v5 = vld [vmem:[#allocation0 + $0x7c0] ss:$8 sm:$0xf]   ;;  %v1525_v6 = vsel %vm1282_vm0, %v1523_v4, %v1521_v2  ;;  %2476 = vst.msk [vmem:[%s3620_s1 + $0xb0] sm:$0xff] %vm1573_vm2, %v1802_v21  }
 0x113   :  { %v1559_v7 = vld [vmem:[#allocation0 + $0x7c0] ss:$8 sm:$0xf0]   ;;  %2451 = vst.msk [vmem:[%s3620_s1 + $0xd8] sm:$0xff] %vm1284_vm1, %v1525_v6  }
 0x114   :  { %v1561_v8 = vsel %vm1282_vm0, %v1559_v7, %v1557_v5 }
 0x115   :  { %2455 = vst.msk [vmem:[%s3620_s1 + $0xf8] sm:$0xff] %vm1284_vm1, %v1561_v8   ;;  %v1813_v22 = vpop.permute.xlu0 %1812  }
 0x116   :  { %2477 = vst.msk [vmem:[%s3620_s1 + $0xd0] sm:$0xff] %vm1573_vm2, %v1813_v22  }
 0x11c   :  { %v1824_v23 = vpop.permute.xlu1 %1823  }
 0x11d   :  { %2478 = vst.msk [vmem:[%s3620_s1 + $0xf0] sm:$0xff] %vm1573_vm2, %v1824_v23  }
 0x125   :  { %v1835_v24 = vpop.permute.xlu0 %1834  }
 0x126   :  { %2479 = vst.msk [vmem:[%s3620_s1 + $0x18] sm:$0xff] %vm1573_vm2, %v1835_v24  }
 0x12c   :  { %v1846_v25 = vpop.permute.xlu1 %1845  }
 0x12d   :  { %2480 = vst.msk [vmem:[%s3620_s1 + $0x38] sm:$0xff] %vm1573_vm2, %v1846_v25  }
 0x130   :  { %v1857_v26 = vpop.permute.xlu0 %1856  }
 0x131   :  { %2481 = vst.msk [vmem:[%s3620_s1 + $0x58] sm:$0xff] %vm1573_vm2, %v1857_v26  }
 0x137   :  { %v1868_v27 = vpop.permute.xlu1 %1867  }
 0x138   :  { %2482 = vst.msk [vmem:[%s3620_s1 + $0x78] sm:$0xff] %vm1573_vm2, %v1868_v27  }
 0x140   :  { %v1879_v28 = vpop.permute.xlu0 %1878  }
 0x141   :  { %2483 = vst.msk [vmem:[%s3620_s1 + $0x98] sm:$0xff] %vm1573_vm2, %v1879_v28  }
 0x146   :  { %v1890_v29 = vpop.permute.xlu1 %1889  }
 0x147   :  { %2484 = vst.msk [vmem:[%s3620_s1 + $0xb8] sm:$0xff] %vm1573_vm2, %v1890_v29  }
 0x149   :  { %v1901_v30 = vpop.permute.xlu0 %1900  }
 0x14a   :  { %2485 = vst.msk [vmem:[%s3620_s1 + $0xd8] sm:$0xff] %vm1573_vm2, %v1901_v30  }
 0x151   :  { %v1912_v31 = vpop.permute.xlu1 %1911  }
 0x152   :  { %2486 = vst.msk [vmem:[%s3620_s1 + $0xf8] sm:$0xff] %vm1573_vm2, %v1912_v31  }

// kernel: freup_pad_attention_forward.2
= control target key start
LH: loop header
LB: loop body
LE: loop exit
PB: predicated region body
PF: predicated region fallthrough
CT: control target
= control target key end

     0   :  { %s10666_s12 = smov 0   ;;  %s10668_s13 = smov 0   ;;  %s14728_s0 = inlined_call_operand.vmem [shape: f32[2,8,256], index: 0, kind: input, shape index: {}]   ;;  %s14729_s1 = inlined_call_operand.vmem [shape: f32[120,32], index: 1, kind: input, shape index: {}]   ;;  %s14730_s2 = inlined_call_operand.vmem [shape: f32[2,4,256], index: 2, kind: output, shape index: {0}]   ;;  %s14731_s3 = inlined_call_operand.vmem [shape: f32[2,4,256], index: 3, kind: output, shape index: {1}]  }
   0x1   :  { %s10670_s14 = smov 0  }
   0x2 LB: > { %s26_s15 = sadd.s32 1, %s10627_s13  ;;  %p8256_p0 = scmp.ge.s32.totalorder %s10631_s14, 1  ;;  %s10631_s14 = sphi %s10670_s14, %s14_s14   ;;  %s10627_s13 = sphi %s10668_s13, %s15740_s13   ;;  %s10623_s12 = sphi %s10666_s12, %s15739_s12  }
   0x3   : > { %p28_p1 = scmp.ge.s32.totalorder %s26_s15, 2  ;;  %p156_p2 = scmp.lt.s32.totalorder %s10631_s14, 3 }
   0x5   : > { %s15742_s15 = smov (%p28_p1, %s26_s15), 0  ;;  %p157_p3 = pnand %p8256_p0, %p156_p2 }
   0x7   : > { %160 = sbr.rel (%p157_p3) target bundleno = 3322 (0xcfa), region = 28 }
   0xe   : > { %p193_p4 = scmp.lt.s32.totalorder %s10623_s12, 1  ;;  %v225_v0 = vld [vmem:[%s14729_s1 + $0x68] sm:$0xff]  ;;  %v14734_v1 = vmov 0.0   ;;  %v10634_v2 = vmov 0   ;;  %v224_v5 = vld [vmem:[%s14729_s1 + $0x50] sm:$0xff]  ;;  %vm232_vm0 = vcmask 64512  }
   0xf   : > { %300 = vmatprep.mubr.f32.mxu0 %v14734_v1  ;;  %9559 = vset.pattern.permute.xlu0 %v10634_v2  ;;  %v10635_v6 = vmov 1   ;;  %v226_v15 = vld [vmem:[%s14729_s1 + $0x58] sm:$0xff]  ;;  %v487_v22 = vld [vmem:[%s14729_s1 + $0x10] sm:$0xff]  ;;  %v600_v23 = vld [vmem:[%s14729_s1 + $0x8] sm:$0xff]  ;;  %vm922_vm3 = vcmask 261120   ;;  %s10637_s11 = smov 120  }
  0x10   : > { %s15744_s12 = smov (!%p193_p4, %s10623_s12), 1  ;;  %229 = vperm.xlu0 %9559, %v225_v0   ;;  %384 = vmatprep.mubr.f32.mxu1 %v14734_v1  ;;  %v488_v24 = vld [vmem:[%s14729_s1 + $0x18] sm:$0xff]  ;;  %v489_v25 = vld [vmem:[%s14729_s1 + $0x20] sm:$0xff]  ;;  %v490_v26 = vld [vmem:[%s14729_s1 + $0x28] sm:$0xff]  ;;  %s10638_s16 = smov 112  }
  0x11   : > { %s8640_s18 = sshll.u32 %s15744_s12, 4  ;;  %v989_v27 = vld [vmem:[%s14729_s1] sm:$0xff]  ;;  %s10639_s17 = smov 104  }
  0x12   : > { %s197_s21 = scalar_lea.vmem %s14728_s0, %s8640_s18  ;;  %s8641_s30 = sshll.u32 %s15744_s12, 3 }
  0x13   : > { %v223_v3 = vld [vmem:[%s197_s21 + $0x8] sm:$0xff]  ;;  %v222_v4 = vld [vmem:[%s197_s21] sm:$0xff]  ;;  %s206_s6 = scalar_lea.vmem %s14730_s2, %s8641_s30  ;;  %s216_s9 = scalar_lea.vmem %s14731_s3, %s8641_s30 }
  0x14   : > { %236 = vmatprep.subr.mxu0 %v223_v3  ;;  %9560 = vset.pattern.permute.xlu0 %v10635_v6 }
  0x15   : > { %237 = vmatpush1.msra.mxu0 %v222_v4  ;;  %314 = vperm.xlu0 %9560, %v225_v0  }
  0x16   : > { %8263 = vmatmul.mubr.msk.f32.vlgmr.msra.gmra.mrb[0].mxu0 %vm232_vm0, %v224_v5 }
  0x17   : > { %567 = vmatprep.mubr.f32.mxu0 %v14734_v1 }
  0x8f   : > { %v230_v7 = vpop.permute.xlu0 %229 }
  0x94   : > { %v315_v17 = vpop.permute.xlu0 %314 }
  0xe9   : > { %v302_v8 = vpop.f32.mrb[0].mxu0 }
  0xea   : > { %v303_v9 = vadd.f32 %v302_v8, %v230_v7  ;;  %v304_v10 = vpop.f32.mrb[1].mxu0 }
  0xeb   : > { %v305_v11 = vadd.f32 %v304_v10, %v230_v7 }
  0xec   : > { %v309_v12 = vmul.f32 0.1, %v303_v9  ;;  %vm307_vm2 = vcmp.ge.f32.partialorder %v303_v9, 0.0 }
  0xed   : > { %vm308_vm1 = vcmp.ge.f32.partialorder %v305_v11, 0.0  ;;  %v310_v13 = vmul.f32 0.1, %v305_v11 }
  0xee   : > { %v311_v16 = vsel %vm307_vm2, %v303_v9, %v309_v12 }
  0xef   : > { %v312_v14 = vsel %vm308_vm1, %v305_v11, %v310_v13 }
  0xf0   : > { %320 = vmatprep.subr.mxu1 %v312_v14 }
  0xf1   : > { %321 = vmatpush1.msra.mxu1 %v311_v16 }
  0xf2   : > { %8264 = vmatmul.mubr.msk.f32.vlgmr.msra.gmra.mrb[0].mxu1 %vm232_vm0, %v226_v15  ;;  %9416 = vmatprep.subr.mxu1 %v600_v23 }
  0xf3   : > { %9417 = vmatpush3.msra.mxu1 %v600_v23 }
 0x1c5   : > { %v386_v18 = vpop.f32.mrb[0].mxu1 }
 0x1c6   : > { %v388_v19 = vpop.f32.mrb[1].mxu1  ;;  %v387_v20 = vadd.f32 %v386_v18, %v315_v17 }
 0x1c7   : > { %v389_v21 = vadd.f32 %v388_v19, %v315_v17 }
 0x1c8   : > { %391 = vxpose.xlu1.b32.start.end [1/1] (short) %v387_v20, 128 }
 0x1c9   : > { %503 = vmatprep.subr.mxu0 %v389_v21 }
 0x1ca   : > { %504 = vmatpush1.msra.mxu0 %v387_v20 }
 0x1cb   : > { %8265 = vmatmul.mubr.msk.f32.vlgmr.msra.gmra.mrb[2].mxu0 %vm232_vm0, %v487_v22  ;;  %8874 = vmatprep.subr.mxu0 %v600_v23 }
 0x1cc   : > { %573 = vmatprep.mubr.f32.mxu0 %v14734_v1  ;;  %8875 = vmatpush3.msra.mxu0 %v600_v23 }
 0x1cd   : > { %8924 = vmatprep.subr.mxu0 %v989_v27 }
 0x1cf   : > { %8266 = vmatmul.mubr.msk.f32.gmra.mrb[4].mxu0 %vm232_vm0, %v488_v24 }
 0x1d0   : > { %579 = vmatprep.mubr.f32.mxu0 %v14734_v1 }
 0x1d3   : > { %8267 = vmatmul.mubr.msk.f32.gmra.mrb[6].mxu0 %vm232_vm0, %v489_v25 }
 0x1d4   : > { %585 = vmatprep.mubr.f32.mxu0 %v14734_v1 }
 0x1d7   : > { %8268 = vmatmul.mubr.msk.f32.gmra.mrb[8].mxu0 %vm232_vm0, %v490_v26 }
 0x205   : > { %423 = vxpose.xlu1.b32.start.end [1/1] (short) %v389_v21, 128  ;;  %v14732_v21 = vmov 0.0|0.0  }
 0x248   : > { %v407_v28 = vpop.trf.xlu1 }
 0x249   : > { %455 = vst.msk [vmem:[#allocation2] sm:$0xff] %vm232_vm0, %v407_v28  ;;  %8876 = vmatprep.mubr.msk.f32.mxu0 %vm232_vm0, %v407_v28 }
 0x24c   : > { %v408_v29 = vpop.trf.xlu1 }
 0x24d   : > { %456 = vst.msk [vmem:[#allocation2 + $0x8] sm:$0xff] %vm232_vm0, %v408_v29  ;;  %8877 = vmatmul.mubr.msk.f32.vlgmr.msra.gmra.mrb[10].mxu0 %vm232_vm0, %v408_v29 }
 0x24e   : > { %8925 = vmatpush3.msra.mxu0 %v989_v27 }
 0x24f   : > { %9224 = vmatprep.subr.bf16.mxu0 %v14732_v21 }
 0x250   : > { %v409_v30 = vpop.trf.xlu1  ;;  %v957_v40 = vld [vmem:[#allocation2] sm:$0xff] }
 0x251   : > { %457 = vst.msk [vmem:[#allocation2 + $0x10] sm:$0xff] %vm232_vm0, %v409_v30  ;;  %8879 = vmatprep.mubr.msk.f32.mxu0 %vm232_vm0, %v409_v30 }
 0x254   : > { %v410_v31 = vpop.trf.xlu1  ;;  %v958_v41 = vld [vmem:[#allocation2 + $0x8] sm:$0xff] }
 0x255   : > { %458 = vst.msk [vmem:[#allocation2 + $0x18] sm:$0xff] %vm232_vm0, %v410_v31  ;;  %8880 = vmatmul.mubr.msk.f32.gmra.mrb[12].mxu0 %vm232_vm0, %v410_v31 }
 0x258   : > { %v411_v32 = vpop.trf.xlu1  ;;  %v959_v43 = vld [vmem:[#allocation2 + $0x10] sm:$0xff] }
 0x259   : > { %459 = vst.msk [vmem:[#allocation2 + $0x20] sm:$0xff] %vm232_vm0, %v411_v32  ;;  %8882 = vmatprep.mubr.msk.f32.mxu0 %vm232_vm0, %v411_v32 }
 0x25c   : > { %v412_v33 = vpop.trf.xlu1  ;;  %v960_v44 = vld [vmem:[#allocation2 + $0x18] sm:$0xff] }
 0x25d   : > { %460 = vst.msk [vmem:[#allocation2 + $0x28] sm:$0xff] %vm232_vm0, %v412_v33  ;;  %8883 = vmatmul.mubr.msk.f32.gmra.mrb[14].mxu0 %vm232_vm0, %v412_v33 }
 0x260   : > { %v413_v34 = vpop.trf.xlu1  ;;  %v961_v46 = vld [vmem:[#allocation2 + $0x20] sm:$0xff] }
 0x261   : > { %461 = vst.msk [vmem:[#allocation2 + $0x30] sm:$0xff] %vm232_vm0, %v413_v34  ;;  %8885 = vmatprep.mubr.msk.f32.mxu0 %vm232_vm0, %v413_v34 }
 0x264   : > { %v414_v35 = vpop.trf.xlu1  ;;  %v962_v47 = vld [vmem:[#allocation2 + $0x28] sm:$0xff] }
 0x265   : > { %462 = vst.msk [vmem:[#allocation2 + $0x38] sm:$0xff] %vm232_vm0, %v414_v35  ;;  %8886 = vmatmul.mubr.msk.f32.gmra.mrb[16].mxu0 %vm232_vm0, %v414_v35 }
 0x268   : > { %v415_v36 = vpop.trf.xlu1  ;;  %v963_v49 = vld [vmem:[#allocation2 + $0x30] sm:$0xff] }
 0x269   : > { %463 = vst.msk [vmem:[#allocation2 + $0x40] sm:$0xff] %vm232_vm0, %v415_v36  ;;  %8888 = vmatprep.mubr.msk.f32.mxu0 %vm232_vm0, %v415_v36 }
 0x26c   : > { %v416_v37 = vpop.trf.xlu1  ;;  %v964_v50 = vld [vmem:[#allocation2 + $0x38] sm:$0xff] }
 0x26d   : > { %464 = vst.msk [vmem:[#allocation2 + $0x48] sm:$0xff] %vm232_vm0, %v416_v37  ;;  %8889 = vmatmul.mubr.msk.f32.gmra.mrb[18].mxu0 %vm232_vm0, %v416_v37 }
 0x270   : > { %v417_v38 = vpop.trf.xlu1  ;;  %v965_v52 = vld [vmem:[#allocation2 + $0x40] sm:$0xff] }
 0x271   : > { %465 = vst.msk [vmem:[#allocation2 + $0x50] sm:$0xff] %vm232_vm0, %v417_v38  ;;  %8891 = vmatprep.mubr.msk.f32.mxu0 %vm232_vm0, %v417_v38 }
 0x274   : > { %v418_v39 = vpop.trf.xlu1  ;;  %v966_v53 = vld [vmem:[#allocation2 + $0x48] sm:$0xff] }
 0x275   : > { %466 = vst.msk [vmem:[#allocation2 + $0x58] sm:$0xff] %vm232_vm0, %v418_v39  ;;  %8892 = vmatmul.mubr.msk.f32.gmra.mrb[20].mxu0 %vm232_vm0, %v418_v39 }
 0x276   : > { %8926 = vmatprep.mubr.msk.f32.mxu0 %vm232_vm0, %v957_v40 }
 0x278   : > { %v419_v42 = vpop.trf.xlu1  ;;  %v967_v55 = vld [vmem:[#allocation2 + $0x50] sm:$0xff] }
 0x279   : > { %8927 = vmatmul.mubr.msk.f32.vlgmr.msra.gmra.mrb[22].mxu0 %vm232_vm0, %v958_v41  ;;  %467 = vst.msk [vmem:[#allocation2 + $0x60] sm:$0xff] %vm232_vm0, %v419_v42  ;;  %8894 = vmatprep.mubr.msk.f32.mxu1 %vm232_vm0, %v419_v42 }
 0x27a   : > { %8929 = vmatprep.mubr.msk.f32.mxu0 %vm232_vm0, %v959_v43 }
 0x27c   : > { %v420_v45 = vpop.trf.xlu1  ;;  %v968_v57 = vld [vmem:[#allocation2 + $0x58] sm:$0xff] }
 0x27d   : > { %8930 = vmatmul.mubr.msk.f32.gmra.mrb[24].mxu0 %vm232_vm0, %v960_v44  ;;  %468 = vst.msk [vmem:[#allocation2 + $0x68] sm:$0xff] %vm232_vm0, %v420_v45  ;;  %8895 = vmatmul.mubr.msk.f32.vlgmr.msra.gmra.mrb[2].mxu1 %vm232_vm0, %v420_v45 }
 0x27e   : > { %8932 = vmatprep.mubr.msk.f32.mxu0 %vm232_vm0, %v961_v46 }
 0x280   : > { %v421_v48 = vpop.trf.xlu1  ;;  %v969_v56 = vld [vmem:[#allocation2 + $0x60] sm:$0xff] }
 0x281   : > { %8933 = vmatmul.mubr.msk.f32.gmra.mrb[26].mxu0 %vm232_vm0, %v962_v47  ;;  %469 = vst.msk [vmem:[#allocation2 + $0x70] sm:$0xff] %vm232_vm0, %v421_v48  ;;  %8897 = vmatprep.mubr.msk.f32.mxu1 %vm232_vm0, %v421_v48 }
 0x282   : > { %8935 = vmatprep.mubr.msk.f32.mxu0 %vm232_vm0, %v963_v49 }
 0x284   : > { %v422_v51 = vpop.trf.xlu1  ;;  %v970_v59 = vld [vmem:[#allocation2 + $0x68] sm:$0xff] }
 0x285   : > { %8936 = vmatmul.mubr.msk.f32.gmra.mrb[28].mxu0 %vm232_vm0, %v964_v50  ;;  %470 = vst.msk [vmem:[#allocation2 + $0x78] sm:$0xff] %vm232_vm0, %v422_v51  ;;  %8898 = vmatmul.mubr.msk.f32.gmra.mrb[4].mxu1 %vm232_vm0, %v422_v51 }
 0x286   : > { %8938 = vmatprep.mubr.msk.f32.mxu0 %vm232_vm0, %v965_v52 }
 0x288   : > { %v439_v54 = vpop.trf.xlu1  ;;  %v971_v60 = vld [vmem:[#allocation2 + $0x70] sm:$0xff] }
 0x289   : > { %8939 = vmatmul.mubr.msk.f32.gmra.mrb[30].mxu0 %vm232_vm0, %v966_v53  ;;  %471 = vst.msk [vmem:[#allocation2 + $0x80] sm:$0xff] %vm232_vm0, %v439_v54  ;;  %8900 = vmatprep.mubr.msk.f32.mxu1 %vm232_vm0, %v439_v54 }
 0x28a   : > { %8941 = vmatprep.mubr.msk.f32.mxu0 %vm232_vm0, %v967_v55 }
 0x28c   : > { %v440_v58 = vpop.trf.xlu1  ;;  %v972_v62 = vld [vmem:[#allocation2 + $0x78] sm:$0xff] }
 0x28d   : > { %8942 = vmatmul.mubr.msk.f32.gmra.mrb[32].mxu0 %vm232_vm0, %v968_v57  ;;  %472 = vst.msk [vmem:[#allocation2 + $0x88] sm:$0xff] %vm232_vm0, %v440_v58  ;;  %8901 = vmatmul.mubr.msk.f32.gmra.mrb[6].mxu1 %vm232_vm0, %v440_v58 }
 0x28e   : > { %8944 = vmatprep.mubr.msk.f32.mxu0 %vm232_vm0, %v969_v56 }
 0x290   : > { %v441_v61 = vpop.trf.xlu1  ;;  %v973_v63 = vld [vmem:[#allocation2 + $0x80] sm:$0xff] }
 0x291   : > { %8945 = vmatmul.mubr.msk.f32.gmra.mrb[34].mxu0 %vm232_vm0, %v970_v59  ;;  %473 = vst.msk [vmem:[#allocation2 + $0x90] sm:$0xff] %vm232_vm0, %v441_v61  ;;  %8903 = vmatprep.mubr.msk.f32.mxu1 %vm232_vm0, %v441_v61 }
 0x292   : > { %8947 = vmatprep.mubr.msk.f32.mxu0 %vm232_vm0, %v971_v60 }
 0x294   : > { %v442_v0 = vpop.trf.xlu1  ;;  %v974_v2 = vld [vmem:[#allocation2 + $0x88] sm:$0xff] }
 0x295   : > { %8948 = vmatmul.mubr.msk.f32.gmra.mrb[36].mxu0 %vm232_vm0, %v972_v62  ;;  %474 = vst.msk [vmem:[#allocation2 + $0x98] sm:$0xff] %vm232_vm0, %v442_v0  ;;  %8904 = vmatmul.mubr.msk.f32.gmra.mrb[8].mxu1 %vm232_vm0, %v442_v0 }
 0x296   : > { %8950 = vmatprep.mubr.msk.f32.mxu0 %vm232_vm0, %v973_v63 }
 0x298   : > { %v443_v3 = vpop.trf.xlu1  ;;  %v975_v4 = vld [vmem:[#allocation2 + $0x90] sm:$0xff] }
 0x299   : > { %8951 = vmatmul.mubr.msk.f32.gmra.mrb[38].mxu0 %vm232_vm0, %v974_v2  ;;  %475 = vst.msk [vmem:[#allocation2 + $0xa0] sm:$0xff] %vm232_vm0, %v443_v3  ;;  %8906 = vmatprep.mubr.msk.f32.mxu1 %vm232_vm0, %v443_v3 }
 0x29a   : > { %8953 = vmatprep.mubr.msk.f32.mxu0 %vm232_vm0, %v975_v4 }
 0x29c   : > { %v444_v5 = vpop.trf.xlu1  ;;  %v976_v6 = vld [vmem:[#allocation2 + $0x98] sm:$0xff] }
 0x29d   : > { %476 = vst.msk [vmem:[#allocation2 + $0xa8] sm:$0xff] %vm232_vm0, %v444_v5  ;;  %8954 = vmatmul.mubr.msk.f32.gmra.mrb[40].mxu0 %vm232_vm0, %v976_v6  ;;  %8907 = vmatmul.mubr.msk.f32.gmra.mrb[10].mxu1 %vm232_vm0, %v444_v5 }
 0x29e   : > { %v569_v7 = vpop.f32.mrb[2].mxu0 }
 0x29f   : > { %v571_v8 = vpop.f32.mrb[3].mxu0 }
 0x2a0   : > { %v445_v9 = vpop.trf.xlu1  ;;  %v977_v10 = vld [vmem:[#allocation2 + $0xa0] sm:$0xff]  ;;  %1474 = vmatprep.subr.mxu1 %v571_v8 }
 0x2a1   : > { %477 = vst.msk [vmem:[#allocation2 + $0xb0] sm:$0xff] %vm232_vm0, %v445_v9  ;;  %8956 = vmatprep.mubr.msk.f32.mxu0 %vm232_vm0, %v977_v10  ;;  %8909 = vmatprep.mubr.msk.f32.mxu1 %vm232_vm0, %v445_v9 }
 0x2a2   : > { %v10796_v11 = vpop.f32.mrb[4].mxu0  ;;  %1475 = vmatpush1.msra.mxu1 %v569_v7 }
 0x2a3   : > { %v577_v12 = vpop.f32.mrb[5].mxu0 }
 0x2a4   : > { %v446_v13 = vpop.trf.xlu1  ;;  %v978_v14 = vld [vmem:[#allocation2 + $0xa8] sm:$0xff]  ;;  %2535 = vmatprep.subr.mxu1 %v577_v12 }
 0x2a5   : > { %478 = vst.msk [vmem:[#allocation2 + $0xb8] sm:$0xff] %vm232_vm0, %v446_v13  ;;  %8957 = vmatmul.mubr.msk.f32.gmra.mrb[42].mxu0 %vm232_vm0, %v978_v14  ;;  %8910 = vmatmul.mubr.msk.f32.gmra.mrb[12].mxu1 %vm232_vm0, %v446_v13 }
 0x2a6   : > { %v10801_v15 = vpop.f32.mrb[6].mxu0 }
 0x2a7   : > { %14976 = vst [vmem:[#allocation5_spill] sm:$0xff] %v10801_v15  ;;  %v10803_v16 = vpop.f32.mrb[7].mxu0 }
 0x2a8   : > { %14977 = vst [vmem:[#allocation6_spill] sm:$0xff] %v10803_v16  ;;  %v447_v17 = vpop.trf.xlu1  ;;  %v979_v18 = vld [vmem:[#allocation2 + $0xb0] sm:$0xff] }
 0x2a9   : > { %479 = vst.msk [vmem:[#allocation2 + $0xc0] sm:$0xff] %vm232_vm0, %v447_v17  ;;  %8959 = vmatprep.mubr.msk.f32.mxu0 %vm232_vm0, %v979_v18  ;;  %8912 = vmatprep.mubr.msk.f32.mxu1 %vm232_vm0, %v447_v17 }
 0x2aa   : > { %v10808_v19 = vpop.f32.mrb[8].mxu0 }
 0x2ab   : > { %14978 = vst [vmem:[#allocation7_spill] sm:$0xff] %v10808_v19  ;;  %v10810_v20 = vpop.f32.mrb[9].mxu0 }
 0x2ac   : > { %14979 = vst [vmem:[#allocation8_spill] sm:$0xff] %v10810_v20  ;;  %v448_v22 = vpop.trf.xlu1  ;;  %v980_v23 = vld [vmem:[#allocation2 + $0xb8] sm:$0xff] }
 0x2ad   : > { %480 = vst.msk [vmem:[#allocation2 + $0xc8] sm:$0xff] %vm232_vm0, %v448_v22  ;;  %8960 = vmatmul.mubr.msk.f32.gmra.mrb[44].mxu0 %vm232_vm0, %v980_v23  ;;  %8913 = vmatmul.mubr.msk.f32.gmra.mrb[14].mxu1 %vm232_vm0, %v448_v22 }
 0x2b0   : > { %v449_v24 = vpop.trf.xlu1  ;;  %v981_v25 = vld [vmem:[#allocation2 + $0xc0] sm:$0xff] }
 0x2b1   : > { %481 = vst.msk [vmem:[#allocation2 + $0xd0] sm:$0xff] %vm232_vm0, %v449_v24  ;;  %8962 = vmatprep.mubr.msk.f32.mxu0 %vm232_vm0, %v981_v25  ;;  %8915 = vmatprep.mubr.msk.f32.mxu1 %vm232_vm0, %v449_v24 }
 0x2b4   : > { %v450_v26 = vpop.trf.xlu1  ;;  %v982_v27 = vld [vmem:[#allocation2 + $0xc8] sm:$0xff] }
 0x2b5   : > { %482 = vst.msk [vmem:[#allocation2 + $0xd8] sm:$0xff] %vm232_vm0, %v450_v26  ;;  %8963 = vmatmul.mubr.msk.f32.gmra.mrb[46].mxu0 %vm232_vm0, %v982_v27  ;;  %8916 = vmatmul.mubr.msk.f32.gmra.mrb[16].mxu1 %vm232_vm0, %v450_v26 }
 0x2b8   : > { %v451_v28 = vpop.trf.xlu1  ;;  %v983_v29 = vld [vmem:[#allocation2 + $0xd0] sm:$0xff] }
 0x2b9   : > { %483 = vst.msk [vmem:[#allocation2 + $0xe0] sm:$0xff] %vm232_vm0, %v451_v28  ;;  %8965 = vmatprep.mubr.msk.f32.mxu0 %vm232_vm0, %v983_v29  ;;  %8918 = vmatprep.mubr.msk.f32.mxu1 %vm232_vm0, %v451_v28 }
 0x2bc   : > { %v452_v30 = vpop.trf.xlu1  ;;  %v984_v31 = vld [vmem:[#allocation2 + $0xd8] sm:$0xff] }
 0x2bd   : > { %484 = vst.msk [vmem:[#allocation2 + $0xe8] sm:$0xff] %vm232_vm0, %v452_v30  ;;  %8966 = vmatmul.mubr.msk.f32.gmra.mrb[48].mxu0 %vm232_vm0, %v984_v31  ;;  %8919 = vmatmul.mubr.msk.f32.gmra.mrb[18].mxu1 %vm232_vm0, %v452_v30 }
 0x2c0   : > { %v453_v32 = vpop.trf.xlu1  ;;  %v985_v33 = vld [vmem:[#allocation2 + $0xe0] sm:$0xff] }
 0x2c1   : > { %485 = vst.msk [vmem:[#allocation2 + $0xf0] sm:$0xff] %vm232_vm0, %v453_v32  ;;  %8968 = vmatprep.mubr.msk.f32.mxu0 %vm232_vm0, %v985_v33  ;;  %8921 = vmatprep.mubr.msk.f32.mxu1 %vm232_vm0, %v453_v32 }
 0x2c4   : > { %v454_v34 = vpop.trf.xlu1  ;;  %v986_v35 = vld [vmem:[#allocation2 + $0xe8] sm:$0xff] }
 0x2c5   : > { %486 = vst.msk [vmem:[#allocation2 + $0xf8] sm:$0xff] %vm232_vm0, %v454_v34  ;;  %8969 = vmatmul.mubr.msk.f32.gmra.mrb[50].mxu0 %vm232_vm0, %v986_v35  ;;  %8922 = vmatmul.mubr.msk.f32.gmra.mrb[20].mxu1 %vm232_vm0, %v454_v34 }
 0x2c6   : > { %1538 = vmatprep.mubr.f32.mxu1 %v14734_v1 }
 0x2c8   : > { %v987_v36 = vld [vmem:[#allocation2 + $0xf0] sm:$0xff] }
 0x2c9   : > { %8971 = vmatprep.mubr.msk.f32.mxu0 %vm232_vm0, %v987_v36 }
 0x2cc   : > { %v988_v37 = vld [vmem:[#allocation2 + $0xf8] sm:$0xff] }
 0x2cd   : > { %8972 = vmatmul.mubr.msk.f32.gmra.mrb[52].mxu0 %vm232_vm0, %v988_v37 }
 0x320   : > { %v8878_v38 = vpop.f32.mrb[10].mxu0 }
 0x321   : > { %924 = vst.msk [vmem:[#allocation4 + $0x8] sm:$0xff] %vm922_vm3, %v8878_v38  ;;  %v763_v39 = vpop.f32.mrb[11].mxu0 }
 0x322   : > { %923 = vst.msk [vmem:[#allocation4] sm:$0xff] %vm922_vm3, %v763_v39 }
 0x328   : > { %v8881_v40 = vpop.f32.mrb[12].mxu0  ;;  %v1347_v41 = vld [vmem:[#allocation4 + $0x8] sm:$0xff] }
 0x329   : > { %926 = vst.msk [vmem:[#allocation4 + $0x18] sm:$0xff] %vm922_vm3, %v8881_v40  ;;  %v773_v42 = vpop.f32.mrb[13].mxu0  ;;  %v1346_v43 = vld [vmem:[#allocation4] sm:$0xff] }
 0x32a   : > { %925 = vst.msk [vmem:[#allocation4 + $0x10] sm:$0xff] %vm922_vm3, %v773_v42  ;;  %v10841_v44 = vpack.i.bf16 %v1347_v41, %v1346_v43  ;;  %v9225_v45 = vpack.c.bf16 %v1347_v41, %v1346_v43 }
 0x32c   : > { %14980 = vst [vmem:[#allocation9_spill] sm:$0xff] %v10841_v44  ;;  %9562 = vrot.lane.b32.xlu0 %v10841_v44, %s10637_s11  ;;  %9226 = vmatpush1.bf16.msra.mxu0 %v9225_v45 }
 0x32d   : > { %9227 = vmatprep.subr.bf16.mxu0 %v14732_v21 }
 0x330   : > { %9567 = vrot.lane.b32.xlu0 %v10841_v44, %s10638_s16  ;;  %v8884_v46 = vpop.f32.mrb[14].mxu0  ;;  %v1349_v47 = vld [vmem:[#allocation4 + $0x18] sm:$0xff] }
 0x331   : > { %928 = vst.msk [vmem:[#allocation4 + $0x28] sm:$0xff] %vm922_vm3, %v8884_v46  ;;  %v783_v48 = vpop.f32.mrb[15].mxu0  ;;  %v1348_v49 = vld [vmem:[#allocation4 + $0x10] sm:$0xff] }
 0x332   : > { %927 = vst.msk [vmem:[#allocation4 + $0x20] sm:$0xff] %vm922_vm3, %v783_v48  ;;  %v10850_v50 = vpack.i.bf16 %v1349_v47, %v1348_v49  ;;  %v9228_v51 = vpack.c.bf16 %v1349_v47, %v1348_v49 }
 0x334   : > { %14981 = vst [vmem:[#allocation10_spill] sm:$0xff] %v10850_v50  ;;  %9572 = vrot.lane.b32.xlu1 %v10850_v50, %s10637_s11  ;;  %9229 = vmatpush1.bf16.msra.mxu0 %v9228_v51 }
 0x335   : > { %9230 = vmatprep.subr.bf16.mxu0 %v14732_v21 }
 0x338   : > { %9577 = vrot.lane.b32.xlu1 %v10850_v50, %s10638_s16  ;;  %v8887_v52 = vpop.f32.mrb[16].mxu0  ;;  %v1351_v53 = vld [vmem:[#allocation4 + $0x28] sm:$0xff] }
 0x339   : > { %930 = vst.msk [vmem:[#allocation4 + $0x38] sm:$0xff] %vm922_vm3, %v8887_v52  ;;  %v793_v54 = vpop.f32.mrb[17].mxu0  ;;  %v1350_v55 = vld [vmem:[#allocation4 + $0x20] sm:$0xff] }
 0x33a   : > { %929 = vst.msk [vmem:[#allocation4 + $0x30] sm:$0xff] %vm922_vm3, %v793_v54  ;;  %v10859_v56 = vpack.i.bf16 %v1351_v53, %v1350_v55  ;;  %v9231_v57 = vpack.c.bf16 %v1351_v53, %v1350_v55 }
 0x33c   : > { %14982 = vst [vmem:[#allocation11_spill] sm:$0xff] %v10859_v56  ;;  %9582 = vrot.lane.b32.xlu0 %v10859_v56, %s10637_s11  ;;  %9232 = vmatpush1.bf16.msra.mxu0 %v9231_v57 }
 0x33d   : > { %9233 = vmatprep.subr.bf16.mxu0 %v14732_v21 }
 0x340   : > { %9587 = vrot.lane.b32.xlu0 %v10859_v56, %s10638_s16  ;;  %v8890_v58 = vpop.f32.mrb[18].mxu0  ;;  %v1353_v59 = vld [vmem:[#allocation4 + $0x38] sm:$0xff] }
 0x341   : > { %932 = vst.msk [vmem:[#allocation4 + $0x48] sm:$0xff] %vm922_vm3, %v8890_v58  ;;  %v803_v60 = vpop.f32.mrb[19].mxu0  ;;  %v1352_v61 = vld [vmem:[#allocation4 + $0x30] sm:$0xff] }
 0x342   : > { %931 = vst.msk [vmem:[#allocation4 + $0x40] sm:$0xff] %vm922_vm3, %v803_v60  ;;  %v10868_v62 = vpack.i.bf16 %v1353_v59, %v1352_v61  ;;  %v9234_v63 = vpack.c.bf16 %v1353_v59, %v1352_v61 }
 0x344   : > { %14983 = vst [vmem:[#allocation12_spill] sm:$0xff] %v10868_v62  ;;  %9597 = vrot.lane.b32.xlu1 %v10868_v62, %s10638_s16  ;;  %9592 = vrot.lane.b32.xlu0 %v10868_v62, %s10637_s11 }
 0x345   : > { %9235 = vmatpush1.bf16.msra.mxu0 %v9234_v63 }
 0x346   : > { %9236 = vmatprep.subr.bf16.mxu0 %v14732_v21 }
 0x348   : > { %v8893_v0 = vpop.f32.mrb[20].mxu0  ;;  %v1355_v2 = vld [vmem:[#allocation4 + $0x48] sm:$0xff] }
 0x349   : > { %934 = vst.msk [vmem:[#allocation4 + $0x58] sm:$0xff] %vm922_vm3, %v8893_v0  ;;  %v813_v3 = vpop.f32.mrb[21].mxu0  ;;  %v1354_v4 = vld [vmem:[#allocation4 + $0x40] sm:$0xff] }
 0x34a   : > { %933 = vst.msk [vmem:[#allocation4 + $0x50] sm:$0xff] %vm922_vm3, %v813_v3  ;;  %v10877_v5 = vpack.i.bf16 %v1355_v2, %v1354_v4  ;;  %v9237_v6 = vpack.c.bf16 %v1355_v2, %v1354_v4 }
 0x34c   : > { %14984 = vst [vmem:[#allocation13_spill] sm:$0xff] %v10877_v5  ;;  %9607 = vrot.lane.b32.xlu0 %v10877_v5, %s10638_s16  ;;  %9602 = vrot.lane.b32.xlu1 %v10877_v5, %s10637_s11  ;;  %v8928_v7 = vpop.f32.mrb[22].mxu0 }
 0x34d   : > { %v1313_v8 = vmul.f32 0.35355338, %v8928_v7  ;;  %9238 = vmatpush1.bf16.msra.mxu0 %v9237_v6  ;;  %v1153_v9 = vpop.f32.mrb[23].mxu0 }
 0x34e   : > { %v1312_v10 = vmul.f32 0.35355338, %v1153_v9  ;;  %9239 = vmatprep.subr.bf16.mxu0 %v14732_v21 }
 0x350   : > { %4240 = vrot.lane.b32.xlu1 %v1313_v8, %s10638_s16  ;;  %2409 = vrot.lane.b32.xlu0 %v1313_v8, %s10637_s11  ;;  %v8931_v12 = vpop.f32.mrb[24].mxu0  ;;  %v1357_v13 = vld [vmem:[#allocation4 + $0x58] sm:$0xff]  ;;  %v8896_v14 = vpop.f32.mrb[2].mxu1 }
 0x351   : > { %8333 = vmatmul.mubr.msk.f32.vlgmr.msra.gmra.mrb[22].mxu1 %vm232_vm0, %v1312_v10  ;;  %v1163_v17 = vpop.f32.mrb[25].mxu0  ;;  %v1356_v18 = vld [vmem:[#allocation4 + $0x50] sm:$0xff]  ;;  %936 = vst.msk [vmem:[#allocation4 + $0x68] sm:$0xff] %vm922_vm3, %v8896_v14  ;;  %v823_v22 = vpop.f32.mrb[3].mxu1  ;;  %v1315_v34 = vmul.f32 0.35355338, %v8931_v12 }
 0x352   : > { %2536 = vmatpush1.msra.mxu1 %v10796_v11  ;;  %1544 = vmatprep.mubr.f32.mxu1 %v14734_v1  ;;  %v9240_v23 = vpack.c.bf16 %v1357_v13, %v1356_v18  ;;  %935 = vst.msk [vmem:[#allocation4 + $0x60] sm:$0xff] %vm922_vm3, %v823_v22  ;;  %v10891_v24 = vpack.i.bf16 %v1357_v13, %v1356_v18  ;;  %v10898_v11 = vmul.f32 0.35355338, %v1163_v17 }
 0x354   : > { %14985 = vst [vmem:[#allocation14_spill] sm:$0xff] %v10891_v24  ;;  %5750 = vrot.lane.b32.xlu0 %v1313_v8, %s10639_s17  ;;  %5748 = vrot.lane.b32.xlu1 %v1312_v10, %s10639_s17  ;;  %v8934_v25 = vpop.f32.mrb[26].mxu0 }
 0x355   : > { %8334 = vmatmul.mubr.msk.f32.gmra.mrb[24].mxu1 %vm232_vm0, %v1313_v8  ;;  %9241 = vmatpush1.bf16.msra.mxu0 %v9240_v23  ;;  %v1173_v26 = vpop.f32.mrb[27].mxu0  ;;  %v10933_v47 = vmul.f32 0.35355338, %v8934_v25 }
 0x356   : > { %1550 = vmatprep.mubr.f32.mxu1 %v14734_v1  ;;  %9242 = vmatprep.subr.bf16.mxu0 %v14732_v21  ;;  %v10918_v38 = vmul.f32 0.35355338, %v1173_v26 }
 0x358   : > { %2407 = vrot.lane.b32.xlu0 %v1312_v10, %s10637_s11  ;;  %v8937_v27 = vpop.f32.mrb[28].mxu0  ;;  %9617 = vrot.lane.b32.xlu1 %v10891_v24, %s10638_s16  ;;  %v8899_v28 = vpop.f32.mrb[4].mxu1  ;;  %v1359_v29 = vld [vmem:[#allocation4 + $0x68] sm:$0xff] }
 0x359   : > { %8335 = vmatmul.mubr.msk.f32.gmra.mrb[26].mxu1 %vm232_vm0, %v10898_v11  ;;  %v1183_v30 = vpop.f32.mrb[29].mxu0  ;;  %938 = vst.msk [vmem:[#allocation4 + $0x78] sm:$0xff] %vm922_vm3, %v8899_v28  ;;  %v833_v31 = vpop.f32.mrb[5].mxu1  ;;  %v1358_v32 = vld [vmem:[#allocation4 + $0x60] sm:$0xff]  ;;  %v10964_v63 = vmul.f32 0.35355338, %v8937_v27 }
 0x35a   : > { %1556 = vmatprep.mubr.f32.mxu1 %v14734_v1  ;;  %937 = vst.msk [vmem:[#allocation4 + $0x70] sm:$0xff] %vm922_vm3, %v833_v31  ;;  %v9243_v33 = vpack.c.bf16 %v1359_v29, %v1358_v32  ;;  %v10908_v35 = vpack.i.bf16 %v1359_v29, %v1358_v32  ;;  %v10948_v52 = vmul.f32 0.35355338, %v1183_v30 }
 0x35c   : > { %14986 = vst [vmem:[#allocation15_spill] sm:$0xff] %v10908_v35  ;;  %4238 = vrot.lane.b32.xlu0 %v1312_v10, %s10638_s16  ;;  %v10911_v36 = vpop.f32.mrb[30].mxu0  ;;  %4242 = vrot.lane.b32.xlu1 %v10898_v11, %s10638_s16 }
 0x35d   : > { %8336 = vmatmul.mubr.msk.f32.gmra.mrb[28].mxu1 %vm232_vm0, %v1315_v34  ;;  %v1193_v37 = vpop.f32.mrb[31].mxu0  ;;  %9244 = vmatpush1.bf16.msra.mxu0 %v9243_v33  ;;  %v10995_v14 = vmul.f32 0.35355338, %v10911_v36 }
 0x35e   : > { %1562 = vmatprep.mubr.f32.mxu1 %v14734_v1  ;;  %9245 = vmatprep.subr.bf16.mxu0 %v14732_v21  ;;  %v10977_v3 = vmul.f32 0.35355338, %v1193_v37 }
 0x360   : > { %v10920_v39 = vpop.f32.mrb[32].mxu0  ;;  %5752 = vrot.lane.b32.xlu1 %v10898_v11, %s10639_s17  ;;  %9612 = vrot.lane.b32.xlu0 %v10891_v24, %s10637_s11  ;;  %v8902_v40 = vpop.f32.mrb[6].mxu1  ;;  %v1361_v43 = vld [vmem:[#allocation4 + $0x78] sm:$0xff] }
 0x361   : > { %8337 = vmatmul.mubr.msk.f32.gmra.mrb[30].mxu1 %vm232_vm0, %v10918_v38  ;;  %v10928_v41 = vpop.f32.mrb[33].mxu0  ;;  %v1360_v42 = vld [vmem:[#allocation4 + $0x70] sm:$0xff]  ;;  %940 = vst.msk [vmem:[#allocation4 + $0x88] sm:$0xff] %vm922_vm3, %v8902_v40  ;;  %v843_v45 = vpop.f32.mrb[7].mxu1  ;;  %v11024_v29 = vmul.f32 0.35355338, %v10920_v39 }
 0x362   : > { %1568 = vmatprep.mubr.f32.mxu1 %v14734_v1  ;;  %939 = vst.msk [vmem:[#allocation4 + $0x80] sm:$0xff] %vm922_vm3, %v843_v45  ;;  %v9246_v46 = vpack.c.bf16 %v1361_v43, %v1360_v42  ;;  %v10935_v48 = vpack.i.bf16 %v1361_v43, %v1360_v42  ;;  %v11006_v17 = vmul.f32 0.35355338, %v10928_v41 }
 0x364   : > { %14987 = vst [vmem:[#allocation16_spill] sm:$0xff] %v10935_v48  ;;  %4246 = vrot.lane.b32.xlu1 %v10918_v38, %s10638_s16  ;;  %2413 = vrot.lane.b32.xlu0 %v1315_v34, %s10637_s11  ;;  %v10940_v49 = vpop.f32.mrb[34].mxu0 }
 0x365   : > { %8338 = vmatmul.mubr.msk.f32.gmra.mrb[32].mxu1 %vm232_vm0, %v10933_v47  ;;  %v10944_v51 = vpop.f32.mrb[35].mxu0  ;;  %9247 = vmatpush1.bf16.msra.mxu0 %v9246_v46 }
 0x366   : > { %1574 = vmatprep.mubr.f32.mxu1 %v14734_v1  ;;  %9248 = vmatprep.subr.bf16.mxu0 %v14732_v21  ;;  %v11033_v30 = vmul.f32 0.35355338, %v10944_v51 }
 0x368   : > { %5756 = vrot.lane.b32.xlu1 %v10918_v38, %s10639_s17  ;;  %4244 = vrot.lane.b32.xlu0 %v1315_v34, %s10638_s16  ;;  %v10953_v53 = vpop.f32.mrb[36].mxu0  ;;  %v8905_v54 = vpop.f32.mrb[8].mxu1  ;;  %v1363_v55 = vld [vmem:[#allocation4 + $0x88] sm:$0xff] }
 0x369   : > { %8339 = vmatmul.mubr.msk.f32.gmra.mrb[34].mxu1 %vm232_vm0, %v10948_v52  ;;  %v10957_v57 = vpop.f32.mrb[37].mxu0  ;;  %942 = vst.msk [vmem:[#allocation4 + $0x98] sm:$0xff] %vm922_vm3, %v8905_v54  ;;  %v853_v58 = vpop.f32.mrb[9].mxu1  ;;  %v1362_v59 = vld [vmem:[#allocation4 + $0x80] sm:$0xff]  ;;  %v11073_v46 = vmul.f32 0.35355338, %v10953_v53 }
 0x36a   : > { %1580 = vmatprep.mubr.f32.mxu1 %v14734_v1  ;;  %941 = vst.msk [vmem:[#allocation4 + $0x90] sm:$0xff] %vm922_vm3, %v853_v58  ;;  %v9249_v60 = vpack.c.bf16 %v1363_v55, %v1362_v59  ;;  %v10962_v61 = vpack.i.bf16 %v1363_v55, %v1362_v59  ;;  %v11062_v41 = vmul.f32 0.35355338, %v10957_v57 }
 0x36c   : > { %14988 = vst [vmem:[#allocation17_spill] sm:$0xff] %v10962_v61  ;;  %4250 = vrot.lane.b32.xlu1 %v10948_v52, %s10638_s16  ;;  %5754 = vrot.lane.b32.xlu0 %v1315_v34, %s10639_s17  ;;  %v10969_v0 = vpop.f32.mrb[38].mxu0  ;;  %v11044_v34 = vmul.f32 0.35355338, %v10940_v49 }
 0x36d   : > { %8340 = vmatmul.mubr.msk.f32.gmra.mrb[36].mxu1 %vm232_vm0, %v10964_v63  ;;  %v10973_v2 = vpop.f32.mrb[39].mxu0  ;;  %9250 = vmatpush1.bf16.msra.mxu0 %v9249_v60  ;;  %v11102_v59 = vmul.f32 0.35355338, %v10969_v0 }
 0x36e   : > { %1586 = vmatprep.mubr.f32.mxu1 %v14734_v1  ;;  %9251 = vmatprep.subr.bf16.mxu0 %v14732_v21  ;;  %v11091_v53 = vmul.f32 0.35355338, %v10973_v2 }
 0x370   : > { %5760 = vrot.lane.b32.xlu1 %v10948_v52, %s10639_s17  ;;  %2411 = vrot.lane.b32.xlu0 %v10898_v11, %s10637_s11  ;;  %v10983_v4 = vpop.f32.mrb[40].mxu0  ;;  %v8908_v6 = vpop.f32.mrb[10].mxu1  ;;  %v1365_v7 = vld [vmem:[#allocation4 + $0x98] sm:$0xff] }
 0x371   : > { %8341 = vmatmul.mubr.msk.f32.gmra.mrb[38].mxu1 %vm232_vm0, %v10977_v3  ;;  %v10987_v8 = vpop.f32.mrb[41].mxu0  ;;  %944 = vst.msk [vmem:[#allocation4 + $0xa8] sm:$0xff] %vm922_vm3, %v8908_v6  ;;  %v863_v9 = vpop.f32.mrb[11].mxu1  ;;  %v1364_v10 = vld [vmem:[#allocation4 + $0x90] sm:$0xff] }
 0x372   : > { %1592 = vmatprep.mubr.f32.mxu1 %v14734_v1  ;;  %943 = vst.msk [vmem:[#allocation4 + $0xa0] sm:$0xff] %vm922_vm3, %v863_v9  ;;  %v9252_v12 = vpack.c.bf16 %v1365_v7, %v1364_v10  ;;  %v10992_v13 = vpack.i.bf16 %v1365_v7, %v1364_v10  ;;  %v11120_v0 = vmul.f32 0.35355338, %v10987_v8 }
 0x374   : > { %14989 = vst [vmem:[#allocation18_spill] sm:$0xff] %v10992_v13  ;;  %4254 = vrot.lane.b32.xlu1 %v10977_v3, %s10638_s16  ;;  %2417 = vrot.lane.b32.xlu0 %v10933_v47, %s10637_s11 }
 0x375   : > { %8342 = vmatmul.mubr.msk.f32.gmra.mrb[40].mxu1 %vm232_vm0, %v10995_v14  ;;  %9253 = vmatpush1.bf16.msra.mxu0 %v9252_v12 }
 0x376   : > { %1598 = vmatprep.mubr.f32.mxu1 %v14734_v1  ;;  %9254 = vmatprep.subr.bf16.mxu0 %v14732_v21 }
 0x378   : > { %5764 = vrot.lane.b32.xlu1 %v10977_v3, %s10639_s17  ;;  %4248 = vrot.lane.b32.xlu0 %v10933_v47, %s10638_s16  ;;  %v11012_v18 = vpop.f32.mrb[42].mxu0  ;;  %v8911_v22 = vpop.f32.mrb[12].mxu1  ;;  %v1367_v26 = vld [vmem:[#allocation4 + $0xa8] sm:$0xff] }
 0x379   : > { %8343 = vmatmul.mubr.msk.f32.gmra.mrb[42].mxu1 %vm232_vm0, %v11006_v17  ;;  %v11016_v23 = vpop.f32.mrb[43].mxu0  ;;  %v1366_v25 = vld [vmem:[#allocation4 + $0xa0] sm:$0xff]  ;;  %946 = vst.msk [vmem:[#allocation4 + $0xb8] sm:$0xff] %vm922_vm3, %v8911_v22  ;;  %v873_v11 = vpop.f32.mrb[13].mxu1 }
 0x37a   : > { %1604 = vmatprep.mubr.f32.mxu1 %v14734_v1  ;;  %945 = vst.msk [vmem:[#allocation4 + $0xb0] sm:$0xff] %vm922_vm3, %v873_v11  ;;  %v9255_v27 = vpack.c.bf16 %v1367_v26, %v1366_v25  ;;  %v11021_v28 = vpack.i.bf16 %v1367_v26, %v1366_v25  ;;  %v11131_v25 = vmul.f32 0.35355338, %v10983_v4  ;;  %v11149_v4 = vmul.f32 0.35355338, %v11016_v23 }
 0x37c   : > { %14990 = vst [vmem:[#allocation19_spill] sm:$0xff] %v11021_v28  ;;  %9632 = vrot.lane.b32.xlu1 %v10935_v48, %s10637_s11  ;;  %5758 = vrot.lane.b32.xlu0 %v10933_v47, %s10639_s17 }
 0x37d   : > { %8344 = vmatmul.mubr.msk.f32.gmra.mrb[44].mxu1 %vm232_vm0, %v11024_v29  ;;  %9256 = vmatpush1.bf16.msra.mxu0 %v9255_v27 }
 0x37e   : > { %1610 = vmatprep.mubr.f32.mxu1 %v14734_v1  ;;  %9257 = vmatprep.subr.bf16.mxu0 %v14732_v21 }
 0x380   : > { %9637 = vrot.lane.b32.xlu1 %v10935_v48, %s10638_s16  ;;  %2415 = vrot.lane.b32.xlu0 %v10918_v38, %s10637_s11  ;;  %v11041_v31 = vpop.f32.mrb[44].mxu0  ;;  %v8914_v32 = vpop.f32.mrb[14].mxu1  ;;  %v1369_v33 = vld [vmem:[#allocation4 + $0xb8] sm:$0xff] }
 0x381   : > { %8345 = vmatmul.mubr.msk.f32.gmra.mrb[46].mxu1 %vm232_vm0, %v11033_v30  ;;  %v11048_v36 = vpop.f32.mrb[45].mxu0  ;;  %948 = vst.msk [vmem:[#allocation4 + $0xc8] sm:$0xff] %vm922_vm3, %v8914_v32  ;;  %v883_v37 = vpop.f32.mrb[15].mxu1  ;;  %v1368_v39 = vld [vmem:[#allocation4 + $0xb0] sm:$0xff] }
 0x382   : > { %1616 = vmatprep.mubr.f32.mxu1 %v14734_v1  ;;  %947 = vst.msk [vmem:[#allocation4 + $0xc0] sm:$0xff] %vm922_vm3, %v883_v37  ;;  %v9258_v38 = vpack.c.bf16 %v1369_v33, %v1368_v39  ;;  %v11053_v40 = vpack.i.bf16 %v1369_v33, %v1368_v39  ;;  %v11160_v37 = vmul.f32 0.35355338, %v11012_v18  ;;  %v11176_v18 = vmul.f32 0.35355338, %v11048_v36 }
 0x384   : > { %14991 = vst [vmem:[#allocation20_spill] sm:$0xff] %v11053_v40  ;;  %4258 = vrot.lane.b32.xlu1 %v11006_v17, %s10638_s16  ;;  %9622 = vrot.lane.b32.xlu0 %v10908_v35, %s10637_s11 }
 0x385   : > { %8346 = vmatmul.mubr.msk.f32.gmra.mrb[48].mxu1 %vm232_vm0, %v11044_v34  ;;  %9259 = vmatpush1.bf16.msra.mxu0 %v9258_v38 }
 0x386   : > { %1622 = vmatprep.mubr.f32.mxu1 %v14734_v1  ;;  %9260 = vmatprep.subr.bf16.mxu0 %v14732_v21 }
 0x388   : > { %5768 = vrot.lane.b32.xlu1 %v11006_v17, %s10639_s17  ;;  %9627 = vrot.lane.b32.xlu0 %v10908_v35, %s10638_s16  ;;  %v11070_v42 = vpop.f32.mrb[46].mxu0  ;;  %v8917_v43 = vpop.f32.mrb[16].mxu1  ;;  %v1371_v45 = vld [vmem:[#allocation4 + $0xc8] sm:$0xff] }
 0x389   : > { %8347 = vmatmul.mubr.msk.f32.gmra.mrb[50].mxu1 %vm232_vm0, %v11062_v41  ;;  %v11077_v47 = vpop.f32.mrb[47].mxu0  ;;  %950 = vst.msk [vmem:[#allocation4 + $0xd8] sm:$0xff] %vm922_vm3, %v8917_v43  ;;  %v893_v49 = vpop.f32.mrb[17].mxu1  ;;  %v1370_v51 = vld [vmem:[#allocation4 + $0xc0] sm:$0xff]  ;;  %v11209_v36 = vmul.f32 0.35355338, %v11070_v42 }
 0x38a   : > { %1628 = vmatprep.mubr.f32.mxu1 %v14734_v1  ;;  %949 = vst.msk [vmem:[#allocation4 + $0xd0] sm:$0xff] %vm922_vm3, %v893_v49  ;;  %v9261_v54 = vpack.c.bf16 %v1371_v45, %v1370_v51  ;;  %v11082_v55 = vpack.i.bf16 %v1371_v45, %v1370_v51 }
 0x38c   : > { %14992 = vst [vmem:[#allocation21_spill] sm:$0xff] %v11082_v55  ;;  %4262 = vrot.lane.b32.xlu1 %v11033_v30, %s10638_s16  ;;  %2421 = vrot.lane.b32.xlu0 %v10964_v63, %s10637_s11 }
 0x38d   : > { %8348 = vmatmul.mubr.msk.f32.gmra.mrb[52].mxu1 %vm232_vm0, %v11073_v46  ;;  %9262 = vmatpush1.bf16.msra.mxu0 %v9261_v54 }
 0x38e   : > { %1634 = vmatprep.mubr.f32.mxu1 %v14734_v1  ;;  %9263 = vmatprep.subr.bf16.mxu0 %v14732_v21 }
 0x390   : > { %5772 = vrot.lane.b32.xlu1 %v11033_v30, %s10639_s17  ;;  %4252 = vrot.lane.b32.xlu0 %v10964_v63, %s10638_s16  ;;  %v11099_v57 = vpop.f32.mrb[48].mxu0  ;;  %v8920_v58 = vpop.f32.mrb[18].mxu1  ;;  %v1373_v6 = vld [vmem:[#allocation4 + $0xd8] sm:$0xff] }
 0x391   : > { %8349 = vmatmul.mubr.msk.f32.gmra.mrb[54].mxu1 %vm232_vm0, %v11091_v53  ;;  %v11106_v60 = vpop.f32.mrb[49].mxu0  ;;  %v1372_v2 = vld [vmem:[#allocation4 + $0xd0] sm:$0xff]  ;;  %952 = vst.msk [vmem:[#allocation4 + $0xe8] sm:$0xff] %vm922_vm3, %v8920_v58  ;;  %v903_v7 = vpop.f32.mrb[19].mxu1  ;;  %v11231_v42 = vmul.f32 0.35355338, %v11099_v57 }
 0x392   : > { %1640 = vmatprep.mubr.f32.mxu1 %v14734_v1  ;;  %951 = vst.msk [vmem:[#allocation4 + $0xe0] sm:$0xff] %vm922_vm3, %v903_v7  ;;  %v9264_v9 = vpack.c.bf16 %v1373_v6, %v1372_v2  ;;  %v11111_v10 = vpack.i.bf16 %v1373_v6, %v1372_v2  ;;  %v11223_v49 = vmul.f32 0.35355338, %v11106_v60 }
 0x394   : > { %14993 = vst [vmem:[#allocation22_spill] sm:$0xff] %v11111_v10  ;;  %5762 = vrot.lane.b32.xlu0 %v10964_v63, %s10639_s17  ;;  %2435 = vrot.lane.b32.xlu1 %v11062_v41, %s10637_s11 }
 0x395   : > { %8350 = vmatmul.mubr.msk.f32.gmra.mrb[56].mxu1 %vm232_vm0, %v11102_v59  ;;  %9265 = vmatpush1.bf16.msra.mxu0 %v9264_v9 }
 0x396   : > { %1646 = vmatprep.mubr.f32.mxu1 %v14734_v1  ;;  %9266 = vmatprep.subr.bf16.mxu0 %v14732_v21 }
 0x398   : > { %2419 = vrot.lane.b32.xlu0 %v10948_v52, %s10637_s11  ;;  %4266 = vrot.lane.b32.xlu1 %v11062_v41, %s10638_s16  ;;  %v11128_v63 = vpop.f32.mrb[50].mxu0  ;;  %v8923_v12 = vpop.f32.mrb[20].mxu1  ;;  %v1375_v22 = vld [vmem:[#allocation4 + $0xe8] sm:$0xff] }
 0x399   : > { %8351 = vmatmul.mubr.msk.f32.gmra.mrb[58].mxu1 %vm232_vm0, %v11120_v0  ;;  %v11135_v8 = vpop.f32.mrb[51].mxu0  ;;  %954 = vst.msk [vmem:[#allocation4 + $0xf8] sm:$0xff] %vm922_vm3, %v8923_v12  ;;  %v913_v26 = vpop.f32.mrb[21].mxu1  ;;  %v1374_v11 = vld [vmem:[#allocation4 + $0xe0] sm:$0xff]  ;;  %v11255_v54 = vmul.f32 0.35355338, %v11128_v63 }
 0x39a   : > { %1652 = vmatprep.mubr.f32.mxu1 %v14734_v1  ;;  %953 = vst.msk [vmem:[#allocation4 + $0xf0] sm:$0xff] %vm922_vm3, %v913_v26  ;;  %v9267_v52 = vpack.c.bf16 %v1375_v22, %v1374_v11  ;;  %v11140_v27 = vpack.i.bf16 %v1375_v22, %v1374_v11 }
 0x39c   : > { %14994 = vst [vmem:[#allocation23_spill] sm:$0xff] %v11140_v27  ;;  %2425 = vrot.lane.b32.xlu0 %v10995_v14, %s10637_s11  ;;  %5776 = vrot.lane.b32.xlu1 %v11062_v41, %s10639_s17 }
 0x39d   : > { %8352 = vmatmul.mubr.msk.f32.gmra.mrb[60].mxu1 %vm232_vm0, %v11131_v25  ;;  %9268 = vmatpush1.bf16.msra.mxu0 %v9267_v52 }
 0x39e   : > { %1658 = vmatprep.mubr.f32.mxu1 %v14734_v1  ;;  %9269 = vmatprep.subr.bf16.mxu0 %v14732_v21  ;;  %v11167_v43 = vpop.permute.xlu0 %9562 }
 0x3a0   : > { %4256 = vrot.lane.b32.xlu0 %v10995_v14, %s10638_s16  ;;  %9652 = vrot.lane.b32.xlu1 %v11021_v28, %s10637_s11  ;;  %v11157_v32 = vpop.f32.mrb[52].mxu0  ;;  %v1377_v33 = vld [vmem:[#allocation4 + $0xf8] sm:$0xff] }
 0x3a1   : > { %8353 = vmatmul.mubr.msk.f32.gmra.mrb[62].mxu1 %vm232_vm0, %v11149_v4  ;;  %v1303_v23 = vpop.f32.mrb[53].mxu0  ;;  %v1376_v39 = vld [vmem:[#allocation4 + $0xf0] sm:$0xff]  ;;  %v11278_v6 = vmul.f32 0.35355338, %v11157_v32 }
 0x3a2   : > { %1664 = vmatprep.mubr.f32.mxu1 %v14734_v1  ;;  %v9270_v38 = vpack.c.bf16 %v1377_v33, %v1376_v39  ;;  %v11165_v41 = vpack.i.bf16 %v1377_v33, %v1376_v39  ;;  %v11189_v45 = vpop.permute.xlu0 %9567  ;;  %v11266_v58 = vmul.f32 0.35355338, %v1303_v23 }
 0x3a3   : > { %14996 = vst [vmem:[#allocation25_spill] sm:$0xff] %v11189_v45 }
 0x3a4   : > { %14995 = vst [vmem:[#allocation24_spill] sm:$0xff] %v11165_v41  ;;  %5766 = vrot.lane.b32.xlu0 %v10995_v14, %s10639_s17  ;;  %4270 = vrot.lane.b32.xlu1 %v11091_v53, %s10638_s16  ;;  %v11185_v14 = vmul.f32 0.35355338, %v11041_v31 }
 0x3a5   : > { %8354 = vmatmul.mubr.msk.f32.gmra.mrb[64].mxu1 %vm232_vm0, %v11160_v37  ;;  %9271 = vmatpush1.bf16.msra.mxu0 %v9270_v38 }
 0x3a6   : > { %1670 = vmatprep.mubr.f32.mxu1 %v14734_v1  ;;  %9272 = vmatprep.subr.bf16.mxu0 %v14732_v21  ;;  %v11275_v2 = vpop.permute.xlu1 %9572 }
 0x3a7   : > { %15002 = vst [vmem:[#allocation31_spill] sm:$0xff] %v11275_v2 }
 0x3a8   : > { %2423 = vrot.lane.b32.xlu0 %v10977_v3, %s10637_s11  ;;  %5780 = vrot.lane.b32.xlu1 %v11091_v53, %s10639_s17  ;;  %v11199_v3 = vmul.f32 0.35355338, %v11077_v47 }
 0x3a9   : > { %8355 = vmatmul.mubr.msk.f32.gmra.mrb[66].mxu1 %vm232_vm0, %v11176_v18 }
 0x3aa   : > { %1676 = vmatprep.mubr.f32.mxu1 %v14734_v1  ;;  %v11292_v9 = vpop.permute.xlu1 %9577 }
 0x3ab   : > { %15004 = vst [vmem:[#allocation33_spill] sm:$0xff] %v11292_v9 }
 0x3ac   : > { %2429 = vrot.lane.b32.xlu0 %v11024_v29, %s10637_s11  ;;  %4274 = vrot.lane.b32.xlu1 %v11120_v0, %s10638_s16 }
 0x3ad   : > { %8356 = vmatmul.mubr.msk.f32.gmra.mrb[68].mxu1 %vm232_vm0, %v11185_v14 }
 0x3ae   : > { %v11201_v31 = vpop.permute.xlu0 %9582  ;;  %1682 = vmatprep.mubr.f32.mxu1 %v14734_v1 }
 0x3af   : > { %14997 = vst [vmem:[#allocation26_spill] sm:$0xff] %v11201_v31 }
 0x3b0   : > { %4260 = vrot.lane.b32.xlu0 %v11024_v29, %s10638_s16  ;;  %5784 = vrot.lane.b32.xlu1 %v11120_v0, %s10639_s17 }
 0x3b1   : > { %8357 = vmatmul.mubr.msk.f32.gmra.mrb[70].mxu1 %vm232_vm0, %v11199_v3 }
 0x3b2   : > { %1688 = vmatprep.mubr.f32.mxu1 %v14734_v1  ;;  %v11214_v47 = vpop.permute.xlu0 %9587 }
 0x3b3   : > { %14998 = vst [vmem:[#allocation27_spill] sm:$0xff] %v11214_v47 }
 0x3b4   : > { %5770 = vrot.lane.b32.xlu0 %v11024_v29, %s10639_s17  ;;  %4278 = vrot.lane.b32.xlu1 %v11149_v4, %s10638_s16 }
 0x3b5   : > { %8358 = vmatmul.mubr.msk.f32.gmra.mrb[72].mxu1 %vm232_vm0, %v11209_v36 }
 0x3b6   : > { %1694 = vmatprep.mubr.f32.mxu1 %v14734_v1  ;;  %v11235_v29 = vpop.permute.xlu0 %9592  ;;  %v11302_v63 = vpop.permute.xlu1 %9597 }
 0x3b7   : > { %14999 = vst [vmem:[#allocation28_spill] sm:$0xff] %v11235_v29  ;;  %15006 = vst [vmem:[#allocation35_spill] sm:$0xff] %v11302_v63 }
 0x3b8   : > { %2427 = vrot.lane.b32.xlu0 %v11006_v17, %s10637_s11  ;;  %5788 = vrot.lane.b32.xlu1 %v11149_v4, %s10639_s17  ;;  %v11245_v17 = vmul.f32 0.35355338, %v11135_v8 }
 0x3b9   : > { %8359 = vmatmul.mubr.msk.f32.gmra.mrb[74].mxu1 %vm232_vm0, %v11223_v49 }
 0x3ba   : > { %1700 = vmatprep.mubr.f32.mxu1 %v14734_v1 }
 0x3bc   : > { %9642 = vrot.lane.b32.xlu0 %v10962_v61, %s10637_s11  ;;  %9667 = vrot.lane.b32.xlu1 %v11111_v10, %s10637_s11 }
 0x3bd   : > { %8360 = vmatmul.mubr.msk.f32.gmra.mrb[76].mxu1 %vm232_vm0, %v11231_v42 }
 0x3be   : > { %v11247_v51 = vpop.permute.xlu0 %9607  ;;  %1706 = vmatprep.mubr.f32.mxu1 %v14734_v1  ;;  %v11310_v22 = vpop.permute.xlu1 %9602 }
 0x3bf   : > { %15000 = vst [vmem:[#allocation29_spill] sm:$0xff] %v11247_v51  ;;  %15007 = vst [vmem:[#allocation36_spill] sm:$0xff] %v11310_v22 }
 0x3c0   : > { %2433 = vrot.lane.b32.xlu0 %v11044_v34, %s10637_s11  ;;  %4282 = vrot.lane.b32.xlu1 %v11176_v18, %s10638_s16 }
 0x3c1   : > { %8361 = vmatmul.mubr.msk.f32.gmra.mrb[78].mxu1 %vm232_vm0, %v11245_v17 }
 0x3c2   : > { %v2410_v57 = vpop.permute.xlu0 %2409  ;;  %1712 = vmatprep.mubr.f32.mxu1 %v14734_v1  ;;  %v11322_v26 = vpop.permute.xlu1 %4240 }
 0x3c3   : > { %15009 = vst [vmem:[#allocation38_spill] sm:$0xff] %v11322_v26 }
 0x3c4   : > { %4264 = vrot.lane.b32.xlu0 %v11044_v34, %s10638_s16  ;;  %5792 = vrot.lane.b32.xlu1 %v11176_v18, %s10639_s17 }
 0x3c5   : > { %8362 = vmatmul.mubr.msk.f32.gmra.mrb[80].mxu1 %vm232_vm0, %v11255_v54 }
 0x3c6   : > { %v11268_v60 = vpop.permute.xlu0 %5750  ;;  %1718 = vmatprep.mubr.f32.mxu1 %v14734_v1  ;;  %v11330_v32 = vpop.permute.xlu1 %5748 }
 0x3c7   : > { %15001 = vst [vmem:[#allocation30_spill] sm:$0xff] %v11268_v60  ;;  %15011 = vst [vmem:[#allocation40_spill] sm:$0xff] %v11330_v32 }
 0x3c8   : > { %5774 = vrot.lane.b32.xlu0 %v11044_v34, %s10639_s17  ;;  %5798 = vrot.lane.b32.xlu1 %v11209_v36, %s10639_s17 }
 0x3c9   : > { %8363 = vmatmul.mubr.msk.f32.gmra.mrb[82].mxu1 %vm232_vm0, %v11266_v58 }
 0x3ca   : > { %v2408_v7 = vpop.permute.xlu0 %2407  ;;  %1724 = vmatprep.mubr.f32.mxu1 %v14734_v1  ;;  %v11342_v33 = vpop.permute.xlu1 %9617 }
 0x3cb   : > { %15012 = vst [vmem:[#allocation41_spill] sm:$0xff] %v11342_v33 }
 0x3cc   : > { %2431 = vrot.lane.b32.xlu0 %v11033_v30, %s10637_s11  ;;  %4286 = vrot.lane.b32.xlu1 %v11199_v3, %s10638_s16 }
 0x3cd   : > { %8364 = vmatmul.mubr.msk.f32.gmra.mrb[84].mxu1 %vm232_vm0, %v11278_v6 }
 0x3ce   : > { %v11289_v34 = vpop.permute.xlu0 %4238  ;;  %2599 = vmatprep.mubr.f32.mxu1 %v14734_v1  ;;  %v11350_v38 = vpop.permute.xlu1 %4242 }
 0x3cf   : > { %15003 = vst [vmem:[#allocation32_spill] sm:$0xff] %v11289_v34  ;;  %15015 = vst [vmem:[#allocation44_spill] sm:$0xff] %v11350_v38 }
 0x3d0   : > { %9647 = vrot.lane.b32.xlu0 %v10992_v13, %s10637_s11  ;;  %5802 = vrot.lane.b32.xlu1 %v11231_v42, %s10639_s17 }
 0x3d1   : > { %8365 = vmatmul.mubr.msk.f32.vlgmr.msra.gmra.mrb[86].mxu1 %vm232_vm0, %v2408_v7 }
 0x3d2   : > { %v11299_v30 = vpop.permute.xlu0 %9612  ;;  %2605 = vmatprep.mubr.f32.mxu1 %v14734_v1 }
 0x3d3   : > { %15005 = vst [vmem:[#allocation34_spill] sm:$0xff] %v11299_v30 }
 0x3d4   : > { %2437 = vrot.lane.b32.xlu0 %v11073_v46, %s10637_s11  ;;  %4290 = vrot.lane.b32.xlu1 %v11223_v49, %s10638_s16 }
 0x3d5   : > { %8366 = vmatmul.mubr.msk.f32.gmra.mrb[88].mxu1 %vm232_vm0, %v2410_v57 }
 0x3d6   : > { %v2414_v12 = vpop.permute.xlu0 %2413  ;;  %2611 = vmatprep.mubr.f32.mxu1 %v14734_v1 }
 0x3d8   : > { %4268 = vrot.lane.b32.xlu0 %v11073_v46, %s10638_s16  ;;  %5806 = vrot.lane.b32.xlu1 %v11255_v54, %s10639_s17 }
 0x3da   : > { %v11316_v8 = vpop.permute.xlu0 %4244 }
 0x3db   : > { %15008 = vst [vmem:[#allocation37_spill] sm:$0xff] %v11316_v8 }
 0x3dc   : > { %5778 = vrot.lane.b32.xlu0 %v11073_v46, %s10639_s17  ;;  %4294 = vrot.lane.b32.xlu1 %v11245_v17, %s10638_s16 }
 0x3de   : > { %v11324_v11 = vpop.permute.xlu0 %5754 }
 0x3df   : > { %15010 = vst [vmem:[#allocation39_spill] sm:$0xff] %v11324_v11 }
 0x3e0   : > { %2441 = vrot.lane.b32.xlu0 %v11102_v59, %s10637_s11  ;;  %5810 = vrot.lane.b32.xlu1 %v11278_v6, %s10639_s17 }
 0x3e2   : > { %v2412_v52 = vpop.permute.xlu0 %2411 }
 0x3e3   : > { %8367 = vmatmul.mubr.msk.f32.gmra.mrb[90].mxu1 %vm232_vm0, %v2412_v52 }
 0x3e4   : > { %4272 = vrot.lane.b32.xlu0 %v11102_v59, %s10638_s16  ;;  %2617 = vmatprep.mubr.f32.mxu1 %v14734_v1 }
 0x3e5   : > { %4298 = vrot.lane.b32.xlu1 %v11266_v58, %s10638_s16 }
 0x3e6   : > { %v2418_v46 = vpop.permute.xlu0 %2417 }
 0x3e7   : > { %8368 = vmatmul.mubr.msk.f32.gmra.mrb[92].mxu1 %vm232_vm0, %v2414_v12 }
 0x3e8   : > { %5782 = vrot.lane.b32.xlu0 %v11102_v59, %s10639_s17  ;;  %2623 = vmatprep.mubr.f32.mxu1 %v14734_v1  ;;  %v11358_v59 = vpop.permute.xlu1 %5752 }
 0x3e9   : > { %15016 = vst [vmem:[#allocation45_spill] sm:$0xff] %v11358_v59 }
 0x3ea   : > { %v11344_v23 = vpop.permute.xlu0 %4248 }
 0x3eb   : > { %15013 = vst [vmem:[#allocation42_spill] sm:$0xff] %v11344_v23 }
 0x3ec   : > { %2439 = vrot.lane.b32.xlu0 %v11091_v53, %s10637_s11  ;;  %v11368_v12 = vpop.permute.xlu1 %4246 }
 0x3ed   : > { %15019 = vst [vmem:[#allocation48_spill] sm:$0xff] %v11368_v12 }
 0x3ee   : > { %v11348_v39 = vpop.permute.xlu0 %5758 }
 0x3ef   : > { %15014 = vst [vmem:[#allocation43_spill] sm:$0xff] %v11348_v39 }
 0x3f0   : > { %9657 = vrot.lane.b32.xlu0 %v11053_v40, %s10637_s11 }
 0x3f2   : > { %v2416_v57 = vpop.permute.xlu0 %2415 }
 0x3f3   : > { %8369 = vmatmul.mubr.msk.f32.gmra.mrb[94].mxu1 %vm232_vm0, %v2416_v57  ;;  %v11374_v57 = vpop.permute.xlu1 %5756 }
 0x3f4   : > { %2445 = vrot.lane.b32.xlu0 %v11131_v25, %s10637_s11  ;;  %2629 = vmatprep.mubr.f32.mxu1 %v14734_v1  ;;  %15020 = vst [vmem:[#allocation49_spill] sm:$0xff] %v11374_v57 }
 0x3f6   : > { %v11360_v7 = vpop.permute.xlu0 %9622 }
 0x3f7   : > { %15017 = vst [vmem:[#allocation46_spill] sm:$0xff] %v11360_v7  ;;  %8370 = vmatmul.mubr.msk.f32.gmra.mrb[96].mxu1 %vm232_vm0, %v2418_v46 }
 0x3f8   : > { %4276 = vrot.lane.b32.xlu0 %v11131_v25, %s10638_s16  ;;  %2635 = vmatprep.mubr.f32.mxu1 %v14734_v1  ;;  %v11382_v1 = vpop.permute.xlu1 %4250 }
 0x3f9   : > { %15023 = vst [vmem:[#allocation52_spill] sm:$0xff] %v11382_v1 }
 0x3fa   : > { %v11366_v53 = vpop.permute.xlu0 %9627 }
 0x3fb   : > { %15018 = vst [vmem:[#allocation47_spill] sm:$0xff] %v11366_v53 }
 0x3fc   : > { %5786 = vrot.lane.b32.xlu0 %v11131_v25, %s10639_s17  ;;  %v11390_v25 = vpop.permute.xlu1 %5760 }
 0x3fd   : > { %15025 = vst [vmem:[#allocation53_spill] sm:$0xff] %v11390_v25 }
 0x3fe   : > { %v2422_v52 = vpop.permute.xlu0 %2421 }
 0x400   : > { %2443 = vrot.lane.b32.xlu0 %v11120_v0, %s10637_s11  ;;  %v15024_v0 = vmov 0.0   ;;  %v11398_v33 = vpop.permute.xlu1 %4254 }
 0x401   : > { %15027 = vst [vmem:[#allocation55_spill] sm:$0xff] %v11398_v33 }
 0x402   : > { %v11376_v21 = vpop.permute.xlu0 %4252 }
 0x403   : > { %15021 = vst [vmem:[#allocation50_spill] sm:$0xff] %v11376_v21 }
 0x404   : > { %9662 = vrot.lane.b32.xlu0 %v11082_v55, %s10637_s11  ;;  %v11406_v51 = vpop.permute.xlu1 %5764 }
 0x405   : > { %15029 = vst [vmem:[#allocation57_spill] sm:$0xff] %v11406_v51 }
 0x406   : > { %v11380_v46 = vpop.permute.xlu0 %5762 }
 0x407   : > { %15022 = vst [vmem:[#allocation51_spill] sm:$0xff] %v11380_v46 }
 0x408   : > { %2449 = vrot.lane.b32.xlu0 %v11160_v37, %s10637_s11  ;;  %v11412_v63 = vpop.permute.xlu1 %9632 }
 0x409   : > { %15030 = vst [vmem:[#allocation58_spill] sm:$0xff] %v11412_v63 }
 0x40a   : > { %v2420_v35 = vpop.permute.xlu0 %2419 }
 0x40b   : > { %8371 = vmatmul.mubr.msk.f32.gmra.mrb[98].mxu1 %vm232_vm0, %v2420_v35 }
 0x40c   : > { %4280 = vrot.lane.b32.xlu0 %v11160_v37, %s10638_s16  ;;  %2641 = vmatprep.mubr.f32.mxu1 %v15024_v0 }
 0x40e   : > { %v2426_v48 = vpop.permute.xlu0 %2425 }
 0x40f   : > { %8372 = vmatmul.mubr.msk.f32.gmra.mrb[100].mxu1 %vm232_vm0, %v2422_v52 }
 0x410   : > { %5790 = vrot.lane.b32.xlu0 %v11160_v37, %s10639_s17  ;;  %2647 = vmatprep.mubr.f32.mxu1 %v15024_v0 }
 0x412   : > { %v11396_v53 = vpop.permute.xlu0 %4256 }
 0x413   : > { %15026 = vst [vmem:[#allocation54_spill] sm:$0xff] %v11396_v53 }
 0x414   : > { %2447 = vrot.lane.b32.xlu0 %v11149_v4, %s10637_s11 }
 0x416   : > { %v11402_v35 = vpop.permute.xlu0 %5766 }
 0x417   : > { %15028 = vst [vmem:[#allocation56_spill] sm:$0xff] %v11402_v35 }
 0x418   : > { %2453 = vrot.lane.b32.xlu0 %v11185_v14, %s10637_s11 }
 0x41a   : > { %v2424_v52 = vpop.permute.xlu0 %2423 }
 0x41b   : > { %8373 = vmatmul.mubr.msk.f32.gmra.mrb[102].mxu1 %vm232_vm0, %v2424_v52  ;;  %v11424_v52 = vpop.permute.xlu1 %9637 }
 0x41c   : > { %4284 = vrot.lane.b32.xlu0 %v11185_v14, %s10638_s16  ;;  %2653 = vmatprep.mubr.f32.mxu1 %v15024_v0  ;;  %15032 = vst [vmem:[#allocation60_spill] sm:$0xff] %v11424_v52 }
 0x41e   : > { %v2430_v37 = vpop.permute.xlu0 %2429 }
 0x41f   : > { %8374 = vmatmul.mubr.msk.f32.gmra.mrb[104].mxu1 %vm232_vm0, %v2426_v48  ;;  %v11440_v46 = vpop.permute.xlu1 %4258 }
 0x420   : > { %5794 = vrot.lane.b32.xlu0 %v11185_v14, %s10639_s17  ;;  %2659 = vmatprep.mubr.f32.mxu1 %v15024_v0  ;;  %15034 = vst [vmem:[#allocation62_spill] sm:$0xff] %v11440_v46 }
 0x422   : > { %v11418_v4 = vpop.permute.xlu0 %4260 }
 0x423   : > { %15031 = vst [vmem:[#allocation59_spill] sm:$0xff] %v11418_v4 }
 0x424   : > { %v11420_v47 = vpop.f32.mrb[22].mxu1  ;;  %2451 = vrot.lane.b32.xlu0 %v11176_v18, %s10637_s11 }
 0x425   : > { %v11426_v9 = vpop.f32.mrb[23].mxu1 }
 0x426   : > { %v11430_v48 = vpop.permute.xlu0 %5770 }
 0x427   : > { %15033 = vst [vmem:[#allocation61_spill] sm:$0xff] %v11430_v48 }
 0x428   : > { %v11432_v35 = vpop.f32.mrb[24].mxu1  ;;  %9672 = vrot.lane.b32.xlu0 %v11140_v27, %s10637_s11 }
 0x429   : > { %v11436_v14 = vpop.f32.mrb[25].mxu1 }
 0x42a   : > { %v1734_v51 = vmax.f32 %v11432_v35, %v11436_v14  ;;  %v2428_v18 = vpop.permute.xlu0 %2427 }
 0x42b   : > { %8375 = vmatmul.mubr.msk.f32.gmra.mrb[106].mxu1 %vm232_vm0, %v2428_v18 }
 0x42c   : > { %v11443_v52 = vpop.f32.mrb[26].mxu1  ;;  %1735 = vmax.xlane.f32.xlu1 %v1734_v51  ;;  %2457 = vrot.lane.b32.xlu0 %v11209_v36, %s10637_s11  ;;  %v11460_v51 = vpop.permute.xlu1 %5768 }
 0x42d   : > { %v11447_v45 = vpop.f32.mrb[27].mxu1  ;;  %2665 = vmatprep.mubr.f32.mxu1 %v15024_v0  ;;  %15036 = vst [vmem:[#allocation64_spill] sm:$0xff] %v11460_v51 }
 0x42e   : > { %v11452_v25 = vpop.permute.xlu0 %9642 }
 0x42f   : > { %15035 = vst [vmem:[#allocation63_spill] sm:$0xff] %v11452_v25  ;;  %8376 = vmatmul.mubr.msk.f32.gmra.mrb[108].mxu1 %vm232_vm0, %v2430_v37 }
 0x430   : > { %v11455_v39 = vpop.f32.mrb[28].mxu1  ;;  %4288 = vrot.lane.b32.xlu0 %v11209_v36, %s10638_s16  ;;  %2671 = vmatprep.mubr.f32.mxu1 %v15024_v0  ;;  %v11476_v60 = vpop.permute.xlu1 %4262 }
 0x431   : > { %v11462_v18 = vpop.f32.mrb[29].mxu1  ;;  %15038 = vst [vmem:[#allocation66_spill] sm:$0xff] %v11476_v60 }
 0x432   : > { %v2434_v11 = vpop.permute.xlu0 %2433 }
 0x434   : > { %v11466_v48 = vpop.f32.mrb[30].mxu1  ;;  %2455 = vrot.lane.b32.xlu0 %v11199_v3, %s10637_s11  ;;  %v11492_v36 = vpop.permute.xlu1 %5772 }
 0x435   : > { %v11470_v37 = vpop.f32.mrb[31].mxu1  ;;  %15041 = vst [vmem:[#allocation69_spill] sm:$0xff] %v11492_v36 }
 0x436   : > { %v11474_v59 = vpop.permute.xlu0 %4264 }
 0x437   : > { %15037 = vst [vmem:[#allocation65_spill] sm:$0xff] %v11474_v59 }
 0x438   : > { %v11478_v51 = vpop.f32.mrb[32].mxu1  ;;  %5796 = vrot.lane.b32.xlu0 %v11199_v3, %s10639_s17  ;;  %v2436_v32 = vpop.permute.xlu1 %2435 }
 0x439   : > { %v11482_v57 = vpop.f32.mrb[33].mxu1 }
 0x43a   : > { %15039 = vst [vmem:[#allocation67_spill] sm:$0xff] %v11482_v57  ;;  %v11486_v4 = vpop.permute.xlu0 %5774 }
 0x43b   : > { %15040 = vst [vmem:[#allocation68_spill] sm:$0xff] %v11486_v4 }
 0x43c   : > { %v11488_v46 = vpop.f32.mrb[34].mxu1  ;;  %9677 = vrot.lane.b32.xlu0 %v11165_v41, %s10637_s11  ;;  %v11520_v23 = vpop.permute.xlu1 %4266 }
 0x43d   : > { %v11494_v59 = vpop.f32.mrb[35].mxu1  ;;  %15043 = vst [vmem:[#allocation71_spill] sm:$0xff] %v11520_v23 }
 0x43e   : > { %v2432_v3 = vpop.permute.xlu0 %2431 }
 0x43f   : > { %8377 = vmatmul.mubr.msk.f32.gmra.mrb[110].mxu1 %vm232_vm0, %v2432_v3 }
 0x440   : > { %v11499_v53 = vpop.f32.mrb[36].mxu1  ;;  %2461 = vrot.lane.b32.xlu0 %v11231_v42, %s10637_s11  ;;  %2677 = vmatprep.mubr.f32.mxu1 %v15024_v0 }
 0x441   : > { %v11504_v4 = vpop.f32.mrb[37].mxu1 }
 0x442   : > { %v11508_v33 = vpop.permute.xlu0 %9647 }
 0x443   : > { %15042 = vst [vmem:[#allocation70_spill] sm:$0xff] %v11508_v33  ;;  %8378 = vmatmul.mubr.msk.f32.gmra.mrb[112].mxu1 %vm232_vm0, %v2434_v11 }
 0x444   : > { %v11511_v60 = vpop.f32.mrb[38].mxu1  ;;  %4292 = vrot.lane.b32.xlu0 %v11231_v42, %s10638_s16  ;;  %2683 = vmatprep.mubr.f32.mxu1 %v15024_v0 }
 0x445   : > { %v11516_v3 = vpop.f32.mrb[39].mxu1 }
 0x446   : > { %v2438_v1 = vpop.permute.xlu0 %2437 }
 0x447   : > { %8379 = vmatmul.mubr.msk.f32.gmra.mrb[114].mxu1 %vm232_vm0, %v2436_v32  ;;  %v11539_v32 = vpop.permute.xlu1 %5776 }
 0x448   : > { %v11523_v36 = vpop.f32.mrb[40].mxu1  ;;  %2459 = vrot.lane.b32.xlu0 %v11223_v49, %s10637_s11  ;;  %2689 = vmatprep.mubr.f32.mxu1 %v15024_v0  ;;  %15045 = vst [vmem:[#allocation73_spill] sm:$0xff] %v11539_v32 }
 0x449   : > { %v11528_v42 = vpop.f32.mrb[41].mxu1 }
 0x44a   : > { %v1758_v11 = vmax.f32 %v11523_v36, %v11528_v42  ;;  %v11532_v24 = vpop.permute.xlu0 %4268 }
 0x44b   : > { %15044 = vst [vmem:[#allocation72_spill] sm:$0xff] %v11532_v24  ;;  %8380 = vmatmul.mubr.msk.f32.gmra.mrb[116].mxu1 %vm232_vm0, %v2438_v1  ;;  %v11556_v32 = vpop.permute.xlu1 %9652 }
 0x44c   : > { %v11535_v21 = vpop.f32.mrb[42].mxu1  ;;  %1759 = vmax.xlane.f32.xlu1 %v1758_v11  ;;  %5800 = vrot.lane.b32.xlu0 %v11223_v49, %s10639_s17  ;;  %15047 = vst [vmem:[#allocation75_spill] sm:$0xff] %v11556_v32 }
 0x44d   : > { %v11541_v23 = vpop.f32.mrb[43].mxu1  ;;  %2695 = vmatprep.mubr.f32.mxu1 %v15024_v0 }
 0x44e   : > { %v11546_v62 = vpop.permute.xlu0 %5778 }
 0x44f   : > { %15046 = vst [vmem:[#allocation74_spill] sm:$0xff] %v11546_v62  ;;  %v11572_v19 = vpop.permute.xlu1 %4270 }
 0x450   : > { %v11548_v24 = vpop.f32.mrb[44].mxu1  ;;  %2465 = vrot.lane.b32.xlu0 %v11255_v54, %s10637_s11  ;;  %15051 = vst [vmem:[#allocation79_spill] sm:$0xff] %v11572_v19 }
 0x451   : > { %v11552_v1 = vpop.f32.mrb[45].mxu1 }
 0x452   : > { %v1764_v49 = vmax.f32 %v11548_v24, %v11552_v1  ;;  %v2442_v11 = vpop.permute.xlu0 %2441 }
 0x453   : > { %v11588_v19 = vpop.permute.xlu1 %5780 }
 0x454   : > { %1765 = vmax.xlane.f32.xlu1 %v1764_v49  ;;  %4296 = vrot.lane.b32.xlu0 %v11255_v54, %s10638_s16  ;;  %v11560_v12 = vpop.f32.mrb[46].mxu1  ;;  %15055 = vst [vmem:[#allocation83_spill] sm:$0xff] %v11588_v19 }
 0x455   : > { %15048 = vst [vmem:[#allocation76_spill] sm:$0xff] %v11560_v12  ;;  %v11562_v62 = vpop.f32.mrb[47].mxu1 }
 0x456   : > { %15049 = vst [vmem:[#allocation77_spill] sm:$0xff] %v11562_v62  ;;  %v11566_v38 = vpop.permute.xlu0 %4272 }
 0x457   : > { %15050 = vst [vmem:[#allocation78_spill] sm:$0xff] %v11566_v38  ;;  %v11602_v27 = vpop.permute.xlu1 %4274 }
 0x458   : > { %v11568_v26 = vpop.f32.mrb[48].mxu1  ;;  %2463 = vrot.lane.b32.xlu0 %v11245_v17, %s10637_s11  ;;  %15057 = vst [vmem:[#allocation85_spill] sm:$0xff] %v11602_v27 }
 0x459   : > { %v11574_v49 = vpop.f32.mrb[49].mxu1 }
 0x45a   : > { %v1770_v54 = vmax.f32 %v11568_v26, %v11574_v49  ;;  %v11578_v34 = vpop.permute.xlu0 %5782 }
 0x45b   : > { %15052 = vst [vmem:[#allocation80_spill] sm:$0xff] %v11578_v34  ;;  %v11618_v27 = vpop.permute.xlu1 %5784 }
 0x45c   : > { %1771 = vmax.xlane.f32.xlu1 %v1770_v54  ;;  %5804 = vrot.lane.b32.xlu0 %v11245_v17, %s10639_s17  ;;  %v11582_v8 = vpop.f32.mrb[50].mxu1  ;;  %15059 = vst [vmem:[#allocation87_spill] sm:$0xff] %v11618_v27 }
 0x45d   : > { %15053 = vst [vmem:[#allocation81_spill] sm:$0xff] %v11582_v8  ;;  %v11584_v38 = vpop.f32.mrb[51].mxu1 }
 0x45e   : > { %15054 = vst [vmem:[#allocation82_spill] sm:$0xff] %v11584_v38  ;;  %v2440_v5 = vpop.permute.xlu0 %2439 }
 0x45f   : > { %8381 = vmatmul.mubr.msk.f32.gmra.mrb[118].mxu1 %vm232_vm0, %v2440_v5  ;;  %v11630_v50 = vpop.permute.xlu1 %4278 }
 0x460   : > { %2469 = vrot.lane.b32.xlu0 %v11278_v6, %s10637_s11  ;;  %2701 = vmatprep.mubr.f32.mxu1 %v15024_v0  ;;  %v11594_v54 = vpop.f32.mrb[52].mxu1  ;;  %15062 = vst [vmem:[#allocation90_spill] sm:$0xff] %v11630_v50 }
 0x461   : > { %v11596_v17 = vpop.f32.mrb[53].mxu1 }
 0x462   : > { %v11598_v34 = vpop.permute.xlu0 %9657 }
 0x463   : > { %15056 = vst [vmem:[#allocation84_spill] sm:$0xff] %v11598_v34  ;;  %8382 = vmatmul.mubr.msk.f32.gmra.mrb[120].mxu1 %vm232_vm0, %v2442_v11  ;;  %v11646_v34 = vpop.permute.xlu1 %5788 }
 0x464   : > { %4300 = vrot.lane.b32.xlu0 %v11278_v6, %s10638_s16  ;;  %2707 = vmatprep.mubr.f32.mxu1 %v15024_v0  ;;  %v11608_v5 = vpop.f32.mrb[54].mxu1  ;;  %15066 = vst [vmem:[#allocation94_spill] sm:$0xff] %v11646_v34 }
 0x465   : > { %v11610_v56 = vpop.f32.mrb[55].mxu1 }
 0x466   : > { %v2446_v19 = vpop.permute.xlu0 %2445 }
 0x467   : > { %v11662_v34 = vpop.permute.xlu1 %9667 }
 0x468   : > { %2467 = vrot.lane.b32.xlu0 %v11266_v58, %s10637_s11  ;;  %v11616_v44 = vpop.f32.mrb[56].mxu1  ;;  %15071 = vst [vmem:[#allocation99_spill] sm:$0xff] %v11662_v34 }
 0x469   : > { %15058 = vst [vmem:[#allocation86_spill] sm:$0xff] %v11616_v44  ;;  %v11620_v11 = vpop.f32.mrb[57].mxu1 }
 0x46a   : > { %15060 = vst [vmem:[#allocation88_spill] sm:$0xff] %v11620_v11  ;;  %v11622_v6 = vpop.permute.xlu0 %4276  ;;  %v1782_v41 = vmax.f32 %v11616_v44, %v11620_v11 }
 0x46b   : > { %15061 = vst [vmem:[#allocation89_spill] sm:$0xff] %v11622_v6  ;;  %v11676_v6 = vpop.permute.xlu1 %4282 }
 0x46c   : > { %5808 = vrot.lane.b32.xlu0 %v11266_v58, %s10639_s17  ;;  %v11628_v55 = vpop.f32.mrb[58].mxu1  ;;  %15076 = vst [vmem:[#allocation104_spill] sm:$0xff] %v11676_v6 }
 0x46d   : > { %9687 = vrot.lane.b32.xlu1 %v10992_v13, %s10638_s16  ;;  %v11634_v20 = vpop.f32.mrb[59].mxu1 }
 0x46e   : > { %v11636_v27 = vpop.permute.xlu0 %5786 }
 0x46f   : > { %15063 = vst [vmem:[#allocation91_spill] sm:$0xff] %v11636_v27 }
 0x470   : > { %v11640_v15 = vpop.f32.mrb[60].mxu1 }
 0x471   : > { %15064 = vst [vmem:[#allocation92_spill] sm:$0xff] %v11640_v15  ;;  %v11642_v10 = vpop.f32.mrb[61].mxu1 }
 0x472   : > { %15065 = vst [vmem:[#allocation93_spill] sm:$0xff] %v11642_v10  ;;  %v2444_v16 = vpop.permute.xlu0 %2443  ;;  %v1788_v58 = vmax.f32 %v11640_v15, %v11642_v10  ;;  %v15096_v15 = vmax.f32 %v11455_v39, %v11462_v18 }
 0x473   : > { %8383 = vmatmul.mubr.msk.f32.gmra.mrb[122].mxu1 %vm232_vm0, %v2444_v16 }
 0x474   : > { %2713 = vmatprep.mubr.f32.mxu1 %v15024_v0  ;;  %v11650_v13 = vpop.f32.mrb[62].mxu1 }
 0x475   : > { %15067 = vst [vmem:[#allocation95_spill] sm:$0xff] %v11650_v13  ;;  %v11652_v27 = vpop.f32.mrb[63].mxu1 }
 0x476   : > { %15068 = vst [vmem:[#allocation96_spill] sm:$0xff] %v11652_v27  ;;  %v11654_v50 = vpop.permute.xlu0 %9662 }
 0x477   : > { %15069 = vst [vmem:[#allocation97_spill] sm:$0xff] %v11654_v50  ;;  %8384 = vmatmul.mubr.msk.f32.gmra.mrb[124].mxu1 %vm232_vm0, %v2446_v19 }
 0x478   : > { %2719 = vmatprep.mubr.f32.mxu1 %v15024_v0  ;;  %v11660_v32 = vpop.f32.mrb[64].mxu1 }
 0x479   : > { %15070 = vst [vmem:[#allocation98_spill] sm:$0xff] %v11660_v32  ;;  %v11664_v16 = vpop.f32.mrb[65].mxu1 }
 0x47a   : > { %15072 = vst [vmem:[#allocation100_spill] sm:$0xff] %v11664_v16  ;;  %v2450_v33 = vpop.permute.xlu0 %2449  ;;  %v1794_v25 = vmax.f32 %v11660_v32, %v11664_v16  ;;  %v11688_v32 = vpop.permute.xlu1 %5792 }
 0x47b   : > { %15081 = vst [vmem:[#allocation109_spill] sm:$0xff] %v11688_v32  ;;  %v15086_v32 = vmax.f32 %v11420_v47, %v11426_v9 }
 0x47c   : > { %v11668_v63 = vpop.f32.mrb[66].mxu1 }
 0x47d   : > { %15073 = vst [vmem:[#allocation101_spill] sm:$0xff] %v11668_v63  ;;  %v11670_v50 = vpop.f32.mrb[67].mxu1 }
 0x47e   : > { %15074 = vst [vmem:[#allocation102_spill] sm:$0xff] %v11670_v50  ;;  %v11672_v7 = vpop.permute.xlu0 %4280 }
 0x47f   : > { %15075 = vst [vmem:[#allocation103_spill] sm:$0xff] %v11672_v7 }
 0x480   : > { %v11678_v30 = vpop.f32.mrb[68].mxu1 }
 0x481   : > { %15077 = vst [vmem:[#allocation105_spill] sm:$0xff] %v11678_v30  ;;  %v11680_v34 = vpop.f32.mrb[69].mxu1 }
 0x482   : > { %15078 = vst [vmem:[#allocation106_spill] sm:$0xff] %v11680_v34  ;;  %v11682_v22 = vpop.permute.xlu0 %5790  ;;  %v1800_v29 = vmax.f32 %v11678_v30, %v11680_v34  ;;  %v11702_v34 = vpop.permute.xlu1 %5798 }
 0x483   : > { %15079 = vst [vmem:[#allocation107_spill] sm:$0xff] %v11682_v22  ;;  %15085 = vst [vmem:[#allocation113_spill] sm:$0xff] %v11702_v34  ;;  %v15090_v34 = vmax.f32 %v11443_v52, %v11447_v45 }
 0x484   : > { %v11686_v16 = vpop.f32.mrb[70].mxu1 }
 0x485   : > { %15080 = vst [vmem:[#allocation108_spill] sm:$0xff] %v11686_v16  ;;  %v11690_v31 = vpop.f32.mrb[71].mxu1 }
 0x486   : > { %15082 = vst [vmem:[#allocation110_spill] sm:$0xff] %v11690_v31  ;;  %v2448_v7 = vpop.permute.xlu0 %2447  ;;  %v1803_v19 = vmax.f32 %v11686_v16, %v11690_v31 }
 0x487   : > { %8385 = vmatmul.mubr.msk.f32.gmra.mrb[126].mxu1 %vm232_vm0, %v2448_v7 }
 0x488   : > { %2725 = vmatprep.mubr.f32.mxu1 %v15024_v0  ;;  %v11696_v6 = vpop.f32.mrb[72].mxu1 }
 0x489   : > { %15083 = vst [vmem:[#allocation111_spill] sm:$0xff] %v11696_v6  ;;  %v11698_v22 = vpop.f32.mrb[73].mxu1 }
 0x48a   : > { %15084 = vst [vmem:[#allocation112_spill] sm:$0xff] %v11698_v22  ;;  %v2454_v10 = vpop.permute.xlu0 %2453  ;;  %v1806_v30 = vmax.f32 %v11696_v6, %v11698_v22 }
 0x48b   : > { %1732 = vmax.xlane.f32.xlu0 %v15086_v32  ;;  %8386 = vmatmul.mubr.msk.f32.gmra.mrb[128].mxu1 %vm232_vm0, %v2450_v33  ;;  %v11722_v32 = vpop.permute.xlu1 %4286  ;;  %v15093_v33 = vmax.f32 %v11594_v54, %v11596_v17 }
 0x48c   : > { %2731 = vmatprep.mubr.f32.mxu1 %v15024_v0  ;;  %v11709_v7 = vpop.f32.mrb[74].mxu1  ;;  %15092 = vst [vmem:[#allocation118_spill] sm:$0xff] %v11722_v32 }
 0x48d   : > { %15087 = vst [vmem:[#allocation114_spill] sm:$0xff] %v11709_v7  ;;  %v11711_v31 = vpop.f32.mrb[75].mxu1 }
 0x48e   : > { %15088 = vst [vmem:[#allocation115_spill] sm:$0xff] %v11711_v31  ;;  %v11713_v16 = vpop.permute.xlu0 %4284 }
 0x48f   : > { %15089 = vst [vmem:[#allocation116_spill] sm:$0xff] %v11713_v16  ;;  %1738 = vmax.xlane.f32.xlu0 %v15090_v34  ;;  %v11742_v44 = vpop.permute.xlu1 %5802 }
 0x490   : > { %v11720_v6 = vpop.f32.mrb[76].mxu1  ;;  %15099 = vst [vmem:[#allocation123_spill] sm:$0xff] %v11742_v44  ;;  %v15104_v44 = vmax.f32 %v11478_v51, %v11482_v57  ;;  %v15113_v57 = vmax.f32 %v11499_v53, %v11504_v4 }
 0x491   : > { %15091 = vst [vmem:[#allocation117_spill] sm:$0xff] %v11720_v6  ;;  %1777 = vmax.xlane.f32.xlu1 %v15093_v33  ;;  %v11727_v22 = vpop.f32.mrb[77].mxu1 }
 0x492   : > { %15094 = vst [vmem:[#allocation119_spill] sm:$0xff] %v11727_v22  ;;  %v11729_v2 = vpop.permute.xlu0 %5794  ;;  %v1812_v16 = vmax.f32 %v11720_v6, %v11727_v22 }
 0x493   : > { %15095 = vst [vmem:[#allocation120_spill] sm:$0xff] %v11729_v2  ;;  %1741 = vmax.xlane.f32.xlu0 %v15096_v15  ;;  %v15100_v2 = vmax.f32 %v11466_v48, %v11470_v37 }
 0x494   : > { %v11736_v34 = vpop.f32.mrb[78].mxu1 }
 0x495   : > { %15097 = vst [vmem:[#allocation121_spill] sm:$0xff] %v11736_v34  ;;  %1783 = vmax.xlane.f32.xlu1 %v1782_v41  ;;  %v11738_v11 = vpop.f32.mrb[79].mxu1 }
 0x496   : > { %15098 = vst [vmem:[#allocation122_spill] sm:$0xff] %v11738_v11  ;;  %v2452_v32 = vpop.permute.xlu0 %2451  ;;  %v1815_v33 = vmax.f32 %v11736_v34, %v11738_v11  ;;  %v15108_v11 = vmax.f32 %v11488_v46, %v11494_v59 }
 0x497   : > { %1744 = vmax.xlane.f32.xlu0 %v15100_v2  ;;  %8387 = vmatmul.mubr.msk.f32.gmra.mrb[130].mxu1 %vm232_vm0, %v2452_v32  ;;  %v11764_v32 = vpop.permute.xlu1 %4290 }
 0x498   : > { %2737 = vmatprep.mubr.f32.mxu1 %v15024_v0  ;;  %v11749_v15 = vpop.f32.mrb[80].mxu1  ;;  %15106 = vst [vmem:[#allocation128_spill] sm:$0xff] %v11764_v32 }
 0x499   : > { %15101 = vst [vmem:[#allocation124_spill] sm:$0xff] %v11749_v15  ;;  %1789 = vmax.xlane.f32.xlu1 %v1788_v58  ;;  %v11751_v41 = vpop.f32.mrb[81].mxu1 }
 0x49a   : > { %15102 = vst [vmem:[#allocation125_spill] sm:$0xff] %v11751_v41  ;;  %v11753_v22 = vpop.permute.xlu0 %9672 }
 0x49b   : > { %15103 = vst [vmem:[#allocation126_spill] sm:$0xff] %v11753_v22  ;;  %1747 = vmax.xlane.f32.xlu0 %v15104_v44  ;;  %8388 = vmatmul.mubr.msk.f32.gmra.mrb[132].mxu1 %vm232_vm0, %v2454_v10 }
 0x49c   : > { %v11761_v2 = vpop.f32.mrb[82].mxu1  ;;  %2743 = vmatprep.mubr.f32.mxu1 %v15024_v0 }
 0x49d   : > { %15105 = vst [vmem:[#allocation127_spill] sm:$0xff] %v11761_v2  ;;  %1795 = vmax.xlane.f32.xlu1 %v1794_v25  ;;  %v11766_v58 = vpop.f32.mrb[83].mxu1  ;;  %v11781_v25 = vpop.permute.xlu1 %5806 }
 0x49e   : > { %15107 = vst [vmem:[#allocation129_spill] sm:$0xff] %v11766_v58  ;;  %v2458_v34 = vpop.permute.xlu0 %2457  ;;  %v1821_v22 = vmax.f32 %v11761_v2, %v11766_v58  ;;  %15112 = vst [vmem:[#allocation133_spill] sm:$0xff] %v11781_v25 }
 0x49f   : > { %1750 = vmax.xlane.f32.xlu0 %v15108_v11 }
 0x4a0   : > { %v11773_v44 = vpop.f32.mrb[84].mxu1 }
 0x4a1   : > { %15109 = vst [vmem:[#allocation130_spill] sm:$0xff] %v11773_v44  ;;  %1801 = vmax.xlane.f32.xlu1 %v1800_v29  ;;  %v11775_v10 = vpop.f32.mrb[85].mxu1 }
 0x4a2   : > { %15110 = vst [vmem:[#allocation131_spill] sm:$0xff] %v11775_v10  ;;  %v1824_v6 = vmax.f32 %v11773_v44, %v11775_v10  ;;  %v11779_v32 = vpop.permute.xlu0 %4288  ;;  %v15116_v10 = vmax.f32 %v11511_v60, %v11516_v3  ;;  %v15121_v44 = vmax.f32 %v11535_v21, %v11541_v23 }
 0x4a3   : > { %15111 = vst [vmem:[#allocation132_spill] sm:$0xff] %v11779_v32  ;;  %1753 = vmax.xlane.f32.xlu0 %v15113_v57  ;;  %v11799_v57 = vpop.permute.xlu1 %4294 }
 0x4a4   : > { %v11786_v58 = vpop.f32.mrb[86].mxu1  ;;  %15118 = vst [vmem:[#allocation137_spill] sm:$0xff] %v11799_v57 }
 0x4a5   : > { %15114 = vst [vmem:[#allocation134_spill] sm:$0xff] %v11786_v58  ;;  %v11788_v2 = vpop.f32.mrb[87].mxu1  ;;  %1804 = vmax.xlane.f32.xlu1 %v1803_v19 }
 0x4a6   : > { %15115 = vst [vmem:[#allocation135_spill] sm:$0xff] %v11788_v2  ;;  %v2456_v11 = vpop.permute.xlu0 %2455 }
 0x4a7   : > { %1756 = vmax.xlane.f32.xlu0 %v15116_v10  ;;  %8389 = vmatmul.mubr.msk.f32.gmra.mrb[134].mxu1 %vm232_vm0, %v2456_v11  ;;  %v11814_v11 = vpop.permute.xlu1 %5810 }
 0x4a8   : > { %v11796_v25 = vpop.f32.mrb[88].mxu1  ;;  %2749 = vmatprep.mubr.f32.mxu1 %v15024_v0  ;;  %15123 = vst [vmem:[#allocation141_spill] sm:$0xff] %v11814_v11 }
 0x4a9   : > { %15117 = vst [vmem:[#allocation136_spill] sm:$0xff] %v11796_v25  ;;  %v11801_v32 = vpop.f32.mrb[89].mxu1  ;;  %1807 = vmax.xlane.f32.xlu1 %v1806_v30  ;;  %v15124_v30 = vmax.f32 %v11560_v12, %v11562_v62 }
 0x4aa   : > { %15119 = vst [vmem:[#allocation138_spill] sm:$0xff] %v11801_v32  ;;  %v11805_v29 = vpop.permute.xlu0 %5796 }
 0x4ab   : > { %15120 = vst [vmem:[#allocation139_spill] sm:$0xff] %v11805_v29  ;;  %1762 = vmax.xlane.f32.xlu0 %v15121_v44  ;;  %8390 = vmatmul.mubr.msk.f32.gmra.mrb[136].mxu1 %vm232_vm0, %v2458_v34  ;;  %v15125_v29 = vmax.f32 %v11582_v8, %v11584_v38  ;;  %v11822_v44 = vpop.permute.xlu1 %4298 }
 0x4ac   : > { %2755 = vmatprep.mubr.f32.mxu1 %v15024_v0  ;;  %15126 = vst [vmem:[#allocation142_spill] sm:$0xff] %v11822_v44 }
 0x4ad   : > { %1813 = vmax.xlane.f32.xlu1 %v1812_v16 }
 0x4ae   : > { %v11812_v10 = vpop.permute.xlu0 %9677 }
 0x4af   : > { %15122 = vst [vmem:[#allocation140_spill] sm:$0xff] %v11812_v10  ;;  %1768 = vmax.xlane.f32.xlu0 %v15124_v30 }
 0x4b1   : > { %1816 = vmax.xlane.f32.xlu1 %v1815_v33 }
 0x4b2   : > { %v2462_v19 = vpop.permute.xlu0 %2461 }
 0x4b3   : > { %1774 = vmax.xlane.f32.xlu0 %v15125_v29 }
 0x4b5   : > { %1822 = vmax.xlane.f32.xlu1 %v1821_v22 }
 0x4b6   : > { %v11824_v34 = vpop.f32.mrb[90].mxu1  ;;  %v11826_v16 = vpop.permute.xlu0 %4292 }
 0x4b7   : > { %15127 = vst [vmem:[#allocation143_spill] sm:$0xff] %v11824_v34  ;;  %15128 = vst [vmem:[#allocation144_spill] sm:$0xff] %v11826_v16  ;;  %v11828_v57 = vpop.f32.mrb[91].mxu1 }
 0x4b8   : > { %15129 = vst [vmem:[#allocation145_spill] sm:$0xff] %v11828_v57 }
 0x4b9   : > { %1825 = vmax.xlane.f32.xlu1 %v1824_v6  ;;  %v1736_v30 = vpop.xlane.xlu1 %1735 }
 0x4ba   : > { %v1829_v33 = vsub.f32 %v11432_v35, %v1736_v30  ;;  %v1830_v10 = vsub.f32 %v11436_v14, %v1736_v30  ;;  %v11834_v38 = vpop.f32.mrb[92].mxu1  ;;  %v2460_v29 = vpop.permute.xlu0 %2459 }
 0x4bb   : > { %15130 = vst [vmem:[#allocation146_spill] sm:$0xff] %v11834_v38  ;;  %v11836_v44 = vpop.f32.mrb[93].mxu1  ;;  %8391 = vmatmul.mubr.msk.f32.gmra.mrb[138].mxu1 %vm232_vm0, %v2460_v29 }
 0x4bc   : > { %15131 = vst [vmem:[#allocation147_spill] sm:$0xff] %v11836_v44  ;;  %v1895_v22 = vmul.f32 1.442695, %v1829_v33  ;;  %v1897_v16 = vmul.f32 1.442695, %v1830_v10  ;;  %2761 = vmatprep.mubr.f32.mxu1 %v15024_v0 }
 0x4be   : > { %9801 = vpow2.f32 %v1895_v22  ;;  %v11842_v6 = vpop.permute.xlu0 %5800 }
 0x4bf   : > { %15132 = vst [vmem:[#allocation148_spill] sm:$0xff] %v11842_v6  ;;  %9803 = vpow2.f32 %v1897_v16  ;;  %8392 = vmatmul.mubr.msk.f32.gmra.mrb[140].mxu1 %vm232_vm0, %v2462_v19 }
 0x4c0   : > { %2767 = vmatprep.mubr.f32.mxu1 %v15024_v0 }
 0x4c2   : > { %v2466_v35 = vpop.permute.xlu0 %2465 }
 0x4c6   : > { %v11846_v14 = vpop.f32.mrb[94].mxu1  ;;  %v11848_v30 = vpop.permute.xlu0 %4296 }
 0x4c7   : > { %15133 = vst [vmem:[#allocation149_spill] sm:$0xff] %v11846_v14  ;;  %15134 = vst [vmem:[#allocation150_spill] sm:$0xff] %v11848_v30  ;;  %v11850_v33 = vpop.f32.mrb[95].mxu1 }
 0x4c8   : > { %15135 = vst [vmem:[#allocation151_spill] sm:$0xff] %v11850_v33  ;;  %v11852_v10 = vpop.eup %9801 }
 0x4c9   : > { %v11856_v22 = vpop.eup %9803  ;;  %9682 = vrot.lane.b32.xlu0 %v10962_v61, %s10638_s16 }
 0x4ca   : > { %9697 = vrot.lane.b32.xlu1 %v11053_v40, %s10638_s16  ;;  %v11862_v19 = vpop.f32.mrb[96].mxu1  ;;  %v2464_v16 = vpop.permute.xlu0 %2463  ;;  %v11866_v8 = vadd.f32 %v11856_v22, %v11852_v10 }
 0x4cb   : > { %15136 = vst [vmem:[#allocation152_spill] sm:$0xff] %v11862_v19  ;;  %v11868_v11 = vpop.f32.mrb[97].mxu1  ;;  %8393 = vmatmul.mubr.msk.f32.gmra.mrb[142].mxu1 %vm232_vm0, %v2464_v16 }
 0x4cc   : > { %15137 = vst [vmem:[#allocation153_spill] sm:$0xff] %v11868_v11  ;;  %v2807_v29 = vmax.f32 %v11862_v19, %v11868_v11  ;;  %2773 = vmatprep.mubr.f32.mxu1 %v15024_v0 }
 0x4ce   : > { %v11874_v61 = vpop.permute.xlu0 %5804 }
 0x4cf   : > { %15138 = vst [vmem:[#allocation154_spill] sm:$0xff] %v11874_v61  ;;  %8394 = vmatmul.mubr.msk.f32.gmra.mrb[144].mxu1 %vm232_vm0, %v2466_v35 }
 0x4d0   : > { %2779 = vmatprep.mubr.f32.mxu1 %v15024_v0 }
 0x4d2   : > { %v2470_v40 = vpop.permute.xlu0 %2469 }
 0x4d6   : > { %v11878_v6 = vpop.permute.xlu0 %4300 }
 0x4d7   : > { %15139 = vst [vmem:[#allocation155_spill] sm:$0xff] %v11878_v6 }
 0x4d9   : > { %v1760_v30 = vpop.xlane.xlu1 %1759 }
 0x4da   : > { %v1845_v62 = vsub.f32 %v11523_v36, %v1760_v30  ;;  %v1846_v12 = vsub.f32 %v11528_v42, %v1760_v30  ;;  %v2468_v16 = vpop.permute.xlu0 %2467  ;;  %v15144_v36 = vmax.f32 %v11608_v5, %v11610_v56 }
 0x4db   : > { %8395 = vmatmul.mubr.msk.f32.gmra.mrb[146].mxu1 %vm232_vm0, %v2468_v16 }
 0x4dc   : > { %v1927_v11 = vmul.f32 1.442695, %v1845_v62  ;;  %v1929_v19 = vmul.f32 1.442695, %v1846_v12  ;;  %2785 = vmatprep.mubr.f32.mxu1 %v15024_v0 }
 0x4de   : > { %9805 = vpow2.f32 %v1927_v11  ;;  %v11884_v61 = vpop.f32.mrb[98].mxu1 }
 0x4df   : > { %15140 = vst [vmem:[#allocation156_spill] sm:$0xff] %v11884_v61  ;;  %9807 = vpow2.f32 %v1929_v19  ;;  %v11886_v35 = vpop.f32.mrb[99].mxu1  ;;  %8396 = vmatmul.mubr.msk.f32.gmra.mrb[148].mxu1 %vm232_vm0, %v2470_v40 }
 0x4e0   : > { %15141 = vst [vmem:[#allocation157_spill] sm:$0xff] %v11886_v35 }
 0x4e1   : > { %v1766_v6 = vpop.xlane.xlu1 %1765 }
 0x4e2   : > { %v1849_v42 = vsub.f32 %v11548_v24, %v1766_v6  ;;  %v1850_v30 = vsub.f32 %v11552_v1, %v1766_v6  ;;  %v11893_v62 = vpop.f32.mrb[100].mxu1 }
 0x4e3   : > { %15142 = vst [vmem:[#allocation158_spill] sm:$0xff] %v11893_v62  ;;  %v11895_v12 = vpop.f32.mrb[101].mxu1 }
 0x4e4   : > { %15143 = vst [vmem:[#allocation159_spill] sm:$0xff] %v11895_v12  ;;  %v1935_v11 = vmul.f32 1.442695, %v1849_v42  ;;  %v1937_v16 = vmul.f32 1.442695, %v1850_v30  ;;  %v2813_v19 = vmax.f32 %v11893_v62, %v11895_v12  ;;  %v15155_v62 = vmax.f32 %v11709_v7, %v11711_v31 }
 0x4e6   : > { %9809 = vpow2.f32 %v1935_v11 }
 0x4e7   : > { %9811 = vpow2.f32 %v1937_v16  ;;  %v15145_v16 = vmax.f32 %v11628_v55, %v11634_v20 }
 0x4e8   : > { %v11899_v40 = vpop.eup %9805  ;;  %1780 = vmax.xlane.f32.xlu0 %v15144_v36  ;;  %v15146_v36 = vmax.f32 %v11796_v25, %v11801_v32  ;;  %v15178_v25 = vld [vmem:[#allocation108_spill] sm:$0xff] }
 0x4e9   : > { %v11904_v24 = vpop.eup %9807  ;;  %v1772_v1 = vpop.xlane.xlu1 %1771 }
 0x4ea   : > { %v1853_v6 = vsub.f32 %v11568_v26, %v1772_v1  ;;  %v1854_v0 = vsub.f32 %v11574_v49, %v1772_v1  ;;  %v11910_v42 = vadd.f32 %v11904_v24, %v11899_v40 }
 0x4ec   : > { %v1943_v30 = vmul.f32 1.442695, %v1853_v6  ;;  %v1945_v11 = vmul.f32 1.442695, %v1854_v0  ;;  %1786 = vmax.xlane.f32.xlu0 %v15145_v16  ;;  %v15149_v0 = vmax.f32 %v11650_v13, %v11652_v27  ;;  %v15168_v27 = vld [vmem:[#allocation31_spill] sm:$0xff] }
 0x4ee   : > { %9813 = vpow2.f32 %v1943_v30  ;;  %2796 = vmax.xlane.f32.xlu1 %v15146_v36  ;;  %v11918_v12 = vpop.f32.mrb[102].mxu1  ;;  %v15150_v30 = vmax.f32 %v11824_v34, %v11828_v57  ;;  %v15167_v34 = vld [vmem:[#allocation88_spill] sm:$0xff] }
 0x4ef   : > { %15147 = vst [vmem:[#allocation160_spill] sm:$0xff] %v11918_v12  ;;  %9815 = vpow2.f32 %v1945_v11  ;;  %v11920_v26 = vpop.f32.mrb[103].mxu1 }
 0x4f0   : > { %15148 = vst [vmem:[#allocation161_spill] sm:$0xff] %v11920_v26  ;;  %v11922_v49 = vpop.eup %9809  ;;  %v2816_v1 = vmax.f32 %v11918_v12, %v11920_v26  ;;  %1792 = vmax.xlane.f32.xlu0 %v15149_v0  ;;  %v15153_v0 = vmax.f32 %v11668_v63, %v11670_v50  ;;  %v15154_v12 = vmax.f32 %v11846_v14, %v11850_v33 }
 0x4f1   : > { %v11929_v6 = vpop.eup %9811 }
 0x4f2   : > { %2799 = vmax.xlane.f32.xlu1 %v15150_v30  ;;  %v11934_v16 = vpop.f32.mrb[104].mxu1  ;;  %v11938_v11 = vadd.f32 %v11929_v6, %v11922_v49 }
 0x4f3   : > { %15151 = vst [vmem:[#allocation162_spill] sm:$0xff] %v11934_v16  ;;  %v11940_v36 = vpop.f32.mrb[105].mxu1 }
 0x4f4   : > { %15152 = vst [vmem:[#allocation163_spill] sm:$0xff] %v11940_v36  ;;  %v2819_v26 = vmax.f32 %v11934_v16, %v11940_v36  ;;  %1798 = vmax.xlane.f32.xlu0 %v15153_v0  ;;  %v15156_v0 = vmax.f32 %v11749_v15, %v11751_v41 }
 0x4f6   : > { %2805 = vmax.xlane.f32.xlu1 %v15154_v12 }
 0x4f8   : > { %v11950_v30 = vpop.eup %9813  ;;  %1810 = vmax.xlane.f32.xlu0 %v15155_v62  ;;  %v15159_v62 = vmax.f32 %v11786_v58, %v11788_v2  ;;  %v11998_v2 = vpop.permute.xlu1 %9687 }
 0x4f9   : > { %v11955_v57 = vpop.eup %9815  ;;  %15165 = vst [vmem:[#allocation171_spill] sm:$0xff] %v11998_v2 }
 0x4fa   : > { %2808 = vmax.xlane.f32.xlu1 %v2807_v29  ;;  %v11959_v36 = vadd.f32 %v11955_v57, %v11950_v30 }
 0x4fc   : > { %1819 = vmax.xlane.f32.xlu0 %v15156_v0 }
 0x4fe   : > { %2814 = vmax.xlane.f32.xlu1 %v2813_v19  ;;  %v11964_v16 = vpop.f32.mrb[106].mxu1 }
 0x4ff   : > { %15157 = vst [vmem:[#allocation164_spill] sm:$0xff] %v11964_v16  ;;  %v11966_v12 = vpop.f32.mrb[107].mxu1 }
 0x500   : > { %15158 = vst [vmem:[#allocation165_spill] sm:$0xff] %v11966_v12  ;;  %v2822_v31 = vmax.f32 %v11964_v16, %v11966_v12  ;;  %2793 = vmax.xlane.f32.xlu0 %v15159_v62  ;;  %v11984_v12 = vpop.permute.xlu0 %5808 }
 0x501   : > { %15164 = vst [vmem:[#allocation170_spill] sm:$0xff] %v11984_v12 }
 0x502   : > { %2817 = vmax.xlane.f32.xlu1 %v2816_v1  ;;  %v11973_v29 = vpop.f32.mrb[108].mxu1 }
 0x503   : > { %15160 = vst [vmem:[#allocation166_spill] sm:$0xff] %v11973_v29  ;;  %v11975_v7 = vpop.f32.mrb[109].mxu1 }
 0x504   : > { %15161 = vst [vmem:[#allocation167_spill] sm:$0xff] %v11975_v7 }
 0x506   : > { %2023 = vadd.xlane.f32.xlu1 %v11866_v8 }
 0x50a   : > { %2820 = vmax.xlane.f32.xlu1 %v2819_v26 }
 0x50e   : > { %2823 = vmax.xlane.f32.xlu1 %v2822_v31 }
 0x512   : > { %v11980_v19 = vpop.f32.mrb[110].mxu1 }
 0x513   : > { %15162 = vst [vmem:[#allocation168_spill] sm:$0xff] %v11980_v19  ;;  %v11982_v41 = vpop.f32.mrb[111].mxu1 }
 0x514   : > { %15163 = vst [vmem:[#allocation169_spill] sm:$0xff] %v11982_v41 }
 0x516   : > { %v11988_v62 = vpop.f32.mrb[112].mxu1  ;;  %9692 = vrot.lane.b32.xlu0 %v11021_v28, %s10638_s16 }
 0x517   : > { %v11992_v16 = vpop.f32.mrb[113].mxu1 }
 0x518   : > { %v1733_v31 = vpop.xlane.xlu0 %1732 }
 0x519   : > { %v1827_v26 = vsub.f32 %v11420_v47, %v1733_v31  ;;  %v1828_v0 = vsub.f32 %v11426_v9, %v1733_v31 }
 0x51a   : > { %v12000_v12 = vpop.f32.mrb[114].mxu1 }
 0x51b   : > { %v1891_v1 = vmul.f32 1.442695, %v1827_v26  ;;  %v1893_v58 = vmul.f32 1.442695, %v1828_v0  ;;  %v12002_v15 = vpop.f32.mrb[115].mxu1 }
 0x51c   : > { %v1739_v33 = vpop.xlane.xlu0 %1738 }
 0x51d   : > { %9817 = vpow2.f32 %v1891_v1  ;;  %v1831_v8 = vsub.f32 %v11443_v52, %v1739_v33  ;;  %v1832_v14 = vsub.f32 %v11447_v45, %v1739_v33  ;;  %v9564_v33 = vunpack.i.l.bf16 %v11167_v43 }
 0x51e   : > { %9819 = vpow2.f32 %v1893_v58  ;;  %v1778_v47 = vpop.xlane.xlu1 %1777  ;;  %v12008_v9 = vpop.f32.mrb[116].mxu1  ;;  %v9565_v58 = vunpack.i.h.bf16 %v11167_v43 }
 0x51f   : > { %v1899_v31 = vmul.f32 1.442695, %v1831_v8  ;;  %v1901_v2 = vmul.f32 1.442695, %v1832_v14  ;;  %v1857_v26 = vsub.f32 %v11594_v54, %v1778_v47  ;;  %v1858_v0 = vsub.f32 %v11596_v17, %v1778_v47  ;;  %v12012_v50 = vpop.f32.mrb[117].mxu1  ;;  %v15166_v8 = vld [vmem:[#allocation86_spill] sm:$0xff] }
 0x520   : > { %v1742_v1 = vpop.xlane.xlu0 %1741 }
 0x521   : > { %9821 = vpow2.f32 %v1899_v31  ;;  %v1951_v52 = vmul.f32 1.442695, %v1857_v26  ;;  %v1953_v63 = vmul.f32 1.442695, %v1858_v0  ;;  %v1833_v45 = vsub.f32 %v11455_v39, %v1742_v1 }
 0x522   : > { %9823 = vpow2.f32 %v1901_v2  ;;  %v1834_v54 = vsub.f32 %v11462_v18, %v1742_v1  ;;  %v1784_v14 = vpop.xlane.xlu1 %1783  ;;  %v9575_v31 = vunpack.i.h.bf16 %v15168_v27  ;;  %v9574_v26 = vunpack.i.l.bf16 %v15168_v27 }
 0x523   : > { %9825 = vpow2.f32 %v1951_v52  ;;  %v1903_v17 = vmul.f32 1.442695, %v1833_v45  ;;  %v1861_v47 = vsub.f32 %v15166_v8, %v1784_v14  ;;  %v1862_v28 = vsub.f32 %v15167_v34, %v1784_v14  ;;  %v15169_v34 = vld [vmem:[#allocation92_spill] sm:$0xff]  ;;  %v15170_v8 = vld [vmem:[#allocation93_spill] sm:$0xff] }
 0x524   : > { %9827 = vpow2.f32 %v1953_v63  ;;  %v1905_v39 = vmul.f32 1.442695, %v1834_v54  ;;  %v1745_v0 = vpop.xlane.xlu0 %1744  ;;  %v9273_v63 = vpack.c.bf16 %v9565_v58, %v9564_v33  ;;  %v9276_v54 = vpack.c.bf16 %v9575_v31, %v9574_v26  ;;  %v15173_v31 = vld [vmem:[#allocation98_spill] sm:$0xff] }
 0x525   : > { %9829 = vpow2.f32 %v1903_v17  ;;  %v1959_v13 = vmul.f32 1.442695, %v1861_v47  ;;  %v1961_v43 = vmul.f32 1.442695, %v1862_v28  ;;  %v1835_v2 = vsub.f32 %v11466_v48, %v1745_v0 }
 0x526   : > { %9831 = vpow2.f32 %v1905_v39  ;;  %v1836_v18 = vsub.f32 %v11470_v37, %v1745_v0  ;;  %v1790_v1 = vpop.xlane.xlu1 %1789  ;;  %v15171_v39 = vld [vmem:[#allocation26_spill] sm:$0xff] }
 0x527   : > { %v9818_v52 = vpop.eup %9817  ;;  %9833 = vpow2.f32 %v1959_v13  ;;  %v1907_v45 = vmul.f32 1.442695, %v1835_v2  ;;  %v1865_v14 = vsub.f32 %v15169_v34, %v1790_v1  ;;  %v1866_v32 = vsub.f32 %v15170_v8, %v1790_v1  ;;  %v15172_v13 = vld [vmem:[#allocation67_spill] sm:$0xff] }
 0x528   : > { %v9820_v27 = vpop.eup %9819  ;;  %9835 = vpow2.f32 %v1961_v43  ;;  %v1909_v17 = vmul.f32 1.442695, %v1836_v18  ;;  %v1748_v47 = vpop.xlane.xlu0 %1747  ;;  %v9585_v0 = vunpack.i.h.bf16 %v15171_v39  ;;  %v15174_v43 = vld [vmem:[#allocation100_spill] sm:$0xff] }
 0x529   : > { %9837 = vpow2.f32 %v1907_v45  ;;  %v1967_v28 = vmul.f32 1.442695, %v1865_v14  ;;  %v1969_v48 = vmul.f32 1.442695, %v1866_v32  ;;  %2179 = vmatprep.mubr.f32.mxu0 %v9820_v27  ;;  %v1837_v37 = vsub.f32 %v11478_v51, %v1748_v47  ;;  %v15175_v45 = vld [vmem:[#allocation28_spill] sm:$0xff] }
 0x52a   : > { %9839 = vpow2.f32 %v1909_v17  ;;  %v1838_v2 = vsub.f32 %v15172_v13, %v1748_v47  ;;  %v1796_v34 = vpop.xlane.xlu1 %1795  ;;  %2180 = vmatmul.mubr.f32.vlgmr.msra.gmra.mrb[54].mxu0 %v9818_v52  ;;  %v12031_v1 = vadd.f32 %v9820_v27, %v9818_v52  ;;  %v9584_v32 = vunpack.i.l.bf16 %v15171_v39 }
 0x52b   : > { %v9822_v58 = vpop.eup %9821  ;;  %9841 = vpow2.f32 %v1967_v28  ;;  %v1911_v33 = vmul.f32 1.442695, %v1837_v37  ;;  %v1869_v26 = vsub.f32 %v15173_v31, %v1796_v34  ;;  %v1870_v18 = vsub.f32 %v15174_v43, %v1796_v34  ;;  %9274 = vmatpush1.bf16.msra.mxu0 %v9273_v63  ;;  %2184 = vmatprep.mubr.f32.mxu0 %v11856_v22 }
 0x52c   : > { %v9824_v51 = vpop.eup %9823  ;;  %v9595_v14 = vunpack.i.h.bf16 %v15175_v45  ;;  %9843 = vpow2.f32 %v1969_v48  ;;  %v1913_v8 = vmul.f32 1.442695, %v1838_v2  ;;  %v1751_v17 = vpop.xlane.xlu0 %1750  ;;  %v15176_v52 = vmov 0.0|0.0  }
 0x52d   : > { %9275 = vmatprep.subr.bf16.mxu0 %v15176_v52  ;;  %v12039_v27 = vpop.eup %9825  ;;  %9845 = vpow2.f32 %v1911_v33  ;;  %v1975_v47 = vmul.f32 1.442695, %v1869_v26  ;;  %v1977_v28 = vmul.f32 1.442695, %v1870_v18  ;;  %v1839_v37 = vsub.f32 %v11488_v46, %v1751_v17 }
 0x52e   : > { %v12042_v63 = vpop.eup %9827  ;;  %v9594_v22 = vunpack.i.l.bf16 %v15175_v45  ;;  %9847 = vpow2.f32 %v1913_v8  ;;  %v1840_v39 = vsub.f32 %v11494_v59, %v1751_v17  ;;  %v12046_v13 = vpop.xlane.xlu1 %1801  ;;  %2185 = vmatmul.mubr.f32.gmra.mrb[56].mxu0 %v11852_v10  ;;  %v12049_v48 = vadd.f32 %v9824_v51, %v9822_v58 }
 0x52f   : > { %v9830_v2 = vpop.eup %9829  ;;  %9849 = vpow2.f32 %v1975_v47  ;;  %v1915_v34 = vmul.f32 1.442695, %v1839_v37  ;;  %9277 = vmatpush1.bf16.msra.mxu0 %v9276_v54  ;;  %2189 = vmatprep.mubr.f32.mxu0 %v9824_v51  ;;  %v12054_v59 = vadd.f32 %v12042_v63, %v12039_v27  ;;  %v9279_v10 = vpack.c.bf16 %v9585_v0, %v9584_v32  ;;  %v15179_v32 = vld [vmem:[#allocation110_spill] sm:$0xff] }
 0x530   : > { %v9832_v33 = vpop.eup %9831  ;;  %9851 = vpow2.f32 %v1977_v28  ;;  %v1917_v46 = vmul.f32 1.442695, %v1840_v39  ;;  %v1754_v31 = vpop.xlane.xlu0 %1753  ;;  %9278 = vmatprep.subr.bf16.mxu0 %v15176_v52  ;;  %v9282_v54 = vpack.c.bf16 %v9595_v14, %v9594_v22  ;;  %v15177_v28 = vld [vmem:[#allocation36_spill] sm:$0xff] }
 0x531   : > { %v12056_v26 = vpop.eup %9833  ;;  %9853 = vpow2.f32 %v1915_v34  ;;  %v1841_v43 = vsub.f32 %v11499_v53, %v1754_v31  ;;  %v1842_v51 = vsub.f32 %v11504_v4, %v1754_v31  ;;  %v2028_v17 = vadd.f32 %v9832_v33, %v9830_v2 }
 0x532   : > { %v12059_v18 = vpop.eup %9835  ;;  %9855 = vpow2.f32 %v1917_v46  ;;  %v1805_v45 = vpop.xlane.xlu1 %1804  ;;  %2190 = vmatmul.mubr.f32.gmra.mrb[58].mxu0 %v9822_v58  ;;  %v9605_v37 = vunpack.i.h.bf16 %v15177_v28  ;;  %v9604_v4 = vunpack.i.l.bf16 %v15177_v28 }
 0x533   : > { %v12062_v8 = vpop.f32.mrb[118].mxu1  ;;  %v9838_v47 = vpop.eup %9837  ;;  %v1919_v39 = vmul.f32 1.442695, %v1841_v43  ;;  %v1875_v0 = vsub.f32 %v15178_v25, %v1805_v45  ;;  %v1876_v34 = vsub.f32 %v15179_v32, %v1805_v45  ;;  %9280 = vmatpush1.bf16.msra.mxu0 %v9279_v10  ;;  %2194 = vmatprep.mubr.f32.mxu0 %v9832_v33  ;;  %v1921_v22 = vmul.f32 1.442695, %v1842_v51 }
 0x534   : > { %v12067_v53 = vpop.f32.mrb[119].mxu1  ;;  %v9840_v14 = vpop.eup %9839  ;;  %2029 = vadd.xlane.f32.xlu1 %v2028_v17  ;;  %9281 = vmatprep.subr.bf16.mxu0 %v15176_v52  ;;  %v12075_v25 = vadd.f32 %v12059_v18, %v12056_v26  ;;  %v15181_v51 = vmax.f32 %v11834_v38, %v11836_v44 }
 0x535   : > { %v1757_v46 = vpop.xlane.xlu0 %1756  ;;  %v12077_v31 = vpop.eup %9841  ;;  %9857 = vpow2.f32 %v1919_v39  ;;  %v1987_v33 = vmul.f32 1.442695, %v1875_v0  ;;  %v1989_v10 = vmul.f32 1.442695, %v1876_v34  ;;  %v12090_v58 = vadd.f32 %v9840_v14, %v9838_v47  ;;  %v15183_v0 = vld [vmem:[#allocation34_spill] sm:$0xff] }
 0x536   : > { %15180 = vst [vmem:[#allocation86_spill] sm:$0xff] %v12077_v31  ;;  %v1843_v43 = vsub.f32 %v11511_v60, %v1757_v46  ;;  %2802 = vmax.xlane.f32.xlu0 %v15181_v51  ;;  %v12083_v45 = vpop.eup %9843  ;;  %9859 = vpow2.f32 %v1921_v22  ;;  %v1844_v17 = vsub.f32 %v11516_v3, %v1757_v46  ;;  %v12086_v28 = vpop.xlane.xlu1 %1807  ;;  %2195 = vmatmul.mubr.f32.gmra.mrb[60].mxu0 %v9830_v2  ;;  %v9615_v34 = vunpack.i.h.bf16 %v15183_v0 }
 0x537   : > { %15182 = vst [vmem:[#allocation88_spill] sm:$0xff] %v12086_v28  ;;  %v12088_v32 = vpop.f32.mrb[120].mxu1  ;;  %v9846_v39 = vpop.eup %9845  ;;  %v9614_v60 = vunpack.i.l.bf16 %v15183_v0  ;;  %9861 = vpow2.f32 %v1987_v33  ;;  %9283 = vmatpush1.bf16.msra.mxu0 %v9282_v54  ;;  %2199 = vmatprep.mubr.f32.mxu0 %v9840_v14  ;;  %v15184_v2 = vmax.f32 %v11973_v29, %v11975_v7  ;;  %v12104_v33 = vadd.f32 %v12083_v45, %v12077_v31  ;;  %v15187_v28 = vld [vmem:[#allocation117_spill] sm:$0xff] }
 0x538   : > { %v1923_v44 = vmul.f32 1.442695, %v1843_v43  ;;  %v12094_v51 = vpop.f32.mrb[121].mxu1  ;;  %v9848_v22 = vpop.eup %9847  ;;  %9863 = vpow2.f32 %v1989_v10  ;;  %v1925_v3 = vmul.f32 1.442695, %v1844_v17  ;;  %9284 = vmatprep.subr.bf16.mxu0 %v15176_v52  ;;  %v9285_v14 = vpack.c.bf16 %v9605_v37, %v9604_v4 }
 0x539   : > { %2826 = vmax.xlane.f32.xlu1 %v15184_v2  ;;  %v1763_v38 = vpop.xlane.xlu0 %1762  ;;  %v12106_v54 = vpop.eup %9849  ;;  %v15186_v43 = vmax.f32 %v11884_v61, %v11886_v35  ;;  %v2034_v46 = vadd.f32 %v9848_v22, %v9846_v39  ;;  %v9288_v29 = vpack.c.bf16 %v9615_v34, %v9614_v60  ;;  %v15189_v35 = vld [vmem:[#allocation46_spill] sm:$0xff]  ;;  %v15192_v60 = vld [vmem:[#allocation76_spill] sm:$0xff] }
 0x53a   : > { %15185 = vst [vmem:[#allocation31_spill] sm:$0xff] %v12106_v54  ;;  %9865 = vpow2.f32 %v1923_v44  ;;  %v1847_v10 = vsub.f32 %v11535_v21, %v1763_v38  ;;  %v12112_v17 = vpop.eup %9851  ;;  %v1848_v0 = vsub.f32 %v11541_v23, %v1763_v38  ;;  %v1814_v2 = vpop.xlane.xlu1 %1813  ;;  %2200 = vmatmul.mubr.f32.gmra.mrb[62].mxu0 %v9838_v47  ;;  %v15188_v44 = vld [vmem:[#allocation119_spill] sm:$0xff]  ;;  %v9624_v61 = vunpack.i.l.bf16 %v15189_v35 }
 0x53b   : > { %2811 = vmax.xlane.f32.xlu0 %v15186_v43  ;;  %9867 = vpow2.f32 %v1925_v3  ;;  %v9854_v7 = vpop.eup %9853  ;;  %v1881_v37 = vsub.f32 %v15187_v28, %v1814_v2  ;;  %v1882_v4 = vsub.f32 %v15188_v44, %v1814_v2  ;;  %9286 = vmatpush1.bf16.msra.mxu0 %v9285_v14  ;;  %v9625_v43 = vunpack.i.h.bf16 %v15189_v35  ;;  %v15193_v35 = vld [vmem:[#allocation58_spill] sm:$0xff] }
 0x53c   : > { %v1931_v31 = vmul.f32 1.442695, %v1847_v10  ;;  %2204 = vmatprep.mubr.f32.mxu0 %v9848_v22  ;;  %v9856_v21 = vpop.eup %9855  ;;  %v1933_v3 = vmul.f32 1.442695, %v1848_v0  ;;  %v15190_v23 = vmax.f32 %v11980_v19, %v11982_v41  ;;  %9287 = vmatprep.subr.bf16.mxu0 %v15176_v52  ;;  %v12125_v47 = vadd.f32 %v12112_v17, %v12106_v54  ;;  %v15194_v10 = vld [vmem:[#allocation77_spill] sm:$0xff] }
 0x53d   : > { %v1769_v38 = vpop.xlane.xlu0 %1768  ;;  %v1999_v28 = vmul.f32 1.442695, %v1881_v37  ;;  %v2001_v34 = vmul.f32 1.442695, %v1882_v4  ;;  %v9635_v14 = vunpack.i.h.bf16 %v15193_v35  ;;  %v12131_v44 = vadd.f32 %v9856_v21, %v9854_v7  ;;  %v15195_v19 = vld [vmem:[#allocation121_spill] sm:$0xff]  ;;  %v15196_v37 = vld [vmem:[#allocation122_spill] sm:$0xff] }
 0x53e   : > { %2829 = vmax.xlane.f32.xlu1 %v15190_v23  ;;  %15191 = vst [vmem:[#allocation92_spill] sm:$0xff] %v12125_v47  ;;  %9869 = vpow2.f32 %v1931_v31  ;;  %v1851_v22 = vsub.f32 %v15192_v60, %v1769_v38  ;;  %v1852_v0 = vsub.f32 %v15194_v10, %v1769_v38  ;;  %v1817_v2 = vpop.xlane.xlu1 %1816  ;;  %2205 = vmatmul.mubr.f32.gmra.mrb[64].mxu0 %v9846_v39 }
 0x53f   : > { %2020 = vadd.xlane.f32.xlu0 %v12031_v1  ;;  %9871 = vpow2.f32 %v1933_v3  ;;  %v9858_v23 = vpop.eup %9857  ;;  %v1883_v31 = vsub.f32 %v15195_v19, %v1817_v2  ;;  %v1884_v4 = vsub.f32 %v15196_v37, %v1817_v2  ;;  %9289 = vmatpush1.bf16.msra.mxu0 %v9288_v29  ;;  %v9634_v1 = vunpack.i.l.bf16 %v15193_v35  ;;  %v15197_v19 = vld [vmem:[#allocation81_spill] sm:$0xff] }
 0x540   : > { %9873 = vpow2.f32 %v1999_v28  ;;  %v1939_v41 = vmul.f32 1.442695, %v1851_v22  ;;  %2209 = vmatprep.mubr.f32.mxu0 %v9856_v21  ;;  %v9860_v60 = vpop.eup %9859  ;;  %v9291_v54 = vpack.c.bf16 %v9625_v43, %v9624_v61  ;;  %v1941_v3 = vmul.f32 1.442695, %v1852_v0  ;;  %9290 = vmatprep.subr.bf16.mxu0 %v15176_v52  ;;  %v15198_v21 = vld [vmem:[#allocation63_spill] sm:$0xff]  ;;  %v15199_v61 = vld [vmem:[#allocation82_spill] sm:$0xff] }
 0x541   : > { %9875 = vpow2.f32 %v2001_v34  ;;  %v1775_v38 = vpop.xlane.xlu0 %1774  ;;  %v12137_v39 = vpop.eup %9861  ;;  %v2003_v28 = vmul.f32 1.442695, %v1883_v31  ;;  %v2005_v22 = vmul.f32 1.442695, %v1884_v4  ;;  %v9645_v35 = vunpack.i.h.bf16 %v15198_v21  ;;  %v15201_v37 = vld [vmem:[#allocation129_spill] sm:$0xff] }
 0x542   : > { %2035 = vadd.xlane.f32.xlu1 %v2034_v46  ;;  %9877 = vpow2.f32 %v1939_v41  ;;  %v1855_v10 = vsub.f32 %v15197_v19, %v1775_v38  ;;  %v12141_v29 = vpop.eup %9863  ;;  %v1856_v43 = vsub.f32 %v15199_v61, %v1775_v38  ;;  %v1823_v46 = vpop.xlane.xlu1 %1822  ;;  %2210 = vmatmul.mubr.f32.gmra.mrb[66].mxu0 %v9854_v7  ;;  %v2040_v34 = vadd.f32 %v9860_v60, %v9858_v23  ;;  %v15200_v41 = vld [vmem:[#allocation127_spill] sm:$0xff]  ;;  %v15203_v61 = vld [vmem:[#allocation130_spill] sm:$0xff] }
 0x543   : > { %2026 = vadd.xlane.f32.xlu0 %v12049_v48  ;;  %9879 = vpow2.f32 %v1941_v3  ;;  %v1887_v31 = vsub.f32 %v15200_v41, %v1823_v46  ;;  %v1888_v4 = vsub.f32 %v15201_v37, %v1823_v46  ;;  %9292 = vmatpush1.bf16.msra.mxu0 %v9291_v54  ;;  %v9644_v19 = vunpack.i.l.bf16 %v15198_v21  ;;  %v15204_v46 = vld [vmem:[#allocation131_spill] sm:$0xff] }
 0x544   : > { %v9866_v0 = vpop.eup %9865  ;;  %9881 = vpow2.f32 %v2003_v28  ;;  %v1947_v2 = vmul.f32 1.442695, %v1855_v10  ;;  %2214 = vmatprep.mubr.f32.mxu0 %v9860_v60  ;;  %v1949_v47 = vmul.f32 1.442695, %v1856_v43  ;;  %v15202_v3 = vmax.f32 %v12000_v12, %v12002_v15  ;;  %9293 = vmatprep.subr.bf16.mxu0 %v15176_v52 }
 0x545   : > { %v9868_v48 = vpop.eup %9867  ;;  %9883 = vpow2.f32 %v2005_v22  ;;  %v12154_v7 = vadd.f32 %v12141_v29, %v12137_v39  ;;  %v9294_v38 = vpack.c.bf16 %v9635_v14, %v9634_v1  ;;  %v2011_v28 = vmul.f32 1.442695, %v1887_v31  ;;  %v15205_v31 = vld [vmem:[#allocation70_spill] sm:$0xff] }
 0x546   : > { %2835 = vmax.xlane.f32.xlu1 %v15202_v3  ;;  %9885 = vpow2.f32 %v1947_v2  ;;  %v2013_v54 = vmul.f32 1.442695, %v1888_v4  ;;  %v1826_v60 = vpop.xlane.xlu1 %1825  ;;  %2215 = vmatmul.mubr.f32.gmra.mrb[68].mxu0 %v9858_v23  ;;  %v12157_v22 = vpop.f32.mrb[122].mxu1  ;;  %v2043_v10 = vadd.f32 %v9868_v48, %v9866_v0  ;;  %v9297_v2 = vpack.c.bf16 %v9645_v35, %v9644_v19 }
 0x547   : > { %2032 = vadd.xlane.f32.xlu0 %v12090_v58  ;;  %9887 = vpow2.f32 %v1949_v47  ;;  %v1889_v43 = vsub.f32 %v15203_v61, %v1826_v60  ;;  %v1890_v41 = vsub.f32 %v15204_v46, %v1826_v60  ;;  %9295 = vmatpush1.bf16.msra.mxu0 %v9294_v38  ;;  %v12161_v14 = vpop.f32.mrb[123].mxu1  ;;  %v9650_v58 = vunpack.i.h.bf16 %v15205_v31 }
 0x548   : > { %v9870_v21 = vpop.eup %9869  ;;  %9889 = vpow2.f32 %v2011_v28  ;;  %2219 = vmatprep.mubr.f32.mxu0 %v9868_v48  ;;  %9296 = vmatprep.subr.bf16.mxu0 %v15176_v52  ;;  %v9649_v37 = vunpack.i.l.bf16 %v15205_v31  ;;  %v15206_v48 = vmax.f32 %v11988_v62, %v11992_v16  ;;  %v15207_v61 = vmax.f32 %v12008_v9, %v12012_v50 }
 0x549   : > { %v9872_v1 = vpop.eup %9871  ;;  %9891 = vpow2.f32 %v2013_v54  ;;  %v2015_v4 = vmul.f32 1.442695, %v1889_v43  ;;  %v2017_v3 = vmul.f32 1.442695, %v1890_v41 }
 0x54a   : > { %2041 = vadd.xlane.f32.xlu1 %v2040_v34  ;;  %v12167_v23 = vpop.eup %9873  ;;  %v2049_v35 = vadd.f32 %v9872_v1, %v9870_v21  ;;  %2220 = vmatmul.mubr.f32.gmra.mrb[70].mxu0 %v9866_v0  ;;  %v12175_v34 = vpop.f32.mrb[124].mxu1  ;;  %v15209_v0 = vmax.f32 %v12062_v8, %v12067_v53 }
 0x54b   : > { %2832 = vmax.xlane.f32.xlu0 %v15206_v48  ;;  %v12173_v19 = vpop.eup %9875  ;;  %9893 = vpow2.f32 %v2015_v4  ;;  %9298 = vmatpush1.bf16.msra.mxu0 %v9297_v2  ;;  %v12178_v28 = vpop.f32.mrb[125].mxu1  ;;  %v9300_v2 = vpack.c.bf16 %v9650_v58, %v9649_v37  ;;  %v15210_v37 = vld [vmem:[#allocation84_spill] sm:$0xff] }
 0x54c   : > { %v9878_v38 = vpop.eup %9877  ;;  %2224 = vmatprep.mubr.f32.mxu0 %v11904_v24  ;;  %v12182_v54 = vadd.f32 %v12173_v19, %v12167_v23  ;;  %9895 = vpow2.f32 %v2017_v3  ;;  %9299 = vmatprep.subr.bf16.mxu0 %v15176_v52  ;;  %v15208_v24 = vld [vmem:[#allocation75_spill] sm:$0xff] }
 0x54d   : > { %v9880_v60 = vpop.eup %9879  ;;  %v9655_v46 = vunpack.i.h.bf16 %v15208_v24  ;;  %v9654_v41 = vunpack.i.l.bf16 %v15208_v24  ;;  %v9660_v24 = vunpack.i.h.bf16 %v15210_v37 }
 0x54e   : > { %2838 = vmax.xlane.f32.xlu1 %v15207_v61  ;;  %v12190_v43 = vpop.eup %9881  ;;  %v2055_v31 = vadd.f32 %v9880_v60, %v9878_v38  ;;  %2225 = vmatmul.mubr.f32.gmra.mrb[72].mxu0 %v11899_v40  ;;  %v9659_v40 = vunpack.i.l.bf16 %v15210_v37 }
 0x54f   : > { %2038 = vadd.xlane.f32.xlu0 %v12131_v44  ;;  %v12195_v4 = vpop.eup %9883  ;;  %9301 = vmatpush1.bf16.msra.mxu0 %v9300_v2  ;;  %v9303_v58 = vpack.c.bf16 %v9655_v46, %v9654_v41 }
 0x550   : > { %v9886_v3 = vpop.eup %9885  ;;  %2229 = vmatprep.mubr.f32.mxu0 %v9872_v1  ;;  %v12200_v48 = vadd.f32 %v12195_v4, %v12190_v43  ;;  %9302 = vmatprep.subr.bf16.mxu0 %v15176_v52  ;;  %v9306_v41 = vpack.c.bf16 %v9660_v24, %v9659_v40 }
 0x551   : > { %v9888_v61 = vpop.eup %9887 }
 0x552   : > { %2841 = vmax.xlane.f32.xlu1 %v15209_v0  ;;  %v12206_v44 = vpop.eup %9889  ;;  %v12210_v1 = vadd.f32 %v9888_v61, %v9886_v3  ;;  %2230 = vmatmul.mubr.f32.gmra.mrb[74].mxu0 %v9870_v21 }
 0x553   : > { %2044 = vadd.xlane.f32.xlu0 %v2043_v10  ;;  %v12212_v2 = vpop.eup %9891  ;;  %9304 = vmatpush1.bf16.msra.mxu0 %v9303_v58  ;;  %v15211_v10 = vld [vmem:[#allocation97_spill] sm:$0xff]  ;;  %v15214_v58 = vld [vmem:[#allocation99_spill] sm:$0xff] }
 0x554   : > { %2234 = vmatprep.mubr.f32.mxu0 %v11929_v6  ;;  %v12217_v0 = vadd.f32 %v12212_v2, %v12206_v44  ;;  %9305 = vmatprep.subr.bf16.mxu0 %v15176_v52  ;;  %v9665_v37 = vunpack.i.h.bf16 %v15211_v10  ;;  %v9664_v47 = vunpack.i.l.bf16 %v15211_v10  ;;  %v9670_v24 = vunpack.i.h.bf16 %v15214_v58 }
 0x555   : > { %v12221_v46 = vpop.eup %9893 }
 0x556   : > { %2047 = vadd.xlane.f32.xlu1 %v11910_v42  ;;  %v12225_v21 = vpop.eup %9895  ;;  %2235 = vmatmul.mubr.f32.gmra.mrb[76].mxu0 %v11922_v49  ;;  %v15213_v42 = vmax.f32 %v12088_v32, %v12094_v51  ;;  %v9309_v40 = vpack.c.bf16 %v9665_v37, %v9664_v47  ;;  %v15218_v47 = vld [vmem:[#allocation126_spill] sm:$0xff] }
 0x557   : > { %2050 = vadd.xlane.f32.xlu0 %v2049_v35  ;;  %9307 = vmatpush1.bf16.msra.mxu0 %v9306_v41  ;;  %v12230_v6 = vadd.f32 %v12225_v21, %v12221_v46  ;;  %v9669_v35 = vunpack.i.l.bf16 %v15214_v58  ;;  %v15217_v41 = vmax.f32 %v12157_v22, %v12161_v14 }
 0x558   : > { %2239 = vmatprep.mubr.f32.mxu0 %v9880_v60  ;;  %9308 = vmatprep.subr.bf16.mxu0 %v15176_v52 }
 0x559   : > { %15212 = vst [vmem:[#allocation93_spill] sm:$0xff] %v12230_v6 }
 0x55a   : > { %2844 = vmax.xlane.f32.xlu1 %v15213_v42  ;;  %2240 = vmatmul.mubr.f32.gmra.mrb[78].mxu0 %v9878_v38  ;;  %v12238_v49 = vpop.f32.mrb[126].mxu1  ;;  %v9312_v42 = vpack.c.bf16 %v9670_v24, %v9669_v35  ;;  %v9674_v38 = vunpack.i.l.bf16 %v15218_v47  ;;  %v15221_v35 = vld [vmem:[#allocation140_spill] sm:$0xff] }
 0x55b   : > { %2056 = vadd.xlane.f32.xlu0 %v2055_v31  ;;  %15215 = vst [vmem:[#allocation26_spill] sm:$0xff] %v12238_v49  ;;  %9310 = vmatpush1.bf16.msra.mxu0 %v9309_v40  ;;  %v12241_v60 = vpop.f32.mrb[127].mxu1  ;;  %v9675_v31 = vunpack.i.h.bf16 %v15218_v47  ;;  %v9680_v40 = vunpack.i.h.bf16 %v15221_v35 }
 0x55c   : > { %2244 = vmatprep.mubr.f32.mxu0 %v11955_v57  ;;  %15216 = vst [vmem:[#allocation67_spill] sm:$0xff] %v12241_v60  ;;  %v2852_v10 = vmax.f32 %v12238_v49, %v12241_v60  ;;  %9311 = vmatprep.subr.bf16.mxu0 %v15176_v52 }
 0x55d   : > { %v9315_v24 = vpack.c.bf16 %v9675_v31, %v9674_v38  ;;  %v15229_v38 = vld [vmem:[#allocation106_spill] sm:$0xff] }
 0x55e   : > { %2847 = vmax.xlane.f32.xlu1 %v15217_v41  ;;  %2245 = vmatmul.mubr.f32.gmra.mrb[80].mxu0 %v11950_v30  ;;  %v12252_v37 = vpop.f32.mrb[128].mxu1  ;;  %v9679_v41 = vunpack.i.l.bf16 %v15221_v35  ;;  %v15222_v30 = vmax.f32 %v12175_v34, %v12178_v28 }
 0x55f   : > { %15219 = vst [vmem:[#allocation98_spill] sm:$0xff] %v12252_v37  ;;  %9313 = vmatpush1.bf16.msra.mxu0 %v9312_v42  ;;  %2249 = vmatprep.mubr.f32.mxu0 %v9888_v61  ;;  %v12254_v57 = vpop.f32.mrb[129].mxu1  ;;  %v15223_v61 = vld [vmem:[#allocation6_spill] sm:$0xff] }
 0x560   : > { %15220 = vst [vmem:[#allocation100_spill] sm:$0xff] %v12254_v57  ;;  %v2855_v58 = vmax.f32 %v12252_v37, %v12254_v57  ;;  %9314 = vmatprep.subr.bf16.mxu0 %v15176_v52  ;;  %v15260_v37 = vld [vmem:[#allocation161_spill] sm:$0xff] }
 0x562   : > { %2053 = vadd.xlane.f32.xlu1 %v11938_v11  ;;  %2250 = vmatmul.mubr.f32.gmra.mrb[82].mxu0 %v9886_v3  ;;  %v9318_v11 = vpack.c.bf16 %v9680_v40, %v9679_v41  ;;  %v12289_v41 = vpop.permute.xlu1 %9697 }
 0x563   : > { %9316 = vmatpush1.bf16.msra.mxu0 %v9315_v24  ;;  %2254 = vmatprep.mubr.f32.mxu0 %v12042_v63  ;;  %v1874_v24 = vsub.f32 %v15229_v38, %v12046_v13  ;;  %15230 = vst [vmem:[#allocation117_spill] sm:$0xff] %v12289_v41  ;;  %v15233_v41 = vld [vmem:[#allocation136_spill] sm:$0xff] }
 0x564   : > { %9317 = vmatprep.subr.bf16.mxu0 %v15176_v52 }
 0x566   : > { %2850 = vmax.xlane.f32.xlu1 %v15222_v30  ;;  %2255 = vmatmul.mubr.f32.gmra.mrb[84].mxu0 %v12039_v27 }
 0x567   : > { %9319 = vmatpush1.bf16.msra.mxu0 %v9318_v11 }
 0x568   : > { %4366 = vmatprep.subr.mxu0 %v15223_v61 }
 0x56a   : > { %2853 = vmax.xlane.f32.xlu1 %v2852_v10  ;;  %v12269_v42 = vpop.f32.mrb[130].mxu1  ;;  %v12282_v10 = vpop.permute.xlu0 %9682 }
 0x56b   : > { %15224 = vst [vmem:[#allocation28_spill] sm:$0xff] %v12269_v42  ;;  %v12271_v47 = vpop.f32.mrb[131].mxu1  ;;  %15228 = vst [vmem:[#allocation34_spill] sm:$0xff] %v12282_v10 }
 0x56c   : > { %15225 = vst [vmem:[#allocation36_spill] sm:$0xff] %v12271_v47  ;;  %v2858_v63 = vmax.f32 %v12269_v42, %v12271_v47 }
 0x56e   : > { %2059 = vadd.xlane.f32.xlu1 %v11959_v36  ;;  %v12276_v3 = vpop.f32.mrb[132].mxu1  ;;  %2859 = vmax.xlane.f32.xlu0 %v2858_v63 }
 0x56f   : > { %15226 = vst [vmem:[#allocation108_spill] sm:$0xff] %v12276_v3  ;;  %v12278_v31 = vpop.f32.mrb[133].mxu1 }
 0x570   : > { %15227 = vst [vmem:[#allocation110_spill] sm:$0xff] %v12278_v31  ;;  %v2861_v27 = vmax.f32 %v12276_v3, %v12278_v31 }
 0x572   : > { %2856 = vmax.xlane.f32.xlu1 %v2855_v58  ;;  %v1985_v58 = vmul.f32 1.442695, %v1874_v24 }
 0x575   : > { %v1781_v36 = vpop.xlane.xlu0 %1780 }
 0x576   : > { %2062 = vadd.xlane.f32.xlu1 %v12210_v1  ;;  %v1859_v35 = vsub.f32 %v11608_v5, %v1781_v36  ;;  %v1860_v40 = vsub.f32 %v11610_v56, %v1781_v36 }
 0x578   : > { %v1955_v30 = vmul.f32 1.442695, %v1859_v35  ;;  %v1957_v11 = vmul.f32 1.442695, %v1860_v40  ;;  %v15234_v40 = vld [vmem:[#allocation138_spill] sm:$0xff] }
 0x579   : > { %v1787_v61 = vpop.xlane.xlu0 %1786 }
 0x57a   : > { %2065 = vadd.xlane.f32.xlu1 %v12054_v59  ;;  %9897 = vpow2.f32 %v1955_v30  ;;  %v1863_v63 = vsub.f32 %v11628_v55, %v1787_v61  ;;  %v1864_v1 = vsub.f32 %v11634_v20, %v1787_v61  ;;  %v12294_v10 = vpop.f32.mrb[134].mxu1  ;;  %v15235_v30 = vld [vmem:[#allocation95_spill] sm:$0xff] }
 0x57b   : > { %15231 = vst [vmem:[#allocation119_spill] sm:$0xff] %v12294_v10  ;;  %9899 = vpow2.f32 %v1957_v11  ;;  %v2797_v38 = vpop.xlane.xlu1 %2796  ;;  %v12296_v5 = vpop.f32.mrb[135].mxu1 }
 0x57c   : > { %15232 = vst [vmem:[#allocation46_spill] sm:$0xff] %v12296_v5  ;;  %v1963_v56 = vmul.f32 1.442695, %v1863_v63  ;;  %v1965_v36 = vmul.f32 1.442695, %v1864_v1  ;;  %v2890_v35 = vsub.f32 %v15233_v41, %v2797_v38  ;;  %v2891_v52 = vsub.f32 %v15234_v40, %v2797_v38  ;;  %v15237_v63 = vld [vmem:[#allocation96_spill] sm:$0xff] }
 0x57d   : > { %9901 = vpow2.f32 %v1985_v58  ;;  %v1793_v55 = vpop.xlane.xlu0 %1792  ;;  %v15239_v58 = vld [vmem:[#allocation143_spill] sm:$0xff]  ;;  %v15240_v40 = vld [vmem:[#allocation145_spill] sm:$0xff] }
 0x57e   : > { %2862 = vmax.xlane.f32.xlu1 %v2861_v27  ;;  %9903 = vpow2.f32 %v1963_v56  ;;  %v2956_v20 = vmul.f32 1.442695, %v2890_v35  ;;  %v2958_v24 = vmul.f32 1.442695, %v2891_v52  ;;  %v1867_v11 = vsub.f32 %v15235_v30, %v1793_v55  ;;  %v12303_v61 = vpop.f32.mrb[136].mxu1  ;;  %v15241_v30 = vld [vmem:[#allocation101_spill] sm:$0xff] }
 0x57f   : > { %15236 = vst [vmem:[#allocation76_spill] sm:$0xff] %v12303_v61  ;;  %9905 = vpow2.f32 %v1965_v36  ;;  %v1868_v1 = vsub.f32 %v15237_v63, %v1793_v55  ;;  %v2800_v31 = vpop.xlane.xlu1 %2799  ;;  %v12306_v41 = vpop.f32.mrb[137].mxu1 }
 0x580   : > { %15238 = vst [vmem:[#allocation58_spill] sm:$0xff] %v12306_v41  ;;  %9907 = vpow2.f32 %v2956_v20  ;;  %v1971_v27 = vmul.f32 1.442695, %v1867_v11  ;;  %v2892_v38 = vsub.f32 %v15239_v58, %v2800_v31  ;;  %v2893_v59 = vsub.f32 %v15240_v40, %v2800_v31  ;;  %v15242_v20 = vld [vmem:[#allocation102_spill] sm:$0xff]  ;;  %v15243_v40 = vld [vmem:[#allocation149_spill] sm:$0xff] }
 0x581   : > { %9909 = vpow2.f32 %v2958_v24  ;;  %v1973_v52 = vmul.f32 1.442695, %v1868_v1  ;;  %v2867_v56 = vmax.f32 %v12303_v61, %v12306_v41  ;;  %v1799_v35 = vpop.xlane.xlu0 %1798  ;;  %v15244_v24 = vld [vmem:[#allocation151_spill] sm:$0xff] }
 0x582   : > { %2071 = vadd.xlane.f32.xlu1 %v12075_v25  ;;  %9911 = vpow2.f32 %v1971_v27  ;;  %v2960_v36 = vmul.f32 1.442695, %v2892_v38  ;;  %v2962_v55 = vmul.f32 1.442695, %v2893_v59  ;;  %v1871_v63 = vsub.f32 %v15241_v30, %v1799_v35  ;;  %v15245_v30 = vld [vmem:[#allocation114_spill] sm:$0xff] }
 0x583   : > { %9913 = vpow2.f32 %v1973_v52  ;;  %v1872_v11 = vsub.f32 %v15242_v20, %v1799_v35  ;;  %v2806_v3 = vpop.xlane.xlu1 %2805 }
 0x584   : > { %v9898_v58 = vpop.eup %9897  ;;  %9915 = vpow2.f32 %v2960_v36  ;;  %v1979_v31 = vmul.f32 1.442695, %v1871_v63  ;;  %v2896_v25 = vsub.f32 %v15243_v40, %v2806_v3  ;;  %v2897_v1 = vsub.f32 %v15244_v24, %v2806_v3  ;;  %v15246_v36 = vld [vmem:[#allocation115_spill] sm:$0xff]  ;;  %v15248_v24 = vld [vmem:[#allocation153_spill] sm:$0xff] }
 0x585   : > { %v9900_v57 = vpop.eup %9899  ;;  %9917 = vpow2.f32 %v2962_v55  ;;  %v1981_v41 = vmul.f32 1.442695, %v1872_v11  ;;  %v1811_v27 = vpop.xlane.xlu0 %1810  ;;  %v15247_v55 = vld [vmem:[#allocation152_spill] sm:$0xff] }
 0x586   : > { %2868 = vmax.xlane.f32.xlu1 %v2867_v56  ;;  %9919 = vpow2.f32 %v1979_v31  ;;  %v2968_v59 = vmul.f32 1.442695, %v2896_v25  ;;  %v2970_v38 = vmul.f32 1.442695, %v2897_v1  ;;  %v1879_v52 = vsub.f32 %v15245_v30, %v1811_v27  ;;  %2259 = vmatprep.mubr.f32.mxu0 %v9900_v57 }
 0x587   : > { %v12318_v35 = vpop.eup %9901  ;;  %9921 = vpow2.f32 %v1981_v41  ;;  %v1880_v63 = vsub.f32 %v15246_v36, %v1811_v27  ;;  %v2809_v20 = vpop.xlane.xlu1 %2808  ;;  %2260 = vmatmul.mubr.f32.gmra.mrb[86].mxu0 %v9898_v58  ;;  %v2067_v40 = vadd.f32 %v9900_v57, %v9898_v58  ;;  %v15249_v57 = vld [vmem:[#allocation124_spill] sm:$0xff] }
 0x588   : > { %v9904_v3 = vpop.eup %9903  ;;  %9923 = vpow2.f32 %v2968_v59  ;;  %v1995_v56 = vmul.f32 1.442695, %v1879_v52  ;;  %v2898_v11 = vsub.f32 %v15247_v55, %v2809_v20  ;;  %v2899_v31 = vsub.f32 %v15248_v24, %v2809_v20  ;;  %2264 = vmatprep.mubr.f32.mxu0 %v12059_v18  ;;  %v15250_v52 = vld [vmem:[#allocation125_spill] sm:$0xff] }
 0x589   : > { %v9906_v25 = vpop.eup %9905  ;;  %9925 = vpow2.f32 %v2970_v38  ;;  %v1997_v1 = vmul.f32 1.442695, %v1880_v63  ;;  %2068 = vadd.xlane.f32.xlu0 %v2067_v40  ;;  %v1820_v30 = vpop.xlane.xlu0 %1819  ;;  %v15251_v40 = vld [vmem:[#allocation158_spill] sm:$0xff] }
 0x58a   : > { %v12324_v41 = vpop.eup %9907  ;;  %9927 = vpow2.f32 %v1995_v56  ;;  %v2972_v27 = vmul.f32 1.442695, %v2898_v11  ;;  %v2974_v36 = vmul.f32 1.442695, %v2899_v31  ;;  %v1885_v58 = vsub.f32 %v15249_v57, %v1820_v30  ;;  %v15252_v56 = vld [vmem:[#allocation159_spill] sm:$0xff] }
 0x58b   : > { %v12327_v59 = vpop.eup %9909  ;;  %9929 = vpow2.f32 %v1997_v1  ;;  %v1886_v55 = vsub.f32 %v15250_v52, %v1820_v30  ;;  %v2815_v20 = vpop.xlane.xlu1 %2814  ;;  %2265 = vmatmul.mubr.f32.gmra.mrb[88].mxu0 %v12056_v26  ;;  %v2073_v18 = vadd.f32 %v9906_v25, %v9904_v3  ;;  %v15253_v1 = vmax.f32 %v12294_v10, %v12296_v5 }
 0x58c   : > { %v12331_v38 = vpop.eup %9911  ;;  %9931 = vpow2.f32 %v2972_v27  ;;  %v2007_v63 = vmul.f32 1.442695, %v1885_v58  ;;  %v2902_v24 = vsub.f32 %v15251_v40, %v2815_v20  ;;  %v2903_v11 = vsub.f32 %v15252_v56, %v2815_v20  ;;  %2269 = vmatprep.mubr.f32.mxu0 %v9906_v25  ;;  %v15254_v20 = vld [vmem:[#allocation134_spill] sm:$0xff] }
 0x58d   : > { %v9914_v31 = vpop.eup %9913  ;;  %9933 = vpow2.f32 %v2974_v36  ;;  %v2009_v57 = vmul.f32 1.442695, %v1886_v55  ;;  %2865 = vmax.xlane.f32.xlu0 %v15253_v1  ;;  %2074 = vadd.xlane.f32.xlu1 %v2073_v18  ;;  %v2794_v30 = vpop.xlane.xlu0 %2793  ;;  %v12340_v26 = vadd.f32 %v12327_v59, %v12324_v41  ;;  %v15256_v55 = vld [vmem:[#allocation105_spill] sm:$0xff]  ;;  %v15257_v18 = vld [vmem:[#allocation135_spill] sm:$0xff] }
 0x58e   : > { %v12342_v27 = vpop.eup %9915  ;;  %9935 = vpow2.f32 %v2007_v63  ;;  %v2980_v58 = vmul.f32 1.442695, %v2902_v24  ;;  %v2982_v52 = vmul.f32 1.442695, %v2903_v11  ;;  %v2888_v25 = vsub.f32 %v15254_v20, %v2794_v30  ;;  %v12345_v40 = vpop.f32.mrb[138].mxu1  ;;  %v15259_v20 = vld [vmem:[#allocation160_spill] sm:$0xff] }
 0x58f   : > { %15255 = vst [vmem:[#allocation77_spill] sm:$0xff] %v12345_v40  ;;  %v12347_v36 = vpop.eup %9917  ;;  %v1873_v56 = vsub.f32 %v15256_v55, %v12046_v13  ;;  %9937 = vpow2.f32 %v2009_v57  ;;  %v2889_v1 = vsub.f32 %v15257_v18, %v2794_v30  ;;  %v2818_v5 = vpop.xlane.xlu1 %2817  ;;  %2270 = vmatmul.mubr.f32.gmra.mrb[90].mxu0 %v9904_v3  ;;  %v2079_v63 = vadd.f32 %v9914_v31, %v12331_v38 }
 0x590   : > { %v12352_v10 = vpop.f32.mrb[139].mxu1  ;;  %v12355_v24 = vpop.eup %9919  ;;  %9939 = vpow2.f32 %v2980_v58  ;;  %v2952_v11 = vmul.f32 1.442695, %v2888_v25  ;;  %v2904_v61 = vsub.f32 %v15259_v20, %v2818_v5  ;;  %v2905_v47 = vsub.f32 %v15260_v37, %v2818_v5  ;;  %2274 = vmatprep.mubr.f32.mxu0 %v12083_v45  ;;  %v15263_v5 = vld [vmem:[#allocation88_spill] sm:$0xff] }
 0x591   : > { %15258 = vst [vmem:[#allocation121_spill] sm:$0xff] %v12352_v10  ;;  %v9922_v13 = vpop.eup %9921  ;;  %9941 = vpow2.f32 %v2982_v52  ;;  %v2954_v57 = vmul.f32 1.442695, %v2889_v1  ;;  %v2870_v3 = vmax.f32 %v12345_v40, %v12352_v10  ;;  %2077 = vadd.xlane.f32.xlu1 %v12104_v33  ;;  %v12365_v30 = vadd.f32 %v12347_v36, %v12342_v27  ;;  %v15264_v52 = vld [vmem:[#allocation112_spill] sm:$0xff]  ;;  %v15266_v33 = vld [vmem:[#allocation86_spill] sm:$0xff] }
 0x592   : > { %v12367_v58 = vpop.eup %9923  ;;  %9943 = vpow2.f32 %v2952_v11  ;;  %v2984_v25 = vmul.f32 1.442695, %v2904_v61  ;;  %v2986_v55 = vmul.f32 1.442695, %v2905_v47  ;;  %v12369_v37 = vpop.f32.mrb[140].mxu1  ;;  %v1878_v18 = vsub.f32 %v15264_v52, %v15263_v5 }
 0x593   : > { %15261 = vst [vmem:[#allocation122_spill] sm:$0xff] %v12365_v30  ;;  %15262 = vst [vmem:[#allocation81_spill] sm:$0xff] %v12369_v37  ;;  %v12371_v45 = vpop.eup %9925  ;;  %9945 = vpow2.f32 %v2954_v57  ;;  %v12375_v1 = vpop.xlane.xlu1 %2023  ;;  %2871 = vmax.xlane.f32.xlu0 %v2870_v3  ;;  %2275 = vmatmul.mubr.f32.gmra.mrb[92].mxu0 %v15266_v33  ;;  %v12381_v10 = vadd.f32 %v9922_v13, %v12355_v24  ;;  %v1983_v47 = vmul.f32 1.442695, %v1873_v56 }
 0x594   : > { %15265 = vst [vmem:[#allocation63_spill] sm:$0xff] %v12375_v1  ;;  %v12378_v20 = vpop.f32.mrb[141].mxu1  ;;  %v12383_v61 = vpop.eup %9927  ;;  %9947 = vpow2.f32 %v2984_v25  ;;  %2279 = vmatprep.mubr.f32.mxu0 %v9914_v31  ;;  %v12389_v57 = vadd.f32 %v12371_v45, %v12367_v58  ;;  %v15269_v31 = vld [vmem:[#allocation111_spill] sm:$0xff]  ;;  %v1993_v1 = vmul.f32 1.442695, %v1878_v18 }
 0x595   : > { %15267 = vst [vmem:[#allocation82_spill] sm:$0xff] %v12378_v20  ;;  %v2873_v11 = vmax.f32 %v12369_v37, %v12378_v20  ;;  %v12391_v3 = vpop.eup %9929  ;;  %9949 = vpow2.f32 %v2986_v55  ;;  %v1877_v25 = vsub.f32 %v15269_v31, %v15263_v5  ;;  %v15270_v55 = vld [vmem:[#allocation162_spill] sm:$0xff] }
 0x596   : > { %15268 = vst [vmem:[#allocation127_spill] sm:$0xff] %v12389_v57  ;;  %v12393_v52 = vpop.eup %9931  ;;  %v12397_v33 = vadd.f32 %v12391_v3, %v12383_v61  ;;  %9951 = vpow2.f32 %v1983_v47 }
 0x597   : > { %2874 = vmax.xlane.f32.xlu1 %v2873_v11  ;;  %v12399_v56 = vpop.eup %9933  ;;  %v2821_v20 = vpop.xlane.xlu1 %2820  ;;  %2080 = vadd.xlane.f32.xlu0 %v2079_v63  ;;  %v15271_v11 = vld [vmem:[#allocation163_spill] sm:$0xff]  ;;  %9953 = vpow2.f32 %v1993_v1 }
 0x598   : > { %2280 = vmatmul.mubr.f32.gmra.mrb[94].mxu0 %v12331_v38  ;;  %v12404_v37 = vpop.eup %9935  ;;  %v2906_v40 = vsub.f32 %v15270_v55, %v2821_v20  ;;  %v2907_v57 = vsub.f32 %v15271_v11, %v2821_v20  ;;  %v12411_v42 = vadd.f32 %v12399_v56, %v12393_v52  ;;  %v15273_v38 = vld [vmem:[#allocation92_spill] sm:$0xff]  ;;  %v1991_v20 = vmul.f32 1.442695, %v1877_v25  ;;  %v15275_v55 = vld [vmem:[#allocation31_spill] sm:$0xff] }
 0x599   : > { %2284 = vmatprep.mubr.f32.mxu0 %v12112_v17  ;;  %v12413_v6 = vpop.eup %9937 }
 0x59a   : > { %15272 = vst [vmem:[#allocation129_spill] sm:$0xff] %v12411_v42  ;;  %v12415_v5 = vpop.eup %9939  ;;  %v2988_v63 = vmul.f32 1.442695, %v2906_v40  ;;  %v2990_v18 = vmul.f32 1.442695, %v2907_v57  ;;  %v12420_v47 = vadd.f32 %v12413_v6, %v12404_v37  ;;  %v15276_v42 = vld [vmem:[#allocation164_spill] sm:$0xff] }
 0x59b   : > { %2083 = vadd.xlane.f32.xlu1 %v15273_v38  ;;  %v12422_v31 = vpop.eup %9941  ;;  %v2824_v17 = vpop.xlane.xlu1 %2823  ;;  %v15277_v40 = vld [vmem:[#allocation165_spill] sm:$0xff] }
 0x59c   : > { %15274 = vst [vmem:[#allocation130_spill] sm:$0xff] %v12420_v47  ;;  %2285 = vmatmul.mubr.f32.gmra.mrb[96].mxu0 %v15275_v55  ;;  %v12425_v11 = vpop.eup %9943  ;;  %9955 = vpow2.f32 %v2988_v63  ;;  %v2908_v30 = vsub.f32 %v15276_v42, %v2824_v17  ;;  %v2909_v57 = vsub.f32 %v15277_v40, %v2824_v17  ;;  %v12431_v38 = vadd.f32 %v12422_v31, %v12415_v5 }
 0x59d   : > { %2289 = vmatprep.mubr.f32.mxu0 %v9922_v13  ;;  %v9946_v60 = vpop.eup %9945  ;;  %9957 = vpow2.f32 %v2990_v18 }
 0x59e   : > { %15278 = vst [vmem:[#allocation131_spill] sm:$0xff] %v12431_v38  ;;  %v12433_v49 = vpop.eup %9947  ;;  %v2992_v1 = vmul.f32 1.442695, %v2908_v30  ;;  %v2994_v25 = vmul.f32 1.442695, %v2909_v57  ;;  %v12435_v47 = vpop.f32.mrb[142].mxu1  ;;  %v12438_v55 = vadd.f32 %v9946_v60, %v12425_v11  ;;  %9959 = vpow2.f32 %v1991_v20 }
 0x59f   : > { %15279 = vst [vmem:[#allocation70_spill] sm:$0xff] %v12435_v47  ;;  %v12440_v63 = vpop.eup %9949  ;;  %v12443_v42 = vpop.f32.mrb[143].mxu1 }
 0x5a0   : > { %2290 = vmatmul.mubr.f32.gmra.mrb[98].mxu0 %v12355_v24  ;;  %15280 = vst [vmem:[#allocation75_spill] sm:$0xff] %v12443_v42  ;;  %9961 = vpow2.f32 %v2992_v1  ;;  %v2876_v13 = vmax.f32 %v12435_v47, %v12443_v42  ;;  %v12450_v30 = vadd.f32 %v12440_v63, %v12433_v49  ;;  %v12452_v18 = vpop.eup %9951  ;;  %v15291_v47 = vld [vmem:[#allocation147_spill] sm:$0xff] }
 0x5a1   : > { %2294 = vmatprep.mubr.f32.mxu0 %v12318_v35  ;;  %9963 = vpow2.f32 %v2994_v25  ;;  %v12462_v40 = vpop.eup %9953 }
 0x5a2   : > { %15281 = vst [vmem:[#allocation84_spill] sm:$0xff] %v12450_v30  ;;  %v12454_v17 = vpop.f32.mrb[144].mxu1  ;;  %2877 = vmax.xlane.f32.xlu0 %v2876_v13 }
 0x5a3   : > { %15282 = vst [vmem:[#allocation97_spill] sm:$0xff] %v12454_v17  ;;  %v12457_v24 = vpop.f32.mrb[145].mxu1 }
 0x5a4   : > { %2295 = vmatmul.mubr.f32.gmra.mrb[100].mxu0 %v12452_v18  ;;  %15283 = vst [vmem:[#allocation99_spill] sm:$0xff] %v12457_v24  ;;  %v2879_v20 = vmax.f32 %v12454_v17, %v12457_v24 }
 0x5a5   : > { %2299 = vmatprep.mubr.f32.mxu0 %v12141_v29 }
 0x5a6   : > { %v12464_v57 = vpop.eup %9955  ;;  %2880 = vmax.xlane.f32.xlu1 %v2879_v20 }
 0x5a7   : > { %v12466_v1 = vpop.eup %9957 }
 0x5a8   : > { %2300 = vmatmul.mubr.f32.gmra.mrb[102].mxu0 %v12137_v39  ;;  %v12472_v25 = vadd.f32 %v12466_v1, %v12464_v57  ;;  %v12474_v13 = vpop.eup %9959 }
 0x5a9   : > { %2304 = vmatprep.mubr.f32.mxu0 %v12462_v40 }
 0x5aa   : > { %v12476_v29 = vpop.eup %9961  ;;  %2086 = vadd.xlane.f32.xlu1 %v12381_v10 }
 0x5ab   : > { %v12479_v24 = vpop.eup %9963 }
 0x5ac   : > { %2305 = vmatmul.mubr.f32.gmra.mrb[104].mxu0 %v12474_v13  ;;  %v12485_v39 = vadd.f32 %v12479_v24, %v12476_v29 }
 0x5ad   : > { %2309 = vmatprep.mubr.f32.mxu0 %v12391_v3 }
 0x5ae   : > { %15284 = vst [vmem:[#allocation126_spill] sm:$0xff] %v12485_v39  ;;  %v12487_v20 = vpop.f32.mrb[146].mxu1 }
 0x5af   : > { %15285 = vst [vmem:[#allocation140_spill] sm:$0xff] %v12487_v20  ;;  %v12490_v17 = vpop.f32.mrb[147].mxu1 }
 0x5b0   : > { %2310 = vmatmul.mubr.f32.gmra.mrb[106].mxu0 %v12383_v61  ;;  %15286 = vst [vmem:[#allocation6_spill] sm:$0xff] %v12490_v17  ;;  %v2882_v10 = vmax.f32 %v12487_v20, %v12490_v17  ;;  %v12509_v61 = vpop.permute.xlu0 %9692 }
 0x5b1   : > { %2314 = vmatprep.mubr.f32.mxu0 %v12173_v19  ;;  %v15287_v19 = vld [vmem:[#allocation22_spill] sm:$0xff]  ;;  %15288 = vst [vmem:[#allocation106_spill] sm:$0xff] %v12509_v61  ;;  %v15293_v61 = vld [vmem:[#allocation167_spill] sm:$0xff] }
 0x5b2   : > { %v12495_v42 = vpop.f32.mrb[148].mxu1  ;;  %2883 = vmax.xlane.f32.xlu0 %v2882_v10  ;;  %v15290_v10 = vld [vmem:[#allocation146_spill] sm:$0xff] }
 0x5b3   : > { %v12498_v3 = vpop.f32.mrb[149].mxu1 }
 0x5b4   : > { %2315 = vmatmul.mubr.f32.gmra.mrb[108].mxu0 %v12167_v23 }
 0x5b5   : > { %2319 = vmatprep.mubr.f32.mxu0 %v12195_v4 }
 0x5b8   : > { %2320 = vmatmul.mubr.f32.gmra.mrb[110].mxu0 %v12190_v43 }
 0x5b9   : > { %2324 = vmatprep.mubr.f32.mxu0 %v12413_v6 }
 0x5bb   : > { %9707 = vrot.lane.b32.xlu1 %v15287_v19, %s10638_s16 }
 0x5bc   : > { %2325 = vmatmul.mubr.f32.gmra.mrb[112].mxu0 %v12404_v37 }
 0x5bd   : > { %2329 = vmatprep.mubr.f32.mxu0 %v12212_v2  ;;  %v15292_v2 = vld [vmem:[#allocation166_spill] sm:$0xff] }
 0x5c0   : > { %2330 = vmatmul.mubr.f32.gmra.mrb[114].mxu0 %v12206_v44 }
 0x5c1   : > { %2334 = vmatprep.mubr.f32.mxu0 %v12225_v21  ;;  %v12513_v23 = vpop.xlane.xlu1 %2029  ;;  %v15294_v21 = vld [vmem:[#allocation156_spill] sm:$0xff] }
 0x5c2   : > { %15289 = vst [vmem:[#allocation136_spill] sm:$0xff] %v12513_v23  ;;  %v15295_v23 = vld [vmem:[#allocation157_spill] sm:$0xff] }
 0x5c3   : > { %v2803_v4 = vpop.xlane.xlu0 %2802 }
 0x5c4   : > { %v2894_v43 = vsub.f32 %v15290_v10, %v2803_v4  ;;  %v2895_v6 = vsub.f32 %v15291_v47, %v2803_v4  ;;  %2335 = vmatmul.mubr.f32.gmra.mrb[116].mxu0 %v12221_v46  ;;  %v15296_v46 = vld [vmem:[#allocation5_spill] sm:$0xff] }
 0x5c5   : > { %3368 = vmatprep.mubr.f32.mxu0 %v9946_v60 }
 0x5c6   : > { %v2964_v37 = vmul.f32 1.442695, %v2894_v43  ;;  %v2966_v19 = vmul.f32 1.442695, %v2895_v6  ;;  %v2827_v17 = vpop.xlane.xlu1 %2826  ;;  %v15297_v6 = vld [vmem:[#allocation8_spill] sm:$0xff] }
 0x5c7   : > { %v2910_v20 = vsub.f32 %v15292_v2, %v2827_v17  ;;  %v2911_v39 = vsub.f32 %v15293_v61, %v2827_v17  ;;  %v15298_v17 = vld [vmem:[#allocation21_spill] sm:$0xff]  ;;  %v15299_v61 = vld [vmem:[#allocation168_spill] sm:$0xff] }
 0x5c8   : > { %v2812_v44 = vpop.xlane.xlu0 %2811  ;;  %9965 = vpow2.f32 %v2964_v37  ;;  %3369 = vmatmul.mubr.f32.vlgmr.msra.gmra.mrb[118].mxu0 %v12425_v11  ;;  %9702 = vrot.lane.b32.xlu0 %v15298_v17, %s10638_s16  ;;  %v15300_v37 = vld [vmem:[#allocation169_spill] sm:$0xff]  ;;  %v15354_v17 = vld [vmem:[#allocation32_spill] sm:$0xff] }
 0x5c9   : > { %v2900_v30 = vsub.f32 %v15294_v21, %v2812_v44  ;;  %v2901_v38 = vsub.f32 %v15295_v23, %v2812_v44  ;;  %9967 = vpow2.f32 %v2966_v19  ;;  %v2996_v47 = vmul.f32 1.442695, %v2910_v20  ;;  %4367 = vmatpush1.msra.mxu0 %v15296_v46  ;;  %3373 = vmatprep.mubr.f32.mxu0 %v12327_v59 }
 0x5ca   : > { %v2998_v4 = vmul.f32 1.442695, %v2911_v39  ;;  %5876 = vmatprep.subr.mxu0 %v15297_v6 }
 0x5cb   : > { %v2976_v60 = vmul.f32 1.442695, %v2900_v30  ;;  %v2978_v10 = vmul.f32 1.442695, %v2901_v38  ;;  %v2830_v43 = vpop.xlane.xlu1 %2829  ;;  %9969 = vpow2.f32 %v2996_v47 }
 0x5cc   : > { %v2912_v23 = vsub.f32 %v15299_v61, %v2830_v43  ;;  %v2913_v11 = vsub.f32 %v15300_v37, %v2830_v43  ;;  %v12530_v19 = vpop.xlane.xlu0 %2020  ;;  %9971 = vpow2.f32 %v2998_v4  ;;  %3374 = vmatmul.mubr.f32.gmra.mrb[120].mxu0 %v12324_v41 }
 0x5cd   : > { %9973 = vpow2.f32 %v2976_v60  ;;  %3378 = vmatprep.mubr.f32.mxu0 %v12347_v36 }
 0x5ce   : > { %v3000_v59 = vmul.f32 1.442695, %v2912_v23  ;;  %v3002_v30 = vmul.f32 1.442695, %v2913_v11  ;;  %9975 = vpow2.f32 %v2978_v10 }
 0x5cf   : > { %v12534_v38 = vpop.xlane.xlu1 %2035 }
 0x5d0   : > { %9977 = vpow2.f32 %v3000_v59  ;;  %v12536_v39 = vpop.xlane.xlu0 %2026  ;;  %3379 = vmatmul.mubr.f32.gmra.mrb[122].mxu0 %v12342_v27 }
 0x5d1   : > { %9979 = vpow2.f32 %v3002_v30 }
 0x5d2   : > { %v9966_v20 = vpop.eup %9965 }
 0x5d3   : > { %v2836_v2 = vpop.xlane.xlu1 %2835  ;;  %v9968_v44 = vpop.eup %9967 }
 0x5d4   : > { %v2916_v21 = vsub.f32 %v12000_v12, %v2836_v2  ;;  %v2917_v41 = vsub.f32 %v12002_v15, %v2836_v2  ;;  %v12541_v47 = vpop.xlane.xlu0 %2032  ;;  %3383 = vmatprep.mubr.f32.mxu0 %v9968_v44  ;;  %v12543_v36 = vadd.f32 %v9968_v44, %v9966_v20 }
 0x5d5   : > { %v12545_v4 = vpop.eup %9969  ;;  %3384 = vmatmul.mubr.f32.gmra.mrb[124].mxu0 %v9966_v20 }
 0x5d6   : > { %v3008_v46 = vmul.f32 1.442695, %v2916_v21  ;;  %v3010_v60 = vmul.f32 1.442695, %v2917_v41  ;;  %v12547_v10 = vpop.eup %9971  ;;  %3388 = vmatprep.mubr.f32.mxu0 %v12371_v45 }
 0x5d7   : > { %v12549_v27 = vpop.xlane.xlu1 %2041  ;;  %v9974_v43 = vpop.eup %9973  ;;  %v12554_v15 = vadd.f32 %v12547_v10, %v12545_v4 }
 0x5d8   : > { %9981 = vpow2.f32 %v3008_v46  ;;  %v2833_v12 = vpop.xlane.xlu0 %2832  ;;  %v9976_v6 = vpop.eup %9975 }
 0x5d9   : > { %9983 = vpow2.f32 %v3010_v60  ;;  %v2914_v61 = vsub.f32 %v11988_v62, %v2833_v12  ;;  %v2915_v23 = vsub.f32 %v11992_v16, %v2833_v12  ;;  %3389 = vmatmul.mubr.f32.gmra.mrb[126].mxu0 %v12367_v58  ;;  %v12561_v11 = vadd.f32 %v9976_v6, %v9974_v43 }
 0x5da   : > { %v12558_v37 = vpop.eup %9977  ;;  %3393 = vmatprep.mubr.f32.mxu0 %v12399_v56 }
 0x5db   : > { %v12563_v45 = vpop.eup %9979  ;;  %v3004_v59 = vmul.f32 1.442695, %v2914_v61  ;;  %v3006_v30 = vmul.f32 1.442695, %v2915_v23  ;;  %v2839_v20 = vpop.xlane.xlu1 %2838 }
 0x5dc   : > { %v2918_v2 = vsub.f32 %v12008_v9, %v2839_v20  ;;  %v2919_v44 = vsub.f32 %v12012_v50, %v2839_v20  ;;  %v12570_v16 = vadd.f32 %v12563_v45, %v12558_v37  ;;  %v15301_v50 = vmax.f32 %v12495_v42, %v12498_v3 }
 0x5dd   : > { %9985 = vpow2.f32 %v3004_v59  ;;  %3394 = vmatmul.mubr.f32.gmra.mrb[128].mxu0 %v12393_v52  ;;  %v2088_v59 = vadd.f32 %v12452_v18, %v12318_v35 }
 0x5de   : > { %9987 = vpow2.f32 %v3006_v30  ;;  %v3012_v62 = vmul.f32 1.442695, %v2918_v2  ;;  %v3014_v58 = vmul.f32 1.442695, %v2919_v44  ;;  %3398 = vmatprep.mubr.f32.mxu0 %v9976_v6  ;;  %v12593_v6 = vpop.xlane.xlu0 %2038 }
 0x5df   : > { %v2842_v21 = vpop.xlane.xlu1 %2841  ;;  %2886 = vmax.xlane.f32.xlu1 %v15301_v50  ;;  %v15305_v50 = vld [vmem:[#allocation122_spill] sm:$0xff] }
 0x5e0   : > { %9989 = vpow2.f32 %v3012_v62  ;;  %v2920_v41 = vsub.f32 %v12062_v8, %v2842_v21  ;;  %v2921_v56 = vsub.f32 %v12067_v53, %v2842_v21 }
 0x5e1   : > { %9991 = vpow2.f32 %v3014_v58  ;;  %3399 = vmatmul.mubr.f32.gmra.mrb[130].mxu0 %v9974_v43 }
 0x5e2   : > { %v12578_v9 = vpop.eup %9981  ;;  %v3016_v46 = vmul.f32 1.442695, %v2920_v41  ;;  %v3018_v60 = vmul.f32 1.442695, %v2921_v56  ;;  %3403 = vmatprep.mubr.f32.mxu0 %v12422_v31  ;;  %v12621_v2 = vpop.xlane.xlu0 %2044  ;;  %v15304_v41 = vld [vmem:[#allocation67_spill] sm:$0xff] }
 0x5e3   : > { %v12580_v12 = vpop.eup %9983  ;;  %v12582_v52 = vpop.xlane.xlu1 %2047  ;;  %2092 = vadd.xlane.f32.xlu1 %v12154_v7 }
 0x5e4   : > { %9993 = vpow2.f32 %v3016_v46  ;;  %v12587_v8 = vadd.f32 %v12580_v12, %v12578_v9 }
 0x5e5   : > { %9995 = vpow2.f32 %v3018_v60  ;;  %3404 = vmatmul.mubr.f32.gmra.mrb[132].mxu0 %v12415_v5 }
 0x5e6   : > { %3408 = vmatprep.mubr.f32.mxu0 %v12440_v63 }
 0x5e7   : > { %v12591_v53 = vpop.eup %9985  ;;  %v2845_v43 = vpop.xlane.xlu1 %2844  ;;  %2098 = vadd.xlane.f32.xlu1 %v12397_v33  ;;  %2089 = vadd.xlane.f32.xlu0 %v2088_v59 }
 0x5e8   : > { %v12596_v61 = vpop.eup %9987  ;;  %v2922_v31 = vsub.f32 %v12088_v32, %v2845_v43  ;;  %v2923_v23 = vsub.f32 %v12094_v51, %v2845_v43  ;;  %v2094_v51 = vadd.f32 %v12474_v13, %v12462_v40  ;;  %v15306_v43 = vld [vmem:[#allocation93_spill] sm:$0xff] }
 0x5e9   : > { %v12605_v7 = vadd.f32 %v12596_v61, %v12591_v53  ;;  %3409 = vmatmul.mubr.f32.gmra.mrb[134].mxu0 %v12433_v49 }
 0x5ea   : > { %v12607_v5 = vpop.eup %9989  ;;  %v3020_v30 = vmul.f32 1.442695, %v2922_v31  ;;  %v3022_v20 = vmul.f32 1.442695, %v2923_v23  ;;  %3413 = vmatprep.mubr.f32.mxu0 %v12466_v1 }
 0x5eb   : > { %v12610_v63 = vpop.eup %9991  ;;  %v2848_v32 = vpop.xlane.xlu1 %2847  ;;  %2104 = vadd.xlane.f32.xlu1 %v12200_v48  ;;  %2095 = vadd.xlane.f32.xlu0 %v2094_v51 }
 0x5ec   : > { %9997 = vpow2.f32 %v3020_v30  ;;  %v2924_v35 = vsub.f32 %v12157_v22, %v2848_v32  ;;  %v2925_v33 = vsub.f32 %v12161_v14, %v2848_v32  ;;  %v12619_v18 = vadd.f32 %v12610_v63, %v12607_v5  ;;  %v12639_v48 = vpop.xlane.xlu0 %2050  ;;  %v15307_v30 = vld [vmem:[#allocation28_spill] sm:$0xff] }
 0x5ed   : > { %9999 = vpow2.f32 %v3022_v20  ;;  %3414 = vmatmul.mubr.f32.gmra.mrb[136].mxu0 %v12464_v57 }
 0x5ee   : > { %v12624_v49 = vpop.eup %9993  ;;  %v3024_v1 = vmul.f32 1.442695, %v2924_v35  ;;  %v3026_v44 = vmul.f32 1.442695, %v2925_v33  ;;  %3418 = vmatprep.mubr.f32.mxu0 %v12479_v24 }
 0x5ef   : > { %v12627_v40 = vpop.eup %9995  ;;  %v12629_v22 = vpop.xlane.xlu1 %2053  ;;  %2110 = vadd.xlane.f32.xlu1 %v12217_v0  ;;  %2101 = vadd.xlane.f32.xlu0 %v12182_v54  ;;  %v15302_v0 = vld [vmem:[#allocation130_spill] sm:$0xff] }
 0x5f0   : > { %10001 = vpow2.f32 %v3024_v1  ;;  %v12634_v14 = vadd.f32 %v12627_v40, %v12624_v49  ;;  %v12658_v56 = vpop.xlane.xlu0 %2056  ;;  %v15310_v1 = vld [vmem:[#allocation100_spill] sm:$0xff] }
 0x5f1   : > { %10003 = vpow2.f32 %v3026_v44  ;;  %3419 = vmatmul.mubr.f32.gmra.mrb[138].mxu0 %v12476_v29 }
 0x5f2   : > { %3423 = vmatprep.mubr.f32.mxu0 %v12547_v10  ;;  %v15303_v10 = vld [vmem:[#allocation26_spill] sm:$0xff] }
 0x5f3   : > { %v2851_v57 = vpop.xlane.xlu1 %2850  ;;  %3084 = vadd.xlane.f32.xlu1 %v12340_v26  ;;  %2107 = vadd.xlane.f32.xlu0 %v15302_v0 }
 0x5f4   : > { %v2926_v13 = vsub.f32 %v12175_v34, %v2851_v57  ;;  %v2927_v24 = vsub.f32 %v12178_v28, %v2851_v57 }
 0x5f5   : > { %3424 = vmatmul.mubr.f32.gmra.mrb[140].mxu0 %v12545_v4 }
 0x5f6   : > { %v12645_v62 = vpop.eup %9997  ;;  %v3028_v58 = vmul.f32 1.442695, %v2926_v13  ;;  %v3030_v21 = vmul.f32 1.442695, %v2927_v24  ;;  %3428 = vmatprep.mubr.f32.mxu0 %v12563_v45  ;;  %v15311_v24 = vld [vmem:[#allocation129_spill] sm:$0xff] }
 0x5f7   : > { %v12649_v54 = vpop.eup %9999  ;;  %v2854_v29 = vpop.xlane.xlu1 %2853  ;;  %3087 = vadd.xlane.f32.xlu1 %v15305_v50  ;;  %2113 = vadd.xlane.f32.xlu0 %v15306_v43  ;;  %v15314_v43 = vld [vmem:[#allocation108_spill] sm:$0xff] }
 0x5f8   : > { %10005 = vpow2.f32 %v3028_v58  ;;  %v2928_v34 = vsub.f32 %v15303_v10, %v2854_v29  ;;  %v2929_v28 = vsub.f32 %v15304_v41, %v2854_v29  ;;  %v12656_v26 = vadd.f32 %v12649_v54, %v12645_v62 }
 0x5f9   : > { %10007 = vpow2.f32 %v3030_v21  ;;  %3429 = vmatmul.mubr.f32.gmra.mrb[142].mxu0 %v12558_v37  ;;  %v15308_v37 = vld [vmem:[#allocation36_spill] sm:$0xff] }
 0x5fa   : > { %v12661_v4 = vpop.eup %10001  ;;  %v3032_v46 = vmul.f32 1.442695, %v2928_v34  ;;  %v3034_v60 = vmul.f32 1.442695, %v2929_v28  ;;  %3433 = vmatprep.mubr.f32.mxu0 %v12596_v61  ;;  %v15309_v61 = vld [vmem:[#allocation98_spill] sm:$0xff] }
 0x5fb   : > { %v12665_v45 = vpop.eup %10003  ;;  %v12667_v31 = vpop.xlane.xlu1 %2059  ;;  %3090 = vadd.xlane.f32.xlu1 %v12543_v36  ;;  %3081 = vadd.xlane.f32.xlu0 %v12438_v55 }
 0x5fc   : > { %10009 = vpow2.f32 %v3032_v46  ;;  %v12672_v23 = vadd.f32 %v12665_v45, %v12661_v4  ;;  %v2860_v59 = vpop.xlane.xlu0 %2859 }
 0x5fd   : > { %10011 = vpow2.f32 %v3034_v60  ;;  %v2932_v20 = vsub.f32 %v15307_v30, %v2860_v59  ;;  %v2933_v32 = vsub.f32 %v15308_v37, %v2860_v59  ;;  %3434 = vmatmul.mubr.f32.gmra.mrb[144].mxu0 %v12591_v53  ;;  %v12679_v35 = vpop.f32.mrb[54].mxu0  ;;  %v15312_v53 = vld [vmem:[#allocation127_spill] sm:$0xff]  ;;  %v15315_v30 = vld [vmem:[#allocation110_spill] sm:$0xff] }
 0x5fe   : > { %3438 = vmatprep.mubr.f32.mxu0 %v12580_v12  ;;  %v2183_v13 = vpop.f32.mrb[55].mxu0  ;;  %v15313_v60 = vld [vmem:[#allocation131_spill] sm:$0xff] }
 0x5ff   : > { %v2857_v51 = vpop.xlane.xlu1 %2856  ;;  %v3040_v57 = vmul.f32 1.442695, %v2932_v20  ;;  %v3042_v36 = vmul.f32 1.442695, %v2933_v32  ;;  %3096 = vadd.xlane.f32.xlu1 %v15311_v24  ;;  %3093 = vadd.xlane.f32.xlu0 %v15312_v53  ;;  %v15316_v32 = vld [vmem:[#allocation84_spill] sm:$0xff] }
 0x600   : > { %v2930_v33 = vsub.f32 %v15309_v61, %v2857_v51  ;;  %v2931_v44 = vsub.f32 %v15310_v1, %v2857_v51  ;;  %v15318_v13 = vld [vmem:[#allocation76_spill] sm:$0xff] }
 0x601   : > { %10013 = vpow2.f32 %v3040_v57  ;;  %3439 = vmatmul.mubr.f32.gmra.mrb[146].mxu0 %v12578_v9  ;;  %v12691_v29 = vpop.f32.mrb[56].mxu0 }
 0x602   : > { %v12685_v55 = vpop.eup %10005  ;;  %v3036_v58 = vmul.f32 1.442695, %v2930_v33  ;;  %v3038_v21 = vmul.f32 1.442695, %v2931_v44  ;;  %10015 = vpow2.f32 %v3042_v36  ;;  %3443 = vmatprep.mubr.f32.mxu0 %v12610_v63  ;;  %v2188_v10 = vpop.f32.mrb[57].mxu0  ;;  %v15317_v36 = vld [vmem:[#allocation126_spill] sm:$0xff] }
 0x603   : > { %v10008_v0 = vpop.eup %10007  ;;  %v12689_v12 = vpop.xlane.xlu1 %2062  ;;  %3099 = vadd.xlane.f32.xlu1 %v12561_v11  ;;  %3108 = vadd.xlane.f32.xlu0 %v12472_v25 }
 0x604   : > { %10017 = vpow2.f32 %v3036_v58  ;;  %v3137_v34 = vadd.f32 %v10008_v0, %v12685_v55  ;;  %v15319_v58 = vld [vmem:[#allocation58_spill] sm:$0xff] }
 0x605   : > { %10019 = vpow2.f32 %v3038_v21  ;;  %3444 = vmatmul.mubr.f32.gmra.mrb[148].mxu0 %v12607_v5  ;;  %v12700_v50 = vpop.f32.mrb[58].mxu0 }
 0x606   : > { %v10010_v41 = vpop.eup %10009  ;;  %3448 = vmatprep.mubr.f32.mxu0 %v12627_v40  ;;  %v2193_v63 = vpop.f32.mrb[59].mxu0 }
 0x607   : > { %v10012_v9 = vpop.eup %10011  ;;  %v12698_v28 = vpop.xlane.xlu1 %2065  ;;  %3102 = vadd.xlane.f32.xlu1 %v15313_v60  ;;  %3114 = vadd.xlane.f32.xlu0 %v12554_v15 }
 0x608   : > { %v12703_v46 = vadd.f32 %v10012_v9, %v10010_v41 }
 0x609   : > { %3449 = vmatmul.mubr.f32.gmra.mrb[150].mxu0 %v12624_v49  ;;  %v12708_v25 = vpop.f32.mrb[60].mxu0 }
 0x60a   : > { %3453 = vmatprep.mubr.f32.mxu0 %v12649_v54  ;;  %v2198_v20 = vpop.f32.mrb[61].mxu0 }
 0x60b   : > { %v2863_v11 = vpop.xlane.xlu1 %2862  ;;  %v12711_v5 = vpop.eup %10013  ;;  %3105 = vadd.xlane.f32.xlu1 %v15316_v32  ;;  %3120 = vadd.xlane.f32.xlu0 %v12605_v7 }
 0x60c   : > { %v2934_v59 = vsub.f32 %v15314_v43, %v2863_v11  ;;  %v2935_v40 = vsub.f32 %v15315_v30, %v2863_v11  ;;  %v10016_v37 = vpop.eup %10015  ;;  %v15320_v43 = vld [vmem:[#allocation119_spill] sm:$0xff] }
 0x60d   : > { %3454 = vmatmul.mubr.f32.gmra.mrb[152].mxu0 %v12645_v62  ;;  %v12719_v49 = vadd.f32 %v10016_v37, %v12711_v5  ;;  %v12723_v1 = vpop.f32.mrb[62].mxu0 }
 0x60e   : > { %v10018_v51 = vpop.eup %10017  ;;  %v3044_v61 = vmul.f32 1.442695, %v2934_v59  ;;  %v3046_v15 = vmul.f32 1.442695, %v2935_v40  ;;  %3458 = vmatprep.mubr.f32.mxu0 %v12665_v45  ;;  %v2203_v44 = vpop.f32.mrb[63].mxu0  ;;  %v15321_v59 = vld [vmem:[#allocation46_spill] sm:$0xff] }
 0x60f   : > { %v10020_v54 = vpop.eup %10019  ;;  %v12721_v33 = vpop.xlane.xlu1 %2071  ;;  %3111 = vadd.xlane.f32.xlu1 %v15317_v36  ;;  %3126 = vadd.xlane.f32.xlu0 %v12619_v18 }
 0x610   : > { %10021 = vpow2.f32 %v3044_v61  ;;  %v3143_v57 = vadd.f32 %v10020_v54, %v10018_v51  ;;  %v3593_v61 = vld [vmem:[%s14729_s1 + $0x38] sm:$0xff] }
 0x611   : > { %10023 = vpow2.f32 %v3046_v15  ;;  %3459 = vmatmul.mubr.f32.gmra.mrb[154].mxu0 %v12661_v4  ;;  %v12729_v62 = vpop.f32.mrb[64].mxu0  ;;  %8974 = vmatprep.subr.mxu1 %v3593_v61 }
 0x612   : > { %3463 = vmatprep.mubr.f32.mxu0 %v10008_v0  ;;  %v2208_v53 = vpop.f32.mrb[65].mxu0  ;;  %8975 = vmatpush3.msra.mxu1 %v3593_v61  ;;  %v15326_v61 = vld [vmem:[#allocation70_spill] sm:$0xff] }
 0x613   : > { %v2869_v7 = vpop.xlane.xlu1 %2868  ;;  %3117 = vadd.xlane.f32.xlu1 %v12570_v16  ;;  %3132 = vadd.xlane.f32.xlu0 %v12656_v26 }
 0x614   : > { %v2938_v24 = vsub.f32 %v15318_v13, %v2869_v7  ;;  %v2939_v21 = vsub.f32 %v15319_v58, %v2869_v7 }
 0x615   : > { %3464 = vmatmul.mubr.f32.gmra.mrb[156].mxu0 %v12685_v55  ;;  %v12736_v18 = vpop.f32.mrb[66].mxu0 }
 0x616   : > { %v3052_v45 = vmul.f32 1.442695, %v2938_v24  ;;  %v3054_v10 = vmul.f32 1.442695, %v2939_v21  ;;  %3468 = vmatprep.mubr.f32.mxu0 %v10012_v9  ;;  %v12738_v4 = vpop.xlane.xlu0 %2068  ;;  %v2213_v0 = vpop.f32.mrb[67].mxu0  ;;  %v15324_v21 = vld [vmem:[#allocation81_spill] sm:$0xff] }
 0x617   : > { %3123 = vadd.xlane.f32.xlu1 %v12587_v8  ;;  %3138 = vadd.xlane.f32.xlu0 %v3137_v34 }
 0x618   : > { %10025 = vpow2.f32 %v3052_v45 }
 0x619   : > { %10027 = vpow2.f32 %v3054_v10  ;;  %3469 = vmatmul.mubr.f32.gmra.mrb[158].mxu0 %v10010_v41  ;;  %v12741_v60 = vpop.f32.mrb[68].mxu0 }
 0x61a   : > { %v10022_v63 = vpop.eup %10021  ;;  %3473 = vmatprep.mubr.f32.mxu0 %v10020_v54  ;;  %v12743_v26 = vpop.xlane.xlu1 %2074  ;;  %v15322_v54 = vld [vmem:[#allocation77_spill] sm:$0xff] }
 0x61b   : > { %v10024_v16 = vpop.eup %10023  ;;  %v2866_v55 = vpop.xlane.xlu0 %2865  ;;  %3129 = vadd.xlane.f32.xlu1 %v12634_v14  ;;  %3144 = vadd.xlane.f32.xlu0 %v3143_v57 }
 0x61c   : > { %v3149_v11 = vadd.f32 %v10024_v16, %v10022_v63  ;;  %v2936_v9 = vsub.f32 %v15320_v43, %v2866_v55  ;;  %v2937_v30 = vsub.f32 %v15321_v59, %v2866_v55  ;;  %v2218_v40 = vpop.f32.mrb[69].mxu0 }
 0x61d   : > { %3474 = vmatmul.mubr.f32.gmra.mrb[160].mxu0 %v10018_v51  ;;  %v12748_v41 = vpop.f32.mrb[70].mxu0 }
 0x61e   : > { %v3048_v8 = vmul.f32 1.442695, %v2936_v9  ;;  %v3050_v34 = vmul.f32 1.442695, %v2937_v30  ;;  %3478 = vmatprep.mubr.f32.mxu0 %v10016_v37  ;;  %v2223_v20 = vpop.f32.mrb[71].mxu0  ;;  %v12750_v32 = vpop.xlane.xlu1 %2077  ;;  %v15323_v37 = vld [vmem:[#allocation121_spill] sm:$0xff] }
 0x61f   : > { %3135 = vadd.xlane.f32.xlu1 %v12672_v23  ;;  %3150 = vadd.xlane.f32.xlu0 %v3149_v11 }
 0x620   : > { %10029 = vpow2.f32 %v3048_v8  ;;  %v2872_v14 = vpop.xlane.xlu0 %2871 }
 0x621   : > { %10031 = vpow2.f32 %v3050_v34  ;;  %3479 = vmatmul.mubr.f32.gmra.mrb[162].mxu0 %v12711_v5  ;;  %v2940_v44 = vsub.f32 %v15322_v54, %v2872_v14  ;;  %v2941_v57 = vsub.f32 %v15323_v37, %v2872_v14  ;;  %v12759_v36 = vpop.f32.mrb[72].mxu0  ;;  %v15325_v5 = vld [vmem:[#allocation82_spill] sm:$0xff]  ;;  %v15327_v54 = vld [vmem:[#allocation75_spill] sm:$0xff] }
 0x622   : > { %v10026_v15 = vpop.eup %10025  ;;  %3483 = vmatprep.mubr.f32.mxu0 %v10024_v16  ;;  %v2228_v23 = vpop.f32.mrb[73].mxu0 }
 0x623   : > { %v10028_v51 = vpop.eup %10027  ;;  %v3056_v13 = vmul.f32 1.442695, %v2940_v44  ;;  %v3058_v24 = vmul.f32 1.442695, %v2941_v57  ;;  %3141 = vadd.xlane.f32.xlu1 %v12703_v46 }
 0x624   : > { %v3155_v7 = vadd.f32 %v10028_v51, %v10026_v15  ;;  %v2875_v58 = vpop.xlane.xlu1 %2874  ;;  %v12769_v59 = vpop.xlane.xlu0 %2080 }
 0x625   : > { %v2942_v53 = vsub.f32 %v15324_v21, %v2875_v58  ;;  %v2943_v45 = vsub.f32 %v15325_v5, %v2875_v58  ;;  %3484 = vmatmul.mubr.f32.gmra.mrb[164].mxu0 %v10022_v63  ;;  %10033 = vpow2.f32 %v3056_v13  ;;  %v12764_v10 = vpop.f32.mrb[74].mxu0 }
 0x626   : > { %10035 = vpow2.f32 %v3058_v24  ;;  %v2233_v55 = vpop.f32.mrb[75].mxu0 }
 0x627   : > { %v3060_v0 = vmul.f32 1.442695, %v2942_v53  ;;  %v3062_v16 = vmul.f32 1.442695, %v2943_v45  ;;  %3147 = vadd.xlane.f32.xlu1 %v12719_v49  ;;  %v15328_v53 = vld [vmem:[#allocation97_spill] sm:$0xff] }
 0x628   : > { %v12773_v34 = vpop.xlane.xlu1 %2083 }
 0x629   : > { %10037 = vpow2.f32 %v3060_v0  ;;  %v12767_v43 = vpop.f32.mrb[76].mxu0 }
 0x62a   : > { %v10030_v11 = vpop.eup %10029  ;;  %10039 = vpow2.f32 %v3062_v16  ;;  %v2238_v9 = vpop.f32.mrb[77].mxu0 }
 0x62b   : > { %v10032_v46 = vpop.eup %10031 }
 0x62c   : > { %3488 = vmatprep.mubr.f32.mxu0 %v10032_v46  ;;  %v3152_v63 = vadd.f32 %v10032_v46, %v10030_v11 }
 0x62d   : > { %3489 = vmatmul.mubr.f32.gmra.mrb[166].mxu0 %v10030_v11  ;;  %v12771_v30 = vpop.f32.mrb[78].mxu0 }
 0x62e   : > { %3153 = vadd.xlane.f32.xlu0 %v3152_v63  ;;  %3493 = vmatprep.mubr.f32.mxu0 %v10028_v51  ;;  %v2243_v40 = vpop.f32.mrb[79].mxu0 }
 0x62f   : > { %v10034_v8 = vpop.eup %10033  ;;  %v2878_v49 = vpop.xlane.xlu0 %2877 }
 0x630   : > { %v10036_v20 = vpop.eup %10035  ;;  %v2944_v14 = vsub.f32 %v15326_v61, %v2878_v49  ;;  %v2945_v44 = vsub.f32 %v15327_v54, %v2878_v49  ;;  %v15330_v49 = vld [vmem:[#allocation140_spill] sm:$0xff]  ;;  %v15331_v61 = vld [vmem:[#allocation6_spill] sm:$0xff] }
 0x631   : > { %3494 = vmatmul.mubr.f32.gmra.mrb[168].mxu0 %v10026_v15  ;;  %v12777_v37 = vpop.f32.mrb[80].mxu0  ;;  %v3158_v57 = vadd.f32 %v10036_v20, %v10034_v8  ;;  %v15329_v15 = vld [vmem:[#allocation99_spill] sm:$0xff] }
 0x632   : > { %3156 = vadd.xlane.f32.xlu0 %v3155_v7  ;;  %3498 = vmatprep.mubr.f32.mxu0 %v10036_v20  ;;  %v3064_v51 = vmul.f32 1.442695, %v2944_v14  ;;  %v3066_v13 = vmul.f32 1.442695, %v2945_v44  ;;  %v2248_v24 = vpop.f32.mrb[81].mxu0 }
 0x633   : > { %v10038_v23 = vpop.eup %10037  ;;  %v2881_v21 = vpop.xlane.xlu1 %2880 }
 0x634   : > { %v10040_v58 = vpop.eup %10039  ;;  %10041 = vpow2.f32 %v3064_v51  ;;  %v2946_v5 = vsub.f32 %v15328_v53, %v2881_v21  ;;  %v2947_v45 = vsub.f32 %v15329_v15, %v2881_v21  ;;  %v15332_v53 = vld [vmem:[#allocation24_spill] sm:$0xff]  ;;  %v15333_v15 = vld [vmem:[#allocation10_spill] sm:$0xff] }
 0x635   : > { %3499 = vmatmul.mubr.f32.gmra.mrb[170].mxu0 %v10034_v8  ;;  %v3161_v0 = vadd.f32 %v10040_v58, %v10038_v23  ;;  %10043 = vpow2.f32 %v3066_v13  ;;  %v12781_v7 = vpop.f32.mrb[82].mxu0 }
 0x636   : > { %3159 = vadd.xlane.f32.xlu0 %v3158_v57  ;;  %3503 = vmatprep.mubr.f32.mxu0 %v10040_v58  ;;  %v3068_v16 = vmul.f32 1.442695, %v2946_v5  ;;  %v3070_v55 = vmul.f32 1.442695, %v2947_v45  ;;  %v2253_v11 = vpop.f32.mrb[83].mxu0 }
 0x638   : > { %10045 = vpow2.f32 %v3068_v16 }
 0x639   : > { %3504 = vmatmul.mubr.f32.gmra.mrb[172].mxu0 %v10038_v23  ;;  %10047 = vpow2.f32 %v3070_v55  ;;  %v12783_v46 = vpop.f32.mrb[84].mxu0  ;;  %v12795_v55 = vpop.xlane.xlu1 %2086 }
 0x63a   : > { %3162 = vadd.xlane.f32.xlu0 %v3161_v0  ;;  %v2258_v9 = vpop.f32.mrb[85].mxu0 }
 0x63e   : > { %v10042_v63 = vpop.eup %10041 }
 0x63f   : > { %v10044_v40 = vpop.eup %10043  ;;  %v2884_v8 = vpop.xlane.xlu0 %2883 }
 0x640   : > { %v2948_v20 = vsub.f32 %v15330_v49, %v2884_v8  ;;  %v2949_v14 = vsub.f32 %v15331_v61, %v2884_v8  ;;  %3508 = vmatprep.mubr.f32.mxu0 %v10044_v40  ;;  %v3164_v54 = vadd.f32 %v10044_v40, %v10042_v63  ;;  %v12801_v8 = vpop.permute.xlu1 %9707  ;;  %v15336_v49 = vld [vmem:[#allocation23_spill] sm:$0xff] }
 0x641   : > { %3509 = vmatmul.mubr.f32.gmra.mrb[174].mxu0 %v10042_v63  ;;  %15335 = vst [vmem:[#allocation95_spill] sm:$0xff] %v12801_v8 }
 0x642   : > { %v10046_v44 = vpop.eup %10045  ;;  %v3072_v57 = vmul.f32 1.442695, %v2948_v20  ;;  %v3074_v51 = vmul.f32 1.442695, %v2949_v14  ;;  %3165 = vadd.xlane.f32.xlu0 %v3164_v54  ;;  %v15338_v14 = vld [vmem:[#allocation9_spill] sm:$0xff] }
 0x643   : > { %v10048_v23 = vpop.eup %10047 }
 0x644   : > { %10049 = vpow2.f32 %v3072_v57  ;;  %3513 = vmatprep.mubr.f32.mxu0 %v10048_v23  ;;  %v3167_v13 = vadd.f32 %v10048_v23, %v10046_v44 }
 0x645   : > { %10051 = vpow2.f32 %v3074_v51  ;;  %3514 = vmatmul.mubr.f32.gmra.mrb[176].mxu0 %v10046_v44 }
 0x646   : > { %3168 = vadd.xlane.f32.xlu1 %v3167_v13 }
 0x64e   : > { %v10050_v24 = vpop.eup %10049 }
 0x64f   : > { %v10052_v58 = vpop.eup %10051 }
 0x650   : > { %3518 = vmatprep.mubr.f32.mxu0 %v10052_v58  ;;  %v3170_v21 = vadd.f32 %v10052_v58, %v10050_v24  ;;  %v15340_v58 = vld [vmem:[#allocation11_spill] sm:$0xff] }
 0x651   : > { %3519 = vmatmul.mubr.f32.gmra.mrb[178].mxu0 %v10050_v24 }
 0x652   : > { %3171 = vadd.xlane.f32.xlu0 %v3170_v21  ;;  %v12815_v21 = vpop.permute.xlu0 %9702 }
 0x653   : > { %15341 = vst [vmem:[#allocation145_spill] sm:$0xff] %v12815_v21 }
 0x657   : > { %9717 = vrot.lane.b32.xlu1 %v15332_v53, %s10638_s16 }
 0x65a   : > { %v12789_v5 = vpop.f32.mrb[86].mxu0 }
 0x65b   : > { %9727 = vrot.lane.b32.xlu1 %v15333_v15, %s10639_s17  ;;  %v2263_v45 = vpop.f32.mrb[87].mxu0 }
 0x65e   : > { %v12793_v0 = vpop.f32.mrb[88].mxu0 }
 0x65f   : > { %v2268_v16 = vpop.f32.mrb[89].mxu0 }
 0x662   : > { %v12797_v11 = vpop.f32.mrb[90].mxu0 }
 0x663   : > { %v2273_v9 = vpop.f32.mrb[91].mxu0 }
 0x666   : > { %v12799_v63 = vpop.f32.mrb[92].mxu0 }
 0x667   : > { %15334 = vst [vmem:[#allocation138_spill] sm:$0xff] %v12799_v63  ;;  %v2278_v40 = vpop.f32.mrb[93].mxu0 }
 0x668   : > { %9712 = vrot.lane.b32.xlu0 %v15336_v49, %s10638_s16 }
 0x66b   : > { %v12805_v20 = vpop.f32.mrb[94].mxu0 }
 0x66c   : > { %15337 = vst [vmem:[#allocation96_spill] sm:$0xff] %v12805_v20  ;;  %v2283_v61 = vpop.f32.mrb[95].mxu0  ;;  %9722 = vrot.lane.b32.xlu0 %v15338_v14, %s10639_s17  ;;  %v2887_v54 = vpop.xlane.xlu1 %2886 }
 0x66d   : > { %v2950_v44 = vsub.f32 %v12495_v42, %v2887_v54  ;;  %v2951_v57 = vsub.f32 %v12498_v3, %v2887_v54  ;;  %v15343_v42 = vld [vmem:[#allocation13_spill] sm:$0xff] }
 0x66f   : > { %v12811_v51 = vpop.f32.mrb[96].mxu0  ;;  %v3076_v23 = vmul.f32 1.442695, %v2950_v44  ;;  %v3078_v13 = vmul.f32 1.442695, %v2951_v57 }
 0x670   : > { %15339 = vst [vmem:[#allocation143_spill] sm:$0xff] %v12811_v51  ;;  %v2288_v24 = vpop.f32.mrb[97].mxu0  ;;  %9732 = vrot.lane.b32.xlu0 %v15340_v58, %s10639_s17  ;;  %v12817_v15 = vpop.xlane.xlu1 %2092  ;;  %v15376_v51 = vld [vmem:[#allocation59_spill] sm:$0xff] }
 0x671   : > { %10053 = vpow2.f32 %v3076_v23 }
 0x672   : > { %10055 = vpow2.f32 %v3078_v13 }
 0x673   : > { %v12819_v45 = vpop.f32.mrb[98].mxu0 }
 0x674   : > { %15342 = vst [vmem:[#allocation101_spill] sm:$0xff] %v12819_v45  ;;  %v2293_v16 = vpop.f32.mrb[99].mxu0  ;;  %9742 = vrot.lane.b32.xlu0 %v15343_v42, %s10639_s17  ;;  %v12823_v3 = vpop.xlane.xlu0 %2089 }
 0x675   : > { %v12827_v61 = vpop.xlane.xlu1 %2098 }
 0x676   : > { %15345 = vst [vmem:[#allocation149_spill] sm:$0xff] %v12827_v61  ;;  %v15389_v61 = vld [vmem:[#allocation118_spill] sm:$0xff] }
 0x677   : > { %v12825_v9 = vpop.f32.mrb[100].mxu0 }
 0x678   : > { %15344 = vst [vmem:[#allocation102_spill] sm:$0xff] %v12825_v9  ;;  %v2298_v40 = vpop.f32.mrb[101].mxu0  ;;  %v12829_v14 = vpop.xlane.xlu0 %2095  ;;  %v15370_v9 = vld [vmem:[#allocation42_spill] sm:$0xff] }
 0x679   : > { %15346 = vst [vmem:[#allocation151_spill] sm:$0xff] %v12829_v14  ;;  %v12835_v58 = vpop.xlane.xlu1 %2104  ;;  %v15351_v40 = vmov 0.0  }
 0x67a   : > { %15349 = vst [vmem:[#allocation152_spill] sm:$0xff] %v12835_v58 }
 0x67b   : > { %v12831_v54 = vpop.f32.mrb[102].mxu0  ;;  %v10054_v44 = vpop.eup %10053 }
 0x67c   : > { %15347 = vst [vmem:[#allocation114_spill] sm:$0xff] %v12831_v54  ;;  %v2303_v57 = vpop.f32.mrb[103].mxu0  ;;  %v10056_v23 = vpop.eup %10055 }
 0x67d   : > { %v12833_v13 = vpop.xlane.xlu0 %2101  ;;  %3523 = vmatprep.mubr.f32.mxu0 %v10056_v23  ;;  %v3173_v24 = vadd.f32 %v10056_v23, %v10054_v44  ;;  %v15355_v57 = vld [vmem:[#allocation7_spill] sm:$0xff]  ;;  %v12848_v23 = vpop.xlane.xlu1 %2110 }
 0x67e   : > { %15348 = vst [vmem:[#allocation115_spill] sm:$0xff] %v12833_v13  ;;  %3524 = vmatmul.mubr.f32.gmra.mrb[180].mxu0 %v10054_v44  ;;  %15356 = vst [vmem:[#allocation158_spill] sm:$0xff] %v12848_v23  ;;  %v15380_v13 = vld [vmem:[#allocation72_spill] sm:$0xff] }
 0x67f   : > { %v12837_v16 = vpop.f32.mrb[104].mxu0  ;;  %3174 = vadd.xlane.f32.xlu1 %v3173_v24  ;;  %4430 = vmatprep.mubr.f32.mxu0 %v15351_v40  ;;  %v15359_v24 = vld [vmem:[#allocation38_spill] sm:$0xff] }
 0x680   : > { %15350 = vst [vmem:[#allocation153_spill] sm:$0xff] %v12837_v16  ;;  %v2308_v42 = vpop.f32.mrb[105].mxu0  ;;  %v15357_v16 = vmov 0.0|0.0  }
 0x681   : > { %v12840_v53 = vpop.xlane.xlu0 %2107 }
 0x682   : > { %15352 = vst [vmem:[#allocation124_spill] sm:$0xff] %v12840_v53  ;;  %8461 = vmatmul.mubr.msk.f32.vlgmr.msra.gmra.mrb[182].mxu0 %vm232_vm0, %v15354_v17  ;;  %v3085_v17 = vpop.xlane.xlu1 %3084 }
 0x683   : > { %v12842_v49 = vpop.f32.mrb[106].mxu0  ;;  %5877 = vmatpush1.msra.mxu0 %v15355_v57  ;;  %4436 = vmatprep.mubr.f32.mxu0 %v15351_v40 }
 0x684   : > { %15353 = vst [vmem:[#allocation125_spill] sm:$0xff] %v12842_v49  ;;  %v2313_v8 = vpop.f32.mrb[107].mxu0  ;;  %9368 = vmatprep.subr.bf16.mxu0 %v15357_v16 }
 0x685   : > { %v12855_v42 = vpop.xlane.xlu0 %2113  ;;  %v15362_v8 = vld [vmem:[#allocation44_spill] sm:$0xff] }
 0x686   : > { %8462 = vmatmul.mubr.msk.f32.gmra.mrb[184].mxu0 %vm232_vm0, %v15359_v24  ;;  %15360 = vst [vmem:[#allocation134_spill] sm:$0xff] %v12855_v42  ;;  %v15365_v42 = vld [vmem:[#allocation12_spill] sm:$0xff] }
 0x687   : > { %v12851_v44 = vpop.f32.mrb[108].mxu0  ;;  %4442 = vmatprep.mubr.f32.mxu0 %v15351_v40 }
 0x688   : > { %15358 = vst [vmem:[#allocation159_spill] sm:$0xff] %v12851_v44  ;;  %v2318_v49 = vpop.f32.mrb[109].mxu0  ;;  %v15364_v44 = vld [vmem:[#allocation37_spill] sm:$0xff] }
 0x689   : > { %v3082_v54 = vpop.xlane.xlu0 %3081  ;;  %v3088_v49 = vpop.xlane.xlu1 %3087 }
 0x68a   : > { %8463 = vmatmul.mubr.msk.f32.gmra.mrb[186].mxu0 %vm232_vm0, %v15362_v8  ;;  %10057 = vrcp.f32 %v3082_v54  ;;  %v15367_v8 = vld [vmem:[#allocation48_spill] sm:$0xff] }
 0x68b   : > { %v12858_v53 = vpop.f32.mrb[110].mxu0  ;;  %4448 = vmatprep.mubr.f32.mxu0 %v15351_v40  ;;  %10059 = vrcp.f32 %v3085_v17 }
 0x68c   : > { %15361 = vst [vmem:[#allocation105_spill] sm:$0xff] %v12858_v53  ;;  %v2323_v57 = vpop.f32.mrb[111].mxu0  ;;  %10061 = vrcp.f32 %v3088_v49 }
 0x68d   : > { %v3094_v21 = vpop.xlane.xlu0 %3093 }
 0x68e   : > { %8464 = vmatmul.mubr.msk.f32.gmra.mrb[188].mxu0 %vm232_vm0, %v15364_v44  ;;  %v3091_v44 = vpop.xlane.xlu1 %3090 }
 0x68f   : > { %v12863_v23 = vpop.f32.mrb[112].mxu0  ;;  %4454 = vmatprep.mubr.f32.mxu0 %v15351_v40  ;;  %10063 = vrcp.f32 %v3091_v44 }
 0x690   : > { %15363 = vst [vmem:[#allocation135_spill] sm:$0xff] %v12863_v23  ;;  %v2328_v24 = vpop.f32.mrb[113].mxu0  ;;  %9737 = vrot.lane.b32.xlu1 %v15365_v42, %s10639_s17  ;;  %v15368_v23 = vld [vmem:[#allocation14_spill] sm:$0xff]  ;;  %10065 = vrcp.f32 %v3094_v21 }
 0x692   : > { %8465 = vmatmul.mubr.msk.f32.gmra.mrb[190].mxu0 %vm232_vm0, %v15367_v8  ;;  %v15371_v8 = vld [vmem:[#allocation52_spill] sm:$0xff] }
 0x693   : > { %v12870_v53 = vpop.f32.mrb[114].mxu0  ;;  %4460 = vmatprep.mubr.f32.mxu0 %v15351_v40 }
 0x694   : > { %15366 = vst [vmem:[#allocation160_spill] sm:$0xff] %v12870_v53  ;;  %v2333_v57 = vpop.f32.mrb[115].mxu0  ;;  %9747 = vrot.lane.b32.xlu1 %v15368_v23, %s10639_s17  ;;  %v10058_v42 = vpop.eup %10057 }
 0x695   : > { %v3097_v23 = vpop.xlane.xlu1 %3096 }
 0x696   : > { %8466 = vmatmul.mubr.msk.f32.gmra.mrb[192].mxu0 %vm232_vm0, %v15370_v9  ;;  %10067 = vrcp.f32 %v3097_v23 }
 0x697   : > { %v12877_v24 = vpop.f32.mrb[116].mxu0  ;;  %4466 = vmatprep.mubr.f32.mxu0 %v15351_v40 }
 0x698   : > { %15369 = vst [vmem:[#allocation161_spill] sm:$0xff] %v12877_v24  ;;  %v2338_v54 = vpop.f32.mrb[117].mxu0  ;;  %v10060_v24 = vpop.eup %10059 }
 0x699   : > { %v15372_v54 = vld [vmem:[#allocation50_spill] sm:$0xff] }
 0x69a   : > { %8467 = vmatmul.mubr.msk.f32.gmra.mrb[194].mxu0 %vm232_vm0, %v15371_v8 }
 0x69b   : > { %v3370_v53 = vpop.f32.mrb[118].mxu0  ;;  %4472 = vmatprep.mubr.f32.mxu0 %v15351_v40 }
 0x69c   : > { %v3530_v57 = vmul.f32 %v10058_v42, %v3370_v53  ;;  %v3372_v17 = vpop.f32.mrb[119].mxu0  ;;  %v10062_v53 = vpop.eup %10061 }
 0x69d   : > { %v3100_v42 = vpop.xlane.xlu1 %3099  ;;  %v15373_v17 = vld [vmem:[#allocation55_spill] sm:$0xff]  ;;  %v10064_v21 = vpop.eup %10063 }
 0x69e   : > { %8976 = vmatprep.mubr.msk.f32.mxu1 %vm232_vm0, %v3530_v57  ;;  %8468 = vmatmul.mubr.msk.f32.gmra.mrb[196].mxu0 %vm232_vm0, %v15372_v54  ;;  %10069 = vrcp.f32 %v3100_v42  ;;  %v10066_v23 = vpop.eup %10065 }
 0x69f   : > { %v3375_v9 = vpop.f32.mrb[120].mxu0  ;;  %4478 = vmatprep.mubr.f32.mxu0 %v15351_v40 }
 0x6a0   : > { %v3532_v49 = vmul.f32 %v10060_v24, %v3375_v9  ;;  %v3377_v58 = vpop.f32.mrb[121].mxu0  ;;  %v3109_v24 = vpop.xlane.xlu0 %3108 }
 0x6a1   : > { %v15374_v58 = vld [vmem:[#allocation54_spill] sm:$0xff]  ;;  %v3103_v54 = vpop.xlane.xlu1 %3102 }
 0x6a2   : > { %8977 = vmatmul.mubr.msk.f32.vlgmr.msra.gmra.mrb[150].mxu1 %vm232_vm0, %v3532_v49  ;;  %8469 = vmatmul.mubr.msk.f32.gmra.mrb[198].mxu0 %vm232_vm0, %v15373_v17  ;;  %10071 = vrcp.f32 %v3103_v54 }
 0x6a3   : > { %v3380_v8 = vpop.f32.mrb[122].mxu0  ;;  %4484 = vmatprep.mubr.f32.mxu0 %v15351_v40 }
 0x6a4   : > { %v3534_v44 = vmul.f32 %v10062_v53, %v3380_v8  ;;  %v3382_v57 = vpop.f32.mrb[123].mxu0  ;;  %v15375_v53 = vld [vmem:[#allocation62_spill] sm:$0xff]  ;;  %v3115_v17 = vpop.xlane.xlu0 %3114 }
 0x6a6   : > { %8979 = vmatprep.mubr.msk.f32.mxu1 %vm232_vm0, %v3534_v44  ;;  %8470 = vmatmul.mubr.msk.f32.gmra.mrb[200].mxu0 %vm232_vm0, %v15374_v58  ;;  %v3106_v58 = vpop.xlane.xlu1 %3105 }
 0x6a7   : > { %4490 = vmatprep.mubr.f32.mxu0 %v15351_v40  ;;  %10073 = vrcp.f32 %v3106_v58 }
 0x6a8   : > { %v3385_v9 = vpop.f32.mrb[124].mxu0  ;;  %10075 = vrcp.f32 %v3109_v24 }
 0x6a9   : > { %v3536_v49 = vmul.f32 %v10064_v21, %v3385_v9  ;;  %v3387_v45 = vpop.f32.mrb[125].mxu0 }
 0x6aa   : > { %8471 = vmatmul.mubr.msk.f32.gmra.mrb[202].mxu0 %vm232_vm0, %v15375_v53  ;;  %v10068_v45 = vpop.eup %10067  ;;  %v15377_v53 = vld [vmem:[#allocation66_spill] sm:$0xff] }
 0x6ab   : > { %8980 = vmatmul.mubr.msk.f32.gmra.mrb[152].mxu1 %vm232_vm0, %v3536_v49  ;;  %4496 = vmatprep.mubr.f32.mxu0 %v15351_v40  ;;  %v3121_v49 = vpop.xlane.xlu0 %3120  ;;  %v10070_v54 = vpop.eup %10069 }
 0x6ac   : > { %v3390_v8 = vpop.f32.mrb[126].mxu0  ;;  %v10072_v58 = vpop.eup %10071 }
 0x6ad   : > { %v3538_v44 = vmul.f32 %v10066_v23, %v3390_v8  ;;  %v3392_v57 = vpop.f32.mrb[127].mxu0 }
 0x6ae   : > { %8472 = vmatmul.mubr.msk.f32.gmra.mrb[204].mxu0 %vm232_vm0, %v15376_v51  ;;  %v3112_v51 = vpop.xlane.xlu1 %3111  ;;  %v15378_v57 = vld [vmem:[#allocation65_spill] sm:$0xff] }
 0x6af   : > { %8982 = vmatprep.mubr.msk.f32.mxu1 %vm232_vm0, %v3538_v44  ;;  %4502 = vmatprep.mubr.f32.mxu0 %v15351_v40  ;;  %10077 = vrcp.f32 %v3112_v51 }
 0x6b0   : > { %v3395_v42 = vpop.f32.mrb[128].mxu0  ;;  %10079 = vrcp.f32 %v3115_v17 }
 0x6b1   : > { %v3540_v21 = vmul.f32 %v10068_v45, %v3395_v42  ;;  %v3397_v9 = vpop.f32.mrb[129].mxu0  ;;  %v3127_v42 = vpop.xlane.xlu0 %3126 }
 0x6b2   : > { %8473 = vmatmul.mubr.msk.f32.gmra.mrb[206].mxu0 %vm232_vm0, %v15377_v53  ;;  %v15379_v53 = vld [vmem:[#allocation71_spill] sm:$0xff]  ;;  %v10074_v24 = vpop.eup %10073 }
 0x6b3   : > { %8983 = vmatmul.mubr.msk.f32.gmra.mrb[154].mxu1 %vm232_vm0, %v3540_v21  ;;  %4508 = vmatprep.mubr.f32.mxu0 %v15351_v40  ;;  %v10076_v51 = vpop.eup %10075 }
 0x6b4   : > { %v3400_v23 = vpop.f32.mrb[130].mxu0 }
 0x6b5   : > { %v3542_v8 = vmul.f32 %v10070_v54, %v3400_v23  ;;  %v3402_v44 = vpop.f32.mrb[131].mxu0 }
 0x6b6   : > { %8474 = vmatmul.mubr.msk.f32.gmra.mrb[208].mxu0 %vm232_vm0, %v15378_v57  ;;  %v3118_v44 = vpop.xlane.xlu1 %3117  ;;  %v3133_v57 = vpop.xlane.xlu0 %3132 }
 0x6b7   : > { %8985 = vmatprep.mubr.msk.f32.mxu1 %vm232_vm0, %v3542_v8  ;;  %4514 = vmatprep.mubr.f32.mxu0 %v15351_v40  ;;  %10081 = vrcp.f32 %v3118_v44 }
 0x6b8   : > { %v3405_v45 = vpop.f32.mrb[132].mxu0  ;;  %10083 = vrcp.f32 %v3121_v49 }
 0x6b9   : > { %v3544_v21 = vmul.f32 %v10072_v58, %v3405_v45  ;;  %v3407_v9 = vpop.f32.mrb[133].mxu0  ;;  %v10078_v17 = vpop.eup %10077 }
 0x6ba   : > { %8475 = vmatmul.mubr.msk.f32.gmra.mrb[210].mxu0 %vm232_vm0, %v15379_v53  ;;  %v15381_v9 = vld [vmem:[#allocation79_spill] sm:$0xff]  ;;  %v10080_v44 = vpop.eup %10079 }
 0x6bb   : > { %8986 = vmatmul.mubr.msk.f32.gmra.mrb[156].mxu1 %vm232_vm0, %v3544_v21  ;;  %4520 = vmatprep.mubr.f32.mxu0 %v15351_v40 }
 0x6bc   : > { %v3410_v54 = vpop.f32.mrb[134].mxu0 }
 0x6bd   : > { %v3546_v23 = vmul.f32 %v10074_v24, %v3410_v54  ;;  %v3412_v8 = vpop.f32.mrb[135].mxu0  ;;  %v3139_v24 = vpop.xlane.xlu0 %3138 }
 0x6be   : > { %8476 = vmatmul.mubr.msk.f32.gmra.mrb[212].mxu0 %vm232_vm0, %v15380_v13  ;;  %v3124_v13 = vpop.xlane.xlu1 %3123  ;;  %v15382_v8 = vld [vmem:[#allocation78_spill] sm:$0xff] }
 0x6bf   : > { %8988 = vmatprep.mubr.msk.f32.mxu1 %vm232_vm0, %v3546_v23  ;;  %4526 = vmatprep.mubr.f32.mxu0 %v15351_v40  ;;  %10085 = vrcp.f32 %v3124_v13 }
 0x6c0   : > { %v3415_v58 = vpop.f32.mrb[136].mxu0  ;;  %10087 = vrcp.f32 %v3127_v42 }
 0x6c1   : > { %v3548_v45 = vmul.f32 %v10076_v51, %v3415_v58  ;;  %v3417_v21 = vpop.f32.mrb[137].mxu0  ;;  %v10082_v49 = vpop.eup %10081 }
 0x6c2   : > { %8477 = vmatmul.mubr.msk.f32.gmra.mrb[214].mxu0 %vm232_vm0, %v15381_v9  ;;  %v12929_v21 = vpop.xlane.xlu0 %3144  ;;  %v15383_v9 = vld [vmem:[#allocation85_spill] sm:$0xff]  ;;  %v10084_v13 = vpop.eup %10083 }
 0x6c3   : > { %8989 = vmatmul.mubr.msk.f32.gmra.mrb[158].mxu1 %vm232_vm0, %v3548_v45  ;;  %4532 = vmatprep.mubr.f32.mxu0 %v15351_v40 }
 0x6c4   : > { %v3420_v53 = vpop.f32.mrb[138].mxu0 }
 0x6c5   : > { %v3550_v54 = vmul.f32 %v10078_v17, %v3420_v53  ;;  %v3422_v23 = vpop.f32.mrb[139].mxu0 }
 0x6c6   : > { %8478 = vmatmul.mubr.msk.f32.gmra.mrb[216].mxu0 %vm232_vm0, %v15382_v8  ;;  %v3130_v23 = vpop.xlane.xlu1 %3129  ;;  %v15384_v8 = vld [vmem:[#allocation89_spill] sm:$0xff] }
 0x6c7   : > { %8991 = vmatprep.mubr.msk.f32.mxu1 %vm232_vm0, %v3550_v54  ;;  %4538 = vmatprep.mubr.f32.mxu0 %v15351_v40  ;;  %10089 = vrcp.f32 %v3130_v23 }
 0x6c8   : > { %v3425_v51 = vpop.f32.mrb[140].mxu0  ;;  %10091 = vrcp.f32 %v3133_v57  ;;  %v15387_v57 = vld [vmem:[#allocation104_spill] sm:$0xff] }
 0x6c9   : > { %v3552_v58 = vmul.f32 %v10080_v44, %v3425_v51  ;;  %v3427_v45 = vpop.f32.mrb[141].mxu0  ;;  %v12939_v51 = vpop.xlane.xlu0 %3150 }
 0x6ca   : > { %8479 = vmatmul.mubr.msk.f32.gmra.mrb[218].mxu0 %vm232_vm0, %v15383_v9  ;;  %v15385_v9 = vld [vmem:[#allocation90_spill] sm:$0xff]  ;;  %v10086_v42 = vpop.eup %10085  ;;  %v3136_v23 = vpop.xlane.xlu1 %3135 }
 0x6cb   : > { %8992 = vmatmul.mubr.msk.f32.gmra.mrb[160].mxu1 %vm232_vm0, %v3552_v58  ;;  %4544 = vmatprep.mubr.f32.mxu0 %v15351_v40  ;;  %10093 = vrcp.f32 %v3136_v23 }
 0x6cc   : > { %v3430_v17 = vpop.f32.mrb[142].mxu0  ;;  %10095 = vrcp.f32 %v3139_v24 }
 0x6cd   : > { %v3554_v53 = vmul.f32 %v10082_v49, %v3430_v17  ;;  %v3432_v54 = vpop.f32.mrb[143].mxu0  ;;  %v12945_v17 = vpop.xlane.xlu0 %3153 }
 0x6ce   : > { %8480 = vmatmul.mubr.msk.f32.gmra.mrb[220].mxu0 %vm232_vm0, %v15384_v8  ;;  %v2404_v8 = vld [vmem:[%s14729_s1 + $0x30] sm:$0xff] }
 0x6cf   : > { %8994 = vmatprep.mubr.msk.f32.mxu1 %vm232_vm0, %v3554_v53  ;;  %4550 = vmatprep.mubr.f32.mxu0 %v15351_v40 }
 0x6d0   : > { %v3435_v44 = vpop.f32.mrb[144].mxu0  ;;  %9024 = vmatprep.subr.mxu1 %v2404_v8 }
 0x6d1   : > { %v3556_v58 = vmul.f32 %v10084_v13, %v3435_v44  ;;  %v3437_v45 = vpop.f32.mrb[145].mxu0  ;;  %v15386_v13 = vld [vmem:[#allocation103_spill] sm:$0xff]  ;;  %v10088_v44 = vpop.eup %10087  ;;  %9025 = vmatpush3.msra.mxu1 %v2404_v8 }
 0x6d2   : > { %8481 = vmatmul.mubr.msk.f32.gmra.mrb[222].mxu0 %vm232_vm0, %v15385_v9  ;;  %9320 = vmatprep.subr.bf16.mxu1 %v15357_v16  ;;  %v3142_v8 = vpop.xlane.xlu1 %3141 }
 0x6d3   : > { %8995 = vmatmul.mubr.msk.f32.gmra.mrb[162].mxu1 %vm232_vm0, %v3556_v58  ;;  %4556 = vmatprep.mubr.f32.mxu0 %v15351_v40  ;;  %10097 = vrcp.f32 %v3142_v8 }
 0x6d4   : > { %v3440_v49 = vpop.f32.mrb[146].mxu0  ;;  %10099 = vrcp.f32 %v12929_v21 }
 0x6d5   : > { %v3558_v53 = vmul.f32 %v10086_v42, %v3440_v49  ;;  %v3442_v54 = vpop.f32.mrb[147].mxu0  ;;  %v12955_v42 = vpop.xlane.xlu0 %3156 }
 0x6d6   : > { %8482 = vmatmul.mubr.msk.f32.gmra.mrb[224].mxu0 %vm232_vm0, %v15386_v13  ;;  %v10090_v49 = vpop.eup %10089 }
 0x6d7   : > { %8997 = vmatprep.mubr.msk.f32.mxu1 %vm232_vm0, %v3558_v53  ;;  %4562 = vmatprep.mubr.f32.mxu0 %v15351_v40  ;;  %v10092_v23 = vpop.eup %10091 }
 0x6d8   : > { %v3445_v58 = vpop.f32.mrb[148].mxu0  ;;  %v10094_v24 = vpop.eup %10093 }
 0x6d9   : > { %v3560_v45 = vmul.f32 %v10088_v44, %v3445_v58  ;;  %v3447_v9 = vpop.f32.mrb[149].mxu0  ;;  %v15388_v44 = vld [vmem:[#allocation116_spill] sm:$0xff]  ;;  %v10096_v8 = vpop.eup %10095 }
 0x6da   : > { %8483 = vmatmul.mubr.msk.f32.gmra.mrb[226].mxu0 %vm232_vm0, %v15387_v57 }
 0x6db   : > { %8998 = vmatmul.mubr.msk.f32.gmra.mrb[164].mxu1 %vm232_vm0, %v3560_v45  ;;  %4568 = vmatprep.mubr.f32.mxu0 %v15351_v40  ;;  %v3160_v45 = vpop.xlane.xlu0 %3159 }
 0x6dc   : > { %v3450_v53 = vpop.f32.mrb[150].mxu0 }
 0x6dd   : > { %v3562_v54 = vmul.f32 %v10090_v49, %v3450_v53  ;;  %v3452_v13 = vpop.f32.mrb[151].mxu0  ;;  %v10098_v21 = vpop.eup %10097 }
 0x6de   : > { %8484 = vmatmul.mubr.msk.f32.gmra.mrb[228].mxu0 %vm232_vm0, %v15388_v44  ;;  %v3148_v13 = vpop.xlane.xlu1 %3147 }
 0x6df   : > { %9000 = vmatprep.mubr.msk.f32.mxu1 %vm232_vm0, %v3562_v54  ;;  %4574 = vmatprep.mubr.f32.mxu0 %v15351_v40  ;;  %v3163_v44 = vpop.xlane.xlu0 %3162  ;;  %10101 = vrcp.f32 %v3148_v13  ;;  %v15392_v13 = vld [vmem:[#allocation144_spill] sm:$0xff] }
 0x6e0   : > { %v3455_v58 = vpop.f32.mrb[152].mxu0  ;;  %10103 = vrcp.f32 %v12939_v51 }
 0x6e1   : > { %v3564_v9 = vmul.f32 %v10092_v23, %v3455_v58  ;;  %v3457_v57 = vpop.f32.mrb[153].mxu0  ;;  %v15390_v23 = vld [vmem:[#allocation132_spill] sm:$0xff]  ;;  %10105 = vrcp.f32 %v12945_v17 }
 0x6e2   : > { %8485 = vmatmul.mubr.msk.f32.gmra.mrb[230].mxu0 %vm232_vm0, %v15389_v61  ;;  %10107 = vrcp.f32 %v12955_v42 }
 0x6e3   : > { %9001 = vmatmul.mubr.msk.f32.gmra.mrb[166].mxu1 %vm232_vm0, %v3564_v9  ;;  %4580 = vmatprep.mubr.f32.mxu0 %v15351_v40  ;;  %v12974_v57 = vpop.xlane.xlu0 %3165  ;;  %10109 = vrcp.f32 %v3160_v45  ;;  %v15399_v45 = vld [vmem:[#allocation40_spill] sm:$0xff] }
 0x6e4   : > { %v3460_v49 = vpop.f32.mrb[154].mxu0  ;;  %10111 = vrcp.f32 %v3163_v44 }
 0x6e5   : > { %v3566_v53 = vmul.f32 %v10094_v24, %v3460_v49  ;;  %v3462_v54 = vpop.f32.mrb[155].mxu0  ;;  %v15391_v24 = vld [vmem:[#allocation128_spill] sm:$0xff]  ;;  %10113 = vrcp.f32 %v12974_v57  ;;  %v15402_v57 = vld [vmem:[#allocation39_spill] sm:$0xff] }
 0x6e6   : > { %8486 = vmatmul.mubr.msk.f32.gmra.mrb[232].mxu0 %vm232_vm0, %v15390_v23 }
 0x6e7   : > { %9003 = vmatprep.mubr.msk.f32.mxu1 %vm232_vm0, %v3566_v53  ;;  %4586 = vmatprep.mubr.f32.mxu0 %v15351_v40  ;;  %v12981_v23 = vpop.xlane.xlu0 %3171 }
 0x6e8   : > { %v3465_v58 = vpop.f32.mrb[156].mxu0 }
 0x6e9   : > { %v3568_v61 = vmul.f32 %v10096_v8, %v3465_v58  ;;  %v3467_v9 = vpop.f32.mrb[157].mxu0  ;;  %v10100_v8 = vpop.eup %10099 }
 0x6ea   : > { %8487 = vmatmul.mubr.msk.f32.gmra.mrb[234].mxu0 %vm232_vm0, %v15391_v24  ;;  %v12987_v24 = vpop.xlane.xlu1 %3168  ;;  %v10102_v51 = vpop.eup %10101 }
 0x6eb   : > { %9004 = vmatmul.mubr.msk.f32.gmra.mrb[168].mxu1 %vm232_vm0, %v3568_v61  ;;  %4592 = vmatprep.mubr.f32.mxu0 %v15351_v40  ;;  %10115 = vrcp.f32 %v12987_v24 }
 0x6ec   : > { %v3470_v49 = vpop.f32.mrb[158].mxu0  ;;  %10117 = vrcp.f32 %v12981_v23 }
 0x6ed   : > { %v3570_v53 = vmul.f32 %v10098_v21, %v3470_v49  ;;  %v3472_v54 = vpop.f32.mrb[159].mxu0  ;;  %v15393_v21 = vld [vmem:[#allocation137_spill] sm:$0xff] }
 0x6ee   : > { %8488 = vmatmul.mubr.msk.f32.gmra.mrb[236].mxu0 %vm232_vm0, %v15392_v13 }
 0x6ef   : > { %9006 = vmatprep.mubr.msk.f32.mxu1 %vm232_vm0, %v3570_v53  ;;  %4598 = vmatprep.mubr.f32.mxu0 %v15351_v40  ;;  %v12993_v53 = vpop.permute.xlu0 %9712 }
 0x6f0   : > { %v3475_v58 = vpop.f32.mrb[160].mxu0  ;;  %15394 = vst [vmem:[#allocation88_spill] sm:$0xff] %v12993_v53 }
 0x6f1   : > { %v3572_v61 = vmul.f32 %v10100_v8, %v3475_v58  ;;  %v3477_v9 = vpop.f32.mrb[161].mxu0  ;;  %v15395_v8 = vld [vmem:[#allocation150_spill] sm:$0xff]  ;;  %v10104_v58 = vpop.eup %10103 }
 0x6f2   : > { %8489 = vmatmul.mubr.msk.f32.gmra.mrb[238].mxu0 %vm232_vm0, %v15393_v21  ;;  %v13000_v9 = vpop.permute.xlu1 %9717 }
 0x6f3   : > { %9007 = vmatmul.mubr.msk.f32.gmra.mrb[170].mxu1 %vm232_vm0, %v3572_v61  ;;  %4604 = vmatprep.mubr.f32.mxu0 %v15351_v40  ;;  %15396 = vst [vmem:[#allocation112_spill] sm:$0xff] %v13000_v9  ;;  %v9723_v53 = vpop.permute.xlu0 %9722 }
 0x6f4   : > { %v3480_v49 = vpop.f32.mrb[162].mxu0  ;;  %v9725_v17 = vunpack.i.h.bf16 %v9723_v53 }
 0x6f5   : > { %v3574_v54 = vmul.f32 %v10102_v51, %v3480_v49  ;;  %v3482_v13 = vpop.f32.mrb[163].mxu0  ;;  %v15397_v51 = vld [vmem:[#allocation142_spill] sm:$0xff]  ;;  %v9724_v49 = vunpack.i.l.bf16 %v9723_v53 }
 0x6f6   : > { %8490 = vmatmul.mubr.msk.f32.gmra.mrb[240].mxu0 %vm232_vm0, %v15395_v8  ;;  %v15398_v13 = vld [vmem:[#allocation155_spill] sm:$0xff]  ;;  %v10106_v8 = vpop.eup %10105 }
 0x6f7   : > { %9009 = vmatprep.mubr.msk.f32.mxu1 %vm232_vm0, %v3574_v54  ;;  %4610 = vmatprep.mubr.f32.mxu0 %v15351_v40  ;;  %v9728_v54 = vpop.permute.xlu1 %9727  ;;  %v9369_v9 = vpack.c.bf16 %v9725_v17, %v9724_v49  ;;  %v10108_v53 = vpop.eup %10107  ;;  %v15400_v17 = vld [vmem:[#allocation30_spill] sm:$0xff] }
 0x6f8   : > { %v3485_v61 = vpop.f32.mrb[164].mxu0  ;;  %v10110_v49 = vpop.eup %10109 }
 0x6f9   : > { %v3576_v21 = vmul.f32 %v10104_v58, %v3485_v61  ;;  %v3487_v20 = vpop.f32.mrb[165].mxu0  ;;  %v9730_v61 = vunpack.i.h.bf16 %v9728_v54 }
 0x6fa   : > { %8491 = vmatmul.mubr.msk.f32.gmra.mrb[242].mxu0 %vm232_vm0, %v15397_v51  ;;  %v9733_v51 = vpop.permute.xlu0 %9732 }
 0x6fb   : > { %9010 = vmatmul.mubr.msk.f32.gmra.mrb[172].mxu1 %vm232_vm0, %v3576_v21  ;;  %4616 = vmatprep.mubr.f32.mxu0 %v15351_v40  ;;  %v9729_v21 = vunpack.i.l.bf16 %v9728_v54  ;;  %v9735_v44 = vunpack.i.h.bf16 %v9733_v51 }
 0x6fe   : > { %8492 = vmatmul.mubr.msk.f32.gmra.mrb[244].mxu0 %vm232_vm0, %v15398_v13 }
 0x6ff   : > { %5940 = vmatprep.mubr.f32.mxu0 %v15351_v40 }
 0x700   : > { %v3490_v58 = vpop.f32.mrb[166].mxu0 }
 0x701   : > { %v3578_v20 = vmul.f32 %v10106_v8, %v3490_v58  ;;  %v3492_v42 = vpop.f32.mrb[167].mxu0  ;;  %v9372_v8 = vpack.c.bf16 %v9730_v61, %v9729_v21  ;;  %v9734_v58 = vunpack.i.l.bf16 %v9733_v51 }
 0x702   : > { %8525 = vmatmul.mubr.msk.f32.vlgmr.msra.gmra.mrb[246].mxu0 %vm232_vm0, %v15399_v45  ;;  %v10112_v42 = vpop.eup %10111 }
 0x703   : > { %9012 = vmatprep.mubr.msk.f32.mxu1 %vm232_vm0, %v3578_v20  ;;  %9370 = vmatpush1.bf16.msra.mxu0 %v9369_v9  ;;  %v10114_v24 = vpop.eup %10113 }
 0x704   : > { %v3495_v63 = vpop.f32.mrb[168].mxu0  ;;  %5946 = vmatprep.mubr.f32.mxu0 %v15351_v40  ;;  %9371 = vmatprep.subr.bf16.mxu0 %v15357_v16 }
 0x705   : > { %v3580_v13 = vmul.f32 %v10108_v53, %v3495_v63  ;;  %v3497_v14 = vpop.f32.mrb[169].mxu0  ;;  %v9375_v63 = vpack.c.bf16 %v9735_v44, %v9734_v58  ;;  %v9743_v53 = vpop.permute.xlu0 %9742  ;;  %v15403_v58 = vld [vmem:[#allocation49_spill] sm:$0xff] }
 0x706   : > { %8526 = vmatmul.mubr.msk.f32.gmra.mrb[248].mxu0 %vm232_vm0, %v15400_v17  ;;  %v15401_v14 = vld [vmem:[#allocation45_spill] sm:$0xff]  ;;  %v9745_v17 = vunpack.i.h.bf16 %v9743_v53 }
 0x707   : > { %9013 = vmatmul.mubr.msk.f32.gmra.mrb[174].mxu1 %vm232_vm0, %v3580_v13  ;;  %9373 = vmatpush1.bf16.msra.mxu0 %v9372_v8 }
 0x708   : > { %v3500_v54 = vpop.f32.mrb[170].mxu0  ;;  %5952 = vmatprep.mubr.f32.mxu0 %v15351_v40  ;;  %9374 = vmatprep.subr.bf16.mxu0 %v15357_v16 }
 0x709   : > { %v3582_v9 = vmul.f32 %v10110_v49, %v3500_v54  ;;  %v3502_v20 = vpop.f32.mrb[171].mxu0  ;;  %v9744_v49 = vunpack.i.l.bf16 %v9743_v53 }
 0x70a   : > { %8527 = vmatmul.mubr.msk.f32.gmra.mrb[250].mxu0 %vm232_vm0, %v15401_v14 }
 0x70b   : > { %9015 = vmatprep.mubr.msk.f32.mxu1 %vm232_vm0, %v3582_v9  ;;  %9376 = vmatpush1.bf16.msra.mxu0 %v9375_v63 }
 0x70c   : > { %v3505_v61 = vpop.f32.mrb[172].mxu0  ;;  %5958 = vmatprep.mubr.f32.mxu0 %v15351_v40  ;;  %v13025_v45 = vpop.xlane.xlu1 %3174  ;;  %9377 = vmatprep.subr.bf16.mxu0 %v15357_v16 }
 0x70d   : > { %v3584_v21 = vmul.f32 %v10112_v42, %v3505_v61  ;;  %v3507_v51 = vpop.f32.mrb[173].mxu0  ;;  %v15404_v42 = vld [vmem:[#allocation43_spill] sm:$0xff]  ;;  %v9381_v61 = vpack.c.bf16 %v9745_v17, %v9744_v49  ;;  %v15407_v49 = vld [vmem:[#allocation57_spill] sm:$0xff]  ;;  %10119 = vrcp.f32 %v13025_v45 }
 0x70e   : > { %8528 = vmatmul.mubr.msk.f32.gmra.mrb[252].mxu0 %vm232_vm0, %v15402_v57  ;;  %v10116_v57 = vpop.eup %10115  ;;  %v15406_v17 = vld [vmem:[#allocation51_spill] sm:$0xff]  ;;  %10121 = vrcp.f32 %v12530_v19 }
 0x70f   : > { %9016 = vmatmul.mubr.msk.f32.gmra.mrb[176].mxu1 %vm232_vm0, %v3584_v21  ;;  %5964 = vmatprep.mubr.f32.mxu0 %v15351_v40  ;;  %v10118_v23 = vpop.eup %10117 }
 0x710   : > { %v9738_v13 = vpop.permute.xlu1 %9737 }
 0x711   : > { %v9740_v8 = vunpack.i.h.bf16 %v9738_v13  ;;  %v9739_v44 = vunpack.i.l.bf16 %v9738_v13 }
 0x712   : > { %8529 = vmatmul.mubr.msk.f32.gmra.mrb[254].mxu0 %vm232_vm0, %v15403_v58 }
 0x713   : > { %v9378_v54 = vpack.c.bf16 %v9740_v8, %v9739_v44  ;;  %5970 = vmatprep.mubr.f32.mxu0 %v15351_v40  ;;  %v15405_v44 = vld [vmem:[#allocation53_spill] sm:$0xff] }
 0x714   : > { %v9748_v9 = vpop.permute.xlu1 %9747  ;;  %v3510_v20 = vpop.f32.mrb[174].mxu0 }
 0x715   : > { %v3586_v63 = vmul.f32 %v10114_v24, %v3510_v20  ;;  %v3512_v14 = vpop.f32.mrb[175].mxu0  ;;  %9379 = vmatpush1.bf16.msra.mxu0 %v9378_v54  ;;  %v9750_v21 = vunpack.i.h.bf16 %v9748_v9  ;;  %v9749_v51 = vunpack.i.l.bf16 %v9748_v9  ;;  %v15408_v20 = vld [vmem:[#allocation56_spill] sm:$0xff] }
 0x716   : > { %8530 = vmatmul.mubr.msk.f32.gmra.mrb[0].mxu0 %vm232_vm0, %v15404_v42  ;;  %9380 = vmatprep.subr.bf16.mxu0 %v15357_v16  ;;  %v15410_v14 = vld [vmem:[#allocation61_spill] sm:$0xff] }
 0x717   : > { %9018 = vmatprep.mubr.msk.f32.mxu1 %vm232_vm0, %v3586_v63  ;;  %5976 = vmatprep.mubr.f32.mxu0 %v15351_v40  ;;  %v9384_v58 = vpack.c.bf16 %v9750_v21, %v9749_v51  ;;  %v15409_v63 = vld [vmem:[#allocation64_spill] sm:$0xff]  ;;  %v15411_v42 = vld [vmem:[#allocation69_spill] sm:$0xff]  ;;  %v15414_v51 = vld [vmem:[#allocation74_spill] sm:$0xff]  ;;  %v10120_v45 = vpop.eup %10119 }
 0x718   : > { %v3515_v53 = vpop.f32.mrb[176].mxu0  ;;  %v15413_v21 = vld [vmem:[#allocation73_spill] sm:$0xff] }
 0x719   : > { %v3588_v13 = vmul.f32 %v10116_v57, %v3515_v53  ;;  %v3517_v8 = vpop.f32.mrb[177].mxu0  ;;  %9382 = vmatpush1.bf16.msra.mxu0 %v9381_v61  ;;  %v15412_v61 = vld [vmem:[#allocation68_spill] sm:$0xff]  ;;  %v15415_v57 = vld [vmem:[#allocation83_spill] sm:$0xff] }
 0x71a   : > { %8531 = vmatmul.mubr.msk.f32.gmra.mrb[2].mxu0 %vm232_vm0, %v15405_v44  ;;  %9383 = vmatprep.subr.bf16.mxu0 %v15357_v16  ;;  %v15416_v53 = vld [vmem:[#allocation80_spill] sm:$0xff]  ;;  %v15418_v8 = vld [vmem:[#allocation63_spill] sm:$0xff] }
 0x71b   : > { %9019 = vmatmul.mubr.msk.f32.gmra.mrb[178].mxu1 %vm232_vm0, %v3588_v13  ;;  %5982 = vmatprep.mubr.f32.mxu0 %v15351_v40  ;;  %v15417_v13 = vld [vmem:[#allocation87_spill] sm:$0xff]  ;;  %10123 = vrcp.f32 %v15418_v8 }
 0x71c   : > { %10125 = vrcp.f32 %v12536_v39  ;;  %v15419_v44 = vld [vmem:[#allocation91_spill] sm:$0xff] }
 0x71d   : > { %9385 = vmatpush1.bf16.msra.mxu0 %v9384_v58  ;;  %v15420_v58 = vld [vmem:[#allocation136_spill] sm:$0xff] }
 0x71e   : > { %8532 = vmatmul.mubr.msk.f32.gmra.mrb[4].mxu0 %vm232_vm0, %v15406_v17  ;;  %9386 = vmatprep.subr.bf16.mxu0 %v15357_v16  ;;  %10127 = vrcp.f32 %v15420_v58  ;;  %v10122_v17 = vpop.eup %10121 }
 0x71f   : > { %5988 = vmatprep.mubr.f32.mxu0 %v15351_v40  ;;  %10129 = vrcp.f32 %v12541_v47 }
 0x720   : > { %10131 = vrcp.f32 %v12534_v38 }
 0x721   : > { %10133 = vrcp.f32 %v12593_v6 }
 0x722   : > { %8533 = vmatmul.mubr.msk.f32.gmra.mrb[6].mxu0 %vm232_vm0, %v15407_v49  ;;  %10135 = vrcp.f32 %v12549_v27  ;;  %v15425_v27 = vld [vmem:[#allocation27_spill] sm:$0xff] }
 0x723   : > { %5994 = vmatprep.mubr.f32.mxu0 %v15351_v40  ;;  %10137 = vrcp.f32 %v12621_v2  ;;  %v9590_v58 = vunpack.i.h.bf16 %v15425_v27  ;;  %v9589_v2 = vunpack.i.l.bf16 %v15425_v27 }
 0x724   : > { %v3520_v54 = vpop.f32.mrb[178].mxu0  ;;  %10139 = vrcp.f32 %v12582_v52 }
 0x725   : > { %v3590_v24 = vmul.f32 %v10118_v23, %v3520_v54  ;;  %v3522_v9 = vpop.f32.mrb[179].mxu0  ;;  %v15421_v54 = vld [vmem:[#allocation94_spill] sm:$0xff]  ;;  %v10124_v47 = vpop.eup %10123  ;;  %10141 = vrcp.f32 %v12639_v48  ;;  %v9327_v48 = vpack.c.bf16 %v9590_v58, %v9589_v2 }
 0x726   : > { %8534 = vmatmul.mubr.msk.f32.gmra.mrb[8].mxu0 %vm232_vm0, %v15408_v20  ;;  %v2341_v20 = vmul.f32 %v10122_v17, %v12679_v35  ;;  %v2343_v38 = vmul.f32 %v10124_v47, %v12691_v29  ;;  %v15424_v35 = vld [vmem:[#allocation107_spill] sm:$0xff]  ;;  %10143 = vrcp.f32 %v12629_v22 }
 0x727   : > { %9021 = vmatprep.mubr.msk.f32.mxu1 %vm232_vm0, %v3590_v24  ;;  %6000 = vmatprep.mubr.f32.mxu0 %v15351_v40  ;;  %v15422_v24 = vld [vmem:[#allocation25_spill] sm:$0xff]  ;;  %10145 = vrcp.f32 %v12658_v56 }
 0x728   : > { %v9570_v9 = vunpack.i.h.bf16 %v15422_v24  ;;  %v9569_v39 = vunpack.i.l.bf16 %v15422_v24  ;;  %10147 = vrcp.f32 %v12667_v31 }
 0x729   : > { %10149 = vrcp.f32 %v12689_v12 }
 0x72a   : > { %8535 = vmatmul.mubr.msk.f32.gmra.mrb[10].mxu0 %vm232_vm0, %v15409_v63  ;;  %v9321_v6 = vpack.c.bf16 %v9570_v9, %v9569_v39  ;;  %10151 = vrcp.f32 %v12698_v28 }
 0x72b   : > { %6006 = vmatprep.mubr.f32.mxu0 %v15351_v40  ;;  %10153 = vrcp.f32 %v12738_v4 }
 0x72c   : > { %10155 = vrcp.f32 %v12721_v33 }
 0x72e   : > { %8536 = vmatmul.mubr.msk.f32.gmra.mrb[12].mxu0 %vm232_vm0, %v15410_v14  ;;  %v10126_v14 = vpop.eup %10125  ;;  %10157 = vrcp.f32 %v12743_v26 }
 0x72f   : > { %6012 = vmatprep.mubr.f32.mxu0 %v15351_v40  ;;  %v10128_v29 = vpop.eup %10127  ;;  %10159 = vrcp.f32 %v12750_v32 }
 0x730   : > { %v10130_v8 = vpop.eup %10129  ;;  %10161 = vrcp.f32 %v12769_v59 }
 0x731   : > { %v2349_v17 = vmul.f32 %v10130_v8, %v12723_v1  ;;  %v15431_v8 = vld [vmem:[#allocation41_spill] sm:$0xff] }
 0x732   : > { %8537 = vmatmul.mubr.msk.f32.gmra.mrb[14].mxu0 %vm232_vm0, %v15411_v42  ;;  %v15423_v42 = vld [vmem:[#allocation33_spill] sm:$0xff] }
 0x733   : > { %6018 = vmatprep.mubr.f32.mxu0 %v15351_v40 }
 0x736   : > { %8538 = vmatmul.mubr.msk.f32.gmra.mrb[16].mxu0 %vm232_vm0, %v15412_v61  ;;  %v9580_v61 = vunpack.i.h.bf16 %v15423_v42 }
 0x737   : > { %6024 = vmatprep.mubr.f32.mxu0 %v15351_v40 }
 0x73a   : > { %8539 = vmatmul.mubr.msk.f32.gmra.mrb[18].mxu0 %vm232_vm0, %v15413_v21  ;;  %v9579_v21 = vunpack.i.l.bf16 %v15423_v42 }
 0x73b   : > { %6030 = vmatprep.mubr.f32.mxu0 %v15351_v40 }
 0x73e   : > { %8540 = vmatmul.mubr.msk.f32.gmra.mrb[20].mxu0 %vm232_vm0, %v15414_v51 }
 0x73f   : > { %6036 = vmatprep.mubr.f32.mxu0 %v15351_v40 }
 0x742   : > { %8541 = vmatmul.mubr.msk.f32.gmra.mrb[22].mxu0 %vm232_vm0, %v15415_v57  ;;  %v2345_v57 = vmul.f32 %v10126_v14, %v12700_v50  ;;  %v2347_v50 = vmul.f32 %v10128_v29, %v12708_v25  ;;  %v10132_v25 = vpop.eup %10131  ;;  %10163 = vrcp.f32 %v12773_v34 }
 0x743   : > { %6042 = vmatprep.mubr.f32.mxu0 %v15351_v40  ;;  %v10134_v52 = vpop.eup %10133  ;;  %v2351_v9 = vmul.f32 %v10132_v25, %v12729_v62  ;;  %10165 = vrcp.f32 %v12795_v55 }
 0x744   : > { %v2353_v47 = vmul.f32 %v10134_v52, %v12736_v18  ;;  %v10136_v62 = vpop.eup %10135  ;;  %v15429_v18 = vld [vmem:[#allocation29_spill] sm:$0xff]  ;;  %10167 = vrcp.f32 %v12823_v3 }
 0x745   : > { %v10138_v22 = vpop.eup %10137  ;;  %v9609_v56 = vunpack.i.l.bf16 %v15429_v18  ;;  %10169 = vrcp.f32 %v12817_v15  ;;  %v15441_v15 = vld [vmem:[#allocation151_spill] sm:$0xff] }
 0x746   : > { %8542 = vmatmul.mubr.msk.f32.gmra.mrb[24].mxu0 %vm232_vm0, %v15416_v53 }
 0x747   : > { %6048 = vmatprep.mubr.f32.mxu0 %v15351_v40 }
 0x74a   : > { %8543 = vmatmul.mubr.msk.f32.gmra.mrb[26].mxu0 %vm232_vm0, %v15417_v13 }
 0x74b   : > { %6054 = vmatprep.mubr.f32.mxu0 %v15351_v40 }
 0x74e   : > { %8544 = vmatmul.mubr.msk.f32.gmra.mrb[28].mxu0 %vm232_vm0, %v15419_v44  ;;  %v9324_v44 = vpack.c.bf16 %v9580_v61, %v9579_v21  ;;  %v9610_v21 = vunpack.i.h.bf16 %v15429_v18 }
 0x74f   : > { %6060 = vmatprep.mubr.f32.mxu0 %v15351_v40 }
 0x750   : > { %v9333_v12 = vpack.c.bf16 %v9610_v21, %v9609_v56 }
 0x751   : > { %v3525_v19 = vpop.f32.mrb[180].mxu0 }
 0x752   : > { %v3592_v49 = vmul.f32 %v10120_v45, %v3525_v19  ;;  %v3527_v23 = vpop.f32.mrb[181].mxu0  ;;  %8545 = vmatmul.mubr.msk.f32.gmra.mrb[30].mxu0 %vm232_vm0, %v15421_v54  ;;  %v15426_v19 = vld [vmem:[#allocation109_spill] sm:$0xff]  ;;  %v15427_v54 = vld [vmem:[#allocation35_spill] sm:$0xff] }
 0x753   : > { %6066 = vmatprep.mubr.f32.mxu0 %v15351_v40  ;;  %v9600_v1 = vunpack.i.h.bf16 %v15427_v54  ;;  %v9599_v24 = vunpack.i.l.bf16 %v15427_v54 }
 0x754   : > { %9022 = vmatmul.mubr.msk.f32.gmra.mrb[180].mxu1 %vm232_vm0, %v3592_v49 }
 0x755   : > { %9026 = vmatprep.mubr.msk.f32.mxu1 %vm232_vm0, %v2341_v20  ;;  %v13104_v63 = vpop.f32.mrb[182].mxu0  ;;  %v15428_v20 = vld [vmem:[#allocation120_spill] sm:$0xff]  ;;  %v9330_v61 = vpack.c.bf16 %v9600_v1, %v9599_v24 }
 0x756   : > { %v13109_v51 = vpop.f32.mrb[183].mxu0  ;;  %8546 = vmatmul.mubr.msk.f32.gmra.mrb[32].mxu0 %vm232_vm0, %v15424_v35  ;;  %v15434_v1 = vld [vmem:[#allocation148_spill] sm:$0xff] }
 0x757   : > { %v4623_v53 = vmax.f32 %v13104_v63, %v13109_v51  ;;  %6072 = vmatprep.mubr.f32.mxu0 %v15351_v40 }
 0x758   : > { %9027 = vmatmul.mubr.msk.f32.vlgmr.msra.gmra.mrb[150].mxu1 %vm232_vm0, %v2343_v38  ;;  %v2355_v38 = vmul.f32 %v10136_v62, %v12741_v60  ;;  %v10140_v60 = vpop.eup %10139  ;;  %10171 = vrcp.f32 %v15441_v15  ;;  %v15457_v15 = vld [vmem:[#allocation124_spill] sm:$0xff] }
 0x759   : > { %9322 = vmatpush1.bf16.msra.mxu1 %v9321_v6  ;;  %9029 = vmatprep.mubr.msk.f32.mxu1 %vm232_vm0, %v2345_v57  ;;  %v13121_v13 = vpop.f32.mrb[184].mxu0  ;;  %v15430_v6 = vld [vmem:[#allocation139_spill] sm:$0xff]  ;;  %v2357_v57 = vmul.f32 %v10138_v22, %v12748_v41  ;;  %v10142_v31 = vpop.eup %10141  ;;  %v9620_v41 = vunpack.i.h.bf16 %v15431_v8  ;;  %v2359_v27 = vmul.f32 %v10140_v60, %v12759_v36 }
 0x75a   : > { %4624 = vmax.xlane.f32.xlu1 %v4623_v53  ;;  %v13125_v45 = vpop.f32.mrb[185].mxu0  ;;  %8547 = vmatmul.mubr.msk.f32.gmra.mrb[34].mxu0 %vm232_vm0, %v15426_v19  ;;  %v2361_v19 = vmul.f32 %v10142_v31, %v12764_v10  ;;  %v10144_v36 = vpop.eup %10143  ;;  %v15433_v10 = vld [vmem:[#allocation47_spill] sm:$0xff] }
 0x75b   : > { %v4626_v49 = vmax.f32 %v13121_v13, %v13125_v45  ;;  %9323 = vmatprep.subr.bf16.mxu1 %v15357_v16  ;;  %6078 = vmatprep.mubr.f32.mxu0 %v15351_v40  ;;  %v10146_v28 = vpop.eup %10145  ;;  %v9630_v25 = vunpack.i.h.bf16 %v15433_v10  ;;  %v2363_v52 = vmul.f32 %v10144_v36, %v12767_v43  ;;  %v9629_v4 = vunpack.i.l.bf16 %v15433_v10  ;;  %v15436_v22 = vld [vmem:[#allocation123_spill] sm:$0xff] }
 0x75c   : > { %9030 = vmatmul.mubr.msk.f32.gmra.mrb[152].mxu1 %vm232_vm0, %v2347_v50  ;;  %v15432_v50 = vld [vmem:[#allocation113_spill] sm:$0xff]  ;;  %v2365_v24 = vmul.f32 %v10146_v28, %v12771_v30  ;;  %v10148_v43 = vpop.eup %10147 }
 0x75d   : > { %9325 = vmatpush1.bf16.msra.mxu1 %v9324_v44  ;;  %9032 = vmatprep.mubr.msk.f32.mxu1 %vm232_vm0, %v2349_v17  ;;  %v13139_v23 = vpop.f32.mrb[186].mxu0  ;;  %v9619_v44 = vunpack.i.l.bf16 %v15431_v8  ;;  %v10150_v33 = vpop.eup %10149  ;;  %v9339_v26 = vpack.c.bf16 %v9630_v25, %v9629_v4  ;;  %v15439_v8 = vld [vmem:[#allocation171_spill] sm:$0xff]  ;;  %v15443_v25 = vld [vmem:[#allocation170_spill] sm:$0xff] }
 0x75e   : > { %4627 = vmax.xlane.f32.xlu1 %v4626_v49  ;;  %v13144_v39 = vpop.f32.mrb[187].mxu0  ;;  %8548 = vmatmul.mubr.msk.f32.gmra.mrb[36].mxu0 %vm232_vm0, %v15428_v20 }
 0x75f   : > { %v4629_v14 = vmax.f32 %v13139_v23, %v13144_v39  ;;  %9326 = vmatprep.subr.bf16.mxu1 %v15357_v16  ;;  %6084 = vmatprep.mubr.f32.mxu0 %v15351_v40  ;;  %v9336_v49 = vpack.c.bf16 %v9620_v41, %v9619_v44  ;;  %v9690_v41 = vunpack.i.h.bf16 %v15439_v8  ;;  %v9689_v44 = vunpack.i.l.bf16 %v15439_v8 }
 0x760   : > { %9033 = vmatmul.mubr.msk.f32.gmra.mrb[154].mxu1 %vm232_vm0, %v2351_v9 }
 0x761   : > { %9328 = vmatpush1.bf16.msra.mxu1 %v9327_v48  ;;  %9035 = vmatprep.mubr.msk.f32.mxu1 %vm232_vm0, %v2353_v47  ;;  %v13157_v42 = vpop.f32.mrb[188].mxu0  ;;  %v15435_v48 = vld [vmem:[#allocation60_spill] sm:$0xff]  ;;  %v9348_v28 = vpack.c.bf16 %v9690_v41, %v9689_v44  ;;  %v15454_v41 = vld [vmem:[#allocation102_spill] sm:$0xff] }
 0x762   : > { %4630 = vmax.xlane.f32.xlu0 %v4629_v14  ;;  %v13161_v35 = vpop.f32.mrb[189].mxu0  ;;  %8549 = vmatmul.mubr.msk.f32.gmra.mrb[38].mxu0 %vm232_vm0, %v15430_v6  ;;  %v9640_v30 = vunpack.i.h.bf16 %v15435_v48  ;;  %v9639_v47 = vunpack.i.l.bf16 %v15435_v48  ;;  %v2367_v14 = vmul.f32 %v10148_v43, %v12777_v37  ;;  %v10152_v37 = vpop.eup %10151 }
 0x763   : > { %v4632_v53 = vmax.f32 %v13157_v42, %v13161_v35  ;;  %9329 = vmatprep.subr.bf16.mxu1 %v15357_v16  ;;  %6090 = vmatprep.mubr.f32.mxu0 %v15351_v40  ;;  %v10154_v32 = vpop.eup %10153  ;;  %v2371_v56 = vmul.f32 %v10152_v37, %v12783_v46 }
 0x764   : > { %9036 = vmatmul.mubr.msk.f32.gmra.mrb[156].mxu1 %vm232_vm0, %v2355_v38  ;;  %v9342_v38 = vpack.c.bf16 %v9640_v30, %v9639_v47  ;;  %v2373_v60 = vmul.f32 %v10154_v32, %v12789_v5  ;;  %v10156_v46 = vpop.eup %10155  ;;  %v15447_v30 = vld [vmem:[#allocation115_spill] sm:$0xff]  ;;  %v15450_v32 = vld [vmem:[#allocation141_spill] sm:$0xff] }
 0x765   : > { %9331 = vmatpush1.bf16.msra.mxu1 %v9330_v61  ;;  %9038 = vmatprep.mubr.msk.f32.mxu1 %vm232_vm0, %v2357_v57  ;;  %v13175_v29 = vpop.f32.mrb[190].mxu0  ;;  %v2369_v61 = vmul.f32 %v10150_v33, %v12781_v7  ;;  %v15437_v7 = vld [vmem:[#allocation34_spill] sm:$0xff]  ;;  %v10158_v5 = vpop.eup %10157  ;;  %v15446_v33 = vld [vmem:[#allocation149_spill] sm:$0xff] }
 0x766   : > { %4633 = vmax.xlane.f32.xlu1 %v4632_v53  ;;  %v13180_v58 = vpop.f32.mrb[191].mxu0  ;;  %8550 = vmatmul.mubr.msk.f32.gmra.mrb[40].mxu0 %vm232_vm0, %v15432_v50  ;;  %v9685_v6 = vunpack.i.h.bf16 %v15437_v7  ;;  %v15438_v53 = vld [vmem:[#allocation154_spill] sm:$0xff]  ;;  %v9684_v59 = vunpack.i.l.bf16 %v15437_v7  ;;  %v15440_v50 = vld [vmem:[#allocation133_spill] sm:$0xff]  ;;  %10173 = vrcp.f32 %v15446_v33 }
 0x767   : > { %v4635_v2 = vmax.f32 %v13175_v29, %v13180_v58  ;;  %9332 = vmatprep.subr.bf16.mxu1 %v15357_v16  ;;  %6096 = vmatprep.mubr.f32.mxu0 %v15351_v40  ;;  %10175 = vrcp.f32 %v15447_v30  ;;  %v15460_v33 = vld [vmem:[#allocation125_spill] sm:$0xff]  ;;  %v15461_v30 = vld [vmem:[#allocation134_spill] sm:$0xff] }
 0x768   : > { %9039 = vmatmul.mubr.msk.f32.gmra.mrb[158].mxu1 %vm232_vm0, %v2359_v27  ;;  %v2375_v27 = vmul.f32 %v10156_v46, %v12793_v0  ;;  %v9345_v3 = vpack.c.bf16 %v9685_v6, %v9684_v59  ;;  %v10160_v0 = vpop.eup %10159  ;;  %v15451_v6 = vld [vmem:[#allocation101_spill] sm:$0xff] }
 0x769   : > { %9334 = vmatpush1.bf16.msra.mxu1 %v9333_v12  ;;  %9041 = vmatprep.mubr.msk.f32.mxu1 %vm232_vm0, %v2361_v19  ;;  %v13193_v17 = vpop.f32.mrb[192].mxu0  ;;  %v2377_v12 = vmul.f32 %v10158_v5, %v12797_v11  ;;  %v10162_v36 = vpop.eup %10161  ;;  %v15442_v11 = vld [vmem:[#allocation138_spill] sm:$0xff]  ;;  %v15453_v5 = vld [vmem:[#allocation145_spill] sm:$0xff] }
 0x76a   : > { %4636 = vmax.xlane.f32.xlu0 %v4635_v2  ;;  %v13197_v54 = vpop.f32.mrb[193].mxu0  ;;  %8551 = vmatmul.mubr.msk.f32.gmra.mrb[42].mxu0 %vm232_vm0, %v15434_v1  ;;  %v10164_v48 = vpop.eup %10163  ;;  %v9705_v8 = vunpack.i.h.bf16 %v15453_v5 }
 0x76b   : > { %v4638_v9 = vmax.f32 %v13193_v17, %v13197_v54  ;;  %9335 = vmatprep.subr.bf16.mxu1 %v15357_v16  ;;  %6102 = vmatprep.mubr.f32.mxu0 %v15351_v40 }
 0x76c   : > { %9042 = vmatmul.mubr.msk.f32.gmra.mrb[160].mxu1 %vm232_vm0, %v2363_v52  ;;  %v15444_v52 = vld [vmem:[#allocation106_spill] sm:$0xff] }
 0x76d   : > { %9337 = vmatpush1.bf16.msra.mxu1 %v9336_v49  ;;  %9044 = vmatprep.mubr.msk.f32.mxu1 %vm232_vm0, %v2365_v24  ;;  %v13211_v20 = vpop.f32.mrb[194].mxu0  ;;  %v2379_v49 = vmul.f32 %v10160_v0, %v15442_v11  ;;  %v9695_v1 = vunpack.i.h.bf16 %v15444_v52  ;;  %v9694_v4 = vunpack.i.l.bf16 %v15444_v52  ;;  %v15445_v24 = vld [vmem:[#allocation96_spill] sm:$0xff] }
 0x76e   : > { %4639 = vmax.xlane.f32.xlu1 %v4638_v9  ;;  %v13216_v62 = vpop.f32.mrb[195].mxu0  ;;  %8552 = vmatmul.mubr.msk.f32.gmra.mrb[44].mxu0 %vm232_vm0, %v15436_v22  ;;  %v2381_v9 = vmul.f32 %v10162_v36, %v15445_v24  ;;  %v15448_v22 = vld [vmem:[#allocation117_spill] sm:$0xff] }
 0x76f   : > { %v4641_v18 = vmax.f32 %v13211_v20, %v13216_v62  ;;  %9338 = vmatprep.subr.bf16.mxu1 %v15357_v16  ;;  %6108 = vmatprep.mubr.f32.mxu0 %v15351_v40  ;;  %v9351_v7 = vpack.c.bf16 %v9695_v1, %v9694_v4  ;;  %v15459_v1 = vld [vmem:[#allocation153_spill] sm:$0xff] }
 0x770   : > { %9045 = vmatmul.mubr.msk.f32.gmra.mrb[162].mxu1 %vm232_vm0, %v2367_v14  ;;  %v10166_v14 = vpop.eup %10165 }
 0x771   : > { %9340 = vmatpush1.bf16.msra.mxu1 %v9339_v26  ;;  %9047 = vmatprep.mubr.msk.f32.mxu1 %vm232_vm0, %v2369_v61  ;;  %v13229_v21 = vpop.f32.mrb[196].mxu0  ;;  %v9700_v26 = vunpack.i.h.bf16 %v15448_v22  ;;  %v9699_v61 = vunpack.i.l.bf16 %v15448_v22 }
 0x772   : > { %4642 = vmax.xlane.f32.xlu0 %v4641_v18  ;;  %v13233_v57 = vpop.f32.mrb[197].mxu0  ;;  %8553 = vmatmul.mubr.msk.f32.gmra.mrb[46].mxu0 %vm232_vm0, %v15438_v53  ;;  %v15449_v18 = vld [vmem:[#allocation143_spill] sm:$0xff] }
 0x773   : > { %v4644_v31 = vmax.f32 %v13229_v21, %v13233_v57  ;;  %9341 = vmatprep.subr.bf16.mxu1 %v15357_v16  ;;  %6114 = vmatprep.mubr.f32.mxu0 %v15351_v40  ;;  %v2383_v37 = vmul.f32 %v10164_v48, %v15449_v18  ;;  %v9354_v46 = vpack.c.bf16 %v9700_v26, %v9699_v61  ;;  %v15462_v18 = vld [vmem:[#allocation159_spill] sm:$0xff] }
 0x774   : > { %9048 = vmatmul.mubr.msk.f32.gmra.mrb[164].mxu1 %vm232_vm0, %v2371_v56  ;;  %v2385_v56 = vmul.f32 %v10166_v14, %v15451_v6  ;;  %v15464_v6 = vld [vmem:[#allocation88_spill] sm:$0xff] }
 0x775   : > { %9343 = vmatpush1.bf16.msra.mxu1 %v9342_v38  ;;  %9050 = vmatprep.mubr.msk.f32.mxu1 %vm232_vm0, %v2373_v60  ;;  %v13248_v34 = vpop.f32.mrb[198].mxu0  ;;  %v10168_v38 = vpop.eup %10167  ;;  %v15452_v60 = vld [vmem:[#allocation152_spill] sm:$0xff] }
 0x776   : > { %4645 = vmax.xlane.f32.xlu1 %v4644_v31  ;;  %v13254_v55 = vpop.f32.mrb[199].mxu0  ;;  %8554 = vmatmul.mubr.msk.f32.gmra.mrb[48].mxu0 %vm232_vm0, %v15440_v50  ;;  %v10170_v59 = vpop.eup %10169  ;;  %10177 = vrcp.f32 %v15452_v60  ;;  %v2387_v44 = vmul.f32 %v10168_v38, %v15454_v41  ;;  %v15463_v38 = vld [vmem:[#allocation105_spill] sm:$0xff] }
 0x777   : > { %v4647_v19 = vmax.f32 %v13248_v34, %v13254_v55  ;;  %9344 = vmatprep.subr.bf16.mxu1 %v15357_v16  ;;  %6120 = vmatprep.mubr.f32.mxu0 %v15351_v40 }
 0x778   : > { %9051 = vmatmul.mubr.msk.f32.gmra.mrb[166].mxu1 %vm232_vm0, %v2375_v27  ;;  %v15455_v27 = vld [vmem:[#allocation158_spill] sm:$0xff] }
 0x779   : > { %9346 = vmatpush1.bf16.msra.mxu1 %v9345_v3  ;;  %9053 = vmatprep.mubr.msk.f32.mxu1 %vm232_vm0, %v2377_v12  ;;  %v13266_v2 = vpop.f32.mrb[200].mxu0  ;;  %10179 = vrcp.f32 %v15455_v27  ;;  %v10172_v3 = vpop.eup %10171  ;;  %v9704_v12 = vunpack.i.l.bf16 %v15453_v5 }
 0x77a   : > { %4648 = vmax.xlane.f32.xlu0 %v4647_v19  ;;  %v13269_v10 = vpop.f32.mrb[201].mxu0  ;;  %8555 = vmatmul.mubr.msk.f32.gmra.mrb[50].mxu0 %vm232_vm0, %v15443_v25  ;;  %v15456_v19 = vld [vmem:[#allocation114_spill] sm:$0xff]  ;;  %10181 = vrcp.f32 %v15457_v15  ;;  %v10174_v11 = vpop.eup %10173  ;;  %v2391_v4 = vmul.f32 %v10172_v3, %v15459_v1 }
 0x77b   : > { %v4650_v43 = vmax.f32 %v13266_v2, %v13269_v10  ;;  %9347 = vmatprep.subr.bf16.mxu1 %v15357_v16  ;;  %6126 = vmatprep.mubr.f32.mxu0 %v15351_v40  ;;  %v2389_v0 = vmul.f32 %v10170_v59, %v15456_v19  ;;  %v2393_v48 = vmul.f32 %v10174_v11, %v15460_v33  ;;  %10183 = vrcp.f32 %v15461_v30 }
 0x77c   : > { %9054 = vmatmul.mubr.msk.f32.gmra.mrb[168].mxu1 %vm232_vm0, %v2379_v49  ;;  %v15458_v49 = vld [vmem:[#allocation95_spill] sm:$0xff] }
 0x77d   : > { %9349 = vmatpush1.bf16.msra.mxu1 %v9348_v28  ;;  %9056 = vmatprep.mubr.msk.f32.mxu1 %vm232_vm0, %v2381_v9  ;;  %v13284_v47 = vpop.f32.mrb[202].mxu0  ;;  %v9710_v25 = vunpack.i.h.bf16 %v15458_v49  ;;  %v9709_v52 = vunpack.i.l.bf16 %v15458_v49  ;;  %v10176_v9 = vpop.eup %10175 }
 0x77e   : > { %4651 = vmax.xlane.f32.xlu1 %v4650_v43  ;;  %v13289_v40 = vpop.f32.mrb[203].mxu0  ;;  %8556 = vmatmul.mubr.msk.f32.gmra.mrb[52].mxu0 %vm232_vm0, %v15450_v32  ;;  %v9357_v43 = vpack.c.bf16 %v9705_v8, %v9704_v12  ;;  %v15465_v8 = vld [vmem:[#allocation135_spill] sm:$0xff]  ;;  %v15467_v12 = vld [vmem:[#allocation112_spill] sm:$0xff] }
 0x77f   : > { %v4653_v53 = vmax.f32 %v13284_v47, %v13289_v40  ;;  %9350 = vmatprep.subr.bf16.mxu1 %v15357_v16  ;;  %v9360_v61 = vpack.c.bf16 %v9710_v25, %v9709_v52  ;;  %v9720_v19 = vunpack.i.h.bf16 %v15467_v12  ;;  %v15468_v25 = vld [vmem:[#allocation161_spill] sm:$0xff] }
 0x780   : > { %9057 = vmatmul.mubr.msk.f32.gmra.mrb[170].mxu1 %vm232_vm0, %v2383_v37  ;;  %v10178_v26 = vpop.eup %10177  ;;  %v2395_v37 = vmul.f32 %v10176_v9, %v15462_v18 }
 0x781   : > { %9352 = vmatpush1.bf16.msra.mxu1 %v9351_v7  ;;  %9059 = vmatprep.mubr.msk.f32.mxu1 %vm232_vm0, %v2385_v56  ;;  %v13300_v31 = vpop.f32.mrb[204].mxu0  ;;  %v2397_v7 = vmul.f32 %v10178_v26, %v15463_v38  ;;  %v9715_v56 = vunpack.i.h.bf16 %v15464_v6 }
 0x782   : > { %4654 = vmax.xlane.f32.xlu0 %v4653_v53  ;;  %v13305_v50 = vpop.f32.mrb[205].mxu0  ;;  %9353 = vmatprep.subr.bf16.mxu1 %v15357_v16  ;;  %v9714_v53 = vunpack.i.l.bf16 %v15464_v6 }
 0x783   : > { %v4656_v36 = vmax.f32 %v13300_v31, %v13305_v50  ;;  %v10180_v60 = vpop.eup %10179 }
 0x784   : > { %9060 = vmatmul.mubr.msk.f32.gmra.mrb[172].mxu1 %vm232_vm0, %v2387_v44  ;;  %v15466_v44 = vld [vmem:[#allocation160_spill] sm:$0xff]  ;;  %v9363_v15 = vpack.c.bf16 %v9715_v56, %v9714_v53 }
 0x785   : > { %9355 = vmatpush1.bf16.msra.mxu1 %v9354_v46  ;;  %9062 = vmatprep.mubr.msk.f32.mxu1 %vm232_vm0, %v2389_v0  ;;  %v13315_v28 = vpop.f32.mrb[206].mxu0  ;;  %v10182_v46 = vpop.eup %10181  ;;  %v2401_v27 = vmul.f32 %v10180_v60, %v15466_v44  ;;  %v9719_v0 = vunpack.i.l.bf16 %v15467_v12 }
 0x786   : > { %4657 = vmax.xlane.f32.xlu1 %v4656_v36  ;;  %v13320_v24 = vpop.f32.mrb[207].mxu0  ;;  %9356 = vmatprep.subr.bf16.mxu1 %v15357_v16  ;;  %v2399_v41 = vmul.f32 %v10182_v46, %v15465_v8  ;;  %v10184_v11 = vpop.eup %10183 }
 0x787   : > { %v4659_v14 = vmax.f32 %v13315_v28, %v13320_v24  ;;  %v2403_v52 = vmul.f32 %v10184_v11, %v15468_v25 }
 0x788   : > { %9063 = vmatmul.mubr.msk.f32.gmra.mrb[174].mxu1 %vm232_vm0, %v2391_v4  ;;  %v9366_v4 = vpack.c.bf16 %v9720_v19, %v9719_v0 }
 0x789   : > { %9358 = vmatpush1.bf16.msra.mxu1 %v9357_v43  ;;  %9065 = vmatprep.mubr.msk.f32.mxu1 %vm232_vm0, %v2393_v48  ;;  %v13329_v22 = vpop.f32.mrb[208].mxu0 }
 0x78a   : > { %4660 = vmax.xlane.f32.xlu0 %v4659_v14  ;;  %v13332_v32 = vpop.f32.mrb[209].mxu0  ;;  %9359 = vmatprep.subr.bf16.mxu1 %v15357_v16 }
 0x78b   : > { %v4662_v59 = vmax.f32 %v13329_v22, %v13332_v32 }
 0x78c   : > { %9066 = vmatmul.mubr.msk.f32.gmra.mrb[176].mxu1 %vm232_vm0, %v2395_v37  ;;  %v15469_v37 = vld [vmem:[#allocation16_spill] sm:$0xff] }
 0x78d   : > { %9361 = vmatpush1.bf16.msra.mxu1 %v9360_v61  ;;  %9068 = vmatprep.mubr.msk.f32.mxu1 %vm232_vm0, %v2397_v7  ;;  %v13342_v5 = vpop.f32.mrb[210].mxu0  ;;  %v15470_v7 = vld [vmem:[#allocation15_spill] sm:$0xff] }
 0x78e   : > { %4663 = vmax.xlane.f32.xlu1 %v4662_v59  ;;  %v13346_v3 = vpop.f32.mrb[211].mxu0  ;;  %9362 = vmatprep.subr.bf16.mxu1 %v15357_v16 }
 0x78f   : > { %v4665_v36 = vmax.f32 %v13342_v5, %v13346_v3 }
 0x790   : > { %9069 = vmatmul.mubr.msk.f32.gmra.mrb[178].mxu1 %vm232_vm0, %v2399_v41 }
 0x791   : > { %9364 = vmatpush1.bf16.msra.mxu1 %v9363_v15  ;;  %9071 = vmatprep.mubr.msk.f32.mxu1 %vm232_vm0, %v2401_v27  ;;  %v13355_v49 = vpop.f32.mrb[212].mxu0 }
 0x792   : > { %v13358_v1 = vpop.f32.mrb[213].mxu0  ;;  %9365 = vmatprep.subr.bf16.mxu1 %v15357_v16 }
 0x793   : > { %v4668_v9 = vmax.f32 %v13355_v49, %v13358_v1 }
 0x794   : > { %9072 = vmatmul.mubr.msk.f32.gmra.mrb[180].mxu1 %vm232_vm0, %v2403_v52 }
 0x795   : > { %9367 = vmatpush1.bf16.msra.mxu1 %v9366_v4  ;;  %v13364_v43 = vpop.f32.mrb[214].mxu0 }
 0x796   : > { %v13366_v33 = vpop.f32.mrb[215].mxu0 }
 0x799   : > { %v13370_v30 = vpop.f32.mrb[216].mxu0 }
 0x79a   : > { %v13372_v14 = vpop.f32.mrb[217].mxu0 }
 0x79d   : > { %v13376_v61 = vpop.f32.mrb[218].mxu0 }
 0x79e   : > { %v13378_v18 = vpop.f32.mrb[219].mxu0 }
 0x79f   : > { %9757 = vrot.lane.b32.xlu1 %v15469_v37, %s10639_s17 }
 0x7a0   : > { %9752 = vrot.lane.b32.xlu0 %v15470_v7, %s10639_s17 }
 0x7a1   : > { %v13386_v6 = vpop.f32.mrb[220].mxu0 }
 0x7a2   : > { %v13388_v56 = vpop.f32.mrb[221].mxu0 }
 0x7a5   : > { %v13392_v59 = vpop.f32.mrb[222].mxu0 }
 0x7a6   : > { %v13394_v60 = vpop.f32.mrb[223].mxu0 }
 0x7a9   : > { %v13398_v8 = vpop.f32.mrb[224].mxu0 }
 0x7aa   : > { %15471 = vst [vmem:[#allocation86_spill] sm:$0xff] %v13398_v8  ;;  %v13400_v41 = vpop.f32.mrb[225].mxu0 }
 0x7ab   : > { %15472 = vst [vmem:[#allocation111_spill] sm:$0xff] %v13400_v41 }
 0x7ad   : > { %v13404_v27 = vpop.f32.mrb[226].mxu0 }
 0x7ae   : > { %15473 = vst [vmem:[#allocation162_spill] sm:$0xff] %v13404_v27  ;;  %v13406_v12 = vpop.f32.mrb[227].mxu0 }
 0x7af   : > { %15474 = vst [vmem:[#allocation163_spill] sm:$0xff] %v13406_v12 }
 0x7b1   : > { %v13410_v0 = vpop.f32.mrb[228].mxu0 }
 0x7b2   : > { %15475 = vst [vmem:[#allocation92_spill] sm:$0xff] %v13410_v0  ;;  %v13412_v15 = vpop.f32.mrb[229].mxu0 }
 0x7b3   : > { %15476 = vst [vmem:[#allocation31_spill] sm:$0xff] %v13412_v15 }
 0x7b5   : > { %v13416_v25 = vpop.f32.mrb[230].mxu0 }
 0x7b6   : > { %15477 = vst [vmem:[#allocation164_spill] sm:$0xff] %v13416_v25  ;;  %v13418_v52 = vpop.f32.mrb[231].mxu0  ;;  %v15503_v25 = vld [vmem:[#allocation18_spill] sm:$0xff] }
 0x7b7   : > { %15478 = vst [vmem:[#allocation165_spill] sm:$0xff] %v13418_v52 }
 0x7b9   : > { %v13422_v37 = vpop.f32.mrb[232].mxu0 }
 0x7ba   : > { %15479 = vst [vmem:[#allocation146_spill] sm:$0xff] %v13422_v37  ;;  %v13424_v7 = vpop.f32.mrb[233].mxu0 }
 0x7bb   : > { %15480 = vst [vmem:[#allocation147_spill] sm:$0xff] %v13424_v7 }
 0x7bd   : > { %v13428_v44 = vpop.f32.mrb[234].mxu0 }
 0x7be   : > { %15481 = vst [vmem:[#allocation166_spill] sm:$0xff] %v13428_v44  ;;  %v13430_v46 = vpop.f32.mrb[235].mxu0 }
 0x7bf   : > { %15482 = vst [vmem:[#allocation167_spill] sm:$0xff] %v13430_v46  ;;  %4666 = vmax.xlane.f32.xlu0 %v4665_v36 }
 0x7c1   : > { %v13434_v53 = vpop.f32.mrb[236].mxu0 }
 0x7c2   : > { %15483 = vst [vmem:[#allocation156_spill] sm:$0xff] %v13434_v53  ;;  %v13436_v38 = vpop.f32.mrb[237].mxu0 }
 0x7c3   : > { %15484 = vst [vmem:[#allocation157_spill] sm:$0xff] %v13436_v38  ;;  %4669 = vmax.xlane.f32.xlu1 %v4668_v9 }
 0x7c5   : > { %v13440_v26 = vpop.f32.mrb[238].mxu0 }
 0x7c6   : > { %15485 = vst [vmem:[#allocation5_spill] sm:$0xff] %v13440_v26  ;;  %v13442_v48 = vpop.f32.mrb[239].mxu0 }
 0x7c7   : > { %15486 = vst [vmem:[#allocation8_spill] sm:$0xff] %v13442_v48  ;;  %v15493_v48 = vld [vmem:[#allocation17_spill] sm:$0xff] }
 0x7c9   : > { %v13446_v15 = vpop.f32.mrb[240].mxu0 }
 0x7ca   : > { %15487 = vst [vmem:[#allocation168_spill] sm:$0xff] %v13446_v15  ;;  %v13448_v36 = vpop.f32.mrb[241].mxu0 }
 0x7cb   : > { %15488 = vst [vmem:[#allocation169_spill] sm:$0xff] %v13448_v36 }
 0x7cd   : > { %v13452_v0 = vpop.f32.mrb[242].mxu0 }
 0x7ce   : > { %15489 = vst [vmem:[#allocation130_spill] sm:$0xff] %v13452_v0  ;;  %v13454_v9 = vpop.f32.mrb[243].mxu0 }
 0x7cf   : > { %15490 = vst [vmem:[#allocation26_spill] sm:$0xff] %v13454_v9 }
 0x7d1   : > { %v13458_v38 = vpop.f32.mrb[244].mxu0 }
 0x7d2   : > { %15491 = vst [vmem:[#allocation67_spill] sm:$0xff] %v13458_v38  ;;  %v13460_v53 = vpop.f32.mrb[245].mxu0 }
 0x7d3   : > { %15492 = vst [vmem:[#allocation122_spill] sm:$0xff] %v13460_v53 }
 0x7d5   : > { %9762 = vrot.lane.b32.xlu0 %v15493_v48, %s10639_s17  ;;  %v13466_v26 = vpop.f32.mrb[246].mxu0 }
 0x7d6   : > { %15494 = vst [vmem:[#allocation93_spill] sm:$0xff] %v13466_v26  ;;  %v13468_v11 = vpop.f32.mrb[247].mxu0 }
 0x7d7   : > { %v6133_v36 = vmax.f32 %v13466_v26, %v13468_v11 }
 0x7d9   : > { %6134 = vmax.xlane.f32.xlu1 %v6133_v36  ;;  %v13472_v15 = vpop.f32.mrb[248].mxu0 }
 0x7da   : > { %15495 = vst [vmem:[#allocation28_spill] sm:$0xff] %v13472_v15  ;;  %v13474_v4 = vpop.f32.mrb[249].mxu0 }
 0x7db   : > { %15496 = vst [vmem:[#allocation36_spill] sm:$0xff] %v13474_v4  ;;  %v6136_v9 = vmax.f32 %v13472_v15, %v13474_v4 }
 0x7dd   : > { %v13478_v0 = vpop.f32.mrb[250].mxu0 }
 0x7de   : > { %15497 = vst [vmem:[#allocation98_spill] sm:$0xff] %v13478_v0  ;;  %v13480_v19 = vpop.f32.mrb[251].mxu0 }
 0x7df   : > { %15498 = vst [vmem:[#allocation100_spill] sm:$0xff] %v13480_v19 }
 0x7e1   : > { %v13484_v53 = vpop.f32.mrb[252].mxu0 }
 0x7e2   : > { %15499 = vst [vmem:[#allocation129_spill] sm:$0xff] %v13484_v53  ;;  %v13486_v38 = vpop.f32.mrb[253].mxu0 }
 0x7e3   : > { %15500 = vst [vmem:[#allocation127_spill] sm:$0xff] %v13486_v38 }
 0x7e5   : > { %v13490_v26 = vpop.f32.mrb[254].mxu0 }
 0x7e6   : > { %15501 = vst [vmem:[#allocation131_spill] sm:$0xff] %v13490_v26  ;;  %v13492_v46 = vpop.f32.mrb[255].mxu0 }
 0x7e7   : > { %15502 = vst [vmem:[#allocation108_spill] sm:$0xff] %v13492_v46  ;;  %v4625_v44 = vpop.xlane.xlu1 %4624 }
 0x7e8   : > { %v4719_v4 = vsub.f32 %v13104_v63, %v4625_v44  ;;  %v4720_v7 = vsub.f32 %v13109_v51, %v4625_v44 }
 0x7e9   : > { %v13498_v48 = vpop.f32.mrb[0].mxu0 }
 0x7ea   : > { %v4783_v37 = vmul.f32 1.442695, %v4719_v4  ;;  %v4785_v52 = vmul.f32 1.442695, %v4720_v7  ;;  %9767 = vrot.lane.b32.xlu1 %v15503_v25, %s10639_s17  ;;  %v13502_v36 = vpop.f32.mrb[1].mxu0 }
 0x7eb   : > { %v4628_v12 = vpop.xlane.xlu1 %4627 }
 0x7ec   : > { %10185 = vpow2.f32 %v4783_v37  ;;  %v4721_v15 = vsub.f32 %v13121_v13, %v4628_v12  ;;  %v4722_v63 = vsub.f32 %v13125_v45, %v4628_v12 }
 0x7ed   : > { %10187 = vpow2.f32 %v4785_v52  ;;  %v13508_v51 = vpop.f32.mrb[2].mxu0 }
 0x7ee   : > { %15504 = vst [vmem:[#allocation110_spill] sm:$0xff] %v13508_v51  ;;  %v4787_v44 = vmul.f32 1.442695, %v4721_v15  ;;  %v4789_v4 = vmul.f32 1.442695, %v4722_v63  ;;  %v13510_v7 = vpop.f32.mrb[3].mxu0 }
 0x7ef   : > { %15505 = vst [vmem:[#allocation84_spill] sm:$0xff] %v13510_v7  ;;  %v4631_v41 = vpop.xlane.xlu0 %4630 }
 0x7f0   : > { %10189 = vpow2.f32 %v4787_v44  ;;  %v4723_v8 = vsub.f32 %v13139_v23, %v4631_v41  ;;  %v4724_v37 = vsub.f32 %v13144_v39, %v4631_v41  ;;  %v15507_v23 = vmax.f32 %v13364_v43, %v13366_v33 }
 0x7f1   : > { %10191 = vpow2.f32 %v4789_v4  ;;  %v13516_v13 = vpop.f32.mrb[4].mxu0 }
 0x7f2   : > { %v4791_v45 = vmul.f32 1.442695, %v4723_v8  ;;  %v4793_v12 = vmul.f32 1.442695, %v4724_v37  ;;  %v13518_v52 = vpop.f32.mrb[5].mxu0 }
 0x7f3   : > { %15506 = vst [vmem:[#allocation126_spill] sm:$0xff] %v13518_v52  ;;  %v4634_v15 = vpop.xlane.xlu1 %4633 }
 0x7f4   : > { %10193 = vpow2.f32 %v4791_v45  ;;  %v4725_v27 = vsub.f32 %v13157_v42, %v4634_v15  ;;  %v4726_v44 = vsub.f32 %v13161_v35, %v4634_v15  ;;  %4672 = vmax.xlane.f32.xlu0 %v15507_v23 }
 0x7f5   : > { %10195 = vpow2.f32 %v4793_v12  ;;  %v13527_v39 = vpop.f32.mrb[6].mxu0 }
 0x7f6   : > { %v10186_v8 = vpop.eup %10185  ;;  %v4795_v41 = vmul.f32 1.442695, %v4725_v27  ;;  %v4797_v4 = vmul.f32 1.442695, %v4726_v44  ;;  %v13529_v37 = vpop.f32.mrb[7].mxu0 }
 0x7f7   : > { %15508 = vst [vmem:[#allocation76_spill] sm:$0xff] %v13529_v37  ;;  %v10188_v25 = vpop.eup %10187  ;;  %v4637_v7 = vpop.xlane.xlu0 %4636 }
 0x7f8   : > { %10197 = vpow2.f32 %v4795_v41  ;;  %5167 = vmatprep.mubr.f32.mxu1 %v10188_v25  ;;  %v4727_v42 = vsub.f32 %v13175_v29, %v4637_v7  ;;  %v4728_v35 = vsub.f32 %v13180_v58, %v4637_v7  ;;  %6137 = vmax.xlane.f32.xlu0 %v6136_v9  ;;  %v13535_v12 = vadd.f32 %v10188_v25, %v10186_v8 }
 0x7f9   : > { %10199 = vpow2.f32 %v4797_v4  ;;  %5168 = vmatmul.mubr.f32.vlgmr.msra.gmra.mrb[182].mxu1 %v10186_v8  ;;  %v13537_v27 = vpop.f32.mrb[8].mxu0 }
 0x7fa   : > { %15509 = vst [vmem:[#allocation58_spill] sm:$0xff] %v13535_v12  ;;  %v10190_v15 = vpop.eup %10189  ;;  %v4799_v44 = vmul.f32 1.442695, %v4727_v42  ;;  %v4801_v23 = vmul.f32 1.442695, %v4728_v35  ;;  %v13539_v63 = vpop.f32.mrb[9].mxu0 }
 0x7fb   : > { %15510 = vst [vmem:[#allocation119_spill] sm:$0xff] %v13539_v63  ;;  %v10192_v52 = vpop.eup %10191  ;;  %v4640_v45 = vpop.xlane.xlu1 %4639 }
 0x7fc   : > { %10201 = vpow2.f32 %v4799_v44  ;;  %5172 = vmatprep.mubr.f32.mxu1 %v10192_v52  ;;  %v4729_v29 = vsub.f32 %v13193_v17, %v4640_v45  ;;  %v4730_v58 = vsub.f32 %v13197_v54, %v4640_v45  ;;  %v13545_v9 = vadd.f32 %v10192_v52, %v10190_v15 }
 0x7fd   : > { %10203 = vpow2.f32 %v4801_v23  ;;  %5173 = vmatmul.mubr.f32.gmra.mrb[184].mxu1 %v10190_v15  ;;  %v13547_v7 = vpop.f32.mrb[10].mxu0 }
 0x7fe   : > { %15511 = vst [vmem:[#allocation46_spill] sm:$0xff] %v13545_v9  ;;  %v10194_v25 = vpop.eup %10193  ;;  %v4803_v8 = vmul.f32 1.442695, %v4729_v29  ;;  %v4805_v4 = vmul.f32 1.442695, %v4730_v58  ;;  %v13549_v42 = vpop.f32.mrb[11].mxu0 }
 0x7ff   : > { %15512 = vst [vmem:[#allocation77_spill] sm:$0xff] %v13549_v42  ;;  %v10196_v35 = vpop.eup %10195  ;;  %v4643_v12 = vpop.xlane.xlu0 %4642 }
 0x800   : > { %10205 = vpow2.f32 %v4803_v8  ;;  %5177 = vmatprep.mubr.f32.mxu1 %v10196_v35  ;;  %v4731_v17 = vsub.f32 %v13211_v20, %v4643_v12  ;;  %v4732_v54 = vsub.f32 %v13216_v62, %v4643_v12  ;;  %v13555_v52 = vadd.f32 %v10196_v35, %v10194_v25 }
 0x801   : > { %10207 = vpow2.f32 %v4805_v4  ;;  %5178 = vmatmul.mubr.f32.gmra.mrb[186].mxu1 %v10194_v25  ;;  %v13557_v45 = vpop.f32.mrb[12].mxu0 }
 0x802   : > { %15513 = vst [vmem:[#allocation121_spill] sm:$0xff] %v13555_v52  ;;  %v10198_v15 = vpop.eup %10197  ;;  %v4807_v23 = vmul.f32 1.442695, %v4731_v17  ;;  %v4809_v29 = vmul.f32 1.442695, %v4732_v54  ;;  %v13559_v58 = vpop.f32.mrb[13].mxu0 }
 0x803   : > { %v10200_v41 = vpop.eup %10199  ;;  %v4646_v9 = vpop.xlane.xlu1 %4645 }
 0x804   : > { %10209 = vpow2.f32 %v4807_v23  ;;  %5182 = vmatprep.mubr.f32.mxu1 %v10200_v41  ;;  %v4733_v20 = vsub.f32 %v13229_v21, %v4646_v9  ;;  %v4734_v62 = vsub.f32 %v13233_v57, %v4646_v9  ;;  %v13565_v12 = vadd.f32 %v10200_v41, %v10198_v15 }
 0x805   : > { %10211 = vpow2.f32 %v4809_v29  ;;  %5183 = vmatmul.mubr.f32.gmra.mrb[188].mxu1 %v10198_v15  ;;  %v13567_v25 = vpop.f32.mrb[14].mxu0  ;;  %v15524_v23 = vmax.f32 %v13478_v0, %v13480_v19 }
 0x806   : > { %15514 = vst [vmem:[#allocation81_spill] sm:$0xff] %v13565_v12  ;;  %v10202_v4 = vpop.eup %10201  ;;  %v4811_v35 = vmul.f32 1.442695, %v4733_v20  ;;  %v4813_v17 = vmul.f32 1.442695, %v4734_v62  ;;  %v13569_v54 = vpop.f32.mrb[15].mxu0 }
 0x807   : > { %15515 = vst [vmem:[#allocation82_spill] sm:$0xff] %v13569_v54  ;;  %v10204_v44 = vpop.eup %10203  ;;  %v4649_v52 = vpop.xlane.xlu0 %4648 }
 0x808   : > { %10213 = vpow2.f32 %v4811_v35  ;;  %5187 = vmatprep.mubr.f32.mxu1 %v10204_v44  ;;  %v4735_v21 = vsub.f32 %v13248_v34, %v4649_v52  ;;  %v4736_v57 = vsub.f32 %v13254_v55, %v4649_v52  ;;  %v13575_v41 = vadd.f32 %v10204_v44, %v10202_v4 }
 0x809   : > { %10215 = vpow2.f32 %v4813_v17  ;;  %5188 = vmatmul.mubr.f32.gmra.mrb[190].mxu1 %v10202_v4  ;;  %v13577_v9 = vpop.f32.mrb[16].mxu0 }
 0x80a   : > { %15516 = vst [vmem:[#allocation70_spill] sm:$0xff] %v13575_v41  ;;  %v10206_v15 = vpop.eup %10205  ;;  %v4815_v29 = vmul.f32 1.442695, %v4735_v21  ;;  %v4817_v20 = vmul.f32 1.442695, %v4736_v57  ;;  %v13579_v62 = vpop.f32.mrb[17].mxu0 }
 0x80b   : > { %15517 = vst [vmem:[#allocation75_spill] sm:$0xff] %v13579_v62  ;;  %v10208_v8 = vpop.eup %10207  ;;  %v4652_v12 = vpop.xlane.xlu1 %4651  ;;  %v15520_v57 = vld [vmem:[#allocation19_spill] sm:$0xff] }
 0x80c   : > { %10217 = vpow2.f32 %v4815_v29  ;;  %5192 = vmatprep.mubr.f32.mxu1 %v10208_v8  ;;  %v4737_v34 = vsub.f32 %v13266_v2, %v4652_v12  ;;  %v4738_v55 = vsub.f32 %v13269_v10, %v4652_v12  ;;  %v13585_v44 = vadd.f32 %v10208_v8, %v10206_v15 }
 0x80d   : > { %10219 = vpow2.f32 %v4817_v20  ;;  %5193 = vmatmul.mubr.f32.gmra.mrb[192].mxu1 %v10206_v15  ;;  %v13587_v52 = vpop.f32.mrb[18].mxu0  ;;  %v15521_v29 = vmax.f32 %v13370_v30, %v13372_v14 }
 0x80e   : > { %15518 = vst [vmem:[#allocation97_spill] sm:$0xff] %v13585_v44  ;;  %15519 = vst [vmem:[#allocation99_spill] sm:$0xff] %v13587_v52  ;;  %v10210_v4 = vpop.eup %10209  ;;  %v4819_v17 = vmul.f32 1.442695, %v4737_v34  ;;  %v4821_v21 = vmul.f32 1.442695, %v4738_v55  ;;  %9772 = vrot.lane.b32.xlu0 %v15520_v57, %s10639_s17 }
 0x80f   : > { %4675 = vmax.xlane.f32.xlu1 %v15521_v29  ;;  %v13594_v35 = vpop.f32.mrb[19].mxu0  ;;  %v10212_v2 = vpop.eup %10211 }
 0x810   : > { %15522 = vst [vmem:[#allocation140_spill] sm:$0xff] %v13594_v35  ;;  %v4655_v10 = vpop.xlane.xlu0 %4654  ;;  %10221 = vpow2.f32 %v4819_v17  ;;  %5197 = vmatprep.mubr.f32.mxu1 %v10212_v2  ;;  %v13600_v20 = vadd.f32 %v10212_v2, %v10210_v4 }
 0x811   : > { %v4739_v12 = vsub.f32 %v13284_v47, %v4655_v10  ;;  %v4740_v15 = vsub.f32 %v13289_v40, %v4655_v10  ;;  %10223 = vpow2.f32 %v4821_v21  ;;  %5198 = vmatmul.mubr.f32.gmra.mrb[194].mxu1 %v10210_v4  ;;  %v13602_v34 = vpop.f32.mrb[20].mxu0 }
 0x812   : > { %15523 = vst [vmem:[#allocation6_spill] sm:$0xff] %v13600_v20  ;;  %v10214_v55 = vpop.eup %10213  ;;  %v13607_v8 = vpop.f32.mrb[21].mxu0 }
 0x813   : > { %v4823_v57 = vmul.f32 1.442695, %v4739_v12  ;;  %v4825_v29 = vmul.f32 1.442695, %v4740_v15  ;;  %6140 = vmax.xlane.f32.xlu1 %v15524_v23  ;;  %v10216_v17 = vpop.eup %10215  ;;  %v4658_v41 = vpop.xlane.xlu1 %4657 }
 0x814   : > { %5202 = vmatprep.mubr.f32.mxu1 %v10216_v17  ;;  %v4741_v40 = vsub.f32 %v13300_v31, %v4658_v41  ;;  %v4742_v4 = vsub.f32 %v13305_v50, %v4658_v41  ;;  %v13613_v21 = vadd.f32 %v10216_v17, %v10214_v55 }
 0x815   : > { %10225 = vpow2.f32 %v4823_v57  ;;  %5203 = vmatmul.mubr.f32.gmra.mrb[196].mxu1 %v10214_v55  ;;  %v13615_v2 = vpop.f32.mrb[22].mxu0 }
 0x816   : > { %15525 = vst [vmem:[#allocation10_spill] sm:$0xff] %v13613_v21  ;;  %10227 = vpow2.f32 %v4825_v29  ;;  %v10218_v23 = vpop.eup %10217  ;;  %v4827_v10 = vmul.f32 1.442695, %v4741_v40  ;;  %v4829_v12 = vmul.f32 1.442695, %v4742_v4  ;;  %v13617_v15 = vpop.f32.mrb[23].mxu0 }
 0x817   : > { %15526 = vst [vmem:[#allocation9_spill] sm:$0xff] %v13617_v15  ;;  %v10220_v0 = vpop.eup %10219  ;;  %v4661_v19 = vpop.xlane.xlu0 %4660 }
 0x818   : > { %10229 = vpow2.f32 %v4827_v10  ;;  %5207 = vmatprep.mubr.f32.mxu1 %v10220_v0  ;;  %v4743_v31 = vsub.f32 %v13315_v28, %v4661_v19  ;;  %v4744_v50 = vsub.f32 %v13320_v24, %v4661_v19  ;;  %v13623_v41 = vadd.f32 %v10220_v0, %v10218_v23 }
 0x819   : > { %10231 = vpow2.f32 %v4829_v12  ;;  %5208 = vmatmul.mubr.f32.gmra.mrb[198].mxu1 %v10218_v23  ;;  %v13625_v55 = vpop.f32.mrb[24].mxu0 }
 0x81a   : > { %15527 = vst [vmem:[#allocation11_spill] sm:$0xff] %v13623_v41  ;;  %v10222_v29 = vpop.eup %10221  ;;  %v4831_v17 = vmul.f32 1.442695, %v4743_v31  ;;  %v4833_v40 = vmul.f32 1.442695, %v4744_v50  ;;  %v13627_v4 = vpop.f32.mrb[25].mxu0 }
 0x81b   : > { %v10224_v47 = vpop.eup %10223  ;;  %v9753_v20 = vpop.permute.xlu0 %9752 }
 0x81c   : > { %v4664_v57 = vpop.xlane.xlu1 %4663  ;;  %10233 = vpow2.f32 %v4831_v17  ;;  %5212 = vmatprep.mubr.f32.mxu1 %v10224_v47  ;;  %v9755_v28 = vunpack.i.h.bf16 %v9753_v20  ;;  %v9754_v24 = vunpack.i.l.bf16 %v9753_v20  ;;  %v13635_v12 = vadd.f32 %v10224_v47, %v10222_v29 }
 0x81d   : > { %v4745_v19 = vsub.f32 %v13329_v22, %v4664_v57  ;;  %10235 = vpow2.f32 %v4833_v40  ;;  %v4746_v0 = vsub.f32 %v13332_v32, %v4664_v57  ;;  %5213 = vmatmul.mubr.f32.gmra.mrb[200].mxu1 %v10222_v29  ;;  %v13633_v23 = vpop.f32.mrb[26].mxu0 }
 0x81e   : > { %15528 = vst [vmem:[#allocation13_spill] sm:$0xff] %v13635_v12  ;;  %v9387_v50 = vpack.c.bf16 %v9755_v28, %v9754_v24  ;;  %v13637_v21 = vpop.f32.mrb[27].mxu0 }
 0x81f   : > { %v10226_v31 = vpop.eup %10225  ;;  %v4835_v41 = vmul.f32 1.442695, %v4745_v19  ;;  %15529 = vst [vmem:[#allocation32_spill] sm:$0xff] %v13637_v21  ;;  %v4837_v17 = vmul.f32 1.442695, %v4746_v0  ;;  %v15531_v19 = vld [vmem:[#allocation20_spill] sm:$0xff] }
 0x820   : > { %v10228_v10 = vpop.eup %10227  ;;  %v9758_v44 = vpop.permute.xlu1 %9757  ;;  %9388 = vmatpush1.bf16.msra.mxu0 %v9387_v50 }
 0x821   : > { %10237 = vpow2.f32 %v4835_v41  ;;  %5217 = vmatprep.mubr.f32.mxu1 %v10228_v10  ;;  %v9760_v22 = vunpack.i.h.bf16 %v9758_v44  ;;  %v9759_v32 = vunpack.i.l.bf16 %v9758_v44  ;;  %v13641_v57 = vadd.f32 %v10228_v10, %v10226_v31  ;;  %v13643_v47 = vpop.f32.mrb[28].mxu0  ;;  %9389 = vmatprep.subr.bf16.mxu0 %v15357_v16 }
 0x822   : > { %10239 = vpow2.f32 %v4837_v17  ;;  %5218 = vmatmul.mubr.f32.gmra.mrb[202].mxu1 %v10226_v31  ;;  %v10230_v29 = vpop.eup %10229  ;;  %v13646_v28 = vpop.f32.mrb[29].mxu0  ;;  %v15538_v17 = vmax.f32 %v13376_v61, %v13378_v18 }
 0x823   : > { %15530 = vst [vmem:[#allocation7_spill] sm:$0xff] %v13641_v57  ;;  %v9390_v40 = vpack.c.bf16 %v9760_v22, %v9759_v32  ;;  %v10232_v24 = vpop.eup %10231 }
 0x824   : > { %9777 = vrot.lane.b32.xlu1 %v15531_v19, %s10639_s17  ;;  %5222 = vmatprep.mubr.f32.mxu1 %v10232_v24  ;;  %v13652_v44 = vadd.f32 %v10232_v24, %v10230_v29 }
 0x825   : > { %9391 = vmatpush1.bf16.msra.mxu0 %v9390_v40  ;;  %v13654_v10 = vpop.f32.mrb[30].mxu0 }
 0x826   : > { %15532 = vst [vmem:[#allocation38_spill] sm:$0xff] %v13652_v44  ;;  %5223 = vmatmul.mubr.f32.gmra.mrb[204].mxu1 %v10230_v29  ;;  %15533 = vst [vmem:[#allocation44_spill] sm:$0xff] %v13654_v10  ;;  %9392 = vmatprep.subr.bf16.mxu0 %v15357_v16  ;;  %v10234_v0 = vpop.eup %10233  ;;  %v13657_v31 = vpop.f32.mrb[31].mxu0 }
 0x827   : > { %15534 = vst [vmem:[#allocation37_spill] sm:$0xff] %v13657_v31  ;;  %v10236_v50 = vpop.eup %10235 }
 0x828   : > { %5227 = vmatprep.mubr.f32.mxu1 %v10236_v50  ;;  %v13661_v22 = vadd.f32 %v10236_v50, %v10234_v0 }
 0x829   : > { %v13663_v32 = vpop.f32.mrb[32].mxu0 }
 0x82a   : > { %15535 = vst [vmem:[#allocation12_spill] sm:$0xff] %v13661_v22  ;;  %5228 = vmatmul.mubr.f32.gmra.mrb[206].mxu1 %v10234_v0  ;;  %v13665_v24 = vpop.f32.mrb[33].mxu0  ;;  %v15541_v22 = vmax.f32 %v13484_v53, %v13486_v38 }
 0x82b   : > { %v10238_v40 = vpop.eup %10237  ;;  %15536 = vst [vmem:[#allocation48_spill] sm:$0xff] %v13665_v24 }
 0x82c   : > { %v10240_v29 = vpop.eup %10239 }
 0x82d   : > { %5232 = vmatprep.mubr.f32.mxu1 %v10240_v29  ;;  %v13669_v20 = vadd.f32 %v10240_v29, %v10238_v40  ;;  %4678 = vmax.xlane.f32.xlu0 %v15538_v17  ;;  %v13674_v50 = vpop.f32.mrb[34].mxu0 }
 0x82e   : > { %5233 = vmatmul.mubr.f32.gmra.mrb[208].mxu1 %v10238_v40  ;;  %15539 = vst [vmem:[#allocation42_spill] sm:$0xff] %v13674_v50  ;;  %v13676_v0 = vpop.f32.mrb[35].mxu0  ;;  %v15554_v40 = vmax.f32 %v13386_v6, %v13388_v56 }
 0x82f   : > { %15537 = vst [vmem:[#allocation14_spill] sm:$0xff] %v13669_v20  ;;  %15540 = vst [vmem:[#allocation52_spill] sm:$0xff] %v13676_v0 }
 0x831   : > { %6143 = vmax.xlane.f32.xlu0 %v15541_v22  ;;  %v13683_v19 = vpop.f32.mrb[36].mxu0  ;;  %v15553_v22 = vld [vmem:[#allocation21_spill] sm:$0xff] }
 0x832   : > { %v13685_v29 = vpop.f32.mrb[37].mxu0 }
 0x833   : > { %15542 = vst [vmem:[#allocation50_spill] sm:$0xff] %v13685_v29 }
 0x835   : > { %v13689_v20 = vpop.f32.mrb[38].mxu0 }
 0x836   : > { %15543 = vst [vmem:[#allocation55_spill] sm:$0xff] %v13689_v20  ;;  %v13691_v17 = vpop.f32.mrb[39].mxu0 }
 0x837   : > { %15544 = vst [vmem:[#allocation54_spill] sm:$0xff] %v13691_v17 }
 0x839   : > { %v13695_v44 = vpop.f32.mrb[40].mxu0 }
 0x83a   : > { %15545 = vst [vmem:[#allocation62_spill] sm:$0xff] %v13695_v44  ;;  %v13697_v41 = vpop.f32.mrb[41].mxu0 }
 0x83b   : > { %15546 = vst [vmem:[#allocation59_spill] sm:$0xff] %v13697_v41 }
 0x83d   : > { %v13701_v53 = vpop.f32.mrb[42].mxu0 }
 0x83e   : > { %15547 = vst [vmem:[#allocation66_spill] sm:$0xff] %v13701_v53  ;;  %v13703_v38 = vpop.f32.mrb[43].mxu0 }
 0x83f   : > { %15548 = vst [vmem:[#allocation65_spill] sm:$0xff] %v13703_v38 }
 0x841   : > { %v13707_v12 = vpop.f32.mrb[44].mxu0 }
 0x842   : > { %15549 = vst [vmem:[#allocation71_spill] sm:$0xff] %v13707_v12  ;;  %v13709_v0 = vpop.f32.mrb[45].mxu0 }
 0x843   : > { %15550 = vst [vmem:[#allocation72_spill] sm:$0xff] %v13709_v0  ;;  %v15556_v0 = vmax.f32 %v13490_v26, %v13492_v46 }
 0x845   : > { %v13713_v17 = vpop.f32.mrb[46].mxu0 }
 0x846   : > { %15551 = vst [vmem:[#allocation79_spill] sm:$0xff] %v13713_v17  ;;  %v13715_v20 = vpop.f32.mrb[47].mxu0 }
 0x847   : > { %15552 = vst [vmem:[#allocation78_spill] sm:$0xff] %v13715_v20  ;;  %9782 = vrot.lane.b32.xlu0 %v15553_v22, %s10639_s17 }
 0x848   : > { %4681 = vmax.xlane.f32.xlu1 %v15554_v40 }
 0x849   : > { %v13724_v38 = vpop.f32.mrb[48].mxu0 }
 0x84a   : > { %v13726_v53 = vpop.f32.mrb[49].mxu0 }
 0x84b   : > { %15555 = vst [vmem:[#allocation85_spill] sm:$0xff] %v13726_v53 }
 0x84c   : > { %6146 = vmax.xlane.f32.xlu1 %v15556_v0  ;;  %v4667_v12 = vpop.xlane.xlu0 %4666 }
 0x84d   : > { %v4747_v22 = vsub.f32 %v13342_v5, %v4667_v12  ;;  %v4748_v41 = vsub.f32 %v13346_v3, %v4667_v12  ;;  %v13735_v20 = vpop.f32.mrb[50].mxu0 }
 0x84e   : > { %15557 = vst [vmem:[#allocation89_spill] sm:$0xff] %v13735_v20  ;;  %v13737_v17 = vpop.f32.mrb[51].mxu0 }
 0x84f   : > { %15558 = vst [vmem:[#allocation90_spill] sm:$0xff] %v13737_v17  ;;  %v4839_v40 = vmul.f32 1.442695, %v4747_v22  ;;  %v4841_v44 = vmul.f32 1.442695, %v4748_v41 }
 0x850   : > { %v9763_v29 = vpop.permute.xlu0 %9762  ;;  %v4670_v57 = vpop.xlane.xlu1 %4669 }
 0x851   : > { %10241 = vpow2.f32 %v4839_v40  ;;  %v9765_v53 = vunpack.i.h.bf16 %v9763_v29  ;;  %v9764_v26 = vunpack.i.l.bf16 %v9763_v29  ;;  %v4749_v0 = vsub.f32 %v13355_v49, %v4670_v57  ;;  %v13742_v46 = vpop.f32.mrb[52].mxu0  ;;  %v15561_v40 = vld [vmem:[#allocation22_spill] sm:$0xff] }
 0x852   : > { %15559 = vst [vmem:[#allocation103_spill] sm:$0xff] %v13742_v46  ;;  %10243 = vpow2.f32 %v4841_v44  ;;  %v4750_v5 = vsub.f32 %v13358_v1, %v4670_v57  ;;  %v13745_v3 = vpop.f32.mrb[53].mxu0  ;;  %v15564_v44 = vmax.f32 %v13392_v59, %v13394_v60 }
 0x853   : > { %15560 = vst [vmem:[#allocation104_spill] sm:$0xff] %v13745_v3  ;;  %v9393_v12 = vpack.c.bf16 %v9765_v53, %v9764_v26  ;;  %v4843_v22 = vmul.f32 1.442695, %v4749_v0 }
 0x854   : > { %v4845_v50 = vmul.f32 1.442695, %v4750_v5 }
 0x855   : > { %10245 = vpow2.f32 %v4843_v22  ;;  %9394 = vmatpush1.bf16.msra.mxu0 %v9393_v12  ;;  %v15565_v12 = vmax.f32 %v13498_v48, %v13502_v36 }
 0x856   : > { %10247 = vpow2.f32 %v4845_v50  ;;  %9395 = vmatprep.subr.bf16.mxu0 %v15357_v16 }
 0x85b   : > { %v10242_v29 = vpop.eup %10241 }
 0x85c   : > { %v10244_v49 = vpop.eup %10243 }
 0x85d   : > { %9787 = vrot.lane.b32.xlu1 %v15561_v40, %s10639_s17  ;;  %5237 = vmatprep.mubr.f32.mxu1 %v10244_v49  ;;  %v13752_v1 = vadd.f32 %v10244_v49, %v10242_v29 }
 0x85e   : > { %5238 = vmatmul.mubr.f32.gmra.mrb[210].mxu1 %v10242_v29 }
 0x85f   : > { %15562 = vst [vmem:[#allocation116_spill] sm:$0xff] %v13752_v1  ;;  %v10246_v26 = vpop.eup %10245 }
 0x860   : > { %v10248_v53 = vpop.eup %10247 }
 0x861   : > { %5242 = vmatprep.mubr.f32.mxu1 %v10248_v53  ;;  %v13754_v57 = vadd.f32 %v10248_v53, %v10246_v26  ;;  %v15567_v53 = vld [vmem:[#allocation23_spill] sm:$0xff] }
 0x862   : > { %5243 = vmatmul.mubr.f32.gmra.mrb[212].mxu1 %v10246_v26 }
 0x863   : > { %15563 = vst [vmem:[#allocation118_spill] sm:$0xff] %v13754_v57 }
 0x866   : > { %4684 = vmax.xlane.f32.xlu0 %v15564_v44  ;;  %v13759_v50 = vpop.xlane.xlu1 %6134  ;;  %v15569_v44 = vld [vmem:[#allocation111_spill] sm:$0xff] }
 0x867   : > { %v6230_v0 = vsub.f32 %v13468_v11, %v13759_v50  ;;  %v15568_v11 = vld [vmem:[#allocation86_spill] sm:$0xff] }
 0x869   : > { %v6295_v5 = vmul.f32 1.442695, %v6230_v0  ;;  %v15570_v0 = vmax.f32 %v15568_v11, %v15569_v44 }
 0x86a   : > { %6149 = vmax.xlane.f32.xlu0 %v15565_v12  ;;  %v9768_v22 = vpop.permute.xlu1 %9767 }
 0x86b   : > { %v9770_v29 = vunpack.i.h.bf16 %v9768_v22  ;;  %v9769_v49 = vunpack.i.l.bf16 %v9768_v22  ;;  %10249 = vpow2.f32 %v6295_v5 }
 0x86d   : > { %v9396_v40 = vpack.c.bf16 %v9770_v29, %v9769_v49  ;;  %v15571_v49 = vld [vmem:[#allocation84_spill] sm:$0xff] }
 0x86f   : > { %9397 = vmatpush1.bf16.msra.mxu0 %v9396_v40  ;;  %v15572_v40 = vmax.f32 %v13508_v51, %v15571_v49  ;;  %v15580_v51 = vld [vmem:[#allocation164_spill] sm:$0xff] }
 0x870   : > { %9398 = vmatprep.subr.bf16.mxu0 %v15357_v16 }
 0x875   : > { %v13767_v26 = vpop.eup %10249 }
 0x876   : > { %15566 = vst [vmem:[#allocation132_spill] sm:$0xff] %v13767_v26  ;;  %6677 = vmatprep.mubr.f32.mxu0 %v13767_v26 }
 0x880   : > { %9792 = vrot.lane.b32.xlu0 %v15567_v53, %s10639_s17 }
 0x881   : > { %4687 = vmax.xlane.f32.xlu1 %v15570_v0  ;;  %v4673_v12 = vpop.xlane.xlu0 %4672 }
 0x882   : > { %v4751_v41 = vsub.f32 %v13364_v43, %v4673_v12  ;;  %v4752_v5 = vsub.f32 %v13366_v33, %v4673_v12 }
 0x884   : > { %v4847_v22 = vmul.f32 1.442695, %v4751_v41  ;;  %v4849_v29 = vmul.f32 1.442695, %v4752_v5  ;;  %v15574_v41 = vld [vmem:[#allocation24_spill] sm:$0xff] }
 0x885   : > { %6152 = vmax.xlane.f32.xlu1 %v15572_v40  ;;  %v13780_v1 = vpop.xlane.xlu0 %6137 }
 0x886   : > { %10251 = vpow2.f32 %v4847_v22 }
 0x887   : > { %10253 = vpow2.f32 %v4849_v29 }
 0x889   : > { %v9773_v53 = vpop.permute.xlu0 %9772 }
 0x88a   : > { %v9775_v26 = vunpack.i.h.bf16 %v9773_v53  ;;  %v9774_v57 = vunpack.i.l.bf16 %v9773_v53 }
 0x88c   : > { %v9399_v44 = vpack.c.bf16 %v9775_v26, %v9774_v57  ;;  %v15575_v57 = vld [vmem:[#allocation162_spill] sm:$0xff]  ;;  %v15576_v26 = vld [vmem:[#allocation163_spill] sm:$0xff] }
 0x88e   : > { %9400 = vmatpush1.bf16.msra.mxu0 %v9399_v44  ;;  %v15577_v44 = vmax.f32 %v15575_v57, %v15576_v26 }
 0x88f   : > { %9401 = vmatprep.subr.bf16.mxu0 %v15357_v16 }
 0x890   : > { %v10252_v43 = vpop.eup %10251 }
 0x891   : > { %v10254_v0 = vpop.eup %10253 }
 0x892   : > { %5247 = vmatprep.mubr.f32.mxu1 %v10254_v0  ;;  %v13783_v33 = vadd.f32 %v10254_v0, %v10252_v43 }
 0x893   : > { %5248 = vmatmul.mubr.f32.gmra.mrb[214].mxu1 %v10252_v43  ;;  %v15578_v43 = vld [vmem:[#allocation126_spill] sm:$0xff] }
 0x894   : > { %15573 = vst [vmem:[#allocation128_spill] sm:$0xff] %v13783_v33  ;;  %v15579_v0 = vmax.f32 %v13516_v13, %v15578_v43 }
 0x896   : > { %9797 = vrot.lane.b32.xlu1 %v15574_v41, %s10639_s17 }
 0x89c   : > { %v4676_v12 = vpop.xlane.xlu1 %4675 }
 0x89d   : > { %v4753_v5 = vsub.f32 %v13370_v30, %v4676_v12  ;;  %v4754_v22 = vsub.f32 %v13372_v14, %v4676_v12  ;;  %v15581_v14 = vld [vmem:[#allocation165_spill] sm:$0xff] }
 0x89e   : > { %v15582_v12 = vmax.f32 %v15580_v51, %v15581_v14  ;;  %v15591_v14 = vld [vmem:[#allocation92_spill] sm:$0xff]  ;;  %v15592_v51 = vld [vmem:[#allocation31_spill] sm:$0xff] }
 0x89f   : > { %v4851_v29 = vmul.f32 1.442695, %v4753_v5  ;;  %v4853_v40 = vmul.f32 1.442695, %v4754_v22  ;;  %4690 = vmax.xlane.f32.xlu0 %v15577_v44  ;;  %v15584_v44 = vld [vmem:[#allocation146_spill] sm:$0xff] }
 0x8a0   : > { %v13792_v53 = vpop.xlane.xlu1 %6140 }
 0x8a1   : > { %10255 = vpow2.f32 %v4851_v29  ;;  %v15583_v29 = vmax.f32 %v13527_v39, %v13529_v37  ;;  %v15593_v37 = vmax.f32 %v15591_v14, %v15592_v51  ;;  %v15596_v51 = vld [vmem:[#allocation156_spill] sm:$0xff] }
 0x8a2   : > { %10257 = vpow2.f32 %v4853_v40 }
 0x8a3   : > { %6155 = vmax.xlane.f32.xlu0 %v15579_v0  ;;  %v15585_v0 = vld [vmem:[#allocation147_spill] sm:$0xff] }
 0x8a4   : > { %v9778_v41 = vpop.permute.xlu1 %9777 }
 0x8a5   : > { %v9780_v33 = vunpack.i.h.bf16 %v9778_v41  ;;  %v9779_v49 = vunpack.i.l.bf16 %v9778_v41  ;;  %v15588_v41 = vld [vmem:[#allocation166_spill] sm:$0xff] }
 0x8a7   : > { %v9402_v30 = vpack.c.bf16 %v9780_v33, %v9779_v49  ;;  %4696 = vmax.xlane.f32.xlu0 %v15582_v12  ;;  %v15586_v49 = vmax.f32 %v15584_v44, %v15585_v0  ;;  %v15587_v33 = vmax.f32 %v13537_v27, %v13539_v63 }
 0x8a9   : > { %9403 = vmatpush1.bf16.msra.mxu0 %v9402_v30  ;;  %v15589_v30 = vld [vmem:[#allocation167_spill] sm:$0xff] }
 0x8aa   : > { %9404 = vmatprep.subr.bf16.mxu0 %v15357_v16  ;;  %v15590_v12 = vmax.f32 %v15588_v41, %v15589_v30 }
 0x8ab   : > { %v10256_v5 = vpop.eup %10255  ;;  %6158 = vmax.xlane.f32.xlu0 %v15583_v29 }
 0x8ac   : > { %v10258_v22 = vpop.eup %10257 }
 0x8ad   : > { %5252 = vmatprep.mubr.f32.mxu1 %v10258_v22  ;;  %v13804_v40 = vadd.f32 %v10258_v22, %v10256_v5 }
 0x8ae   : > { %5253 = vmatmul.mubr.f32.gmra.mrb[216].mxu1 %v10256_v5 }
 0x8af   : > { %4699 = vmax.xlane.f32.xlu0 %v15586_v49  ;;  %v15594_v49 = vmax.f32 %v13547_v7, %v13549_v42 }
 0x8b3   : > { %6161 = vmax.xlane.f32.xlu0 %v15587_v33  ;;  %v15595_v33 = vmax.f32 %v13557_v45, %v13559_v58 }
 0x8b7   : > { %4702 = vmax.xlane.f32.xlu0 %v15590_v12 }
 0x8ba   : > { %4693 = vmax.xlane.f32.xlu1 %v15593_v37  ;;  %v4679_v29 = vpop.xlane.xlu0 %4678  ;;  %v15597_v37 = vld [vmem:[#allocation157_spill] sm:$0xff] }
 0x8bb   : > { %v4755_v22 = vsub.f32 %v13376_v61, %v4679_v29  ;;  %v4756_v5 = vsub.f32 %v13378_v18, %v4679_v29  ;;  %6164 = vmax.xlane.f32.xlu0 %v15594_v49  ;;  %v15598_v14 = vmax.f32 %v15596_v51, %v15597_v37  ;;  %v15599_v61 = vmax.f32 %v13567_v25, %v13569_v54  ;;  %v15601_v49 = vld [vmem:[#allocation8_spill] sm:$0xff] }
 0x8bc   : > { %v15604_v37 = vld [vmem:[#allocation168_spill] sm:$0xff] }
 0x8bd   : > { %v4855_v0 = vmul.f32 1.442695, %v4755_v22  ;;  %v4857_v63 = vmul.f32 1.442695, %v4756_v5  ;;  %v15600_v5 = vld [vmem:[#allocation5_spill] sm:$0xff] }
 0x8be   : > { %6167 = vmax.xlane.f32.xlu1 %v15595_v33  ;;  %v13826_v12 = vpop.xlane.xlu0 %6143  ;;  %v15602_v42 = vmax.f32 %v15600_v5, %v15601_v49 }
 0x8bf   : > { %10259 = vpow2.f32 %v4855_v0  ;;  %4705 = vmax.xlane.f32.xlu0 %v15598_v14  ;;  %v15603_v0 = vmax.f32 %v13577_v9, %v13579_v62  ;;  %v15605_v14 = vld [vmem:[#allocation169_spill] sm:$0xff] }
 0x8c0   : > { %10261 = vpow2.f32 %v4857_v63  ;;  %v15606_v63 = vmax.f32 %v15604_v37, %v15605_v14  ;;  %v15613_v14 = vld [vmem:[#allocation67_spill] sm:$0xff]  ;;  %v15614_v37 = vld [vmem:[#allocation122_spill] sm:$0xff] }
 0x8c2   : > { %6170 = vmax.xlane.f32.xlu1 %v15599_v61  ;;  %v9783_v18 = vpop.permute.xlu0 %9782 }
 0x8c3   : > { %v9785_v29 = vunpack.i.h.bf16 %v9783_v18  ;;  %v9784_v22 = vunpack.i.l.bf16 %v9783_v18  ;;  %4708 = vmax.xlane.f32.xlu0 %v15602_v42  ;;  %v15607_v18 = vmax.f32 %v13587_v52, %v13594_v35  ;;  %v15608_v42 = vld [vmem:[#allocation130_spill] sm:$0xff]  ;;  %v15615_v35 = vmax.f32 %v15613_v14, %v15614_v37 }
 0x8c5   : > { %v9405_v33 = vpack.c.bf16 %v9785_v29, %v9784_v22  ;;  %v15609_v29 = vld [vmem:[#allocation26_spill] sm:$0xff] }
 0x8c6   : > { %6173 = vmax.xlane.f32.xlu1 %v15603_v0  ;;  %v15610_v22 = vmax.f32 %v15608_v42, %v15609_v29 }
 0x8c7   : > { %9406 = vmatpush1.bf16.msra.mxu0 %v9405_v33  ;;  %4711 = vmax.xlane.f32.xlu0 %v15606_v63  ;;  %v15612_v63 = vmax.f32 %v13602_v34, %v13607_v8 }
 0x8c8   : > { %9407 = vmatprep.subr.bf16.mxu0 %v15357_v16 }
 0x8c9   : > { %v10260_v61 = vpop.eup %10259 }
 0x8ca   : > { %6176 = vmax.xlane.f32.xlu1 %v15607_v18  ;;  %v10262_v54 = vpop.eup %10261 }
 0x8cb   : > { %5257 = vmatprep.mubr.f32.mxu1 %v10262_v54  ;;  %4714 = vmax.xlane.f32.xlu0 %v15610_v22  ;;  %v13850_v62 = vadd.f32 %v10262_v54, %v10260_v61  ;;  %v15617_v22 = vmax.f32 %v13625_v55, %v13627_v4  ;;  %v15618_v54 = vmax.f32 %v13615_v2, %v13617_v15 }
 0x8cc   : > { %v13852_v33 = vpop.f32.mrb[182].mxu1  ;;  %5258 = vmatmul.mubr.f32.gmra.mrb[218].mxu1 %v10260_v61 }
 0x8cd   : > { %15611 = vst [vmem:[#allocation144_spill] sm:$0xff] %v13852_v33  ;;  %v5171_v0 = vpop.f32.mrb[183].mxu1 }
 0x8ce   : > { %6179 = vmax.xlane.f32.xlu1 %v15612_v63 }
 0x8cf   : > { %4717 = vmax.xlane.f32.xlu0 %v15615_v35  ;;  %v15620_v35 = vmax.f32 %v13643_v47, %v13646_v28 }
 0x8d0   : > { %v13860_v18 = vpop.f32.mrb[184].mxu1 }
 0x8d1   : > { %15616 = vst [vmem:[#allocation137_spill] sm:$0xff] %v13860_v18  ;;  %v5176_v52 = vpop.f32.mrb[185].mxu1 }
 0x8d2   : > { %6185 = vmax.xlane.f32.xlu1 %v15617_v22  ;;  %v15621_v22 = vmax.f32 %v13633_v23, %v13637_v21  ;;  %v15629_v21 = vld [vmem:[#allocation52_spill] sm:$0xff] }
 0x8d3   : > { %6182 = vmax.xlane.f32.xlu0 %v15618_v54 }
 0x8d4   : > { %v13868_v61 = vpop.f32.mrb[186].mxu1 }
 0x8d5   : > { %15619 = vst [vmem:[#allocation150_spill] sm:$0xff] %v13868_v61  ;;  %v4682_v0 = vpop.xlane.xlu1 %4681  ;;  %v5181_v33 = vpop.f32.mrb[187].mxu1 }
 0x8d6   : > { %v4757_v63 = vsub.f32 %v13386_v6, %v4682_v0  ;;  %v4758_v37 = vsub.f32 %v13388_v56, %v4682_v0  ;;  %6191 = vmax.xlane.f32.xlu1 %v15620_v35  ;;  %v15623_v6 = vmax.f32 %v13663_v32, %v13665_v24  ;;  %v15624_v56 = vmax.f32 %v13654_v10, %v13657_v31  ;;  %v15633_v31 = vld [vmem:[#allocation59_spill] sm:$0xff]  ;;  %v15636_v10 = vld [vmem:[#allocation54_spill] sm:$0xff] }
 0x8d7   : > { %6188 = vmax.xlane.f32.xlu0 %v15621_v22 }
 0x8d8   : > { %v4859_v52 = vmul.f32 1.442695, %v4757_v63  ;;  %v4861_v18 = vmul.f32 1.442695, %v4758_v37  ;;  %v13878_v15 = vpop.f32.mrb[188].mxu1 }
 0x8d9   : > { %15622 = vst [vmem:[#allocation142_spill] sm:$0xff] %v13878_v15  ;;  %v13880_v54 = vpop.xlane.xlu1 %6146  ;;  %v5186_v33 = vpop.f32.mrb[189].mxu1  ;;  %v15626_v15 = vld [vmem:[#allocation50_spill] sm:$0xff] }
 0x8da   : > { %10263 = vpow2.f32 %v4859_v52  ;;  %6197 = vmax.xlane.f32.xlu1 %v15623_v6  ;;  %v15627_v61 = vmax.f32 %v13683_v19, %v15626_v15  ;;  %v15628_v33 = vld [vmem:[#allocation42_spill] sm:$0xff] }
 0x8db   : > { %10265 = vpow2.f32 %v4861_v18  ;;  %6194 = vmax.xlane.f32.xlu0 %v15624_v56  ;;  %v15630_v24 = vmax.f32 %v15628_v33, %v15629_v21  ;;  %v15632_v56 = vld [vmem:[#allocation62_spill] sm:$0xff] }
 0x8dc   : > { %v13888_v37 = vpop.f32.mrb[190].mxu1 }
 0x8dd   : > { %15625 = vst [vmem:[#allocation155_spill] sm:$0xff] %v13888_v37  ;;  %v9788_v0 = vpop.permute.xlu1 %9787  ;;  %v5191_v63 = vpop.f32.mrb[191].mxu1  ;;  %v15634_v37 = vmax.f32 %v15632_v56, %v15633_v31  ;;  %v15643_v31 = vld [vmem:[#allocation65_spill] sm:$0xff] }
 0x8de   : > { %v9790_v35 = vunpack.i.h.bf16 %v9788_v0  ;;  %v9789_v22 = vunpack.i.l.bf16 %v9788_v0  ;;  %6203 = vmax.xlane.f32.xlu1 %v15627_v61  ;;  %v15635_v63 = vld [vmem:[#allocation55_spill] sm:$0xff] }
 0x8df   : > { %6200 = vmax.xlane.f32.xlu0 %v15630_v24  ;;  %v15637_v15 = vmax.f32 %v15635_v63, %v15636_v10  ;;  %v15639_v24 = vld [vmem:[#allocation71_spill] sm:$0xff] }
 0x8e0   : > { %v9408_v52 = vpack.c.bf16 %v9790_v35, %v9789_v22  ;;  %v13896_v18 = vpop.f32.mrb[192].mxu1 }
 0x8e1   : > { %15631 = vst [vmem:[#allocation40_spill] sm:$0xff] %v13896_v18  ;;  %v5196_v6 = vpop.f32.mrb[193].mxu1  ;;  %v15640_v18 = vld [vmem:[#allocation72_spill] sm:$0xff] }
 0x8e2   : > { %9409 = vmatpush1.bf16.msra.mxu0 %v9408_v52  ;;  %6209 = vmax.xlane.f32.xlu1 %v15634_v37  ;;  %v15641_v6 = vmax.f32 %v15639_v24, %v15640_v18  ;;  %v15642_v37 = vld [vmem:[#allocation66_spill] sm:$0xff] }
 0x8e3   : > { %9410 = vmatprep.subr.bf16.mxu0 %v15357_v16  ;;  %6206 = vmax.xlane.f32.xlu0 %v15637_v15  ;;  %v15644_v56 = vmax.f32 %v15642_v37, %v15643_v31  ;;  %v15646_v15 = vld [vmem:[#allocation85_spill] sm:$0xff] }
 0x8e4   : > { %v10264_v0 = vpop.eup %10263  ;;  %v13905_v35 = vpop.f32.mrb[194].mxu1  ;;  %v15647_v63 = vmax.f32 %v13724_v38, %v15646_v15  ;;  %v15656_v15 = vld [vmem:[#allocation58_spill] sm:$0xff] }
 0x8e5   : > { %v10266_v61 = vpop.eup %10265  ;;  %15638 = vst [vmem:[#allocation30_spill] sm:$0xff] %v13905_v35  ;;  %v5201_v22 = vpop.f32.mrb[195].mxu1  ;;  %v15649_v35 = vld [vmem:[#allocation78_spill] sm:$0xff] }
 0x8e6   : > { %5262 = vmatprep.mubr.f32.mxu1 %v10266_v61  ;;  %6215 = vmax.xlane.f32.xlu1 %v15641_v6  ;;  %v13910_v52 = vadd.f32 %v10266_v61, %v10264_v0  ;;  %v15648_v22 = vld [vmem:[#allocation79_spill] sm:$0xff] }
 0x8e7   : > { %5263 = vmatmul.mubr.f32.gmra.mrb[220].mxu1 %v10264_v0  ;;  %6212 = vmax.xlane.f32.xlu0 %v15644_v56  ;;  %v15650_v33 = vmax.f32 %v15648_v22, %v15649_v35  ;;  %v15652_v0 = vmax.f32 %v13742_v46, %v13745_v3  ;;  %v15653_v56 = vmax.f32 %v13735_v20, %v13737_v17  ;;  %v15659_v20 = vld [vmem:[#allocation121_spill] sm:$0xff] }
 0x8e8   : > { %v13915_v21 = vpop.f32.mrb[196].mxu1 }
 0x8e9   : > { %15645 = vst [vmem:[#allocation45_spill] sm:$0xff] %v13915_v21  ;;  %v5206_v10 = vpop.f32.mrb[197].mxu1  ;;  %v15655_v21 = vld [vmem:[#allocation46_spill] sm:$0xff] }
 0x8ea   : > { %6221 = vmax.xlane.f32.xlu1 %v15647_v63 }
 0x8eb   : > { %6218 = vmax.xlane.f32.xlu0 %v15650_v33 }
 0x8ec   : > { %v13923_v18 = vpop.f32.mrb[198].mxu1 }
 0x8ed   : > { %15651 = vst [vmem:[#allocation39_spill] sm:$0xff] %v13923_v18  ;;  %v5211_v61 = vpop.f32.mrb[199].mxu1 }
 0x8ee   : > { %6227 = vmax.xlane.f32.xlu1 %v15652_v0  ;;  %v15658_v0 = vld [vmem:[#allocation81_spill] sm:$0xff] }
 0x8ef   : > { %6224 = vmax.xlane.f32.xlu0 %v15653_v56 }
 0x8f0   : > { %v13931_v10 = vpop.f32.mrb[200].mxu1 }
 0x8f1   : > { %15654 = vst [vmem:[#allocation49_spill] sm:$0xff] %v13931_v10  ;;  %v5216_v6 = vpop.f32.mrb[201].mxu1 }
 0x8f2   : > { %4915 = vadd.xlane.f32.xlu1 %v15655_v21 }
 0x8f3   : > { %v4685_v63 = vpop.xlane.xlu0 %4684  ;;  %4912 = vadd.xlane.f32.xlu0 %v15656_v15 }
 0x8f4   : > { %v4759_v61 = vsub.f32 %v13392_v59, %v4685_v63  ;;  %v4760_v18 = vsub.f32 %v13394_v60, %v4685_v63  ;;  %v15661_v59 = vld [vmem:[#allocation97_spill] sm:$0xff] }
 0x8f5   : > { %v13935_v33 = vpop.f32.mrb[202].mxu1 }
 0x8f6   : > { %15657 = vst [vmem:[#allocation43_spill] sm:$0xff] %v13935_v33  ;;  %v5221_v3 = vpop.f32.mrb[203].mxu1  ;;  %4921 = vadd.xlane.f32.xlu1 %v15658_v0  ;;  %v4863_v46 = vmul.f32 1.442695, %v4759_v61  ;;  %v4865_v17 = vmul.f32 1.442695, %v4760_v18 }
 0x8f7   : > { %v6150_v56 = vpop.xlane.xlu0 %6149  ;;  %4918 = vadd.xlane.f32.xlu0 %v15659_v20  ;;  %v15662_v0 = vld [vmem:[#allocation70_spill] sm:$0xff] }
 0x8f8   : > { %10267 = vpow2.f32 %v4863_v46  ;;  %v6239_v21 = vsub.f32 %v13498_v48, %v6150_v56  ;;  %v6240_v15 = vsub.f32 %v13502_v36, %v6150_v56  ;;  %v15665_v36 = vld [vmem:[#allocation6_spill] sm:$0xff]  ;;  %v15667_v56 = vld [vmem:[#allocation13_spill] sm:$0xff] }
 0x8f9   : > { %v13941_v6 = vpop.f32.mrb[204].mxu1  ;;  %10269 = vpow2.f32 %v4865_v17 }
 0x8fa   : > { %15660 = vst [vmem:[#allocation53_spill] sm:$0xff] %v13941_v6  ;;  %v5226_v33 = vpop.f32.mrb[205].mxu1  ;;  %4927 = vadd.xlane.f32.xlu1 %v15661_v59  ;;  %v6313_v60 = vmul.f32 1.442695, %v6239_v21  ;;  %v6315_v3 = vmul.f32 1.442695, %v6240_v15 }
 0x8fb   : > { %v9793_v63 = vpop.permute.xlu0 %9792  ;;  %4924 = vadd.xlane.f32.xlu0 %v15662_v0  ;;  %v15664_v6 = vld [vmem:[#allocation10_spill] sm:$0xff]  ;;  %v15668_v59 = vld [vmem:[#allocation11_spill] sm:$0xff] }
 0x8fc   : > { %10271 = vpow2.f32 %v6313_v60  ;;  %v9795_v20 = vunpack.i.h.bf16 %v9793_v63  ;;  %v9794_v46 = vunpack.i.l.bf16 %v9793_v63  ;;  %v15670_v0 = vld [vmem:[#allocation7_spill] sm:$0xff] }
 0x8fd   : > { %v13947_v18 = vpop.f32.mrb[206].mxu1  ;;  %10273 = vpow2.f32 %v6315_v3  ;;  %v15669_v3 = vld [vmem:[#allocation38_spill] sm:$0xff] }
 0x8fe   : > { %15663 = vst [vmem:[#allocation51_spill] sm:$0xff] %v13947_v18  ;;  %v5231_v61 = vpop.f32.mrb[207].mxu1  ;;  %4933 = vadd.xlane.f32.xlu1 %v15664_v6  ;;  %v9411_v48 = vpack.c.bf16 %v9795_v20, %v9794_v46  ;;  %v15671_v20 = vld [vmem:[#allocation93_spill] sm:$0xff]  ;;  %v15679_v18 = vld [vmem:[#allocation111_spill] sm:$0xff] }
 0x8ff   : > { %4930 = vadd.xlane.f32.xlu0 %v15665_v36  ;;  %v6229_v46 = vsub.f32 %v15671_v20, %v13759_v50  ;;  %v15673_v61 = vld [vmem:[#allocation36_spill] sm:$0xff]  ;;  %v15674_v36 = vld [vmem:[#allocation14_spill] sm:$0xff] }
 0x900   : > { %9412 = vmatpush1.bf16.msra.mxu0 %v9411_v48  ;;  %v6232_v48 = vsub.f32 %v15673_v61, %v13780_v1  ;;  %v15678_v20 = vld [vmem:[#allocation118_spill] sm:$0xff]  ;;  %v5392_v61 = vld [vmem:[%s14729_s1 + $0x40] sm:$0xff] }
 0x901   : > { %v13951_v17 = vpop.f32.mrb[208].mxu1  ;;  %9413 = vmatprep.subr.bf16.mxu0 %v15357_v16  ;;  %9074 = vmatprep.subr.mxu1 %v5392_v61 }
 0x902   : > { %15666 = vst [vmem:[#allocation57_spill] sm:$0xff] %v13951_v17  ;;  %v5236_v33 = vpop.f32.mrb[209].mxu1  ;;  %4939 = vadd.xlane.f32.xlu1 %v15667_v56  ;;  %v10268_v21 = vpop.eup %10267  ;;  %v6293_v56 = vmul.f32 1.442695, %v6229_v46  ;;  %9075 = vmatpush3.msra.mxu1 %v5392_v61 }
 0x903   : > { %v10270_v15 = vpop.eup %10269  ;;  %4936 = vadd.xlane.f32.xlu0 %v15668_v59  ;;  %v15675_v33 = vld [vmem:[#allocation12_spill] sm:$0xff]  ;;  %v6299_v59 = vmul.f32 1.442695, %v6232_v48 }
 0x904   : > { %5267 = vmatprep.mubr.f32.mxu1 %v10270_v15  ;;  %v4971_v60 = vadd.f32 %v10270_v15, %v10268_v21  ;;  %10275 = vpow2.f32 %v6293_v56 }
 0x905   : > { %5268 = vmatmul.mubr.f32.gmra.mrb[222].mxu1 %v10268_v21  ;;  %v15676_v21 = vld [vmem:[#allocation28_spill] sm:$0xff]  ;;  %10277 = vpow2.f32 %v6299_v59 }
 0x906   : > { %4945 = vadd.xlane.f32.xlu1 %v15669_v3  ;;  %v13957_v6 = vpop.eup %10271  ;;  %v6231_v15 = vsub.f32 %v15676_v21, %v13780_v1  ;;  %v15677_v3 = vld [vmem:[#allocation100_spill] sm:$0xff] }
 0x907   : > { %v13959_v63 = vpop.eup %10273  ;;  %4942 = vadd.xlane.f32.xlu0 %v15670_v0  ;;  %v6234_v0 = vsub.f32 %v15677_v3, %v13792_v53 }
 0x908   : > { %v13966_v16 = vadd.f32 %v13959_v63, %v13957_v6  ;;  %v6297_v1 = vmul.f32 1.442695, %v6231_v15 }
 0x909   : > { %v6303_v3 = vmul.f32 1.442695, %v6234_v0 }
 0x90a   : > { %15672 = vst [vmem:[#allocation56_spill] sm:$0xff] %v13966_v16  ;;  %4951 = vadd.xlane.f32.xlu1 %v15674_v36  ;;  %v15680_v36 = vld [vmem:[#allocation116_spill] sm:$0xff] }
 0x90b   : > { %4948 = vadd.xlane.f32.xlu0 %v15675_v33  ;;  %v15681_v33 = vld [vmem:[#allocation98_spill] sm:$0xff] }
 0x90c   : > { %v6233_v21 = vsub.f32 %v15681_v33, %v13792_v53 }
 0x90e   : > { %v4688_v50 = vpop.xlane.xlu1 %4687  ;;  %4957 = vadd.xlane.f32.xlu1 %v15678_v20  ;;  %v15683_v20 = vld [vmem:[#allocation84_spill] sm:$0xff]  ;;  %v6301_v59 = vmul.f32 1.442695, %v6233_v21 }
 0x90f   : > { %v4761_v17 = vsub.f32 %v15568_v11, %v4688_v50  ;;  %v4762_v10 = vsub.f32 %v15679_v18, %v4688_v50  ;;  %4954 = vadd.xlane.f32.xlu0 %v15680_v36  ;;  %v15682_v18 = vld [vmem:[#allocation110_spill] sm:$0xff]  ;;  %v15684_v36 = vld [vmem:[#allocation127_spill] sm:$0xff] }
 0x910   : > { %v6236_v56 = vsub.f32 %v15684_v36, %v13826_v12 }
 0x911   : > { %v4867_v46 = vmul.f32 1.442695, %v4761_v17  ;;  %v4869_v48 = vmul.f32 1.442695, %v4762_v10  ;;  %v15685_v17 = vld [vmem:[#allocation128_spill] sm:$0xff] }
 0x912   : > { %v6153_v11 = vpop.xlane.xlu1 %6152  ;;  %4963 = vadd.xlane.f32.xlu1 %v13804_v40  ;;  %v15686_v40 = vld [vmem:[#allocation129_spill] sm:$0xff]  ;;  %v6307_v33 = vmul.f32 1.442695, %v6236_v56 }
 0x913   : > { %10279 = vpow2.f32 %v4867_v46  ;;  %v6241_v50 = vsub.f32 %v15682_v18, %v6153_v11  ;;  %v6242_v16 = vsub.f32 %v15683_v20, %v6153_v11  ;;  %4960 = vadd.xlane.f32.xlu0 %v15685_v17  ;;  %v6235_v0 = vsub.f32 %v15686_v40, %v13826_v12  ;;  %v15687_v11 = vld [vmem:[#allocation108_spill] sm:$0xff] }
 0x914   : > { %10281 = vpow2.f32 %v4869_v48  ;;  %v6238_v48 = vsub.f32 %v15687_v11, %v13880_v54 }
 0x915   : > { %10283 = vpow2.f32 %v6297_v1  ;;  %v6317_v10 = vmul.f32 1.442695, %v6241_v50  ;;  %v6319_v15 = vmul.f32 1.442695, %v6242_v16  ;;  %v13997_v16 = vpop.eup %10275  ;;  %v6305_v21 = vmul.f32 1.442695, %v6235_v0 }
 0x916   : > { %10285 = vpow2.f32 %v6303_v3  ;;  %v9798_v53 = vpop.permute.xlu1 %9797  ;;  %4969 = vadd.xlane.f32.xlu1 %v13910_v52  ;;  %v15688_v52 = vld [vmem:[#allocation131_spill] sm:$0xff]  ;;  %v14001_v12 = vpop.eup %10277  ;;  %v6311_v18 = vmul.f32 1.442695, %v6238_v48 }
 0x917   : > { %10287 = vpow2.f32 %v6317_v10  ;;  %v9800_v61 = vunpack.i.h.bf16 %v9798_v53  ;;  %v9799_v46 = vunpack.i.l.bf16 %v9798_v53  ;;  %4966 = vadd.xlane.f32.xlu0 %v13850_v62  ;;  %v6237_v3 = vsub.f32 %v15688_v52, %v13880_v54 }
 0x918   : > { %10289 = vpow2.f32 %v6319_v15 }
 0x919   : > { %v9414_v1 = vpack.c.bf16 %v9800_v61, %v9799_v46  ;;  %10291 = vpow2.f32 %v6301_v59  ;;  %v6309_v62 = vmul.f32 1.442695, %v6237_v3 }
 0x91a   : > { %10293 = vpow2.f32 %v6307_v33 }
 0x91b   : > { %9415 = vmatpush1.bf16.msra.mxu0 %v9414_v1  ;;  %4972 = vadd.xlane.f32.xlu0 %v4971_v60  ;;  %10295 = vpow2.f32 %v6305_v21 }
 0x91c   : > { %10297 = vpow2.f32 %v6311_v18 }
 0x91d   : > { %v10280_v50 = vpop.eup %10279  ;;  %10299 = vpow2.f32 %v6309_v62 }
 0x91e   : > { %v10282_v20 = vpop.eup %10281  ;;  %6678 = vmatmul.mubr.f32.vlgmr.msra.gmra.mrb[54].mxu0 %v13997_v16 }
 0x91f   : > { %v14004_v36 = vpop.eup %10283  ;;  %5272 = vmatprep.mubr.f32.mxu1 %v10282_v20  ;;  %6682 = vmatprep.mubr.f32.mxu0 %v14001_v12  ;;  %v4974_v56 = vadd.f32 %v10282_v20, %v10280_v50  ;;  %v15689_v20 = vld [vmem:[#allocation164_spill] sm:$0xff] }
 0x920   : > { %v14007_v17 = vpop.eup %10285  ;;  %5273 = vmatmul.mubr.f32.gmra.mrb[224].mxu1 %v10280_v50 }
 0x921   : > { %v10288_v54 = vpop.eup %10287  ;;  %4975 = vadd.xlane.f32.xlu1 %v4974_v56  ;;  %v15690_v56 = vld [vmem:[#allocation165_spill] sm:$0xff] }
 0x922   : > { %v10290_v10 = vpop.eup %10289  ;;  %6683 = vmatmul.mubr.f32.gmra.mrb[56].mxu0 %v14004_v36 }
 0x923   : > { %6687 = vmatprep.mubr.f32.mxu0 %v14007_v17  ;;  %v14011_v60 = vadd.f32 %v10290_v10, %v10288_v54  ;;  %v14013_v15 = vpop.eup %10291 }
 0x924   : > { %v14015_v59 = vpop.eup %10293 }
 0x925   : > { %v14019_v53 = vpop.eup %10295 }
 0x926   : > { %6688 = vmatmul.mubr.f32.gmra.mrb[58].mxu0 %v14013_v15  ;;  %v14021_v40 = vpop.eup %10297 }
 0x927   : > { %6692 = vmatprep.mubr.f32.mxu0 %v14015_v59  ;;  %v14025_v0 = vpop.eup %10299 }
 0x92a   : > { %6693 = vmatmul.mubr.f32.gmra.mrb[60].mxu0 %v14019_v53 }
 0x92b   : > { %6697 = vmatprep.mubr.f32.mxu0 %v14021_v40 }
 0x92c   : > { %v4691_v61 = vpop.xlane.xlu0 %4690 }
 0x92d   : > { %v4763_v46 = vsub.f32 %v15575_v57, %v4691_v61  ;;  %v4764_v33 = vsub.f32 %v15576_v26, %v4691_v61 }
 0x92e   : > { %6698 = vmatmul.mubr.f32.gmra.mrb[62].mxu0 %v14025_v0 }
 0x92f   : > { %6702 = vmatprep.mubr.f32.mxu0 %v13959_v63  ;;  %v4871_v11 = vmul.f32 1.442695, %v4763_v46  ;;  %v4873_v48 = vmul.f32 1.442695, %v4764_v33 }
 0x930   : > { %v6156_v1 = vpop.xlane.xlu0 %6155 }
 0x931   : > { %10301 = vpow2.f32 %v4871_v11  ;;  %v14031_v21 = vpop.f32.mrb[210].mxu1  ;;  %v6243_v52 = vsub.f32 %v13516_v13, %v6156_v1  ;;  %v6244_v3 = vsub.f32 %v15578_v43, %v6156_v1 }
 0x932   : > { %6703 = vmatmul.mubr.f32.gmra.mrb[64].mxu0 %v13957_v6  ;;  %10303 = vpow2.f32 %v4873_v48  ;;  %v5241_v57 = vpop.f32.mrb[211].mxu1 }
 0x933   : > { %6707 = vmatprep.mubr.f32.mxu0 %v10290_v10  ;;  %v6321_v26 = vmul.f32 1.442695, %v6243_v52  ;;  %v6323_v18 = vmul.f32 1.442695, %v6244_v3  ;;  %v15691_v10 = vld [vmem:[#allocation76_spill] sm:$0xff] }
 0x934   : > { %v4697_v50 = vpop.xlane.xlu0 %4696 }
 0x935   : > { %10305 = vpow2.f32 %v6321_v26  ;;  %v14036_v63 = vpop.f32.mrb[212].mxu1  ;;  %v4767_v62 = vsub.f32 %v15689_v20, %v4697_v50  ;;  %v4768_v61 = vsub.f32 %v15690_v56, %v4697_v50  ;;  %v15692_v26 = vld [vmem:[#allocation147_spill] sm:$0xff] }
 0x936   : > { %6708 = vmatmul.mubr.f32.gmra.mrb[66].mxu0 %v10288_v54  ;;  %10307 = vpow2.f32 %v6323_v18  ;;  %v5246_v13 = vpop.f32.mrb[213].mxu1 }
 0x937   : > { %v4879_v46 = vmul.f32 1.442695, %v4767_v62  ;;  %v4881_v43 = vmul.f32 1.442695, %v4768_v61 }
 0x938   : > { %v6159_v33 = vpop.xlane.xlu0 %6158 }
 0x939   : > { %10309 = vpow2.f32 %v4879_v46  ;;  %v6245_v6 = vsub.f32 %v13527_v39, %v6159_v33  ;;  %v6246_v11 = vsub.f32 %v15691_v10, %v6159_v33  ;;  %v15693_v46 = vld [vmem:[#allocation119_spill] sm:$0xff] }
 0x93a   : > { %10311 = vpow2.f32 %v4881_v43 }
 0x93b   : > { %v10302_v48 = vpop.eup %10301  ;;  %v6325_v1 = vmul.f32 1.442695, %v6245_v6  ;;  %v6327_v52 = vmul.f32 1.442695, %v6246_v11 }
 0x93c   : > { %v10304_v3 = vpop.eup %10303  ;;  %v4700_v57 = vpop.xlane.xlu0 %4699 }
 0x93d   : > { %10313 = vpow2.f32 %v6325_v1  ;;  %5277 = vmatprep.mubr.f32.mxu1 %v10304_v3  ;;  %v4769_v54 = vsub.f32 %v15584_v44, %v4700_v57  ;;  %v4770_v18 = vsub.f32 %v15692_v26, %v4700_v57  ;;  %v4977_v50 = vadd.f32 %v10304_v3, %v10302_v48 }
 0x93e   : > { %10315 = vpow2.f32 %v6327_v52  ;;  %5278 = vmatmul.mubr.f32.gmra.mrb[226].mxu1 %v10302_v48 }
 0x93f   : > { %v10306_v20 = vpop.eup %10305  ;;  %v4883_v62 = vmul.f32 1.442695, %v4769_v54  ;;  %v4885_v39 = vmul.f32 1.442695, %v4770_v18  ;;  %4978 = vadd.xlane.f32.xlu0 %v4977_v50  ;;  %v15694_v18 = vld [vmem:[#allocation92_spill] sm:$0xff] }
 0x940   : > { %v10308_v56 = vpop.eup %10307  ;;  %v6162_v61 = vpop.xlane.xlu0 %6161 }
 0x941   : > { %10317 = vpow2.f32 %v4883_v62  ;;  %6712 = vmatprep.mubr.f32.mxu0 %v10308_v56  ;;  %v6247_v13 = vsub.f32 %v13537_v27, %v6162_v61  ;;  %v6248_v43 = vsub.f32 %v15693_v46, %v6162_v61  ;;  %v14046_v33 = vadd.f32 %v10308_v56, %v10306_v20 }
 0x942   : > { %10319 = vpow2.f32 %v4885_v39  ;;  %6713 = vmatmul.mubr.f32.gmra.mrb[68].mxu0 %v10306_v20  ;;  %v15695_v20 = vld [vmem:[#allocation31_spill] sm:$0xff] }
 0x943   : > { %v14048_v44 = vpop.eup %10309  ;;  %v6329_v6 = vmul.f32 1.442695, %v6247_v13  ;;  %v6331_v10 = vmul.f32 1.442695, %v6248_v43  ;;  %v15696_v13 = vld [vmem:[#allocation77_spill] sm:$0xff] }
 0x944   : > { %v14050_v11 = vpop.eup %10311  ;;  %v4703_v48 = vpop.xlane.xlu0 %4702 }
 0x945   : > { %10321 = vpow2.f32 %v6329_v6  ;;  %v4771_v1 = vsub.f32 %v15588_v41, %v4703_v48  ;;  %v4772_v52 = vsub.f32 %v15589_v30, %v4703_v48  ;;  %v4983_v27 = vadd.f32 %v14050_v11, %v14048_v44 }
 0x946   : > { %10323 = vpow2.f32 %v6331_v10 }
 0x947   : > { %v4694_v3 = vpop.xlane.xlu1 %4693  ;;  %v10314_v57 = vpop.eup %10313  ;;  %v4887_v54 = vmul.f32 1.442695, %v4771_v1  ;;  %v4889_v26 = vmul.f32 1.442695, %v4772_v52  ;;  %4984 = vadd.xlane.f32.xlu0 %v4983_v27 }
 0x948   : > { %v4765_v50 = vsub.f32 %v15694_v18, %v4694_v3  ;;  %v4766_v62 = vsub.f32 %v15695_v20, %v4694_v3  ;;  %v10316_v39 = vpop.eup %10315  ;;  %v6165_v56 = vpop.xlane.xlu0 %6164 }
 0x949   : > { %10325 = vpow2.f32 %v4887_v54  ;;  %6717 = vmatprep.mubr.f32.mxu0 %v10316_v39  ;;  %v6249_v30 = vsub.f32 %v13547_v7, %v6165_v56  ;;  %v6250_v46 = vsub.f32 %v15696_v13, %v6165_v56  ;;  %v14060_v6 = vadd.f32 %v10316_v39, %v10314_v57  ;;  %v15698_v56 = vld [vmem:[#allocation82_spill] sm:$0xff] }
 0x94a   : > { %v4875_v61 = vmul.f32 1.442695, %v4765_v50  ;;  %v4877_v41 = vmul.f32 1.442695, %v4766_v62  ;;  %10327 = vpow2.f32 %v4889_v26  ;;  %6718 = vmatmul.mubr.f32.gmra.mrb[70].mxu0 %v10314_v57  ;;  %v15697_v57 = vld [vmem:[#allocation157_spill] sm:$0xff] }
 0x94b   : > { %v6168_v43 = vpop.xlane.xlu1 %6167  ;;  %v14062_v10 = vpop.eup %10317  ;;  %v6333_v48 = vmul.f32 1.442695, %v6249_v30  ;;  %v6335_v3 = vmul.f32 1.442695, %v6250_v46 }
 0x94c   : > { %10329 = vpow2.f32 %v4875_v61  ;;  %v6251_v1 = vsub.f32 %v13557_v45, %v6168_v43  ;;  %v6252_v52 = vsub.f32 %v13559_v58, %v6168_v43  ;;  %v14066_v27 = vpop.eup %10319  ;;  %v4706_v7 = vpop.xlane.xlu0 %4705 }
 0x94d   : > { %10331 = vpow2.f32 %v4877_v41  ;;  %v4773_v18 = vsub.f32 %v15596_v51, %v4706_v7  ;;  %v4774_v50 = vsub.f32 %v15697_v57, %v4706_v7  ;;  %v14072_v62 = vadd.f32 %v14066_v27, %v14062_v10 }
 0x94e   : > { %10333 = vpow2.f32 %v6333_v48  ;;  %v6337_v54 = vmul.f32 1.442695, %v6251_v1  ;;  %v6339_v26 = vmul.f32 1.442695, %v6252_v52 }
 0x94f   : > { %10335 = vpow2.f32 %v6335_v3  ;;  %v6171_v20 = vpop.xlane.xlu1 %6170  ;;  %v10322_v45 = vpop.eup %10321  ;;  %v4891_v58 = vmul.f32 1.442695, %v4773_v18  ;;  %v4893_v30 = vmul.f32 1.442695, %v4774_v50 }
 0x950   : > { %10337 = vpow2.f32 %v6337_v54  ;;  %v6253_v39 = vsub.f32 %v13567_v25, %v6171_v20  ;;  %v6254_v61 = vsub.f32 %v15698_v56, %v6171_v20  ;;  %v10324_v41 = vpop.eup %10323  ;;  %v4709_v13 = vpop.xlane.xlu0 %4708  ;;  %v15699_v54 = vld [vmem:[#allocation75_spill] sm:$0xff]  ;;  %v15701_v56 = vld [vmem:[#allocation169_spill] sm:$0xff] }
 0x951   : > { %10339 = vpow2.f32 %v6339_v26  ;;  %6722 = vmatprep.mubr.f32.mxu0 %v10324_v41  ;;  %v4775_v43 = vsub.f32 %v15600_v5, %v4709_v13  ;;  %v4776_v48 = vsub.f32 %v15601_v49, %v4709_v13  ;;  %v14078_v52 = vadd.f32 %v10324_v41, %v10322_v45 }
 0x952   : > { %10341 = vpow2.f32 %v4891_v58  ;;  %v6341_v51 = vmul.f32 1.442695, %v6253_v39  ;;  %v6343_v46 = vmul.f32 1.442695, %v6254_v61  ;;  %6723 = vmatmul.mubr.f32.gmra.mrb[72].mxu0 %v10322_v45  ;;  %v15700_v58 = vld [vmem:[#allocation168_spill] sm:$0xff] }
 0x953   : > { %10343 = vpow2.f32 %v4893_v30  ;;  %v6174_v1 = vpop.xlane.xlu1 %6173  ;;  %v14080_v25 = vpop.eup %10325  ;;  %v4895_v3 = vmul.f32 1.442695, %v4775_v43  ;;  %v4897_v57 = vmul.f32 1.442695, %v4776_v48  ;;  %v15703_v43 = vld [vmem:[#allocation140_spill] sm:$0xff] }
 0x954   : > { %10345 = vpow2.f32 %v6341_v51  ;;  %v6255_v7 = vsub.f32 %v13577_v9, %v6174_v1  ;;  %v6256_v26 = vsub.f32 %v15699_v54, %v6174_v1  ;;  %v14084_v18 = vpop.eup %10327  ;;  %v4712_v5 = vpop.xlane.xlu0 %4711  ;;  %v15702_v51 = vld [vmem:[#allocation99_spill] sm:$0xff] }
 0x955   : > { %10347 = vpow2.f32 %v6343_v46  ;;  %v4777_v45 = vsub.f32 %v15700_v58, %v4712_v5  ;;  %v4778_v61 = vsub.f32 %v15701_v56, %v4712_v5  ;;  %v4989_v9 = vadd.f32 %v14084_v18, %v14080_v25 }
 0x956   : > { %v10330_v50 = vpop.eup %10329  ;;  %10349 = vpow2.f32 %v4895_v3  ;;  %v6345_v49 = vmul.f32 1.442695, %v6255_v7  ;;  %v6347_v20 = vmul.f32 1.442695, %v6256_v26 }
 0x957   : > { %v10332_v39 = vpop.eup %10331  ;;  %10351 = vpow2.f32 %v4897_v57  ;;  %v6177_v41 = vpop.xlane.xlu1 %6176  ;;  %v4899_v13 = vmul.f32 1.442695, %v4777_v45  ;;  %v4901_v3 = vmul.f32 1.442695, %v4778_v61  ;;  %4990 = vadd.xlane.f32.xlu0 %v4989_v9 }
 0x958   : > { %v10334_v30 = vpop.eup %10333  ;;  %10353 = vpow2.f32 %v6345_v49  ;;  %5282 = vmatprep.mubr.f32.mxu1 %v10332_v39  ;;  %v6257_v46 = vsub.f32 %v15702_v51, %v6177_v41  ;;  %v6258_v48 = vsub.f32 %v15703_v43, %v6177_v41  ;;  %v4715_v7 = vpop.xlane.xlu0 %4714  ;;  %v4980_v54 = vadd.f32 %v10332_v39, %v10330_v50 }
 0x959   : > { %v10336_v1 = vpop.eup %10335  ;;  %10355 = vpow2.f32 %v6347_v20  ;;  %5283 = vmatmul.mubr.f32.gmra.mrb[228].mxu1 %v10330_v50  ;;  %v4779_v49 = vsub.f32 %v15608_v42, %v4715_v7  ;;  %v4780_v45 = vsub.f32 %v15609_v29, %v4715_v7 }
 0x95a   : > { %v10338_v26 = vpop.eup %10337  ;;  %10357 = vpow2.f32 %v4899_v13  ;;  %v6349_v57 = vmul.f32 1.442695, %v6257_v46  ;;  %v6351_v5 = vmul.f32 1.442695, %v6258_v48  ;;  %6727 = vmatprep.mubr.f32.mxu0 %v10336_v1  ;;  %5287 = vmatprep.mubr.f32.mxu1 %v14050_v11  ;;  %v14095_v56 = vadd.f32 %v10336_v1, %v10334_v30 }
 0x95b   : > { %v10340_v58 = vpop.eup %10339  ;;  %10359 = vpow2.f32 %v4901_v3  ;;  %6728 = vmatmul.mubr.f32.gmra.mrb[74].mxu0 %v10334_v30  ;;  %4981 = vadd.xlane.f32.xlu1 %v4980_v54  ;;  %v6180_v20 = vpop.xlane.xlu1 %6179  ;;  %v4903_v50 = vmul.f32 1.442695, %v4779_v49  ;;  %v4905_v11 = vmul.f32 1.442695, %v4780_v45 }
 0x95c   : > { %v14097_v61 = vpop.eup %10341  ;;  %10361 = vpow2.f32 %v6349_v57  ;;  %6732 = vmatprep.mubr.f32.mxu0 %v10340_v58  ;;  %v6259_v39 = vsub.f32 %v13602_v34, %v6180_v20  ;;  %v6260_v42 = vsub.f32 %v13607_v8, %v6180_v20  ;;  %v4718_v29 = vpop.xlane.xlu0 %4717  ;;  %v14102_v41 = vadd.f32 %v10340_v58, %v10338_v26  ;;  %v15704_v34 = vld [vmem:[#allocation122_spill] sm:$0xff] }
 0x95d   : > { %v10344_v9 = vpop.eup %10343  ;;  %10363 = vpow2.f32 %v6351_v5  ;;  %5288 = vmatmul.mubr.f32.gmra.mrb[230].mxu1 %v14048_v44  ;;  %v4781_v46 = vsub.f32 %v15613_v14, %v4718_v29  ;;  %v4782_v8 = vsub.f32 %v15704_v34, %v4718_v29 }
 0x95e   : > { %v10346_v13 = vpop.eup %10345  ;;  %10365 = vpow2.f32 %v4903_v50  ;;  %v6353_v30 = vmul.f32 1.442695, %v6259_v39  ;;  %v6355_v51 = vmul.f32 1.442695, %v6260_v42  ;;  %5292 = vmatprep.mubr.f32.mxu1 %v14066_v27  ;;  %v4992_v44 = vadd.f32 %v10344_v9, %v14097_v61 }
 0x95f   : > { %v10348_v43 = vpop.eup %10347  ;;  %10367 = vpow2.f32 %v4905_v11  ;;  %6733 = vmatmul.mubr.f32.gmra.mrb[76].mxu0 %v10338_v26  ;;  %4987 = vadd.xlane.f32.xlu1 %v14072_v62  ;;  %v6186_v48 = vpop.xlane.xlu1 %6185  ;;  %v4907_v3 = vmul.f32 1.442695, %v4781_v46  ;;  %v4909_v54 = vmul.f32 1.442695, %v4782_v8 }
 0x960   : > { %v14109_v1 = vpop.eup %10349  ;;  %10369 = vpow2.f32 %v6353_v30  ;;  %6737 = vmatprep.mubr.f32.mxu0 %v10348_v43  ;;  %v6263_v7 = vsub.f32 %v13625_v55, %v6186_v48  ;;  %v6264_v14 = vsub.f32 %v13627_v4, %v6186_v48  ;;  %v6183_v26 = vpop.xlane.xlu0 %6182  ;;  %v14116_v62 = vadd.f32 %v10348_v43, %v10346_v13  ;;  %v15705_v4 = vld [vmem:[#allocation9_spill] sm:$0xff] }
 0x961   : > { %v14113_v27 = vpop.eup %10351  ;;  %10371 = vpow2.f32 %v6355_v51  ;;  %5293 = vmatmul.mubr.f32.gmra.mrb[232].mxu1 %v14062_v10  ;;  %v6261_v58 = vsub.f32 %v13615_v2, %v6183_v26  ;;  %v6262_v45 = vsub.f32 %v15705_v4, %v6183_v26  ;;  %v15708_v4 = vld [vmem:[#allocation44_spill] sm:$0xff] }
 0x962   : > { %v10354_v57 = vpop.eup %10353  ;;  %10373 = vpow2.f32 %v4907_v3  ;;  %v6361_v5 = vmul.f32 1.442695, %v6263_v7  ;;  %v6363_v49 = vmul.f32 1.442695, %v6264_v14  ;;  %5297 = vmatprep.mubr.f32.mxu1 %v14084_v18  ;;  %v4995_v10 = vadd.f32 %v14113_v27, %v14109_v1 }
 0x963   : > { %v10356_v55 = vpop.eup %10355  ;;  %10375 = vpow2.f32 %v4909_v54  ;;  %6738 = vmatmul.mubr.f32.gmra.mrb[78].mxu0 %v10346_v13  ;;  %4993 = vadd.xlane.f32.xlu1 %v4992_v44  ;;  %v6192_v20 = vpop.xlane.xlu1 %6191  ;;  %v6357_v39 = vmul.f32 1.442695, %v6261_v58  ;;  %v6359_v11 = vmul.f32 1.442695, %v6262_v45 }
 0x964   : > { %v14123_v50 = vpop.eup %10357  ;;  %10377 = vpow2.f32 %v6361_v5  ;;  %6742 = vmatprep.mubr.f32.mxu0 %v10356_v55  ;;  %v6267_v42 = vsub.f32 %v13643_v47, %v6192_v20  ;;  %v6268_v2 = vsub.f32 %v13646_v28, %v6192_v20  ;;  %4996 = vadd.xlane.f32.xlu0 %v4995_v10  ;;  %v6189_v29 = vpop.xlane.xlu0 %6188  ;;  %v14130_v13 = vadd.f32 %v10356_v55, %v10354_v57  ;;  %v15706_v28 = vld [vmem:[#allocation32_spill] sm:$0xff]  ;;  %v15709_v10 = vld [vmem:[#allocation37_spill] sm:$0xff] }
 0x965   : > { %v14127_v18 = vpop.eup %10359  ;;  %10379 = vpow2.f32 %v6363_v49  ;;  %5298 = vmatmul.mubr.f32.gmra.mrb[234].mxu1 %v14080_v25  ;;  %v6265_v43 = vsub.f32 %v13633_v23, %v6189_v29  ;;  %v6266_v34 = vsub.f32 %v15706_v28, %v6189_v29  ;;  %v15710_v29 = vld [vmem:[#allocation50_spill] sm:$0xff] }
 0x966   : > { %v10362_v30 = vpop.eup %10361  ;;  %10381 = vpow2.f32 %v6357_v39  ;;  %v6369_v51 = vmul.f32 1.442695, %v6267_v42  ;;  %v6371_v46 = vmul.f32 1.442695, %v6268_v2  ;;  %5302 = vmatprep.mubr.f32.mxu1 %v10344_v9  ;;  %v14134_v8 = vpop.f32.mrb[214].mxu1  ;;  %v4998_v25 = vadd.f32 %v14127_v18, %v14123_v50  ;;  %v15707_v9 = vld [vmem:[#allocation48_spill] sm:$0xff] }
 0x967   : > { %v10364_v47 = vpop.eup %10363  ;;  %10383 = vpow2.f32 %v6359_v11  ;;  %6743 = vmatmul.mubr.f32.gmra.mrb[80].mxu0 %v10354_v57  ;;  %v6198_v48 = vpop.xlane.xlu1 %6197  ;;  %v6365_v3 = vmul.f32 1.442695, %v6265_v43  ;;  %v6367_v26 = vmul.f32 1.442695, %v6266_v34 }
 0x968   : > { %v14138_v44 = vpop.eup %10365  ;;  %10385 = vpow2.f32 %v6369_v51  ;;  %v5251_v7 = vpop.f32.mrb[215].mxu1  ;;  %6747 = vmatprep.mubr.f32.mxu0 %v10364_v47  ;;  %v6271_v23 = vsub.f32 %v13663_v32, %v6198_v48  ;;  %v6272_v14 = vsub.f32 %v15707_v9, %v6198_v48  ;;  %4999 = vadd.xlane.f32.xlu1 %v4998_v25  ;;  %v14145_v5 = vadd.f32 %v10364_v47, %v10362_v30  ;;  %v15711_v25 = vld [vmem:[#allocation42_spill] sm:$0xff] }
 0x969   : > { %v14142_v54 = vpop.eup %10367  ;;  %10387 = vpow2.f32 %v6371_v46  ;;  %5303 = vmatmul.mubr.f32.gmra.mrb[236].mxu1 %v14097_v61  ;;  %v6195_v57 = vpop.xlane.xlu0 %6194 }
 0x96a   : > { %v10370_v49 = vpop.eup %10369  ;;  %10389 = vpow2.f32 %v6365_v3  ;;  %v6377_v58 = vmul.f32 1.442695, %v6271_v23  ;;  %v6379_v55 = vmul.f32 1.442695, %v6272_v14  ;;  %v6269_v45 = vsub.f32 %v15708_v4, %v6195_v57  ;;  %5307 = vmatprep.mubr.f32.mxu1 %v14113_v27  ;;  %v15712_v3 = vld [vmem:[#allocation52_spill] sm:$0xff]  ;;  %v15715_v4 = vld [vmem:[#allocation59_spill] sm:$0xff] }
 0x96b   : > { %v10372_v32 = vpop.eup %10371  ;;  %10391 = vpow2.f32 %v6367_v26  ;;  %v6270_v20 = vsub.f32 %v15709_v10, %v6195_v57  ;;  %6748 = vmatmul.mubr.f32.gmra.mrb[82].mxu0 %v10362_v30  ;;  %v5001_v39 = vadd.f32 %v14142_v54, %v14138_v44  ;;  %v6204_v61 = vpop.xlane.xlu1 %6203  ;;  %v15713_v23 = vld [vmem:[#allocation132_spill] sm:$0xff] }
 0x96c   : > { %v14152_v42 = vpop.eup %10373  ;;  %10393 = vpow2.f32 %v6377_v58  ;;  %v6373_v2 = vmul.f32 1.442695, %v6269_v45  ;;  %6752 = vmatprep.mubr.f32.mxu0 %v10372_v32  ;;  %v6275_v11 = vsub.f32 %v13683_v19, %v6204_v61  ;;  %v6276_v51 = vsub.f32 %v15710_v29, %v6204_v61  ;;  %v15714_v58 = vld [vmem:[#allocation62_spill] sm:$0xff] }
 0x96d   : > { %v14156_v46 = vpop.eup %10375  ;;  %10395 = vpow2.f32 %v6379_v55  ;;  %v6375_v27 = vmul.f32 1.442695, %v6270_v20  ;;  %5002 = vadd.xlane.f32.xlu0 %v5001_v39  ;;  %5308 = vmatmul.mubr.f32.gmra.mrb[238].mxu1 %v14109_v1  ;;  %v6201_v30 = vpop.xlane.xlu0 %6200  ;;  %v14159_v43 = vadd.f32 %v10372_v32, %v10370_v49  ;;  %v6421_v1 = vadd.f32 %v13997_v16, %v15713_v23 }
 0x96e   : > { %v14161_v47 = vpop.eup %10377  ;;  %10397 = vpow2.f32 %v6373_v2  ;;  %v6385_v28 = vmul.f32 1.442695, %v6275_v11  ;;  %v6387_v34 = vmul.f32 1.442695, %v6276_v51  ;;  %v6273_v48 = vsub.f32 %v15711_v25, %v6201_v30  ;;  %5312 = vmatprep.mubr.f32.mxu1 %v14127_v18  ;;  %v15716_v2 = vld [vmem:[#allocation55_spill] sm:$0xff]  ;;  %v15717_v51 = vld [vmem:[#allocation54_spill] sm:$0xff] }
 0x96f   : > { %v10380_v19 = vpop.eup %10379  ;;  %10399 = vpow2.f32 %v6375_v27  ;;  %v6274_v7 = vsub.f32 %v15712_v3, %v6201_v30  ;;  %6753 = vmatmul.mubr.f32.gmra.mrb[84].mxu0 %v10370_v49  ;;  %v5004_v9 = vadd.f32 %v14156_v46, %v14152_v42  ;;  %v6210_v14 = vpop.xlane.xlu1 %6209  ;;  %v6424_v16 = vadd.f32 %v14004_v36, %v14001_v12  ;;  %v15718_v25 = vld [vmem:[#allocation72_spill] sm:$0xff] }
 0x970   : > { %v10382_v26 = vpop.eup %10381  ;;  %10401 = vpow2.f32 %v6385_v28  ;;  %v6381_v57 = vmul.f32 1.442695, %v6273_v48  ;;  %v6279_v55 = vsub.f32 %v15714_v58, %v6210_v14  ;;  %v6280_v45 = vsub.f32 %v15715_v4, %v6210_v14  ;;  %v15719_v58 = vld [vmem:[#allocation85_spill] sm:$0xff] }
 0x971   : > { %v10384_v18 = vpop.eup %10383  ;;  %10403 = vpow2.f32 %v6387_v34  ;;  %v6383_v32 = vmul.f32 1.442695, %v6274_v7  ;;  %6422 = vadd.xlane.f32.xlu0 %v6421_v1  ;;  %5005 = vadd.xlane.f32.xlu1 %v5004_v9  ;;  %v6207_v49 = vpop.xlane.xlu0 %6206  ;;  %v14175_v10 = vadd.f32 %v10380_v19, %v14161_v47  ;;  %v6427_v12 = vadd.f32 %v14013_v15, %v14007_v17 }
 0x972   : > { %v14177_v20 = vpop.eup %10385  ;;  %10405 = vpow2.f32 %v6381_v57  ;;  %v6393_v39 = vmul.f32 1.442695, %v6279_v55  ;;  %v6395_v61 = vmul.f32 1.442695, %v6280_v45  ;;  %5313 = vmatmul.mubr.f32.gmra.mrb[240].mxu1 %v14123_v50  ;;  %6757 = vmatprep.mubr.f32.mxu0 %v10384_v18  ;;  %v6277_v11 = vsub.f32 %v15716_v2, %v6207_v49  ;;  %v15720_v2 = vld [vmem:[#allocation103_spill] sm:$0xff] }
 0x973   : > { %v14181_v29 = vpop.eup %10387  ;;  %10407 = vpow2.f32 %v6383_v32  ;;  %v6278_v27 = vsub.f32 %v15717_v51, %v6207_v49  ;;  %5317 = vmatprep.mubr.f32.mxu1 %v14142_v54  ;;  %6758 = vmatmul.mubr.f32.gmra.mrb[86].mxu0 %v10382_v26  ;;  %v6216_v36 = vpop.xlane.xlu1 %6215  ;;  %v14187_v30 = vadd.f32 %v10384_v18, %v10382_v26  ;;  %v6430_v17 = vadd.f32 %v14019_v53, %v14015_v59 }
 0x974   : > { %v10390_v28 = vpop.eup %10389  ;;  %10409 = vpow2.f32 %v6393_v39  ;;  %v6389_v50 = vmul.f32 1.442695, %v6277_v11  ;;  %6762 = vmatprep.mubr.f32.mxu0 %v10380_v19  ;;  %v6283_v34 = vsub.f32 %v15639_v24, %v6216_v36  ;;  %v6284_v48 = vsub.f32 %v15718_v25, %v6216_v36  ;;  %v15721_v11 = vld [vmem:[#allocation104_spill] sm:$0xff] }
 0x975   : > { %v10392_v3 = vpop.eup %10391  ;;  %10411 = vpow2.f32 %v6395_v61  ;;  %v6391_v7 = vmul.f32 1.442695, %v6278_v27  ;;  %6428 = vadd.xlane.f32.xlu0 %v6427_v12  ;;  %6425 = vadd.xlane.f32.xlu1 %v6424_v16  ;;  %v6213_v54 = vpop.xlane.xlu0 %6212  ;;  %v14195_v15 = vadd.f32 %v14181_v29, %v14177_v20  ;;  %v6433_v59 = vadd.f32 %v14025_v0, %v14021_v40 }
 0x976   : > { %v14197_v23 = vpop.eup %10393  ;;  %10413 = vpow2.f32 %v6389_v50  ;;  %v6401_v19 = vmul.f32 1.442695, %v6283_v34  ;;  %v6403_v24 = vmul.f32 1.442695, %v6284_v48  ;;  %5318 = vmatmul.mubr.f32.gmra.mrb[242].mxu1 %v14138_v44  ;;  %v6281_v1 = vsub.f32 %v15642_v37, %v6213_v54  ;;  %v15723_v34 = vld [vmem:[#allocation89_spill] sm:$0xff] }
 0x977   : > { %v14201_v9 = vpop.eup %10395  ;;  %10415 = vpow2.f32 %v6391_v7  ;;  %v6282_v14 = vsub.f32 %v15643_v31, %v6213_v54  ;;  %5322 = vmatprep.mubr.f32.mxu1 %v14156_v46  ;;  %6763 = vmatmul.mubr.f32.gmra.mrb[88].mxu0 %v14161_v47  ;;  %v6222_v53 = vpop.xlane.xlu1 %6221  ;;  %v14208_v26 = vadd.f32 %v10392_v3, %v10390_v28 }
 0x978   : > { %v14210_v57 = vpop.eup %10397  ;;  %10417 = vpow2.f32 %v6401_v19  ;;  %v6397_v44 = vmul.f32 1.442695, %v6281_v1  ;;  %6767 = vmatprep.mubr.f32.mxu0 %v10392_v3  ;;  %v6287_v37 = vsub.f32 %v13724_v38, %v6222_v53  ;;  %v6288_v55 = vsub.f32 %v15719_v58, %v6222_v53  ;;  %v15724_v3 = vld [vmem:[#allocation90_spill] sm:$0xff] }
 0x979   : > { %v10400_v31 = vpop.eup %10399  ;;  %10419 = vpow2.f32 %v6403_v24  ;;  %v6399_v46 = vmul.f32 1.442695, %v6282_v14  ;;  %6434 = vadd.xlane.f32.xlu0 %v6433_v59  ;;  %6431 = vadd.xlane.f32.xlu1 %v6430_v17  ;;  %v6219_v47 = vpop.xlane.xlu0 %6218  ;;  %v14216_v40 = vadd.f32 %v14201_v9, %v14197_v23 }
 0x97a   : > { %v14218_v0 = vpop.eup %10401  ;;  %10421 = vpow2.f32 %v6397_v44  ;;  %v6409_v4 = vmul.f32 1.442695, %v6287_v37  ;;  %v6411_v45 = vmul.f32 1.442695, %v6288_v55  ;;  %5323 = vmatmul.mubr.f32.gmra.mrb[244].mxu1 %v14152_v42  ;;  %v6285_v38 = vsub.f32 %v15648_v22, %v6219_v47 }
 0x97b   : > { %v14222_v18 = vpop.eup %10403  ;;  %10423 = vpow2.f32 %v6399_v46  ;;  %v6286_v32 = vsub.f32 %v15649_v35, %v6219_v47  ;;  %6768 = vmatmul.mubr.f32.gmra.mrb[90].mxu0 %v10390_v28  ;;  %v6228_v49 = vpop.xlane.xlu1 %6227  ;;  %v14226_v16 = vadd.f32 %v10400_v31, %v14210_v57  ;;  %v15722_v35 = vld [vmem:[#allocation56_spill] sm:$0xff] }
 0x97c   : > { %v14228_v39 = vpop.eup %10405  ;;  %10425 = vpow2.f32 %v6409_v4  ;;  %v6405_v61 = vmul.f32 1.442695, %v6285_v38  ;;  %6772 = vmatprep.mubr.f32.mxu0 %v14181_v29  ;;  %v6291_v42 = vsub.f32 %v15720_v2, %v6228_v49  ;;  %v6292_v22 = vsub.f32 %v15721_v11, %v6228_v49 }
 0x97d   : > { %v10408_v51 = vpop.eup %10407  ;;  %10427 = vpow2.f32 %v6411_v45  ;;  %v6407_v27 = vmul.f32 1.442695, %v6286_v32  ;;  %6440 = vadd.xlane.f32.xlu0 %v14011_v60  ;;  %6437 = vadd.xlane.f32.xlu1 %v15722_v35  ;;  %v6225_v12 = vpop.xlane.xlu0 %6224  ;;  %v14237_v36 = vadd.f32 %v14222_v18, %v14218_v0 }
 0x97e   : > { %v14239_v28 = vpop.eup %10409  ;;  %10429 = vpow2.f32 %v6405_v61  ;;  %v6417_v29 = vmul.f32 1.442695, %v6291_v42  ;;  %v6419_v50 = vmul.f32 1.442695, %v6292_v22  ;;  %v6289_v25 = vsub.f32 %v15723_v34, %v6225_v12 }
 0x97f   : > { %v14242_v48 = vpop.eup %10411  ;;  %10431 = vpow2.f32 %v6407_v27  ;;  %v6290_v7 = vsub.f32 %v15724_v3, %v6225_v12  ;;  %6773 = vmatmul.mubr.f32.gmra.mrb[92].mxu0 %v14177_v20  ;;  %v4916_v60 = vpop.xlane.xlu1 %4915  ;;  %v14247_v54 = vadd.f32 %v10408_v51, %v14228_v39  ;;  %v15726_v12 = vld [vmem:[#allocation137_spill] sm:$0xff] }
 0x980   : > { %v14249_v17 = vpop.eup %10413  ;;  %10433 = vpow2.f32 %v6417_v29  ;;  %v6413_v19 = vmul.f32 1.442695, %v6289_v25  ;;  %6777 = vmatprep.mubr.f32.mxu0 %v10400_v31  ;;  %v14253_v24 = vadd.f32 %v14242_v48, %v14239_v28 }
 0x981   : > { %v10416_v1 = vpop.eup %10415  ;;  %10435 = vpow2.f32 %v6419_v50  ;;  %v6415_v14 = vmul.f32 1.442695, %v6290_v7  ;;  %6446 = vadd.xlane.f32.xlu0 %v14060_v6  ;;  %6443 = vadd.xlane.f32.xlu1 %v14046_v33  ;;  %v14257_v20 = vpop.f32.mrb[216].mxu1  ;;  %v15727_v50 = vld [vmem:[#allocation150_spill] sm:$0xff]  ;;  %v15729_v7 = vld [vmem:[#allocation155_spill] sm:$0xff] }
 0x982   : > { %v4913_v59 = vpop.xlane.xlu0 %4912  ;;  %v14259_v53 = vpop.eup %10417  ;;  %10437 = vpow2.f32 %v6413_v19  ;;  %v14262_v37 = vadd.f32 %v10416_v1, %v14249_v17 }
 0x983   : > { %v5256_v44 = vpop.f32.mrb[217].mxu1  ;;  %v14264_v58 = vpop.eup %10419  ;;  %10439 = vpow2.f32 %v6415_v14  ;;  %6778 = vmatmul.mubr.f32.gmra.mrb[94].mxu0 %v14210_v57 }
 0x984   : > { %v4922_v55 = vpop.xlane.xlu1 %4921  ;;  %v14267_v31 = vpop.eup %10421  ;;  %10441 = vrcp.f32 %v4916_v60  ;;  %6782 = vmatprep.mubr.f32.mxu0 %v14201_v9  ;;  %v14272_v33 = vadd.f32 %v14264_v58, %v14259_v53 }
 0x985   : > { %v14274_v6 = vpop.eup %10423  ;;  %10443 = vrcp.f32 %v4913_v59  ;;  %6452 = vadd.xlane.f32.xlu0 %v14095_v56  ;;  %6449 = vadd.xlane.f32.xlu1 %v14078_v52  ;;  %v15731_v59 = vld [vmem:[#allocation30_spill] sm:$0xff] }
 0x986   : > { %v4919_v46 = vpop.xlane.xlu0 %4918  ;;  %v14278_v47 = vpop.eup %10425  ;;  %v14282_v57 = vadd.f32 %v14274_v6, %v14267_v31 }
 0x987   : > { %v14284_v4 = vpop.eup %10427  ;;  %10445 = vrcp.f32 %v4919_v46  ;;  %6783 = vmatmul.mubr.f32.gmra.mrb[96].mxu0 %v14197_v23 }
 0x988   : > { %v4928_v9 = vpop.xlane.xlu1 %4927  ;;  %v14287_v45 = vpop.eup %10429  ;;  %10447 = vrcp.f32 %v4922_v55  ;;  %6787 = vmatprep.mubr.f32.mxu0 %v10408_v51  ;;  %v14291_v52 = vadd.f32 %v14284_v4, %v14278_v47  ;;  %v15725_v51 = vld [vmem:[#allocation144_spill] sm:$0xff] }
 0x989   : > { %v14293_v56 = vpop.eup %10431  ;;  %6458 = vadd.xlane.f32.xlu0 %v14116_v62  ;;  %6455 = vadd.xlane.f32.xlu1 %v14102_v41 }
 0x98a   : > { %v4925_v38 = vpop.xlane.xlu0 %4924  ;;  %v14297_v32 = vpop.eup %10433  ;;  %v14301_v23 = vadd.f32 %v14293_v56, %v14287_v45 }
 0x98b   : > { %10449 = vrcp.f32 %v4925_v38  ;;  %v14303_v49 = vpop.eup %10435  ;;  %6788 = vmatmul.mubr.f32.gmra.mrb[98].mxu0 %v14228_v39 }
 0x98c   : > { %v4934_v61 = vpop.xlane.xlu1 %4933  ;;  %v14306_v2 = vpop.eup %10437  ;;  %10451 = vrcp.f32 %v4928_v9  ;;  %6792 = vmatprep.mubr.f32.mxu0 %v14222_v18  ;;  %v14311_v41 = vadd.f32 %v14303_v49, %v14297_v32  ;;  %v15733_v9 = vld [vmem:[#allocation39_spill] sm:$0xff] }
 0x98d   : > { %v14313_v62 = vpop.eup %10439  ;;  %6464 = vadd.xlane.f32.xlu0 %v14145_v5  ;;  %6461 = vadd.xlane.f32.xlu1 %v14130_v13 }
 0x98e   : > { %v4931_v42 = vpop.xlane.xlu0 %4930  ;;  %v10442_v11 = vpop.eup %10441  ;;  %v14319_v39 = vadd.f32 %v14313_v62, %v14306_v2 }
 0x98f   : > { %10453 = vrcp.f32 %v4931_v42  ;;  %v10444_v22 = vpop.eup %10443  ;;  %6793 = vmatmul.mubr.f32.gmra.mrb[100].mxu0 %v14218_v0  ;;  %v5331_v5 = vmul.f32 %v10442_v11, %v15726_v12 }
 0x990   : > { %v4940_v18 = vpop.xlane.xlu1 %4939  ;;  %10455 = vrcp.f32 %v4934_v61  ;;  %v5329_v27 = vmul.f32 %v10444_v22, %v15725_v51  ;;  %6797 = vmatprep.mubr.f32.mxu0 %v10416_v1 }
 0x991   : > { %v10446_v35 = vpop.eup %10445  ;;  %6467 = vadd.xlane.f32.xlu1 %v14159_v43  ;;  %6470 = vadd.xlane.f32.xlu0 %v14187_v30  ;;  %v15728_v43 = vld [vmem:[#allocation142_spill] sm:$0xff] }
 0x992   : > { %v4937_v13 = vpop.xlane.xlu0 %4936  ;;  %v10448_v29 = vpop.eup %10447  ;;  %9076 = vmatprep.mubr.msk.f32.mxu1 %vm232_vm0, %v5329_v27  ;;  %v5333_v34 = vmul.f32 %v10446_v35, %v15727_v50  ;;  %v15737_v35 = vld [vmem:[#allocation51_spill] sm:$0xff] }
 0x993   : > { %10457 = vrcp.f32 %v4937_v13  ;;  %9077 = vmatmul.mubr.msk.f32.vlgmr.msra.gmra.mrb[150].mxu1 %vm232_vm0, %v5331_v5  ;;  %6798 = vmatmul.mubr.f32.gmra.mrb[102].mxu0 %v14249_v17  ;;  %v5335_v30 = vmul.f32 %v10448_v29, %v15728_v43 }
 0x994   : > { %v4946_v0 = vpop.xlane.xlu1 %4945  ;;  %10459 = vrcp.f32 %v4940_v18  ;;  %9079 = vmatprep.mubr.msk.f32.mxu1 %vm232_vm0, %v5333_v34  ;;  %6802 = vmatprep.mubr.f32.mxu0 %v14242_v48  ;;  %v6902_v48 = vld [vmem:[%s14729_s1 + $0x48] sm:$0xff]  ;;  %v15735_v18 = vld [vmem:[#allocation43_spill] sm:$0xff] }
 0x995   : > { %v10450_v25 = vpop.eup %10449  ;;  %6473 = vadd.xlane.f32.xlu1 %v14175_v10  ;;  %6476 = vadd.xlane.f32.xlu0 %v14208_v26  ;;  %v15730_v10 = vld [vmem:[#allocation40_spill] sm:$0xff] }
 0x996   : > { %v4943_v3 = vpop.xlane.xlu0 %4942  ;;  %v5337_v60 = vmul.f32 %v10450_v25, %v15729_v7  ;;  %v10452_v19 = vpop.eup %10451  ;;  %9124 = vmatprep.subr.mxu1 %v6902_v48 }
 0x997   : > { %10461 = vrcp.f32 %v4943_v3  ;;  %9080 = vmatmul.mubr.msk.f32.gmra.mrb[152].mxu1 %vm232_vm0, %v5335_v30  ;;  %6803 = vmatmul.mubr.f32.gmra.mrb[104].mxu0 %v14239_v28  ;;  %v5339_v26 = vmul.f32 %v10452_v19, %v15730_v10 }
 0x998   : > { %v4952_v17 = vpop.xlane.xlu1 %4951  ;;  %10463 = vrcp.f32 %v4946_v0  ;;  %9082 = vmatprep.mubr.msk.f32.mxu1 %vm232_vm0, %v5337_v60  ;;  %6807 = vmatprep.mubr.f32.mxu0 %v14274_v6 }
 0x999   : > { %v10454_v1 = vpop.eup %10453  ;;  %6479 = vadd.xlane.f32.xlu1 %v14195_v15  ;;  %6482 = vadd.xlane.f32.xlu0 %v14226_v16  ;;  %v15732_v15 = vld [vmem:[#allocation45_spill] sm:$0xff] }
 0x99a   : > { %v4949_v14 = vpop.xlane.xlu0 %4948  ;;  %v5341_v28 = vmul.f32 %v10454_v1, %v15731_v59  ;;  %v10456_v44 = vpop.eup %10455  ;;  %9125 = vmatpush3.msra.mxu1 %v6902_v48 }
 0x99b   : > { %10465 = vrcp.f32 %v4949_v14  ;;  %9083 = vmatmul.mubr.msk.f32.gmra.mrb[154].mxu1 %vm232_vm0, %v5339_v26  ;;  %6808 = vmatmul.mubr.f32.gmra.mrb[106].mxu0 %v14267_v31  ;;  %v5343_v16 = vmul.f32 %v10456_v44, %v15732_v15 }
 0x99c   : > { %v4958_v55 = vpop.xlane.xlu1 %4957  ;;  %10467 = vrcp.f32 %v4952_v17  ;;  %9085 = vmatprep.mubr.msk.f32.mxu1 %vm232_vm0, %v5341_v28  ;;  %6812 = vmatprep.mubr.f32.mxu0 %v14264_v58  ;;  %v15734_v58 = vld [vmem:[#allocation49_spill] sm:$0xff] }
 0x99d   : > { %v10458_v46 = vpop.eup %10457  ;;  %6485 = vadd.xlane.f32.xlu1 %v14216_v40  ;;  %6488 = vadd.xlane.f32.xlu0 %v14247_v54 }
 0x99e   : > { %v4955_v6 = vpop.xlane.xlu0 %4954  ;;  %v5345_v38 = vmul.f32 %v10458_v46, %v15733_v9  ;;  %v10460_v61 = vpop.eup %10459  ;;  %v14414_v9 = vld [vmem:[%s14729_s1 + $0x60] sm:$0xff] }
 0x99f   : > { %10469 = vrcp.f32 %v4955_v6  ;;  %9086 = vmatmul.mubr.msk.f32.gmra.mrb[156].mxu1 %vm232_vm0, %v5343_v16  ;;  %6813 = vmatmul.mubr.f32.gmra.mrb[108].mxu0 %v14259_v53  ;;  %v5259_v42 = vpop.f32.mrb[218].mxu1  ;;  %v5347_v11 = vmul.f32 %v10460_v61, %v15734_v58 }
 0x9a0   : > { %10471 = vrcp.f32 %v4958_v55  ;;  %9088 = vmatprep.mubr.msk.f32.mxu1 %vm232_vm0, %v5345_v38  ;;  %6817 = vmatprep.mubr.f32.mxu0 %v14293_v56  ;;  %v4964_v40 = vpop.xlane.xlu1 %4963  ;;  %v5261_v54 = vpop.f32.mrb[219].mxu1 }
 0x9a1   : > { %v10462_v31 = vpop.eup %10461  ;;  %6491 = vadd.xlane.f32.xlu1 %v14237_v36  ;;  %6494 = vadd.xlane.f32.xlu0 %v14262_v37  ;;  %v15736_v36 = vld [vmem:[#allocation53_spill] sm:$0xff] }
 0x9a2   : > { %v4961_v22 = vpop.xlane.xlu0 %4960  ;;  %v5349_v51 = vmul.f32 %v10462_v31, %v15735_v18  ;;  %v10464_v27 = vpop.eup %10463  ;;  %9174 = vmatprep.subr.mxu1 %v14414_v9 }
 0x9a3   : > { %10473 = vrcp.f32 %v4961_v22  ;;  %9089 = vmatmul.mubr.msk.f32.gmra.mrb[158].mxu1 %vm232_vm0, %v5347_v11  ;;  %6818 = vmatmul.mubr.f32.gmra.mrb[110].mxu0 %v14287_v45  ;;  %v5351_v37 = vmul.f32 %v10464_v27, %v15736_v36 }
 0x9a4   : > { %10475 = vrcp.f32 %v4964_v40  ;;  %9091 = vmatprep.mubr.msk.f32.mxu1 %vm232_vm0, %v5349_v51  ;;  %6822 = vmatprep.mubr.f32.mxu0 %v14284_v4 }
 0x9a5   : > { %v10466_v53 = vpop.eup %10465  ;;  %6497 = vadd.xlane.f32.xlu1 %v14253_v24  ;;  %6500 = vadd.xlane.f32.xlu0 %v14282_v57  ;;  %v15738_v24 = vld [vmem:[#allocation57_spill] sm:$0xff] }
 0x9a6   : > { %v4967_v56 = vpop.xlane.xlu0 %4966  ;;  %v5353_v12 = vmul.f32 %v10466_v53, %v15737_v35  ;;  %v10468_v5 = vpop.eup %10467 }
 0x9a7   : > { %10477 = vrcp.f32 %v4967_v56  ;;  %9092 = vmatmul.mubr.msk.f32.gmra.mrb[160].mxu1 %vm232_vm0, %v5351_v37  ;;  %6823 = vmatmul.mubr.f32.gmra.mrb[112].mxu0 %v14278_v47  ;;  %v5355_v57 = vmul.f32 %v10468_v5, %v15738_v24  ;;  %v4970_v47 = vpop.xlane.xlu1 %4969 }
 0x9a8   : > { %9094 = vmatprep.mubr.msk.f32.mxu1 %vm232_vm0, %v5353_v12  ;;  %6827 = vmatprep.mubr.f32.mxu0 %v14313_v62  ;;  %10479 = vrcp.f32 %v4970_v47 }
 0x9a9   : > { %v10470_v45 = vpop.eup %10469  ;;  %6503 = vadd.xlane.f32.xlu1 %v14272_v33  ;;  %6506 = vadd.xlane.f32.xlu0 %v14301_v23 }
 0x9aa   : > { %v5357_v4 = vmul.f32 %v10470_v45, %v14031_v21  ;;  %v10472_v13 = vpop.eup %10471 }
 0x9ab   : > { %9095 = vmatmul.mubr.msk.f32.gmra.mrb[162].mxu1 %vm232_vm0, %v5355_v57  ;;  %6828 = vmatmul.mubr.f32.gmra.mrb[114].mxu0 %v14306_v2  ;;  %v5359_v33 = vmul.f32 %v10472_v13, %v14036_v63 }
 0x9ac   : > { %6832 = vmatprep.mubr.f32.mxu0 %v14303_v49  ;;  %9097 = vmatprep.mubr.msk.f32.mxu1 %vm232_vm0, %v5357_v4 }
 0x9ad   : > { %v10474_v29 = vpop.eup %10473  ;;  %6509 = vadd.xlane.f32.xlu1 %v14291_v52  ;;  %6512 = vadd.xlane.f32.xlu0 %v14319_v39 }
 0x9ae   : > { %v5361_v23 = vmul.f32 %v10474_v29, %v14134_v8  ;;  %v10476_v21 = vpop.eup %10475 }
 0x9af   : > { %9098 = vmatmul.mubr.msk.f32.gmra.mrb[164].mxu1 %vm232_vm0, %v5359_v33  ;;  %6833 = vmatmul.mubr.f32.gmra.mrb[116].mxu0 %v14297_v32  ;;  %v5363_v49 = vmul.f32 %v10476_v21, %v14257_v20  ;;  %v4973_v32 = vpop.xlane.xlu0 %4972  ;;  %v4976_v20 = vpop.xlane.xlu1 %4975 }
 0x9b0   : > { %9100 = vmatprep.mubr.msk.f32.mxu1 %vm232_vm0, %v5361_v23  ;;  %10481 = vrcp.f32 %v4973_v32 }
 0x9b1   : > { %v10478_v2 = vpop.eup %10477  ;;  %6515 = vadd.xlane.f32.xlu1 %v14311_v41  ;;  %10483 = vrcp.f32 %v4976_v20 }
 0x9b2   : > { %v5365_v52 = vmul.f32 %v10478_v2, %v5259_v42  ;;  %v10480_v63 = vpop.eup %10479 }
 0x9b3   : > { %9101 = vmatmul.mubr.msk.f32.gmra.mrb[166].mxu1 %vm232_vm0, %v5363_v49 }
 0x9b4   : > { %9103 = vmatprep.mubr.msk.f32.mxu1 %vm232_vm0, %v5365_v52 }
 0x9ba   : > { %v5264_v8 = vpop.f32.mrb[220].mxu1  ;;  %v10482_v50 = vpop.eup %10481 }
 0x9bb   : > { %v5367_v62 = vmul.f32 %v10480_v63, %v5264_v8  ;;  %v5266_v39 = vpop.f32.mrb[221].mxu1  ;;  %v10484_v30 = vpop.eup %10483 }
 0x9bd   : > { %9104 = vmatmul.mubr.msk.f32.gmra.mrb[168].mxu1 %vm232_vm0, %v5367_v62 }
 0x9cc   : > { %v4979_v44 = vpop.xlane.xlu0 %4978 }
 0x9cd   : > { %10485 = vrcp.f32 %v4979_v44 }
 0x9d4   : > { %v4985_v38 = vpop.xlane.xlu0 %4984 }
 0x9d7   : > { %v10486_v61 = vpop.eup %10485 }
 0x9d8   : > { %v5269_v34 = vpop.f32.mrb[222].mxu1 }
 0x9d9   : > { %v5369_v0 = vmul.f32 %v10482_v50, %v5269_v34  ;;  %v5271_v25 = vpop.f32.mrb[223].mxu1 }
 0x9db   : > { %9106 = vmatprep.mubr.msk.f32.mxu1 %vm232_vm0, %v5369_v0 }
 0x9e4   : > { %v4991_v54 = vpop.xlane.xlu0 %4990 }
 0x9e8   : > { %v4982_v46 = vpop.xlane.xlu1 %4981 }
 0x9e9   : > { %10487 = vrcp.f32 %v4982_v46 }
 0x9ea   : > { %10489 = vrcp.f32 %v4985_v38 }
 0x9ec   : > { %v4988_v6 = vpop.xlane.xlu1 %4987 }
 0x9ed   : > { %10491 = vrcp.f32 %v4988_v6 }
 0x9ee   : > { %10493 = vrcp.f32 %v4991_v54 }
 0x9f0   : > { %v4994_v58 = vpop.xlane.xlu1 %4993 }
 0x9f1   : > { %v14396_v41 = vpop.f32.mrb[54].mxu0  ;;  %v4997_v18 = vpop.xlane.xlu0 %4996  ;;  %10495 = vrcp.f32 %v4994_v58 }
 0x9f2   : > { %v6681_v43 = vpop.f32.mrb[55].mxu0  ;;  %10497 = vrcp.f32 %v4997_v18 }
 0x9f3   : > { %v5274_v3 = vpop.f32.mrb[224].mxu1  ;;  %v10488_v57 = vpop.eup %10487 }
 0x9f4   : > { %v5371_v7 = vmul.f32 %v10484_v30, %v5274_v3  ;;  %v5276_v60 = vpop.f32.mrb[225].mxu1  ;;  %v10490_v23 = vpop.eup %10489 }
 0x9f5   : > { %v14398_v19 = vpop.f32.mrb[56].mxu0  ;;  %v5000_v51 = vpop.xlane.xlu1 %4999 }
 0x9f6   : > { %9107 = vmatmul.mubr.msk.f32.gmra.mrb[170].mxu1 %vm232_vm0, %v5371_v7  ;;  %v6686_v17 = vpop.f32.mrb[57].mxu0  ;;  %10499 = vrcp.f32 %v5000_v51 }
 0x9f7   : > { %v10492_v62 = vpop.eup %10491 }
 0x9f8   : > { %v10494_v43 = vpop.eup %10493 }
 0x9f9   : > { %v14401_v48 = vpop.f32.mrb[58].mxu0 }
 0x9fa   : > { %v6691_v1 = vpop.f32.mrb[59].mxu0  ;;  %v5003_v27 = vpop.xlane.xlu0 %5002 }
 0x9fb   : > { %10501 = vrcp.f32 %v5003_v27 }
 0x9fd   : > { %v14403_v10 = vpop.f32.mrb[60].mxu0 }
 0x9fe   : > { %v6696_v26 = vpop.f32.mrb[61].mxu0  ;;  %v14420_v53 = vpop.xlane.xlu1 %5005 }
 0x9ff   : > { %v6423_v56 = vpop.xlane.xlu0 %6422  ;;  %v10496_v26 = vpop.eup %10495 }
 0xa00   : > { %10503 = vrcp.f32 %v6423_v56 }
 0xa01   : > { %v14405_v14 = vpop.f32.mrb[62].mxu0  ;;  %10505 = vrcp.f32 %v14420_v53 }
 0xa02   : > { %v6701_v59 = vpop.f32.mrb[63].mxu0  ;;  %v14424_v35 = vpop.xlane.xlu1 %6425 }
 0xa03   : > { %v6429_v45 = vpop.xlane.xlu0 %6428  ;;  %10507 = vrcp.f32 %v14424_v35 }
 0xa04   : > { %10509 = vrcp.f32 %v6429_v45 }
 0xa05   : > { %v14407_v28 = vpop.f32.mrb[64].mxu0 }
 0xa06   : > { %v6706_v55 = vpop.f32.mrb[65].mxu0  ;;  %v14428_v24 = vpop.xlane.xlu1 %6431 }
 0xa07   : > { %v14430_v47 = vpop.xlane.xlu0 %6434  ;;  %10511 = vrcp.f32 %v14428_v24 }
 0xa08   : > { %10513 = vrcp.f32 %v14430_v47 }
 0xa09   : > { %v14409_v15 = vpop.f32.mrb[66].mxu0 }
 0xa0a   : > { %v6711_v16 = vpop.f32.mrb[67].mxu0  ;;  %v14435_v49 = vpop.xlane.xlu1 %6437 }
 0xa0b   : > { %v6441_v50 = vpop.xlane.xlu0 %6440  ;;  %10515 = vrcp.f32 %v14435_v49 }
 0xa0c   : > { %10517 = vrcp.f32 %v6441_v50 }
 0xa0e   : > { %v14440_v25 = vpop.xlane.xlu1 %6443 }
 0xa0f   : > { %v14445_v17 = vpop.xlane.xlu0 %6446  ;;  %10519 = vrcp.f32 %v14440_v25 }
 0xa10   : > { %10521 = vrcp.f32 %v14445_v17 }
 0xa11   : > { %v5279_v31 = vpop.f32.mrb[226].mxu1 }
 0xa12   : > { %v5373_v42 = vmul.f32 %v10486_v61, %v5279_v31  ;;  %v5281_v40 = vpop.f32.mrb[227].mxu1  ;;  %v14450_v55 = vpop.xlane.xlu1 %6449 }
 0xa13   : > { %v10498_v61 = vpop.eup %10497  ;;  %10523 = vrcp.f32 %v14450_v55 }
 0xa14   : > { %9109 = vmatprep.mubr.msk.f32.mxu1 %vm232_vm0, %v5373_v42  ;;  %v14455_v42 = vpop.xlane.xlu0 %6452  ;;  %v10500_v51 = vpop.eup %10499 }
 0xa15   : > { %v14418_v11 = vpop.f32.mrb[68].mxu0  ;;  %10525 = vrcp.f32 %v14455_v42 }
 0xa16   : > { %v6716_v22 = vpop.f32.mrb[69].mxu0 }
 0xa17   : > { %v14460_v22 = vpop.xlane.xlu1 %6455 }
 0xa18   : > { %10527 = vrcp.f32 %v14460_v22 }
 0xa1b   : > { %v6462_v53 = vpop.xlane.xlu1 %6461 }
 0xa1d   : > { %v14422_v36 = vpop.f32.mrb[70].mxu0 }
 0xa1e   : > { %v6721_v37 = vpop.f32.mrb[71].mxu0 }
 0xa25   : > { %v14426_v12 = vpop.f32.mrb[72].mxu0 }
 0xa26   : > { %v6726_v5 = vpop.f32.mrb[73].mxu0 }
 0xa2c   : > { %v5284_v4 = vpop.f32.mrb[228].mxu1 }
 0xa2d   : > { %v5375_v13 = vmul.f32 %v10488_v57, %v5284_v4  ;;  %v5286_v29 = vpop.f32.mrb[229].mxu1  ;;  %v6459_v4 = vpop.xlane.xlu0 %6458 }
 0xa2e   : > { %v14432_v33 = vpop.f32.mrb[74].mxu0  ;;  %10529 = vrcp.f32 %v6459_v4 }
 0xa2f   : > { %9110 = vmatmul.mubr.msk.f32.gmra.mrb[172].mxu1 %vm232_vm0, %v5375_v13  ;;  %v6731_v21 = vpop.f32.mrb[75].mxu0  ;;  %v10502_v13 = vpop.eup %10501  ;;  %10531 = vrcp.f32 %v6462_v53 }
 0xa30   : > { %v5289_v2 = vpop.f32.mrb[230].mxu1 }
 0xa31   : > { %v5377_v52 = vmul.f32 %v10490_v23, %v5289_v2  ;;  %v5291_v63 = vpop.f32.mrb[231].mxu1  ;;  %v10504_v2 = vpop.eup %10503 }
 0xa32   : > { %v14437_v8 = vpop.f32.mrb[76].mxu0  ;;  %v6465_v63 = vpop.xlane.xlu0 %6464 }
 0xa33   : > { %9112 = vmatprep.mubr.msk.f32.mxu1 %vm232_vm0, %v5377_v52  ;;  %v6736_v39 = vpop.f32.mrb[77].mxu0  ;;  %v10506_v52 = vpop.eup %10505  ;;  %10533 = vrcp.f32 %v6465_v63 }
 0xa34   : > { %v5294_v32 = vpop.f32.mrb[232].mxu1 }
 0xa35   : > { %v5379_v34 = vmul.f32 %v10492_v62, %v5294_v32  ;;  %v5296_v0 = vpop.f32.mrb[233].mxu1 }
 0xa36   : > { %v14442_v20 = vpop.f32.mrb[78].mxu0  ;;  %v6839_v0 = vmul.f32 %v10504_v2, %v14396_v41 }
 0xa37   : > { %9113 = vmatmul.mubr.msk.f32.gmra.mrb[174].mxu1 %vm232_vm0, %v5379_v34  ;;  %v6741_v30 = vpop.f32.mrb[79].mxu0  ;;  %v10508_v34 = vpop.eup %10507 }
 0xa38   : > { %v5299_v3 = vpop.f32.mrb[234].mxu1  ;;  %v6468_v30 = vpop.xlane.xlu1 %6467  ;;  %v6841_v49 = vmul.f32 %v10508_v34, %v14398_v19 }
 0xa39   : > { %v5381_v7 = vmul.f32 %v10494_v43, %v5299_v3  ;;  %v5301_v60 = vpop.f32.mrb[235].mxu1  ;;  %v10510_v43 = vpop.eup %10509  ;;  %10535 = vrcp.f32 %v6468_v30 }
 0xa3a   : > { %v14447_v1 = vpop.f32.mrb[80].mxu0  ;;  %v10512_v50 = vpop.eup %10511 }
 0xa3b   : > { %9115 = vmatprep.mubr.msk.f32.mxu1 %vm232_vm0, %v5381_v7  ;;  %v6746_v59 = vpop.f32.mrb[81].mxu0  ;;  %v6471_v7 = vpop.xlane.xlu0 %6470  ;;  %v6845_v19 = vmul.f32 %v10512_v50, %v14403_v10 }
 0xa3c   : > { %v5304_v44 = vpop.f32.mrb[236].mxu1  ;;  %v10514_v59 = vpop.eup %10513  ;;  %10537 = vrcp.f32 %v6471_v7 }
 0xa3d   : > { %v5383_v46 = vmul.f32 %v10496_v26, %v5304_v44  ;;  %v5306_v16 = vpop.f32.mrb[237].mxu1  ;;  %v6843_v26 = vmul.f32 %v10510_v43, %v14401_v48  ;;  %v6474_v41 = vpop.xlane.xlu1 %6473  ;;  %v6847_v48 = vmul.f32 %v10514_v59, %v14405_v14 }
 0xa3e   : > { %v14452_v6 = vpop.f32.mrb[82].mxu0  ;;  %v10516_v44 = vpop.eup %10515  ;;  %10539 = vrcp.f32 %v6474_v41 }
 0xa3f   : > { %v6751_v38 = vpop.f32.mrb[83].mxu0  ;;  %9116 = vmatmul.mubr.msk.f32.gmra.mrb[176].mxu1 %vm232_vm0, %v5383_v46  ;;  %v10518_v16 = vpop.eup %10517 }
 0xa40   : > { %v5309_v31 = vpop.f32.mrb[238].mxu1  ;;  %v6477_v17 = vpop.xlane.xlu0 %6476  ;;  %v6849_v38 = vmul.f32 %v10516_v44, %v14407_v28  ;;  %v6851_v10 = vmul.f32 %v10518_v16, %v14409_v15 }
 0xa41   : > { %v5385_v40 = vmul.f32 %v10498_v61, %v5309_v31  ;;  %v5311_v54 = vpop.f32.mrb[239].mxu1  ;;  %v10520_v61 = vpop.eup %10519  ;;  %10541 = vrcp.f32 %v6477_v17 }
 0xa42   : > { %v14457_v58 = vpop.f32.mrb[84].mxu0  ;;  %v6480_v14 = vpop.xlane.xlu1 %6479  ;;  %v6853_v42 = vmul.f32 %v10520_v61, %v14418_v11 }
 0xa43   : > { %v6756_v18 = vpop.f32.mrb[85].mxu0  ;;  %9118 = vmatprep.mubr.msk.f32.mxu1 %vm232_vm0, %v5385_v40  ;;  %v10522_v31 = vpop.eup %10521  ;;  %10543 = vrcp.f32 %v6480_v14 }
 0xa44   : > { %v6855_v28 = vmul.f32 %v10522_v31, %v14422_v36  ;;  %v6483_v54 = vpop.xlane.xlu0 %6482  ;;  %v10524_v15 = vpop.eup %10523 }
 0xa45   : > { %v5314_v27 = vpop.f32.mrb[240].mxu1  ;;  %v10526_v22 = vpop.eup %10525  ;;  %10545 = vrcp.f32 %v6483_v54 }
 0xa46   : > { %v5387_v37 = vmul.f32 %v10500_v51, %v5314_v27  ;;  %v5316_v5 = vpop.f32.mrb[241].mxu1  ;;  %v14464_v57 = vpop.f32.mrb[86].mxu0  ;;  %v6857_v51 = vmul.f32 %v10524_v15, %v14426_v12  ;;  %v6859_v11 = vmul.f32 %v10526_v22, %v14432_v33 }
 0xa47   : > { %v6761_v56 = vpop.f32.mrb[87].mxu0  ;;  %v6486_v27 = vpop.xlane.xlu1 %6485 }
 0xa48   : > { %9119 = vmatmul.mubr.msk.f32.gmra.mrb[178].mxu1 %vm232_vm0, %v5387_v37  ;;  %v10528_v36 = vpop.eup %10527  ;;  %v6489_v4 = vpop.xlane.xlu0 %6488  ;;  %10547 = vrcp.f32 %v6486_v27 }
 0xa49   : > { %v5319_v29 = vpop.f32.mrb[242].mxu1  ;;  %v10530_v56 = vpop.eup %10529  ;;  %10549 = vrcp.f32 %v6489_v4 }
 0xa4a   : > { %v5389_v23 = vmul.f32 %v10502_v13, %v5319_v29  ;;  %v5321_v21 = vpop.f32.mrb[243].mxu1  ;;  %v14469_v35 = vpop.f32.mrb[88].mxu0  ;;  %v6861_v13 = vmul.f32 %v10528_v36, %v14437_v8  ;;  %v6863_v12 = vmul.f32 %v10530_v56, %v14442_v20 }
 0xa4b   : > { %v6766_v45 = vpop.f32.mrb[89].mxu0  ;;  %v10532_v33 = vpop.eup %10531 }
 0xa4c   : > { %9121 = vmatprep.mubr.msk.f32.mxu1 %vm232_vm0, %v5389_v23  ;;  %v6492_v23 = vpop.xlane.xlu1 %6491  ;;  %v10534_v21 = vpop.eup %10533  ;;  %v6865_v45 = vmul.f32 %v10532_v33, %v14447_v1  ;;  %v10578_v33 = vld [vmem:[#allocation2 + $0x8] sm:$0xff] }
 0xa4d   : > { %v5324_v62 = vpop.f32.mrb[244].mxu1  ;;  %v6495_v8 = vpop.xlane.xlu0 %6494  ;;  %10551 = vrcp.f32 %v6492_v23 }
 0xa4e   : > { %v5391_v39 = vmul.f32 %v10506_v52, %v5324_v62  ;;  %v5326_v24 = vpop.f32.mrb[245].mxu1  ;;  %v14473_v32 = vpop.f32.mrb[90].mxu0  ;;  %v6867_v52 = vmul.f32 %v10534_v21, %v14452_v6  ;;  %10553 = vrcp.f32 %v6495_v8  ;;  %v10579_v8 = vld [vmem:[#allocation2 + $0x10] sm:$0xff] }
 0xa4f   : > { %v6771_v47 = vpop.f32.mrb[91].mxu0  ;;  %v10536_v20 = vpop.eup %10535 }
 0xa50   : > { %9122 = vmatmul.mubr.msk.f32.gmra.mrb[180].mxu1 %vm232_vm0, %v5391_v39  ;;  %v10538_v62 = vpop.eup %10537  ;;  %v6498_v39 = vpop.xlane.xlu1 %6497  ;;  %v6869_v24 = vmul.f32 %v10536_v20, %v14457_v58 }
 0xa51   : > { %9126 = vmatprep.mubr.msk.f32.mxu1 %vm232_vm0, %v6839_v0  ;;  %v6871_v1 = vmul.f32 %v10538_v62, %v14464_v57  ;;  %v10540_v6 = vpop.eup %10539  ;;  %v6501_v0 = vpop.xlane.xlu0 %6500  ;;  %10555 = vrcp.f32 %v6498_v39 }
 0xa52   : > { %v14480_v3 = vpop.f32.mrb[92].mxu0  ;;  %v10542_v43 = vpop.eup %10541  ;;  %v6873_v30 = vmul.f32 %v10540_v6, %v14469_v35  ;;  %10557 = vrcp.f32 %v6501_v0 }
 0xa53   : > { %v6776_v60 = vpop.f32.mrb[93].mxu0  ;;  %v6875_v50 = vmul.f32 %v10542_v43, %v14473_v32  ;;  %v10544_v57 = vpop.eup %10543  ;;  %v10583_v43 = vld [vmem:[#allocation2 + $0x30] sm:$0xff] }
 0xa54   : > { %9127 = vmatmul.mubr.msk.f32.vlgmr.msra.gmra.mrb[150].mxu1 %vm232_vm0, %v6841_v49  ;;  %v6504_v7 = vpop.xlane.xlu1 %6503  ;;  %v10546_v60 = vpop.eup %10545 }
 0xa55   : > { %9129 = vmatprep.mubr.msk.f32.mxu1 %vm232_vm0, %v6843_v26  ;;  %9175 = vmatpush3.msra.mxu1 %v14414_v9  ;;  %v6877_v26 = vmul.f32 %v10544_v57, %v14480_v3  ;;  %v6507_v41 = vpop.xlane.xlu0 %6506  ;;  %v10548_v32 = vpop.eup %10547  ;;  %10559 = vrcp.f32 %v6504_v7  ;;  %v10585_v57 = vld [vmem:[#allocation2 + $0x40] sm:$0xff] }
 0xa56   : > { %v14487_v25 = vpop.f32.mrb[94].mxu0  ;;  %v10550_v44 = vpop.eup %10549  ;;  %10561 = vrcp.f32 %v6507_v41 }
 0xa57   : > { %v6781_v46 = vpop.f32.mrb[95].mxu0  ;;  %v6879_v35 = vmul.f32 %v10546_v60, %v14487_v25  ;;  %v10552_v25 = vpop.eup %10551 }
 0xa58   : > { %9130 = vmatmul.mubr.msk.f32.gmra.mrb[152].mxu1 %vm232_vm0, %v6845_v19  ;;  %v6510_v46 = vpop.xlane.xlu1 %6509  ;;  %v10554_v61 = vpop.eup %10553 }
 0xa59   : > { %9132 = vmatprep.mubr.msk.f32.mxu1 %vm232_vm0, %v6847_v48  ;;  %10563 = vrcp.f32 %v6510_v46 }
 0xa5a   : > { %v14495_v9 = vpop.f32.mrb[96].mxu0 }
 0xa5b   : > { %v6786_v55 = vpop.f32.mrb[97].mxu0  ;;  %v6881_v48 = vmul.f32 %v10548_v32, %v14495_v9 }
 0xa5c   : > { %9133 = vmatmul.mubr.msk.f32.gmra.mrb[154].mxu1 %vm232_vm0, %v6849_v38  ;;  %v6513_v38 = vpop.xlane.xlu0 %6512  ;;  %v6516_v31 = vpop.xlane.xlu1 %6515 }
 0xa5d   : > { %9135 = vmatprep.mubr.msk.f32.mxu1 %vm232_vm0, %v6851_v10  ;;  %10565 = vrcp.f32 %v6513_v38 }
 0xa5e   : > { %v14503_v40 = vpop.f32.mrb[98].mxu0  ;;  %10567 = vrcp.f32 %v6516_v31 }
 0xa5f   : > { %v6791_v18 = vpop.f32.mrb[99].mxu0  ;;  %v6883_v3 = vmul.f32 %v10550_v44, %v14503_v40  ;;  %v10588_v44 = vld [vmem:[#allocation2 + $0x58] sm:$0xff] }
 0xa60   : > { %9136 = vmatmul.mubr.msk.f32.gmra.mrb[156].mxu1 %vm232_vm0, %v6853_v42  ;;  %v10556_v42 = vpop.eup %10555 }
 0xa61   : > { %9138 = vmatprep.mubr.msk.f32.mxu1 %vm232_vm0, %v6855_v28  ;;  %v10558_v40 = vpop.eup %10557 }
 0xa62   : > { %v14509_v37 = vpop.f32.mrb[100].mxu0  ;;  %v10560_v22 = vpop.eup %10559 }
 0xa63   : > { %v6796_v5 = vpop.f32.mrb[101].mxu0  ;;  %v6885_v10 = vmul.f32 %v10552_v25, %v14509_v37  ;;  %v10590_v25 = vld [vmem:[#allocation2 + $0x68] sm:$0xff] }
 0xa64   : > { %9139 = vmatmul.mubr.msk.f32.gmra.mrb[158].mxu1 %vm232_vm0, %v6857_v51  ;;  %v10562_v51 = vpop.eup %10561 }
 0xa65   : > { %9141 = vmatprep.mubr.msk.f32.mxu1 %vm232_vm0, %v6859_v11  ;;  %v10564_v11 = vpop.eup %10563 }
 0xa66   : > { %v14515_v53 = vpop.f32.mrb[102].mxu0 }
 0xa67   : > { %v6801_v29 = vpop.f32.mrb[103].mxu0  ;;  %v6887_v14 = vmul.f32 %v10554_v61, %v14515_v53  ;;  %v10566_v5 = vpop.eup %10565 }
 0xa68   : > { %9142 = vmatmul.mubr.msk.f32.gmra.mrb[160].mxu1 %vm232_vm0, %v6861_v13  ;;  %v10568_v56 = vpop.eup %10567  ;;  %v10577_v29 = vld [vmem:[#allocation2] sm:$0xff] }
 0xa69   : > { %9144 = vmatprep.mubr.msk.f32.mxu1 %vm232_vm0, %v6863_v12 }
 0xa6a   : > { %v14521_v2 = vpop.f32.mrb[104].mxu0 }
 0xa6b   : > { %v6806_v63 = vpop.f32.mrb[105].mxu0  ;;  %v6889_v28 = vmul.f32 %v10556_v42, %v14521_v2 }
 0xa6c   : > { %9145 = vmatmul.mubr.msk.f32.gmra.mrb[162].mxu1 %vm232_vm0, %v6865_v45  ;;  %v10580_v63 = vld [vmem:[#allocation2 + $0x18] sm:$0xff] }
 0xa6d   : > { %9147 = vmatprep.mubr.msk.f32.mxu1 %vm232_vm0, %v6867_v52 }
 0xa6e   : > { %v6809_v34 = vpop.f32.mrb[106].mxu0 }
 0xa6f   : > { %v6811_v47 = vpop.f32.mrb[107].mxu0  ;;  %v6891_v18 = vmul.f32 %v10558_v40, %v6809_v34 }
 0xa70   : > { %9148 = vmatmul.mubr.msk.f32.gmra.mrb[164].mxu1 %vm232_vm0, %v6869_v24  ;;  %v10581_v24 = vld [vmem:[#allocation2 + $0x20] sm:$0xff] }
 0xa71   : > { %9150 = vmatprep.mubr.msk.f32.mxu1 %vm232_vm0, %v6871_v1  ;;  %v10582_v1 = vld [vmem:[#allocation2 + $0x28] sm:$0xff] }
 0xa72   : > { %v6814_v49 = vpop.f32.mrb[108].mxu0 }
 0xa73   : > { %v6816_v58 = vpop.f32.mrb[109].mxu0  ;;  %v6893_v27 = vmul.f32 %v10560_v22, %v6814_v49  ;;  %v10584_v49 = vld [vmem:[#allocation2 + $0x38] sm:$0xff] }
 0xa74   : > { %9151 = vmatmul.mubr.msk.f32.gmra.mrb[166].mxu1 %vm232_vm0, %v6873_v30 }
 0xa75   : > { %9153 = vmatprep.mubr.msk.f32.mxu1 %vm232_vm0, %v6875_v50 }
 0xa76   : > { %v6819_v59 = vpop.f32.mrb[110].mxu0 }
 0xa77   : > { %v6821_v19 = vpop.f32.mrb[111].mxu0  ;;  %v6895_v37 = vmul.f32 %v10562_v51, %v6819_v59 }
 0xa78   : > { %9154 = vmatmul.mubr.msk.f32.gmra.mrb[168].mxu1 %vm232_vm0, %v6877_v26  ;;  %v10586_v26 = vld [vmem:[#allocation2 + $0x48] sm:$0xff]  ;;  %v10587_v19 = vld [vmem:[#allocation2 + $0x50] sm:$0xff] }
 0xa79   : > { %9156 = vmatprep.mubr.msk.f32.mxu1 %vm232_vm0, %v6879_v35 }
 0xa7a   : > { %v6824_v16 = vpop.f32.mrb[112].mxu0 }
 0xa7b   : > { %v6826_v17 = vpop.f32.mrb[113].mxu0  ;;  %v6897_v36 = vmul.f32 %v10564_v11, %v6824_v16  ;;  %v10596_v11 = vld [vmem:[#allocation2 + $0x98] sm:$0xff] }
 0xa7c   : > { %9157 = vmatmul.mubr.msk.f32.gmra.mrb[170].mxu1 %vm232_vm0, %v6881_v48 }
 0xa7d   : > { %9159 = vmatprep.mubr.msk.f32.mxu1 %vm232_vm0, %v6883_v3  ;;  %v10589_v3 = vld [vmem:[#allocation2 + $0x60] sm:$0xff] }
 0xa7e   : > { %v6829_v55 = vpop.f32.mrb[114].mxu0 }
 0xa7f   : > { %v6831_v9 = vpop.f32.mrb[115].mxu0  ;;  %v6899_v4 = vmul.f32 %v10566_v5, %v6829_v55  ;;  %v10591_v55 = vld [vmem:[#allocation2 + $0x70] sm:$0xff] }
 0xa80   : > { %9160 = vmatmul.mubr.msk.f32.gmra.mrb[172].mxu1 %vm232_vm0, %v6885_v10  ;;  %v10592_v9 = vld [vmem:[#allocation2 + $0x78] sm:$0xff] }
 0xa81   : > { %9162 = vmatprep.mubr.msk.f32.mxu1 %vm232_vm0, %v6887_v14 }
 0xa82   : > { %v6834_v54 = vpop.f32.mrb[116].mxu0 }
 0xa83   : > { %v6836_v15 = vpop.f32.mrb[117].mxu0  ;;  %v6901_v13 = vmul.f32 %v10568_v56, %v6834_v54  ;;  %v10597_v56 = vld [vmem:[#allocation2 + $0xa0] sm:$0xff] }
 0xa84   : > { %9163 = vmatmul.mubr.msk.f32.gmra.mrb[174].mxu1 %vm232_vm0, %v6889_v28  ;;  %v10593_v28 = vld [vmem:[#allocation2 + $0x80] sm:$0xff] }
 0xa85   : > { %9165 = vmatprep.mubr.msk.f32.mxu1 %vm232_vm0, %v6891_v18  ;;  %v10594_v18 = vld [vmem:[#allocation2 + $0x88] sm:$0xff] }
 0xa88   : > { %9166 = vmatmul.mubr.msk.f32.gmra.mrb[176].mxu1 %vm232_vm0, %v6893_v27  ;;  %v10595_v27 = vld [vmem:[#allocation2 + $0x90] sm:$0xff] }
 0xa89   : > { %9168 = vmatprep.mubr.msk.f32.mxu1 %vm232_vm0, %v6895_v37 }
 0xa8c   : > { %9169 = vmatmul.mubr.msk.f32.gmra.mrb[178].mxu1 %vm232_vm0, %v6897_v36 }
 0xa8d   : > { %9171 = vmatprep.mubr.msk.f32.mxu1 %vm232_vm0, %v6899_v4 }
 0xa90   : > { %9172 = vmatmul.mubr.msk.f32.gmra.mrb[180].mxu1 %vm232_vm0, %v6901_v13 }
 0xb27   : > { %v9128_v53 = vpop.f32.mrb[150].mxu1 }
 0xb28   : > { %v7065_v12 = vpop.f32.mrb[151].mxu1  ;;  %v7257_v21 = vadd.f32 %v10578_v33, %v9128_v53  ;;  %v10598_v53 = vld [vmem:[#allocation2 + $0xa8] sm:$0xff]  ;;  %v10599_v33 = vld [vmem:[#allocation2 + $0xb0] sm:$0xff] }
 0xb29   : > { %v7256_v23 = vadd.f32 %v10577_v29, %v7065_v12 }
 0xb2b   : > { %v9131_v45 = vpop.f32.mrb[152].mxu1  ;;  %9176 = vmatprep.mubr.msk.f32.mxu1 %vm232_vm0, %v7256_v23 }
 0xb2c   : > { %v7075_v2 = vpop.f32.mrb[153].mxu1  ;;  %9177 = vmatmul.mubr.msk.f32.vlgmr.msra.gmra.mrb[246].mxu1 %vm232_vm0, %v7257_v21  ;;  %v7259_v20 = vadd.f32 %v10580_v63, %v9131_v45  ;;  %v10600_v45 = vld [vmem:[#allocation2 + $0xb8] sm:$0xff]  ;;  %v10601_v63 = vld [vmem:[#allocation2 + $0xc0] sm:$0xff] }
 0xb2d   : > { %v7258_v52 = vadd.f32 %v10579_v8, %v7075_v2 }
 0xb2f   : > { %v9134_v62 = vpop.f32.mrb[154].mxu1  ;;  %9179 = vmatprep.mubr.msk.f32.mxu1 %vm232_vm0, %v7258_v52 }
 0xb30   : > { %v7085_v39 = vpop.f32.mrb[155].mxu1  ;;  %9180 = vmatmul.mubr.msk.f32.gmra.mrb[248].mxu1 %vm232_vm0, %v7259_v20  ;;  %v7261_v47 = vadd.f32 %v10582_v1, %v9134_v62  ;;  %v10602_v62 = vld [vmem:[#allocation2 + $0xc8] sm:$0xff]  ;;  %v10603_v1 = vld [vmem:[#allocation2 + $0xd0] sm:$0xff] }
 0xb31   : > { %v7260_v34 = vadd.f32 %v10581_v24, %v7085_v39 }
 0xb33   : > { %v9137_v6 = vpop.f32.mrb[156].mxu1  ;;  %9182 = vmatprep.mubr.msk.f32.mxu1 %vm232_vm0, %v7260_v34 }
 0xb34   : > { %v7095_v0 = vpop.f32.mrb[157].mxu1  ;;  %9183 = vmatmul.mubr.msk.f32.gmra.mrb[250].mxu1 %vm232_vm0, %v7261_v47  ;;  %v7263_v50 = vadd.f32 %v10584_v49, %v9137_v6  ;;  %v10604_v6 = vld [vmem:[#allocation2 + $0xd8] sm:$0xff]  ;;  %v10605_v49 = vld [vmem:[#allocation2 + $0xe0] sm:$0xff] }
 0xb35   : > { %v7262_v30 = vadd.f32 %v10583_v43, %v7095_v0 }
 0xb37   : > { %v9140_v58 = vpop.f32.mrb[158].mxu1  ;;  %9185 = vmatprep.mubr.msk.f32.mxu1 %vm232_vm0, %v7262_v30 }
 0xb38   : > { %v7105_v7 = vpop.f32.mrb[159].mxu1  ;;  %9186 = vmatmul.mubr.msk.f32.gmra.mrb[252].mxu1 %vm232_vm0, %v7263_v50  ;;  %v7265_v59 = vadd.f32 %v10586_v26, %v9140_v58  ;;  %v10606_v58 = vld [vmem:[#allocation2 + $0xe8] sm:$0xff]  ;;  %v10607_v26 = vld [vmem:[#allocation2 + $0xf0] sm:$0xff] }
 0xb39   : > { %v7264_v60 = vadd.f32 %v10585_v57, %v7105_v7 }
 0xb3b   : > { %v9143_v41 = vpop.f32.mrb[160].mxu1  ;;  %9188 = vmatprep.mubr.msk.f32.mxu1 %vm232_vm0, %v7264_v60 }
 0xb3c   : > { %v7115_v35 = vpop.f32.mrb[161].mxu1  ;;  %9189 = vmatmul.mubr.msk.f32.gmra.mrb[254].mxu1 %vm232_vm0, %v7265_v59  ;;  %v7267_v46 = vadd.f32 %v10588_v44, %v9143_v41  ;;  %v10608_v41 = vld [vmem:[#allocation2 + $0xf8] sm:$0xff] }
 0xb3d   : > { %v7266_v32 = vadd.f32 %v10587_v19, %v7115_v35  ;;  %v14589_v19 = vld [vmem:[%s14729_s1 + $0x70] ss:$0 sm:$0xff] }
 0xb3f   : > { %v9146_v48 = vpop.f32.mrb[162].mxu1  ;;  %9191 = vmatprep.mubr.msk.f32.mxu1 %vm232_vm0, %v7266_v32 }
 0xb40   : > { %v7125_v16 = vpop.f32.mrb[163].mxu1  ;;  %9192 = vmatmul.mubr.msk.f32.gmra.mrb[0].mxu1 %vm232_vm0, %v7267_v46  ;;  %v7269_v38 = vadd.f32 %v10590_v25, %v9146_v48 }
 0xb41   : > { %v7268_v17 = vadd.f32 %v10589_v3, %v7125_v16 }
 0xb43   : > { %v9149_v61 = vpop.f32.mrb[164].mxu1  ;;  %9194 = vmatprep.mubr.msk.f32.mxu1 %vm232_vm0, %v7268_v17 }
 0xb44   : > { %v7135_v10 = vpop.f32.mrb[165].mxu1  ;;  %9195 = vmatmul.mubr.msk.f32.gmra.mrb[2].mxu1 %vm232_vm0, %v7269_v38  ;;  %v7271_v31 = vadd.f32 %v10592_v9, %v9149_v61 }
 0xb45   : > { %v7270_v14 = vadd.f32 %v10591_v55, %v7135_v10 }
 0xb47   : > { %v9152_v42 = vpop.f32.mrb[166].mxu1  ;;  %9197 = vmatprep.mubr.msk.f32.mxu1 %vm232_vm0, %v7270_v14 }
 0xb48   : > { %v7145_v40 = vpop.f32.mrb[167].mxu1  ;;  %9198 = vmatmul.mubr.msk.f32.gmra.mrb[4].mxu1 %vm232_vm0, %v7271_v31  ;;  %v7273_v15 = vadd.f32 %v10594_v18, %v9152_v42 }
 0xb49   : > { %v7272_v54 = vadd.f32 %v10593_v28, %v7145_v40 }
 0xb4b   : > { %v9155_v22 = vpop.f32.mrb[168].mxu1  ;;  %9200 = vmatprep.mubr.msk.f32.mxu1 %vm232_vm0, %v7272_v54 }
 0xb4c   : > { %v7155_v51 = vpop.f32.mrb[169].mxu1  ;;  %9201 = vmatmul.mubr.msk.f32.gmra.mrb[6].mxu1 %vm232_vm0, %v7273_v15  ;;  %v7275_v5 = vadd.f32 %v10596_v11, %v9155_v22 }
 0xb4d   : > { %v7274_v37 = vadd.f32 %v10595_v27, %v7155_v51 }
 0xb4f   : > { %v9158_v36 = vpop.f32.mrb[170].mxu1  ;;  %9203 = vmatprep.mubr.msk.f32.mxu1 %vm232_vm0, %v7274_v37 }
 0xb50   : > { %v7165_v4 = vpop.f32.mrb[171].mxu1  ;;  %9204 = vmatmul.mubr.msk.f32.gmra.mrb[8].mxu1 %vm232_vm0, %v7275_v5  ;;  %v7277_v12 = vadd.f32 %v10598_v53, %v9158_v36 }
 0xb51   : > { %v7276_v13 = vadd.f32 %v10597_v56, %v7165_v4 }
 0xb53   : > { %v9161_v29 = vpop.f32.mrb[172].mxu1  ;;  %9206 = vmatprep.mubr.msk.f32.mxu1 %vm232_vm0, %v7276_v13 }
 0xb54   : > { %v7175_v23 = vpop.f32.mrb[173].mxu1  ;;  %9207 = vmatmul.mubr.msk.f32.gmra.mrb[10].mxu1 %vm232_vm0, %v7277_v12  ;;  %v7279_v2 = vadd.f32 %v10600_v45, %v9161_v29 }
 0xb55   : > { %v7278_v21 = vadd.f32 %v10599_v33, %v7175_v23 }
 0xb57   : > { %v9164_v8 = vpop.f32.mrb[174].mxu1  ;;  %9209 = vmatprep.mubr.msk.f32.mxu1 %vm232_vm0, %v7278_v21 }
 0xb58   : > { %v7185_v52 = vpop.f32.mrb[175].mxu1  ;;  %9210 = vmatmul.mubr.msk.f32.gmra.mrb[12].mxu1 %vm232_vm0, %v7279_v2  ;;  %v7281_v39 = vadd.f32 %v10602_v62, %v9164_v8 }
 0xb59   : > { %v7280_v20 = vadd.f32 %v10601_v63, %v7185_v52 }
 0xb5b   : > { %v9167_v24 = vpop.f32.mrb[176].mxu1  ;;  %9212 = vmatprep.mubr.msk.f32.mxu1 %vm232_vm0, %v7280_v20 }
 0xb5c   : > { %v7195_v34 = vpop.f32.mrb[177].mxu1  ;;  %9213 = vmatmul.mubr.msk.f32.gmra.mrb[14].mxu1 %vm232_vm0, %v7281_v39  ;;  %v7283_v0 = vadd.f32 %v10604_v6, %v9167_v24 }
 0xb5d   : > { %v7282_v47 = vadd.f32 %v10603_v1, %v7195_v34 }
 0xb5f   : > { %v9170_v43 = vpop.f32.mrb[178].mxu1  ;;  %9215 = vmatprep.mubr.msk.f32.mxu1 %vm232_vm0, %v7282_v47 }
 0xb60   : > { %v7205_v30 = vpop.f32.mrb[179].mxu1  ;;  %9216 = vmatmul.mubr.msk.f32.gmra.mrb[16].mxu1 %vm232_vm0, %v7283_v0  ;;  %v7285_v7 = vadd.f32 %v10606_v58, %v9170_v43 }
 0xb61   : > { %v7284_v50 = vadd.f32 %v10605_v49, %v7205_v30 }
 0xb63   : > { %v9173_v57 = vpop.f32.mrb[180].mxu1  ;;  %9218 = vmatprep.mubr.msk.f32.mxu1 %vm232_vm0, %v7284_v50 }
 0xb64   : > { %v7215_v60 = vpop.f32.mrb[181].mxu1  ;;  %9219 = vmatmul.mubr.msk.f32.gmra.mrb[18].mxu1 %vm232_vm0, %v7285_v7  ;;  %v7287_v35 = vadd.f32 %v10608_v41, %v9173_v57 }
 0xb65   : > { %v7286_v59 = vadd.f32 %v10607_v26, %v7215_v60 }
 0xb67   : > { %9221 = vmatprep.mubr.msk.f32.mxu1 %vm232_vm0, %v7286_v59 }
 0xb68   : > { %9222 = vmatmul.mubr.msk.f32.gmra.mrb[20].mxu1 %vm232_vm0, %v7287_v35 }
 0xbff   : > { %v9178_v32 = vpop.f32.mrb[246].mxu1 }
 0xc00   : > { %v7456_v44 = vpop.f32.mrb[247].mxu1  ;;  %v7462_v3 = vadd.f32 %v9178_v32, %v14589_v19 }
 0xc01   : > { %v7457_v46 = vadd.f32 %v14589_v19, %v7456_v44 }
 0xc03   : > { %v9181_v48 = vpop.f32.mrb[248].mxu1  ;;  %7615 = vxpose.xlu0.b32.start [1/16] (narrow) %v7457_v46, 8 }
 0xc04   : > { %v7466_v16 = vpop.f32.mrb[249].mxu1  ;;  %v7472_v55 = vadd.f32 %v9181_v48, %v14589_v19 }
 0xc05   : > { %v7467_v38 = vadd.f32 %v14589_v19, %v7466_v16 }
 0xc07   : > { %v9184_v17 = vpop.f32.mrb[250].mxu1  ;;  %7616 = vxpose.xlu0.b32.cont [2/16] (narrow) %v7462_v3, 8 }
 0xc08   : > { %v7476_v25 = vpop.f32.mrb[251].mxu1  ;;  %v7482_v28 = vadd.f32 %v9184_v17, %v14589_v19 }
 0xc09   : > { %v7477_v31 = vadd.f32 %v14589_v19, %v7476_v25 }
 0xc0b   : > { %v9187_v61 = vpop.f32.mrb[252].mxu1  ;;  %7617 = vxpose.xlu0.b32.cont [3/16] (narrow) %v7467_v38, 8 }
 0xc0c   : > { %v7486_v10 = vpop.f32.mrb[253].mxu1  ;;  %v7492_v27 = vadd.f32 %v9187_v61, %v14589_v19 }
 0xc0d   : > { %v7487_v15 = vadd.f32 %v14589_v19, %v7486_v10 }
 0xc0f   : > { %v9190_v14 = vpop.f32.mrb[254].mxu1  ;;  %7618 = vxpose.xlu0.b32.cont [4/16] (narrow) %v7472_v55, 8 }
 0xc10   : > { %v7496_v9 = vpop.f32.mrb[255].mxu1  ;;  %v7502_v13 = vadd.f32 %v9190_v14, %v14589_v19  ;;  %v10640_v14 = vmov 683565275  }
 0xc11   : > { %v7497_v5 = vadd.f32 %v14589_v19, %v7496_v9 }
 0xc13   : > { %v9193_v42 = vpop.f32.mrb[0].mxu1  ;;  %7619 = vxpose.xlu0.b32.cont [5/16] (narrow) %v7477_v31, 8  ;;  %v10641_v31 = vmov 2475754826  }
 0xc14   : > { %v7506_v40 = vpop.f32.mrb[1].mxu1  ;;  %v7512_v2 = vadd.f32 %v9193_v42, %v14589_v19 }
 0xc15   : > { %v7507_v23 = vadd.f32 %v14589_v19, %v7506_v40  ;;  %v10642_v40 = vmov 2131351028  }
 0xc17   : > { %v9196_v54 = vpop.f32.mrb[2].mxu1  ;;  %7620 = vxpose.xlu0.b32.cont [6/16] (narrow) %v7482_v28, 8 }
 0xc18   : > { %v7516_v18 = vpop.f32.mrb[3].mxu1  ;;  %v7522_v6 = vadd.f32 %v9196_v54, %v14589_v19  ;;  %v10643_v54 = vmov 2102212464  }
 0xc19   : > { %v7517_v62 = vadd.f32 %v14589_v19, %v7516_v18 }
 0xc1b   : > { %v9199_v22 = vpop.f32.mrb[4].mxu1  ;;  %7621 = vxpose.xlu0.b32.cont [7/16] (narrow) %v7487_v15, 8  ;;  %v10644_v15 = vmov 920167782  }
 0xc1c   : > { %v7526_v51 = vpop.f32.mrb[5].mxu1  ;;  %v7532_v41 = vadd.f32 %v9199_v22, %v14589_v19 }
 0xc1d   : > { %v7527_v58 = vadd.f32 %v14589_v19, %v7526_v51 }
 0xc1f   : > { %v9202_v37 = vpop.f32.mrb[6].mxu1  ;;  %7622 = vxpose.xlu0.b32.cont [8/16] (narrow) %v7492_v27, 8 }
 0xc20   : > { %v7536_v11 = vpop.f32.mrb[7].mxu1  ;;  %v7542_v53 = vadd.f32 %v9202_v37, %v14589_v19 }
 0xc21   : > { %v7537_v36 = vadd.f32 %v14589_v19, %v7536_v11 }
 0xc23   : > { %v9205_v4 = vpop.f32.mrb[8].mxu1  ;;  %7647 = vxpose.xlu1.b32.start [1/16] (narrow) %v7537_v36, 8  ;;  %7623 = vxpose.xlu0.b32.cont [9/16] (narrow) %v7497_v5, 8  ;;  %v10645_v36 = vmov 1326507024  }
 0xc24   : > { %v7546_v56 = vpop.f32.mrb[9].mxu1  ;;  %v7552_v8 = vadd.f32 %v9205_v4, %v14589_v19 }
 0xc25   : > { %v7547_v33 = vadd.f32 %v14589_v19, %v7546_v56 }
 0xc27   : > { %v9208_v12 = vpop.f32.mrb[10].mxu1  ;;  %7648 = vxpose.xlu1.b32.cont [2/16] (narrow) %v7542_v53, 8  ;;  %7624 = vxpose.xlu0.b32.cont [10/16] (narrow) %v7502_v13, 8 }
 0xc28   : > { %v7556_v29 = vpop.f32.mrb[11].mxu1  ;;  %v7562_v0 = vadd.f32 %v9208_v12, %v14589_v19 }
 0xc29   : > { %v7557_v39 = vadd.f32 %v14589_v19, %v7556_v29 }
 0xc2b   : > { %v9211_v21 = vpop.f32.mrb[12].mxu1  ;;  %7649 = vxpose.xlu1.b32.cont [3/16] (narrow) %v7547_v33, 8  ;;  %7625 = vxpose.xlu0.b32.cont [11/16] (narrow) %v7507_v23, 8 }
 0xc2c   : > { %v7566_v45 = vpop.f32.mrb[13].mxu1  ;;  %v7572_v35 = vadd.f32 %v9211_v21, %v14589_v19 }
 0xc2d   : > { %v7567_v7 = vadd.f32 %v14589_v19, %v7566_v45 }
 0xc2f   : > { %v9214_v52 = vpop.f32.mrb[14].mxu1  ;;  %7650 = vxpose.xlu1.b32.cont [4/16] (narrow) %v7552_v8, 8  ;;  %7626 = vxpose.xlu0.b32.cont [12/16] (narrow) %v7512_v2, 8 }
 0xc30   : > { %v7582_v63 = vadd.f32 %v9214_v52, %v14589_v19  ;;  %v7576_v20 = vpop.f32.mrb[15].mxu1 }
 0xc31   : > { %v7577_v24 = vadd.f32 %v14589_v19, %v7576_v20 }
 0xc33   : > { %v9217_v34 = vpop.f32.mrb[16].mxu1  ;;  %7651 = vxpose.xlu1.b32.cont [5/16] (narrow) %v7557_v39, 8  ;;  %7627 = vxpose.xlu0.b32.cont [13/16] (narrow) %v7517_v62, 8 }
 0xc34   : > { %v7592_v1 = vadd.f32 %v9217_v34, %v14589_v19  ;;  %v7586_v47 = vpop.f32.mrb[17].mxu1 }
 0xc35   : > { %v7587_v43 = vadd.f32 %v14589_v19, %v7586_v47 }
 0xc37   : > { %v9220_v30 = vpop.f32.mrb[18].mxu1  ;;  %7652 = vxpose.xlu1.b32.cont [6/16] (narrow) %v7562_v0, 8  ;;  %7628 = vxpose.xlu0.b32.cont [14/16] (narrow) %v7522_v6, 8 }
 0xc38   : > { %v7602_v49 = vadd.f32 %v9220_v30, %v14589_v19  ;;  %v7596_v50 = vpop.f32.mrb[19].mxu1 }
 0xc39   : > { %v7597_v57 = vadd.f32 %v14589_v19, %v7596_v50 }
 0xc3b   : > { %7653 = vxpose.xlu1.b32.cont [7/16] (narrow) %v7567_v7, 8  ;;  %7629 = vxpose.xlu0.b32.cont [15/16] (narrow) %v7527_v58, 8  ;;  %v9223_v60 = vpop.f32.mrb[20].mxu1 }
 0xc3c   : > { %v7612_v26 = vadd.f32 %v9223_v60, %v14589_v19  ;;  %v7606_v59 = vpop.f32.mrb[21].mxu1 }
 0xc3d   : > { %v7607_v32 = vadd.f32 %v14589_v19, %v7606_v59 }
 0xc3f   : > { %7654 = vxpose.xlu1.b32.cont [8/16] (narrow) %v7572_v35, 8  ;;  %7630 = vxpose.xlu0.b32.end [16/16] (narrow) %v7532_v41, 8 }
 0xc43   : > { %7655 = vxpose.xlu1.b32.cont [9/16] (narrow) %v7577_v24, 8 }
 0xc47   : > { %7656 = vxpose.xlu1.b32.cont [10/16] (narrow) %v7582_v63, 8 }
 0xc4b   : > { %7657 = vxpose.xlu1.b32.cont [11/16] (narrow) %v7587_v43, 8 }
 0xc4f   : > { %7658 = vxpose.xlu1.b32.cont [12/16] (narrow) %v7592_v1, 8 }
 0xc53   : > { %7659 = vxpose.xlu1.b32.cont [13/16] (narrow) %v7597_v57, 8 }
 0xc57   : > { %7660 = vxpose.xlu1.b32.cont [14/16] (narrow) %v7602_v49, 8 }
 0xc5b   : > { %7661 = vxpose.xlu1.b32.cont [15/16] (narrow) %v7607_v32, 8 }
 0xc5f   : > { %7662 = vxpose.xlu1.b32.end [16/16] (narrow) %v7612_v26, 8 }
 0xc83   : > { %v14623_v44 = vpop.trf.xlu0 }
 0xc84   : > { %v7682_v46 = vand.u32 2139095040, %v14623_v44  ;;  %v7679_v16 = vand.u32 2147483647, %v14623_v44  ;;  %vm7681_vm1 = vcmp.lt.s32.totalorder %v14623_v44, 0 }
 0xc86   : > { %v7683_v48 = vshrl.u32 %v7682_v46, 23  ;;  %v7686_v19 = vand.u32 8388607, %v7679_v16  ;;  %vm7680_vm3 = vcmp.le.f32.partialorder %v7679_v16, 0.7853982 }
 0xc88   : > { %v8622_v3 = vadd.s32 4294967169, %v7683_v48  ;;  %v7687_v61 = vor.u32 8388608, %v7686_v19 }
 0xc8a   : > { %v7689_v17 = vadd.s32 1, %v8622_v3  ;;  %v7727_v56 = vshll.u32 %v7687_v61, 8 }
 0xc8c   : > { %vm7690_vm4 = vcmp.gt.s32.totalorder %v7689_v17, 0 }
 0xc8d   : > { %v7691_v25 = vsel %vm7690_vm4, %v7689_v17, 0 }
 0xc8e   : > { %v7693_v38 = vand.u32 31, %v7691_v25  ;;  %v7692_v10 = vshrl.u32 %v7691_v25, 5 }
 0xc90   : > { %v7694_v55 = vsub.s32 32, %v7693_v38  ;;  %v7696_v9 = vshll.u32 %v10640_v14, %v7693_v38  ;;  %v7699_v42 = vshll.u32 %v10641_v31, %v7693_v38  ;;  %v7702_v28 = vshll.u32 %v10642_v40, %v7693_v38 }
 0xc91   : > { %v7705_v18 = vshll.u32 %v10643_v54, %v7693_v38  ;;  %v7708_v22 = vshll.u32 %v10644_v15, %v7693_v38  ;;  %vm7711_vm5 = vcmp.lt.s32.totalorder %v7692_v10, 1  ;;  %vm7714_vm6 = vcmp.lt.s32.totalorder %v7692_v10, 4 }
 0xc92   : > { %v7695_v51 = vshrl.u32 %v10640_v14, %v7694_v55  ;;  %v7697_v27 = vshrl.u32 %v10641_v31, %v7694_v55  ;;  %v7700_v37 = vshrl.u32 %v10642_v40, %v7694_v55  ;;  %v7703_v11 = vshrl.u32 %v10643_v54, %v7694_v55 }
 0xc93   : > { %v7706_v5 = vshrl.u32 %v10644_v15, %v7694_v55  ;;  %v7709_v4 = vshrl.u32 %v10645_v36, %v7694_v55  ;;  %vm7712_vm7 = vcmp.lt.s32.totalorder %v7692_v10, 2  ;;  %vm7713_vm8 = vcmp.lt.s32.totalorder %v7692_v10, 3 }
 0xc94   : > { %v7698_v13 = vor.u32 %v7697_v27, %v7696_v9  ;;  %v7701_v53 = vor.u32 %v7700_v37, %v7699_v42  ;;  %v7704_v12 = vor.u32 %v7703_v11, %v7702_v28 }
 0xc95   : > { %v7707_v29 = vor.u32 %v7706_v5, %v7705_v18  ;;  %v7710_v23 = vor.u32 %v7709_v4, %v7708_v22 }
 0xc96   : > { %v7715_v33 = vsel %vm7711_vm5, %v7695_v51, %v7698_v13  ;;  %v7716_v21 = vsel %vm7714_vm6, %v7704_v12, 2102212464  ;;  %v7719_v45 = vsel %vm7711_vm5, %v7698_v13, %v7701_v53  ;;  %v7723_v2 = vsel %vm7711_vm5, %v7701_v53, %v7704_v12 }
 0xc97   : > { %v7717_v8 = vsel %vm7713_vm8, %v7701_v53, %v7716_v21  ;;  %v7720_v52 = vsel %vm7714_vm6, %v7707_v29, 920167782  ;;  %v7724_v63 = vsel %vm7714_vm6, %v7710_v23, 1326507024 }
 0xc98   : > { %v7721_v20 = vsel %vm7713_vm8, %v7704_v12, %v7720_v52  ;;  %v7725_v62 = vsel %vm7713_vm8, %v7707_v29, %v7724_v63  ;;  %v7718_v39 = vsel %vm7712_vm7, %v7715_v33, %v7717_v8 }
 0xc99   : > { %v7722_v24 = vsel %vm7712_vm7, %v7719_v45, %v7721_v20  ;;  %v7726_v34 = vsel %vm7712_vm7, %v7723_v2, %v7725_v62  ;;  %v7734_v43 = vmul.u32 %v7727_v56, %v7718_v39 }
 0xc9a   : > { %v14640_v1 = vmul.u32.u64.low %v7727_v56, %v7726_v34  ;;  %v14641_v47 = vmul.u32.u64.high %v7727_v56, %v7726_v34, %v14640_v1  ;;  %v14643_v6 = vmul.u32.u64.low %v7727_v56, %v7722_v24  ;;  %v14644_v0 = vmul.u32.u64.high %v7727_v56, %v7722_v24, %v14643_v6 }
 0xc9c   : > { %vm7736_vm9 = vc.u32 %v14641_v47, %v14643_v6  ;;  %v7737_v30 = vadd.s32 1, %v14644_v0 }
 0xc9e   : > { %v7738_v49 = vsel %vm7736_vm9, %v7737_v30, %v14644_v0 }
 0xc9f   : > { %v7739_v50 = vadd.s32 %v7738_v49, %v7734_v43 }
 0xca1   : > { %v7740_v58 = vadd.s32 536870912, %v7739_v50 }
 0xca3   : > { %v14651_v7 = vpop.trf.xlu1  ;;  %v14654_v60 = vshrl.u32 %v7740_v58, 30 }
 0xca4   : > { %v7785_v57 = vand.u32 2139095040, %v14651_v7  ;;  %v7782_v32 = vand.u32 2147483647, %v14651_v7  ;;  %vm7784_vm4 = vcmp.lt.s32.totalorder %v14651_v7, 0 }
 0xca5   : > { %v7742_v59 = vshll.u32 %v14654_v60, 30 }
 0xca6   : > { %v7786_v26 = vshrl.u32 %v7785_v57, 23  ;;  %v7789_v17 = vand.u32 8388607, %v7782_v32  ;;  %vm7783_vm5 = vcmp.le.f32.partialorder %v7782_v32, 0.7853982 }
 0xca7   : > { %v14657_v35 = vsub.s32 %v7739_v50, %v7742_v59  ;;  %v7735_v50 = vadd.s32 %v14643_v6, %v14641_v47 }
 0xca8   : > { %v8626_v41 = vadd.s32 4294967169, %v7786_v26  ;;  %v7790_v55 = vor.u32 8388608, %v7789_v17 }
 0xca9   : > { %v7745_v48 = vsub.s32 0, %v14657_v35 }
 0xcaa   : > { %v7792_v46 = vadd.s32 1, %v8626_v41  ;;  %v7830_v23 = vshll.u32 %v7790_v55, 8 }
 0xcab   : > { %v8623_v3 = vmin.u32 %v7745_v48, %v14657_v35 }
 0xcac   : > { %vm7793_vm10 = vcmp.gt.s32.totalorder %v7792_v46, 0 }
 0xcad   : > { %v7794_v19 = vsel %vm7793_vm10, %v7792_v46, 0  ;;  %v7747_v25 = vclz %v8623_v3 }
 0xcae   : > { %v7796_v38 = vand.u32 31, %v7794_v19  ;;  %v7795_v9 = vshrl.u32 %v7794_v19, 5 }
 0xcaf   : > { %v8624_v61 = vadd.s32 4294967294, %v7747_v25 }
 0xcb0   : > { %v7797_v10 = vsub.s32 32, %v7796_v38  ;;  %v7799_v42 = vshll.u32 %v10640_v14, %v7796_v38  ;;  %v7802_v28 = vshll.u32 %v10641_v31, %v7796_v38  ;;  %v7805_v51 = vshll.u32 %v10642_v40, %v7796_v38 }
 0xcb1   : > { %v7808_v27 = vshll.u32 %v10643_v54, %v7796_v38  ;;  %v7811_v5 = vshll.u32 %v10644_v15, %v7796_v38  ;;  %vm8625_vm11 = vcmp.lt.s32.totalorder %v8624_v61, 0  ;;  %vm7814_vm12 = vcmp.lt.s32.totalorder %v7795_v9, 1 }
 0xcb2   : > { %v7800_v18 = vshrl.u32 %v10641_v31, %v7797_v10  ;;  %v7803_v22 = vshrl.u32 %v10642_v40, %v7797_v10  ;;  %v7806_v37 = vshrl.u32 %v10643_v54, %v7797_v10  ;;  %v7809_v11 = vshrl.u32 %v10644_v15, %v7797_v10 }
 0xcb3   : > { %v7812_v4 = vshrl.u32 %v10645_v36, %v7797_v10  ;;  %v7750_v29 = vsel %vm8625_vm11, 0, %v8624_v61  ;;  %vm7817_vm13 = vcmp.lt.s32.totalorder %v7795_v9, 4  ;;  %v7798_v33 = vshrl.u32 %v10640_v14, %v7797_v10 }
 0xcb4   : > { %v7801_v56 = vor.u32 %v7800_v18, %v7799_v42  ;;  %v7804_v13 = vor.u32 %v7803_v22, %v7802_v28  ;;  %v7807_v53 = vor.u32 %v7806_v37, %v7805_v51  ;;  %v7810_v12 = vor.u32 %v7809_v11, %v7808_v27 }
 0xcb5   : > { %v7813_v31 = vor.u32 %v7812_v4, %v7811_v5  ;;  %vm7816_vm14 = vcmp.lt.s32.totalorder %v7795_v9, 3  ;;  %vm7815_vm15 = vcmp.lt.s32.totalorder %v7795_v9, 2  ;;  %v7755_v2 = vsub.s32 4294967266, %v7750_v29 }
 0xcb6   : > { %v7822_v40 = vsel %vm7814_vm12, %v7801_v56, %v7804_v13  ;;  %v7819_v54 = vsel %vm7817_vm13, %v7807_v53, 2102212464  ;;  %v7823_v21 = vsel %vm7817_vm13, %v7810_v12, 920167782  ;;  %v7826_v45 = vsel %vm7814_vm12, %v7804_v13, %v7807_v53 }
 0xcb7   : > { %v7824_v15 = vsel %vm7816_vm14, %v7807_v53, %v7823_v21  ;;  %v7827_v36 = vsel %vm7817_vm13, %v7813_v31, 1326507024  ;;  %v7818_v8 = vsel %vm7814_vm12, %v7798_v33, %v7801_v56  ;;  %v7820_v63 = vsel %vm7816_vm14, %v7804_v13, %v7819_v54 }
 0xcb8   : > { %v7825_v52 = vsel %vm7815_vm15, %v7822_v40, %v7824_v15  ;;  %v7828_v20 = vsel %vm7816_vm14, %v7810_v12, %v7827_v36  ;;  %v7756_v14 = vadd.s32 127, %v7755_v2  ;;  %v7821_v0 = vsel %vm7815_vm15, %v7818_v8, %v7820_v63 }
 0xcb9   : > { %v14675_v62 = vmul.u32.u64.low %v7830_v23, %v7825_v52  ;;  %v14676_v39 = vmul.u32.u64.high %v7830_v23, %v7825_v52, %v14675_v62  ;;  %v7829_v24 = vsel %vm7815_vm15, %v7826_v45, %v7828_v20  ;;  %v7751_v30 = vsub.s32 32, %v7750_v29 }
 0xcba   : > { %v14678_v34 = vmul.u32.u64.low %v7830_v23, %v7829_v24  ;;  %v14679_v1 = vmul.u32.u64.high %v7830_v23, %v7829_v24, %v14678_v34  ;;  %v7837_v49 = vmul.u32 %v7830_v23, %v7821_v0  ;;  %v7757_v58 = vshll.u32 %v7756_v14, 23 }
 0xcbb   : > { %v7840_v43 = vadd.s32 1, %v14676_v39  ;;  %v7753_v59 = vshrl.u32 %v7735_v50, %v7751_v30  ;;  %v7752_v46 = vshll.u32 %v14657_v35, %v7750_v29  ;;  %v7765_v4 = vsub.s32 4, %v14654_v60 }
 0xcbc   : > { %vm7839_vm0 = vc.u32 %v14679_v1, %v14675_v62  ;;  %v7758_v48 = vor.u32 4788187, %v7757_v58  ;;  %v7838_v18 = vadd.s32 %v14675_v62, %v14679_v1  ;;  %vm7771_vm12 = vweird.f32 %v14623_v44 }
 0xcbd   : > { %v7841_v57 = vsel %vm7839_vm0, %v7840_v43, %v14676_v39  ;;  %v7754_v17 = vor.u32 %v7753_v59, %v7752_v46  ;;  %v7766_v12 = vsel %vm7681_vm1, %v7765_v4, %v14654_v60  ;;  %vm7874_vm13 = vweird.f32 %v14651_v7 }
 0xcbe   : > { %v7842_v26 = vadd.s32 %v7841_v57, %v7837_v49  ;;  %v7759_v25 = vand.u32 2147483647, %v7758_v48  ;;  %v7768_v16 = vsel %vm7680_vm3, 0, %v7766_v12 }
 0xcbf   : > { %v7761_v61 = vcvt.s32.f32 %v7754_v17  ;;  %v7991_v54 = vadd.s32 3, %v7768_v16  ;;  %v7772_v60 = vand.u32 3, %v7768_v16 }
 0xcc0   : > { %v7843_v41 = vadd.s32 536870912, %v7842_v26 }
 0xcc1   : > { %v7762_v55 = vmul.f32 %v7761_v61, %v7759_v25  ;;  %v7992_v8 = vand.u32 3, %v7991_v54  ;;  %vm7774_vm6 = vcmp.eq.s32.totalorder %v7772_v60, 0  ;;  %vm7777_vm7 = vcmp.eq.s32.totalorder %v7772_v60, 2 }
 0xcc2   : > { %v7844_v3 = vshrl.u32 %v7843_v41, 30  ;;  %vm7773_vm10 = vcmp.lt.s32.totalorder %v7772_v60, 2 }
 0xcc3   : > { %v7763_v47 = vxor.u32 2147483648, %v7762_v55  ;;  %vm7994_vm8 = vcmp.eq.s32.totalorder %v7992_v8, 0  ;;  %vm7997_vm9 = vcmp.eq.s32.totalorder %v7992_v8, 2  ;;  %vm7993_vm11 = vcmp.lt.s32.totalorder %v7992_v8, 2 }
 0xcc4   : > { %v7845_v19 = vshll.u32 %v7844_v3, 30  ;;  %v7868_v23 = vsub.s32 4, %v7844_v3 }
 0xcc5   : > { %v7764_v28 = vsel %vm7681_vm1, %v7763_v47, %v7762_v55 }
 0xcc6   : > { %v7846_v38 = vsub.s32 %v7842_v26, %v7845_v19  ;;  %v7767_v27 = vsel %vm7680_vm3, %v14623_v44, %v7764_v28  ;;  %v7869_v45 = vsel %vm7784_vm4, %v7868_v23, %v7844_v3 }
 0xcc7   : > { %10569 = vcosq.f32 %v7767_v27  ;;  %v7871_v52 = vsel %vm7783_vm5, 0, %v7869_v45 }
 0xcc8   : > { %v7848_v10 = vsub.s32 0, %v7846_v38  ;;  %10571 = vsinq.f32 %v7767_v27  ;;  %v8095_v62 = vadd.s32 3, %v7871_v52  ;;  %v7875_v1 = vand.u32 3, %v7871_v52 }
 0xcca   : > { %v8627_v9 = vmin.u32 %v7848_v10, %v7846_v38  ;;  %v8096_v14 = vand.u32 3, %v8095_v62  ;;  %vm7880_vm14 = vcmp.eq.s32.totalorder %v7875_v1, 2  ;;  %vm7877_vm0 = vcmp.eq.s32.totalorder %v7875_v1, 0 }
 0xccc   : > { %v7850_v42 = vclz %v8627_v9  ;;  %vm8101_vm15 = vcmp.eq.s32.totalorder %v8096_v14, 2  ;;  %vm8098_vm1 = vcmp.eq.s32.totalorder %v8096_v14, 0  ;;  %vm8097_vm3 = vcmp.lt.s32.totalorder %v8096_v14, 2 }
 0xcce   : > { %v8628_v6 = vadd.s32 4294967294, %v7850_v42 }
 0xcd0   : > { %vm8629_vm2 = vcmp.lt.s32.totalorder %v8628_v6, 0 }
 0xcd1   : > { %v7853_v35 = vsel %vm8629_vm2, 0, %v8628_v6  ;;  %v10570_v21 = vpop.eup %10569  ;;  %vm7876_vm2 = vcmp.lt.s32.totalorder %v7875_v1, 2 }
 0xcd2   : > { %v7854_v22 = vsub.s32 32, %v7853_v35  ;;  %v7858_v51 = vsub.s32 4294967266, %v7853_v35  ;;  %v7855_v11 = vshll.u32 %v7846_v38, %v7853_v35  ;;  %v10572_v36 = vpop.eup %10571  ;;  %v7778_v20 = vxor.u32 2147483648, %v10570_v21 }
 0xcd3   : > { %v7775_v63 = vxor.u32 2147483648, %v10572_v36 }
 0xcd4   : > { %v7856_v37 = vshrl.u32 %v7838_v18, %v7854_v22  ;;  %v7859_v5 = vadd.s32 127, %v7858_v51  ;;  %v7779_v24 = vsel %vm7777_vm7, %v7778_v20, %v10572_v36  ;;  %v7999_v34 = vsel %vm7997_vm9, %v7778_v20, %v10572_v36 }
 0xcd5   : > { %v7776_v39 = vsel %vm7774_vm6, %v10570_v21, %v7775_v63  ;;  %v7996_v32 = vsel %vm7994_vm8, %v10570_v21, %v7775_v63 }
 0xcd6   : > { %v7857_v56 = vor.u32 %v7856_v37, %v7855_v11  ;;  %v7860_v13 = vshll.u32 %v7859_v5, 23  ;;  %v7780_v0 = vsel %vm7773_vm10, %v7776_v39, %v7779_v24  ;;  %v8000_v43 = vsel %vm7993_vm11, %v7996_v32, %v7999_v34 }
 0xcd7   : > { %v7781_v58 = vsel %vm7771_vm12, nan, %v7780_v0  ;;  %v8001_v57 = vsel %vm7771_vm12, nan, %v8000_v43 }
 0xcd8   : > { %v7861_v53 = vor.u32 4788187, %v7860_v13  ;;  %v7864_v29 = vcvt.s32.f32 %v7857_v56  ;;  %v7887_v3 = vrot.slane %v7781_v58, 4  ;;  %v8108_v17 = vrot.slane %v8001_v57, 4 }
 0xcda   : > { %v7862_v31 = vand.u32 2147483647, %v7861_v53  ;;  %v7891_v9 = vmul.f32 %v7887_v3, %v14623_v44  ;;  %v8112_v42 = vmul.f32 %v8108_v17, %v14623_v44 }
 0xcdc   : > { %v7865_v40 = vmul.f32 %v7864_v29, %v7862_v31 }
 0xcde   : > { %v7866_v33 = vxor.u32 2147483648, %v7865_v40 }
 0xce0   : > { %v7867_v15 = vsel %vm7784_vm4, %v7866_v33, %v7865_v40 }
 0xce1   : > { %v7870_v2 = vsel %vm7783_vm5, %v14651_v7, %v7867_v15 }
 0xce2   : > { %10573 = vcosq.f32 %v7870_v2 }
 0xce3   : > { %10575 = vsinq.f32 %v7870_v2 }
 0xcec   : > { %v10574_v30 = vpop.eup %10573 }
 0xced   : > { %v10576_v49 = vpop.eup %10575  ;;  %v7881_v50 = vxor.u32 2147483648, %v10574_v30 }
 0xcee   : > { %v7878_v26 = vxor.u32 2147483648, %v10576_v49 }
 0xcef   : > { %v7882_v59 = vsel %vm7880_vm14, %v7881_v50, %v10576_v49  ;;  %v8103_v41 = vsel %vm8101_vm15, %v7881_v50, %v10576_v49 }
 0xcf0   : > { %v7879_v46 = vsel %vm7877_vm0, %v10574_v30, %v7878_v26  ;;  %v8100_v48 = vsel %vm8098_vm1, %v10574_v30, %v7878_v26 }
 0xcf1   : > { %v7883_v19 = vsel %vm7876_vm2, %v7879_v46, %v7882_v59  ;;  %v8104_v25 = vsel %vm8097_vm3, %v8100_v48, %v8103_v41 }
 0xcf2   : > { %v7884_v38 = vsel %vm7874_vm13, nan, %v7883_v19  ;;  %v8105_v61 = vsel %vm7874_vm13, nan, %v8104_v25 }
 0xcf3   : > { %v7888_v10 = vrot.slane %v7884_v38, 4  ;;  %v8109_v55 = vrot.slane %v8105_v61, 4 }
 0xcf5   : > { %v7892_v47 = vmul.f32 %v7888_v10, %v14651_v7  ;;  %v8113_v6 = vmul.f32 %v8109_v55, %v14651_v7 }
 0xcf7   : > { %v7895_v28 = vcombine.low %v7891_v9, %v7892_v47  ;;  %v8116_v35 = vcombine.low %v8112_v42, %v8113_v6 }
 0xcf9   : > { %7897 = vst [vmem:[%s206_s6] sm:$0xff] %v7895_v28  ;;  %8118 = vst [vmem:[%s216_s9] sm:$0xff] %v8116_v35 }
 0xcfa PF: > { %s14_s14 = sadd.s32 1, %s10631_s14   ;;  %s15739_s12 = smov %s10627_s13 }
 0xcfb   : > { %p11_p5 = scmp.ge.s32.totalorder %s14_s14, 4   ;;  %s15740_s13 = smov %s15742_s15 }
 0xcfd   :  { %13 = sbr.rel (!%p11_p5) target bundleno = 2 (0x2), region = 75 }

// kernel: freup_pad_attention_forward.3
= control target key start
LH: loop header
LB: loop body
LE: loop exit
PB: predicated region body
PF: predicated region fallthrough
CT: control target
= control target key end

     0   :  { %s743_s12 = smov 0   ;;  %s745_s13 = smov 0   ;;  %s801_s0 = inlined_call_operand.vmem [shape: f32[2,4,1024], index: 0, kind: input, shape index: {}]   ;;  %s802_s1 = inlined_call_operand.vmem [shape: f32[4,4], index: 1, kind: input, shape index: {}]   ;;  %s803_s2 = inlined_call_operand.vmem [shape: f32[4,1], index: 2, kind: input, shape index: {}]   ;;  %s804_s3 = inlined_call_operand.vmem [shape: f32[2,4,1024], index: 3, kind: output, shape index: {}]  }
   0x1   :  { %s747_s14 = smov 0  }
   0x2 LB: > { %s25_s15 = sadd.s32 1, %s715_s13  ;;  %p645_p0 = scmp.ge.s32.totalorder %s719_s14, 1  ;;  %s719_s14 = sphi %s747_s14, %s13_s14   ;;  %s715_s13 = sphi %s745_s13, %s806_s13   ;;  %s711_s12 = sphi %s743_s12, %s805_s12  }
   0x3   : > { %p27_p1 = scmp.ge.s32.totalorder %s25_s15, 2  ;;  %p158_p2 = scmp.lt.s32.totalorder %s719_s14, 3 }
   0x5   : > { %s808_s15 = smov (%p27_p1, %s25_s15), 0  ;;  %p159_p3 = pnand %p645_p0, %p158_p2 }
   0x6   : > { %p191_p4 = scmp.lt.s32.totalorder (!%p159_p3), %s711_s12, 1  ;;  %v721_v0 = vmov (!%p159_p3), 0.0   ;;  %v215_v1 = vld [vmem:[%s803_s2] sm:$0xf] (!%p159_p3)  ;;  %v722_v2 = vmov (!%p159_p3), 0   ;;  %vm233_vm0 = vcmask (!%p159_p3), 1043456  }
   0x7   : > { %162 = sbr.rel (%p159_p3) target bundleno = 244 (0xf4), region = 32  ;;  %314 = vmatprep.mubr.f32.mxu0 (!%p159_p3), %v721_v0  ;;  %385 = vmatprep.mubr.f32.mxu1 (!%p159_p3), %v721_v0  ;;  %v210_v9 = vld [vmem:[%s802_s1] sm:$0xf] (!%p159_p3)  ;;  %vm229_vm1 = vcmask (!%p159_p3), 31744  }
   0x8   : > { %692 = vset.pattern.permute.xlu0 (!%p159_p3), %v722_v2 }
   0x9   : > { %218 = vperm.xlu0 (!%p159_p3), %692, %v215_v1  }
   0xe   : > { %s810_s12 = smov (!%p191_p4, %s711_s12), 1 }
   0xf   : > { %s664_s18 = sshll.u32 %s810_s12, 5 }
  0x10   : > { %s198_s21 = scalar_lea.vmem %s801_s0, %s664_s18  ;;  %s208_s26 = scalar_lea.vmem %s804_s3, %s664_s18 }
  0x11   : > { %v211_v3 = vld [vmem:[%s198_s21] sm:$0xff]  ;;  %v212_v4 = vld [vmem:[%s198_s21 + $0x8] sm:$0xff]  ;;  %v213_v5 = vld [vmem:[%s198_s21 + $0x10] sm:$0xff] }
  0x12   : > { %v225_v6 = vcombine.high %v211_v3, %v211_v3  ;;  %v226_v7 = vcombine.high %v212_v4, %v212_v4  ;;  %v214_v8 = vld [vmem:[%s198_s21 + $0x18] sm:$0xff]  ;;  %v227_v10 = vcombine.high %v213_v5, %v213_v5 }
  0x13   : > { %v228_v11 = vcombine.high %v214_v8, %v214_v8 }
  0x14   : > { %650 = vmatprep.subr.msk.mxu0 %vm233_vm0, %v225_v6  ;;  %653 = vmatprep.subr.msk.mxu1 %vm233_vm0, %v226_v7 }
  0x15   : > { %651 = vmatpush1.msk.msra.mxu0 %vm233_vm0, %v211_v3  ;;  %654 = vmatpush1.msk.msra.mxu1 %vm233_vm0, %v212_v4 }
  0x16   : > { %652 = vmatmul.mubr.msk.f32.vlgmr.msra.gmra.mrb[0].mxu0 %vm229_vm1, %v210_v9  ;;  %655 = vmatmul.mubr.msk.f32.vlgmr.msra.gmra.mrb[0].mxu1 %vm229_vm1, %v210_v9 }
  0x17   : > { %656 = vmatprep.subr.msk.mxu0 %vm233_vm0, %v227_v10  ;;  %659 = vmatprep.subr.msk.mxu1 %vm233_vm0, %v228_v11 }
  0x18   : > { %657 = vmatpush1.msk.msra.mxu0 %vm233_vm0, %v213_v5  ;;  %660 = vmatpush1.msk.msra.mxu1 %vm233_vm0, %v214_v8 }
  0x19   : > { %456 = vmatprep.mubr.f32.mxu0 %v721_v0  ;;  %527 = vmatprep.mubr.f32.mxu1 %v721_v0 }
  0x1a   : > { %658 = vmatmul.mubr.msk.f32.vlgmr.msra.gmra.mrb[2].mxu0 %vm229_vm1, %v210_v9  ;;  %661 = vmatmul.mubr.msk.f32.vlgmr.msra.gmra.mrb[2].mxu1 %vm229_vm1, %v210_v9 }
  0x88   : > { %v219_v12 = vpop.permute.xlu0 %218 }
  0xe9   : > { %v316_v13 = vpop.f32.mrb[0].mxu0  ;;  %v387_v14 = vpop.f32.mrb[0].mxu1 }
  0xea   : > { %v317_v15 = vadd.f32 %v316_v13, %v219_v12  ;;  %v318_v16 = vpop.f32.mrb[1].mxu0  ;;  %v388_v17 = vadd.f32 %v387_v14, %v219_v12  ;;  %v389_v18 = vpop.f32.mrb[1].mxu1 }
  0xeb   : > { %v319_v19 = vadd.f32 %v318_v16, %v219_v12  ;;  %v390_v20 = vadd.f32 %v389_v18, %v219_v12 }
  0xed   : > { %v542_v21 = vcombine.low %v317_v15, %v319_v19  ;;  %v543_v22 = vcombine.low %v388_v17, %v390_v20  ;;  %v458_v23 = vpop.f32.mrb[2].mxu0  ;;  %v529_v24 = vpop.f32.mrb[2].mxu1 }
  0xee   : > { %v459_v25 = vadd.f32 %v458_v23, %v219_v12  ;;  %v530_v26 = vadd.f32 %v529_v24, %v219_v12  ;;  %v460_v27 = vpop.f32.mrb[3].mxu0  ;;  %v531_v28 = vpop.f32.mrb[3].mxu1 }
  0xef   : > { %550 = vst [vmem:[%s208_s26] sm:$0xff] %v542_v21  ;;  %551 = vst [vmem:[%s208_s26 + $0x8] sm:$0xff] %v543_v22  ;;  %v461_v29 = vadd.f32 %v460_v27, %v219_v12  ;;  %v532_v30 = vadd.f32 %v531_v28, %v219_v12 }
  0xf1   : > { %v544_v31 = vcombine.low %v459_v25, %v461_v29  ;;  %v545_v32 = vcombine.low %v530_v26, %v532_v30 }
  0xf3   : > { %552 = vst [vmem:[%s208_s26 + $0x10] sm:$0xff] %v544_v31  ;;  %553 = vst [vmem:[%s208_s26 + $0x18] sm:$0xff] %v545_v32 }
  0xf4 PF: > { %s13_s14 = sadd.s32 1, %s719_s14   ;;  %s805_s12 = smov %s715_s13 }
  0xf5   : > { %p10_p5 = scmp.ge.s32.totalorder %s13_s14, 4   ;;  %s806_s13 = smov %s808_s15 }
  0xf7   :  { %12 = sbr.rel (!%p10_p5) target bundleno = 2 (0x2), region = 62 }

</bundles_post_ra>
